<compile_context>
chip_gen: v7x
topology: tpu7x:2x2x1
jax: 0.10.0
libtpu: 0.0.40
codegen_flags: <defaults>
</compile_context>

<pallas_src>
import math

import jax
import jax.numpy as jnp
import numpy as np
from jax.experimental import pallas as pl
from jax.experimental.pallas import tpu as pltpu

LN_EPS = 1e-5  # nn.LayerNorm default


def default_size(x, in_dim, out_dim):
    if x > 0:
        return x
    return int(np.ceil(in_dim / np.sqrt(in_dim / out_dim)))


def in_outs(data_dim, out_dim, hidden_dims=(-1, -1)):
    hidden_dims = list(hidden_dims)
    hidden_empty = not hidden_dims

    def def_size(x):
        return default_size(x, data_dim, out_dim)

    first_out = def_size(hidden_dims[0] if not hidden_empty else out_dim)
    size_pairs = [(data_dim, first_out)]
    for hidden_index in range(len(hidden_dims) - 1):
        lhsize, rhsize = map(def_size, hidden_dims[hidden_index:hidden_index + 2])
        size_pairs.append((lhsize, rhsize))
    size_pairs.append(
        tuple(map(def_size, (hidden_dims[-1] if hidden_dims else data_dim, out_dim))))
    return size_pairs


def _round_up(x, m):
    return ((x + m - 1) // m) * m


def _layer(h, w, aff):
    """Linear -> LayerNorm -> Mish on the current VMEM tiles.

    h:   (TB, fan_in)  activations (f32, or matmul dtype for the first layer)
    w:   (fan_in, fan_out) weights in the matmul dtype (bf16 fast path / f32)
    aff: (3, fan_out) f32 rows: [bias; gamma; beta]
    """
    # Linear on the MXU, f32 accumulation.
    y = jnp.dot(h.astype(w.dtype), w, preferred_element_type=jnp.float32)
    y = y + aff[0:1, :]                                    # bias

    # One-pass LayerNorm statistics: a single sweep produces sum and
    # sum-of-squares (one pair of lane reductions instead of two dependent
    # mean passes).  Biased variance matches nn.LayerNorm.
    n = y.shape[-1]
    inv_n = 1.0 / float(n)
    s = jnp.sum(y, axis=-1, keepdims=True)
    s2 = jnp.sum(y * y, axis=-1, keepdims=True)
    mu = s * inv_n
    var = jnp.maximum(s2 * inv_n - mu * mu, 0.0)
    y = (y - mu) * jax.lax.rsqrt(var + LN_EPS)
    y = y * aff[1:2, :] + aff[2:3, :]                      # gamma, beta

    # Mish with a single transcendental:
    #   x * tanh(softplus(x)) == x * ((1+e^x)^2 - 1) / ((1+e^x)^2 + 1)
    # Clamping keeps exp finite; for x > 20 the factor equals 1 in f32, so the
    # clamp does not change the result (and avoids log1p(exp(x)) overflow).
    t = jnp.exp(jnp.minimum(y, 20.0))
    u = (1.0 + t) * (1.0 + t)
    return y * ((u - 1.0) / (u + 1.0))


def ulayerset_kernel(x_ref,
                     w1_ref, a1_ref,
                     w2_ref, a2_ref,
                     w3_ref, a3_ref,
                     o_ref):
    h = x_ref[...]
    h = _layer(h, w1_ref[...], a1_ref[...])
    h = _layer(h, w2_ref[...], a2_ref[...])
    h = _layer(h, w3_ref[...], a3_ref[...])
    # NOTE: the (B, out_dim) HBM output is contiguous, so writeback bytes are
    # not amplified; the residual cost is masked vst into the narrow VMEM out
    # tile.  A fully lane-dense (TB//16, 128) repack needs a sublane->lane
    # vreg relayout that does not reliably lower in Mosaic for out_dim=8.
    # TODO(synk): lane-dense output repack once that relayout is supported.
    o_ref[...] = h.astype(o_ref.dtype)


def ulayerset_forward(x, params, *, matmul_dtype=jnp.bfloat16, tb=512):
    """x: (B, data_dim) f32.  params: list of 3 dicts with wT/b/gamma/beta.

    matmul_dtype=bf16 is the recommended fast path on v6e/v7x (f32
    accumulation; all LN / Mish math stays f32).  Pass jnp.float32 for exact
    parity with the PyTorch module numerics (also the right choice for the
    VPU/EUP-f32-only v5e elementwise path, where only the MXU benefits).
    """
    B, D = x.shape
    out_dim = params[-1]["wT"].shape[1]

    # Batch tile: multiple of 8 sublanes, capped at `tb`; pad B up to a tile
    # multiple (zero rows are harmless: LN eps keeps them finite, rows are
    # dropped again below).
    TB = min(tb, _round_up(B, 8))
    B_pad = _round_up(B, TB)
    x_p = x if B_pad == B else jnp.pad(x, ((0, B_pad - B), (0, 0)))
    x_p = x_p.astype(matmul_dtype)

    const_map = lambda i: (0, 0)
    flat_inputs = [x_p]
    in_specs = [pl.BlockSpec((TB, D), lambda i: (i, 0))]
    for p in params:
        w = p["wT"].astype(matmul_dtype)
        # Pack bias / gamma / beta into one (3, fan_out) f32 array per layer:
        # fewer DMA descriptors and less padded-VMEM waste than 9 tiny rows.
        aff = jnp.concatenate(
            [p["b"].astype(jnp.float32),
             p["gamma"].astype(jnp.float32),
             p["beta"].astype(jnp.float32)], axis=0)
        flat_inputs += [w, aff]
        in_specs += [pl.BlockSpec(w.shape, const_map),      # resident weights
                     pl.BlockSpec(aff.shape, const_map)]    # resident affine

    # Cost estimate: 3 matmuls + one exp per hidden/output element.
    h1 = params[0]["wT"].shape[1]
    h2 = params[1]["wT"].shape[1]
    flops = 2 * B_pad * (D * h1 + h1 * h2 + h2 * out_dim)
    transcendentals = B_pad * (h1 + h2 + out_dim)
    param_bytes = sum(int(np.prod(a.shape)) * a.dtype.itemsize
                      for a in flat_inputs[1:])
    bytes_accessed = (int(np.prod(x_p.shape)) * x_p.dtype.itemsize
                      + B_pad * out_dim * 4 + param_bytes)

    out = pl.pallas_call(
        ulayerset_kernel,
        out_shape=jax.ShapeDtypeStruct((B_pad, out_dim), jnp.float32),
        grid_spec=pltpu.PrefetchScalarGridSpec(
            num_scalar_prefetch=0,
            grid=(B_pad // TB,),
            in_specs=in_specs,
            out_specs=pl.BlockSpec((TB, out_dim), lambda i: (i, 0)),
        ),
        compiler_params=pltpu.CompilerParams(
            dimension_semantics=("parallel",),        # megacore-shard the batch
            vmem_limit_bytes=32 * 1024 * 1024,        # explicit (v7x: 64 MiB phys)
        ),
        cost_estimate=pl.CostEstimate(
            flops=int(flops),
            transcendentals=int(transcendentals),
            bytes_accessed=int(bytes_accessed)),
    )(*flat_inputs)
    return out[:B]


def init_params(key, size_pairs):
    """Deterministic synthetic params (shapes match nn.Linear / nn.LayerNorm)."""
    params = []
    for (fan_in, fan_out) in size_pairs:
        key, kw, kb = jax.random.split(key, 3)
        bound = 1.0 / math.sqrt(fan_in)
        # nn.Linear weight is (out, in); we store its transpose (in, out).
        wT = jax.random.uniform(kw, (fan_in, fan_out), jnp.float32, -bound, bound)
        b = jax.random.uniform(kb, (1, fan_out), jnp.float32, -bound, bound)
        gamma = jnp.ones((1, fan_out), jnp.float32)
        beta = jnp.zeros((1, fan_out), jnp.float32)
        params.append(dict(wT=wT, b=b, gamma=gamma, beta=beta))
    return params


def reference_forward(x, params):
    """Pure-JAX f32 reference matching the PyTorch module (eval mode)."""
    h = x
    for p in params:
        y = h @ p["wT"] + p["b"]
        mu = jnp.mean(y, axis=-1, keepdims=True)
        var = jnp.mean((y - mu) ** 2, axis=-1, keepdims=True)
        y = (y - mu) / jnp.sqrt(var + LN_EPS) * p["gamma"] + p["beta"]
        h = y * jnp.tanh(jax.nn.softplus(y))
    return h


if __name__ == "__main__":
    data_dim, out_dim, batch = 32, 8, 1000   # batch not a tile multiple: exercises padding
    size_pairs = in_outs(data_dim, out_dim, [-1, -1])   # [(32,16),(16,16),(16,8)]

    key = jax.random.PRNGKey(0)
    key, kx = jax.random.split(key)
    x = jax.random.normal(kx, (batch, data_dim), jnp.float32)
    params = init_params(key, size_pairs)

    ref = reference_forward(x, params)

    # Exact-parity path: f32 MXU operands, tight tolerance vs. module numerics.
    out_f32 = ulayerset_forward(x, params, matmul_dtype=jnp.float32)
    out_f32 = jax.block_until_ready(out_f32)
    np.testing.assert_allclose(np.asarray(out_f32), np.asarray(ref),
                               rtol=1e-5, atol=1e-5)

    # Fast path (default): bf16 MXU operands, f32 accumulation / LN / Mish.
    out_bf16 = ulayerset_forward(x, params)     # matmul_dtype=jnp.bfloat16
    out_bf16 = jax.block_until_ready(out_bf16)
    np.testing.assert_allclose(np.asarray(out_bf16), np.asarray(ref),
                               rtol=5e-2, atol=5e-2)

    print("KERNEL_OK")
</pallas_src>

<mosaic_0001>
module attributes {stable_mosaic.version = 11 : i64} {
  func.func @ulayerset_kernel(%arg0: i32, %arg1: memref<512x32xf32, #tpu.memory_space<vmem>>, %arg2: memref<32x16xf32, #tpu.memory_space<vmem>>, %arg3: memref<3x16xf32, #tpu.memory_space<vmem>>, %arg4: memref<16x16xf32, #tpu.memory_space<vmem>>, %arg5: memref<3x16xf32, #tpu.memory_space<vmem>>, %arg6: memref<16x8xf32, #tpu.memory_space<vmem>>, %arg7: memref<3x8xf32, #tpu.memory_space<vmem>>, %arg8: memref<512x8xf32, #tpu.memory_space<vmem>>) attributes {dimension_semantics = [#tpu.dimension_semantics<parallel>], iteration_bounds = array<i64: 2>, scalar_prefetch = 0 : i64, scratch_operands = 0 : i64, tpu.core_type = #tpu.core_type<tc>, window_params = [{transform_indices = @transform_0, window_bounds = array<i64: 512, 32>}, {pipeline_mode = #tpu.pipeline_mode<synchronous>, transform_indices = @transform_1, window_bounds = array<i64: 32, 16>}, {pipeline_mode = #tpu.pipeline_mode<synchronous>, transform_indices = @transform_2, window_bounds = array<i64: 3, 16>}, {pipeline_mode = #tpu.pipeline_mode<synchronous>, transform_indices = @transform_3, window_bounds = array<i64: 16, 16>}, {pipeline_mode = #tpu.pipeline_mode<synchronous>, transform_indices = @transform_4, window_bounds = array<i64: 3, 16>}, {pipeline_mode = #tpu.pipeline_mode<synchronous>, transform_indices = @transform_5, window_bounds = array<i64: 16, 8>}, {pipeline_mode = #tpu.pipeline_mode<synchronous>, transform_indices = @transform_6, window_bounds = array<i64: 3, 8>}, {transform_indices = @transform_7, window_bounds = array<i64: 512, 8>}]} {
    %c0 = arith.constant 0 : index
    %c0_0 = arith.constant 0 : index
    %0 = vector.load %arg1[%c0, %c0_0] : memref<512x32xf32, #tpu.memory_space<vmem>>, vector<512x32xf32>
    %c0_1 = arith.constant 0 : index
    %c0_2 = arith.constant 0 : index
    %1 = vector.load %arg2[%c0_1, %c0_2] : memref<32x16xf32, #tpu.memory_space<vmem>>, vector<32x16xf32>
    %c0_3 = arith.constant 0 : index
    %c0_4 = arith.constant 0 : index
    %2 = vector.load %arg3[%c0_3, %c0_4] : memref<3x16xf32, #tpu.memory_space<vmem>>, vector<3x16xf32>
    %cst = arith.constant dense<0.000000e+00> : vector<512x16xf32>
    %3 = tpu.matmul %0, %1, %cst {dimension_numbers = #tpu.dot_dimension_numbers<[1], [0], [0], [1], [0, 0, 1, 1], [], []>} : vector<512x32xf32>, vector<32x16xf32>, vector<512x16xf32> -> vector<512x16xf32>
    %4 = vector.extract_strided_slice %2 {offsets = [0, 0], sizes = [1, 16], strides = [1, 1]} : vector<3x16xf32> to vector<1x16xf32>
    %5 = vector.broadcast %4 : vector<1x16xf32> to vector<512x16xf32>
    %6 = arith.addf %3, %5 : vector<512x16xf32>
    %cst_5 = arith.constant dense<0.000000e+00> : vector<512xf32>
    %7 = vector.multi_reduction <add>, %6, %cst_5 [1] : vector<512x16xf32> to vector<512xf32>
    %8 = vector.shape_cast %7 : vector<512xf32> to vector<512x1xf32>
    %9 = arith.mulf %6, %6 : vector<512x16xf32>
    %cst_6 = arith.constant dense<0.000000e+00> : vector<512xf32>
    %10 = vector.multi_reduction <add>, %9, %cst_6 [1] : vector<512x16xf32> to vector<512xf32>
    %11 = vector.shape_cast %10 : vector<512xf32> to vector<512x1xf32>
    %cst_7 = arith.constant 6.250000e-02 : f32
    %12 = vector.broadcast %cst_7 : f32 to vector<512x1xf32>
    %13 = arith.mulf %8, %12 : vector<512x1xf32>
    %cst_8 = arith.constant 6.250000e-02 : f32
    %14 = vector.broadcast %cst_8 : f32 to vector<512x1xf32>
    %15 = arith.mulf %11, %14 : vector<512x1xf32>
    %16 = arith.mulf %13, %13 : vector<512x1xf32>
    %17 = arith.subf %15, %16 : vector<512x1xf32>
    %cst_9 = arith.constant 0.000000e+00 : f32
    %18 = vector.broadcast %cst_9 : f32 to vector<512x1xf32>
    %19 = arith.maximumf %17, %18 : vector<512x1xf32>
    %20 = vector.broadcast %13 : vector<512x1xf32> to vector<512x16xf32>
    %21 = arith.subf %6, %20 : vector<512x16xf32>
    %cst_10 = arith.constant 9.99999974E-6 : f32
    %22 = vector.broadcast %cst_10 : f32 to vector<512x1xf32>
    %23 = arith.addf %19, %22 : vector<512x1xf32>
    %24 = math.rsqrt %23 : vector<512x1xf32>
    %25 = vector.broadcast %24 : vector<512x1xf32> to vector<512x16xf32>
    %26 = arith.mulf %21, %25 : vector<512x16xf32>
    %27 = vector.extract_strided_slice %2 {offsets = [1, 0], sizes = [1, 16], strides = [1, 1]} : vector<3x16xf32> to vector<1x16xf32>
    %28 = vector.broadcast %27 : vector<1x16xf32> to vector<512x16xf32>
    %29 = arith.mulf %26, %28 : vector<512x16xf32>
    %30 = vector.extract_strided_slice %2 {offsets = [2, 0], sizes = [1, 16], strides = [1, 1]} : vector<3x16xf32> to vector<1x16xf32>
    %31 = vector.broadcast %30 : vector<1x16xf32> to vector<512x16xf32>
    %32 = arith.addf %29, %31 : vector<512x16xf32>
    %cst_11 = arith.constant 2.000000e+01 : f32
    %33 = vector.broadcast %cst_11 : f32 to vector<512x16xf32>
    %34 = arith.minimumf %32, %33 : vector<512x16xf32>
    %35 = math.exp %34 : vector<512x16xf32>
    %cst_12 = arith.constant 1.000000e+00 : f32
    %36 = vector.broadcast %cst_12 : f32 to vector<512x16xf32>
    %37 = arith.addf %36, %35 : vector<512x16xf32>
    %cst_13 = arith.constant 1.000000e+00 : f32
    %38 = vector.broadcast %cst_13 : f32 to vector<512x16xf32>
    %39 = arith.addf %38, %35 : vector<512x16xf32>
    %40 = arith.mulf %37, %39 : vector<512x16xf32>
    %cst_14 = arith.constant 1.000000e+00 : f32
    %41 = vector.broadcast %cst_14 : f32 to vector<512x16xf32>
    %42 = arith.subf %40, %41 : vector<512x16xf32>
    %cst_15 = arith.constant 1.000000e+00 : f32
    %43 = vector.broadcast %cst_15 : f32 to vector<512x16xf32>
    %44 = arith.addf %40, %43 : vector<512x16xf32>
    %45 = arith.divf %42, %44 : vector<512x16xf32>
    %46 = arith.mulf %32, %45 : vector<512x16xf32>
    %c0_16 = arith.constant 0 : index
    %c0_17 = arith.constant 0 : index
    %47 = vector.load %arg4[%c0_16, %c0_17] : memref<16x16xf32, #tpu.memory_space<vmem>>, vector<16x16xf32>
    %c0_18 = arith.constant 0 : index
    %c0_19 = arith.constant 0 : index
    %48 = vector.load %arg5[%c0_18, %c0_19] : memref<3x16xf32, #tpu.memory_space<vmem>>, vector<3x16xf32>
    %cst_20 = arith.constant dense<0.000000e+00> : vector<512x16xf32>
    %49 = tpu.matmul %46, %47, %cst_20 {dimension_numbers = #tpu.dot_dimension_numbers<[1], [0], [0], [1], [0, 0, 1, 1], [], []>} : vector<512x16xf32>, vector<16x16xf32>, vector<512x16xf32> -> vector<512x16xf32>
    %50 = vector.extract_strided_slice %48 {offsets = [0, 0], sizes = [1, 16], strides = [1, 1]} : vector<3x16xf32> to vector<1x16xf32>
    %51 = vector.broadcast %50 : vector<1x16xf32> to vector<512x16xf32>
    %52 = arith.addf %49, %51 : vector<512x16xf32>
    %cst_21 = arith.constant dense<0.000000e+00> : vector<512xf32>
    %53 = vector.multi_reduction <add>, %52, %cst_21 [1] : vector<512x16xf32> to vector<512xf32>
    %54 = vector.shape_cast %53 : vector<512xf32> to vector<512x1xf32>
    %55 = arith.mulf %52, %52 : vector<512x16xf32>
    %cst_22 = arith.constant dense<0.000000e+00> : vector<512xf32>
    %56 = vector.multi_reduction <add>, %55, %cst_22 [1] : vector<512x16xf32> to vector<512xf32>
    %57 = vector.shape_cast %56 : vector<512xf32> to vector<512x1xf32>
    %cst_23 = arith.constant 6.250000e-02 : f32
    %58 = vector.broadcast %cst_23 : f32 to vector<512x1xf32>
    %59 = arith.mulf %54, %58 : vector<512x1xf32>
    %cst_24 = arith.constant 6.250000e-02 : f32
    %60 = vector.broadcast %cst_24 : f32 to vector<512x1xf32>
    %61 = arith.mulf %57, %60 : vector<512x1xf32>
    %62 = arith.mulf %59, %59 : vector<512x1xf32>
    %63 = arith.subf %61, %62 : vector<512x1xf32>
    %cst_25 = arith.constant 0.000000e+00 : f32
    %64 = vector.broadcast %cst_25 : f32 to vector<512x1xf32>
    %65 = arith.maximumf %63, %64 : vector<512x1xf32>
    %66 = vector.broadcast %59 : vector<512x1xf32> to vector<512x16xf32>
    %67 = arith.subf %52, %66 : vector<512x16xf32>
    %cst_26 = arith.constant 9.99999974E-6 : f32
    %68 = vector.broadcast %cst_26 : f32 to vector<512x1xf32>
    %69 = arith.addf %65, %68 : vector<512x1xf32>
    %70 = math.rsqrt %69 : vector<512x1xf32>
    %71 = vector.broadcast %70 : vector<512x1xf32> to vector<512x16xf32>
    %72 = arith.mulf %67, %71 : vector<512x16xf32>
    %73 = vector.extract_strided_slice %48 {offsets = [1, 0], sizes = [1, 16], strides = [1, 1]} : vector<3x16xf32> to vector<1x16xf32>
    %74 = vector.broadcast %73 : vector<1x16xf32> to vector<512x16xf32>
    %75 = arith.mulf %72, %74 : vector<512x16xf32>
    %76 = vector.extract_strided_slice %48 {offsets = [2, 0], sizes = [1, 16], strides = [1, 1]} : vector<3x16xf32> to vector<1x16xf32>
    %77 = vector.broadcast %76 : vector<1x16xf32> to vector<512x16xf32>
    %78 = arith.addf %75, %77 : vector<512x16xf32>
    %cst_27 = arith.constant 2.000000e+01 : f32
    %79 = vector.broadcast %cst_27 : f32 to vector<512x16xf32>
    %80 = arith.minimumf %78, %79 : vector<512x16xf32>
    %81 = math.exp %80 : vector<512x16xf32>
    %cst_28 = arith.constant 1.000000e+00 : f32
    %82 = vector.broadcast %cst_28 : f32 to vector<512x16xf32>
    %83 = arith.addf %82, %81 : vector<512x16xf32>
    %cst_29 = arith.constant 1.000000e+00 : f32
    %84 = vector.broadcast %cst_29 : f32 to vector<512x16xf32>
    %85 = arith.addf %84, %81 : vector<512x16xf32>
    %86 = arith.mulf %83, %85 : vector<512x16xf32>
    %cst_30 = arith.constant 1.000000e+00 : f32
    %87 = vector.broadcast %cst_30 : f32 to vector<512x16xf32>
    %88 = arith.subf %86, %87 : vector<512x16xf32>
    %cst_31 = arith.constant 1.000000e+00 : f32
    %89 = vector.broadcast %cst_31 : f32 to vector<512x16xf32>
    %90 = arith.addf %86, %89 : vector<512x16xf32>
    %91 = arith.divf %88, %90 : vector<512x16xf32>
    %92 = arith.mulf %78, %91 : vector<512x16xf32>
    %c0_32 = arith.constant 0 : index
    %c0_33 = arith.constant 0 : index
    %93 = vector.load %arg6[%c0_32, %c0_33] : memref<16x8xf32, #tpu.memory_space<vmem>>, vector<16x8xf32>
    %c0_34 = arith.constant 0 : index
    %c0_35 = arith.constant 0 : index
    %94 = vector.load %arg7[%c0_34, %c0_35] : memref<3x8xf32, #tpu.memory_space<vmem>>, vector<3x8xf32>
    %cst_36 = arith.constant dense<0.000000e+00> : vector<512x8xf32>
    %95 = tpu.matmul %92, %93, %cst_36 {dimension_numbers = #tpu.dot_dimension_numbers<[1], [0], [0], [1], [0, 0, 1, 1], [], []>} : vector<512x16xf32>, vector<16x8xf32>, vector<512x8xf32> -> vector<512x8xf32>
    %96 = vector.extract_strided_slice %94 {offsets = [0, 0], sizes = [1, 8], strides = [1, 1]} : vector<3x8xf32> to vector<1x8xf32>
    %97 = vector.broadcast %96 : vector<1x8xf32> to vector<512x8xf32>
    %98 = arith.addf %95, %97 : vector<512x8xf32>
    %cst_37 = arith.constant dense<0.000000e+00> : vector<512xf32>
    %99 = vector.multi_reduction <add>, %98, %cst_37 [1] : vector<512x8xf32> to vector<512xf32>
    %100 = vector.shape_cast %99 : vector<512xf32> to vector<512x1xf32>
    %101 = arith.mulf %98, %98 : vector<512x8xf32>
    %cst_38 = arith.constant dense<0.000000e+00> : vector<512xf32>
    %102 = vector.multi_reduction <add>, %101, %cst_38 [1] : vector<512x8xf32> to vector<512xf32>
    %103 = vector.shape_cast %102 : vector<512xf32> to vector<512x1xf32>
    %cst_39 = arith.constant 1.250000e-01 : f32
    %104 = vector.broadcast %cst_39 : f32 to vector<512x1xf32>
    %105 = arith.mulf %100, %104 : vector<512x1xf32>
    %cst_40 = arith.constant 1.250000e-01 : f32
    %106 = vector.broadcast %cst_40 : f32 to vector<512x1xf32>
    %107 = arith.mulf %103, %106 : vector<512x1xf32>
    %108 = arith.mulf %105, %105 : vector<512x1xf32>
    %109 = arith.subf %107, %108 : vector<512x1xf32>
    %cst_41 = arith.constant 0.000000e+00 : f32
    %110 = vector.broadcast %cst_41 : f32 to vector<512x1xf32>
    %111 = arith.maximumf %109, %110 : vector<512x1xf32>
    %112 = vector.broadcast %105 : vector<512x1xf32> to vector<512x8xf32>
    %113 = arith.subf %98, %112 : vector<512x8xf32>
    %cst_42 = arith.constant 9.99999974E-6 : f32
    %114 = vector.broadcast %cst_42 : f32 to vector<512x1xf32>
    %115 = arith.addf %111, %114 : vector<512x1xf32>
    %116 = math.rsqrt %115 : vector<512x1xf32>
    %117 = vector.broadcast %116 : vector<512x1xf32> to vector<512x8xf32>
    %118 = arith.mulf %113, %117 : vector<512x8xf32>
    %119 = vector.extract_strided_slice %94 {offsets = [1, 0], sizes = [1, 8], strides = [1, 1]} : vector<3x8xf32> to vector<1x8xf32>
    %120 = vector.broadcast %119 : vector<1x8xf32> to vector<512x8xf32>
    %121 = arith.mulf %118, %120 : vector<512x8xf32>
    %122 = vector.extract_strided_slice %94 {offsets = [2, 0], sizes = [1, 8], strides = [1, 1]} : vector<3x8xf32> to vector<1x8xf32>
    %123 = vector.broadcast %122 : vector<1x8xf32> to vector<512x8xf32>
    %124 = arith.addf %121, %123 : vector<512x8xf32>
    %cst_43 = arith.constant 2.000000e+01 : f32
    %125 = vector.broadcast %cst_43 : f32 to vector<512x8xf32>
    %126 = arith.minimumf %124, %125 : vector<512x8xf32>
    %127 = math.exp %126 : vector<512x8xf32>
    %cst_44 = arith.constant 1.000000e+00 : f32
    %128 = vector.broadcast %cst_44 : f32 to vector<512x8xf32>
    %129 = arith.addf %128, %127 : vector<512x8xf32>
    %cst_45 = arith.constant 1.000000e+00 : f32
    %130 = vector.broadcast %cst_45 : f32 to vector<512x8xf32>
    %131 = arith.addf %130, %127 : vector<512x8xf32>
    %132 = arith.mulf %129, %131 : vector<512x8xf32>
    %cst_46 = arith.constant 1.000000e+00 : f32
    %133 = vector.broadcast %cst_46 : f32 to vector<512x8xf32>
    %134 = arith.subf %132, %133 : vector<512x8xf32>
    %cst_47 = arith.constant 1.000000e+00 : f32
    %135 = vector.broadcast %cst_47 : f32 to vector<512x8xf32>
    %136 = arith.addf %132, %135 : vector<512x8xf32>
    %137 = arith.divf %134, %136 : vector<512x8xf32>
    %138 = arith.mulf %124, %137 : vector<512x8xf32>
    %c0_48 = arith.constant 0 : index
    %c0_49 = arith.constant 0 : index
    %139 = vector.load %arg8[%c0_48, %c0_49] : memref<512x8xf32, #tpu.memory_space<vmem>>, vector<512x8xf32>
    tpu.vector_store %arg8[%c0_48, %c0_49], %138 {strides = array<i32>} : memref<512x8xf32, #tpu.memory_space<vmem>>, vector<512x8xf32>,
    return
  }
  func.func @transform_0(%arg0: i32) -> (i32, i32) {
    %c0_i32 = arith.constant 0 : i32
    %c0_i32_0 = arith.constant 0 : i32
    return %arg0, %c0_i32 : i32, i32
  }
  func.func @transform_1(%arg0: i32) -> (i32, i32) {
    %c0_i32 = arith.constant 0 : i32
    %c0_i32_0 = arith.constant 0 : i32
    %c0_i32_1 = arith.constant 0 : i32
    return %c0_i32, %c0_i32_0 : i32, i32
  }
  func.func @transform_2(%arg0: i32) -> (i32, i32) {
    %c0_i32 = arith.constant 0 : i32
    %c0_i32_0 = arith.constant 0 : i32
    %c0_i32_1 = arith.constant 0 : i32
    return %c0_i32, %c0_i32_0 : i32, i32
  }
  func.func @transform_3(%arg0: i32) -> (i32, i32) {
    %c0_i32 = arith.constant 0 : i32
    %c0_i32_0 = arith.constant 0 : i32
    %c0_i32_1 = arith.constant 0 : i32
    return %c0_i32, %c0_i32_0 : i32, i32
  }
  func.func @transform_4(%arg0: i32) -> (i32, i32) {
    %c0_i32 = arith.constant 0 : i32
    %c0_i32_0 = arith.constant 0 : i32
    %c0_i32_1 = arith.constant 0 : i32
    return %c0_i32, %c0_i32_0 : i32, i32
  }
  func.func @transform_5(%arg0: i32) -> (i32, i32) {
    %c0_i32 = arith.constant 0 : i32
    %c0_i32_0 = arith.constant 0 : i32
    %c0_i32_1 = arith.constant 0 : i32
    return %c0_i32, %c0_i32_0 : i32, i32
  }
  func.func @transform_6(%arg0: i32) -> (i32, i32) {
    %c0_i32 = arith.constant 0 : i32
    %c0_i32_0 = arith.constant 0 : i32
    %c0_i32_1 = arith.constant 0 : i32
    return %c0_i32, %c0_i32_0 : i32, i32
  }
  func.func @transform_7(%arg0: i32) -> (i32, i32) {
    %c0_i32 = arith.constant 0 : i32
    %c0_i32_0 = arith.constant 0 : i32
    return %arg0, %c0_i32 : i32, i32
  }
}

</mosaic_0001>

<bundles_post_ra>
// kernel: tpu_custom_call.1
= control target key start
LH: loop header
LB: loop body
LE: loop exit
PB: predicated region body
PF: predicated region fallthrough
CT: control target
= control target key end

     0   :  { %s9750_s24 = smov 0   ;;  %s15556_s0 = inlined_call_operand.vmem [shape: f32[1024,32], index: 0, kind: input, shape index: {}]   ;;  %s15557_s1 = inlined_call_operand.vmem [shape: f32[32,16], index: 1, kind: input, shape index: {}]   ;;  %s15558_s2 = inlined_call_operand.vmem [shape: f32[3,16], index: 2, kind: input, shape index: {}]   ;;  %s15559_s3 = inlined_call_operand.vmem [shape: f32[16,16], index: 3, kind: input, shape index: {}]   ;;  %s15560_s4 = inlined_call_operand.vmem [shape: f32[3,16], index: 4, kind: input, shape index: {}]   ;;  %s15561_s5 = inlined_call_operand.vmem [shape: f32[16,8], index: 5, kind: input, shape index: {}]   ;;  %s15562_s6 = inlined_call_operand.vmem [shape: f32[3,8], index: 6, kind: input, shape index: {}]   ;;  %s15563_s7 = inlined_call_operand.vmem [shape: f32[1024,8], index: 7, kind: output, shape index: {}]  }
   0x1 LB: > { %s7623_s25 = sadd.s32 4294967295, %s9708_s24   ;;  %p7627_p0 = scmp.ge.s32.totalorder %s9708_s24, 1  ;;  %s9708_s24 = sphi %s9750_s24, %s17_s24  }
   0x2   : > { %p238_p1 = scmp.lt.s32.totalorder %s9708_s24, 3 }
   0x4   : > { %p239_p2 = pnand %p7627_p0, %p238_p1 }
   0x6   : > { %242 = sbr.rel (%p239_p2) target bundleno = 1748 (0x6d4), region = 48 }
   0xd   : > { %v346_v0 = vld [vmem:[%s15557_s1] sm:$0xff]  ;;  %v347_v1 = vld [vmem:[%s15557_s1 + $0x8] sm:$0xff]  ;;  %v348_v2 = vld [vmem:[%s15557_s1 + $0x10] sm:$0xff]  ;;  %s7628_s9 = sshll.u32 %s7623_s25, 6  ;;  %vm355_vm0 = vcmask 261120   ;;  %vm933_vm1 = vcmask 130048  }
   0xe   : > { %v8522_v3 = vpack.c.bf16 %v347_v1, %v346_v0  ;;  %v349_v4 = vld [vmem:[%s15557_s1 + $0x18] sm:$0xff]  ;;  %p271_p3 = scmp.lt.s32.totalorder %s7628_s9, 127  ;;  %vm5702_vm2 = vcmask 64512  }
   0xf   : > { %v8526_v5 = vpack.c.bf16 %v349_v4, %v348_v2 }
  0x10   : > { %8523 = vmatprep.subr.bf16.mxu0 %v8522_v3  ;;  %s16412_s9 = smov (!%p271_p3, %s7628_s9), 127 }
  0x11   : > { %8525 = vmatpush3.bf16.msra.mxu0 %v8522_v3  ;;  %s7629_s12 = sshll.u32 %s16412_s9, 3 }
  0x12   : > { %8527 = vmatprep.subr.bf16.mxu0 %v8526_v5  ;;  %s9778_s15 = scalar_lea.vmem %s15556_s0, %s7629_s12  ;;  %s14214_s16 = scalar_lea.vmem %s15563_s7, %s7629_s12 }
  0x13   : > { %v282_v6 = vld [vmem:[%s9778_s15] sm:$0xff]  ;;  %v283_v7 = vld [vmem:[%s9778_s15 + $0x8] sm:$0xff]  ;;  %v284_v8 = vld [vmem:[%s9778_s15 + $0x10] sm:$0xff] }
  0x14   : > { %8226 = vmatprep.mubr.msk.f32.mxu0 %vm355_vm0, %v282_v6  ;;  %v285_v9 = vld [vmem:[%s9778_s15 + $0x18] sm:$0xff]  ;;  %v286_v10 = vld [vmem:[%s9778_s15 + $0x20] sm:$0xff]  ;;  %v287_v11 = vld [vmem:[%s9778_s15 + $0x28] sm:$0xff] }
  0x15   : > { %8529 = vmatpush3.bf16.msra.mxu0 %v8526_v5  ;;  %v288_v12 = vld [vmem:[%s9778_s15 + $0x30] sm:$0xff]  ;;  %v289_v13 = vld [vmem:[%s9778_s15 + $0x38] sm:$0xff]  ;;  %v290_v14 = vld [vmem:[%s9778_s15 + $0x40] sm:$0xff] }
  0x16   : > { %v291_v15 = vld [vmem:[%s9778_s15 + $0x48] sm:$0xff]  ;;  %v292_v16 = vld [vmem:[%s9778_s15 + $0x50] sm:$0xff]  ;;  %v293_v17 = vld [vmem:[%s9778_s15 + $0x58] sm:$0xff] }
  0x17   : > { %v294_v18 = vld [vmem:[%s9778_s15 + $0x60] sm:$0xff]  ;;  %v295_v19 = vld [vmem:[%s9778_s15 + $0x68] sm:$0xff]  ;;  %v296_v20 = vld [vmem:[%s9778_s15 + $0x70] sm:$0xff] }
  0x18   : > { %8227 = vmatmul.mubr.msk.f32.vlgmr.msra.gmra.mrb[0].mxu0 %vm355_vm0, %v283_v7  ;;  %v297_v21 = vld [vmem:[%s9778_s15 + $0x78] sm:$0xff]  ;;  %v298_v22 = vld [vmem:[%s9778_s15 + $0x80] sm:$0xff]  ;;  %v299_v23 = vld [vmem:[%s9778_s15 + $0x88] sm:$0xff] }
  0x19   : > { %8229 = vmatprep.mubr.msk.f32.mxu0 %vm355_vm0, %v284_v8  ;;  %v300_v24 = vld [vmem:[%s9778_s15 + $0x90] sm:$0xff]  ;;  %v301_v25 = vld [vmem:[%s9778_s15 + $0x98] sm:$0xff]  ;;  %v302_v26 = vld [vmem:[%s9778_s15 + $0xa0] sm:$0xff] }
  0x1a   : > { %v303_v27 = vld [vmem:[%s9778_s15 + $0xa8] sm:$0xff]  ;;  %v304_v28 = vld [vmem:[%s9778_s15 + $0xb0] sm:$0xff]  ;;  %v305_v29 = vld [vmem:[%s9778_s15 + $0xb8] sm:$0xff] }
  0x1b   : > { %v306_v30 = vld [vmem:[%s9778_s15 + $0xc0] sm:$0xff]  ;;  %v307_v31 = vld [vmem:[%s9778_s15 + $0xc8] sm:$0xff]  ;;  %v308_v32 = vld [vmem:[%s9778_s15 + $0xd0] sm:$0xff] }
  0x1c   : > { %8230 = vmatmul.mubr.msk.f32.gmra.mrb[2].mxu0 %vm355_vm0, %v285_v9  ;;  %v309_v33 = vld [vmem:[%s9778_s15 + $0xd8] sm:$0xff]  ;;  %v310_v34 = vld [vmem:[%s9778_s15 + $0xe0] sm:$0xff]  ;;  %v311_v35 = vld [vmem:[%s9778_s15 + $0xe8] sm:$0xff]  ;;  %v351_v9 = vlaneseq }
  0x1d   : > { %8232 = vmatprep.mubr.msk.f32.mxu0 %vm355_vm0, %v286_v10  ;;  %v312_v36 = vld [vmem:[%s9778_s15 + $0xf0] sm:$0xff]  ;;  %v313_v37 = vld [vmem:[%s9778_s15 + $0xf8] sm:$0xff]  ;;  %v314_v38 = vld [vmem:[%s9778_s15 + $0x100] sm:$0xff] }
  0x1e   : > { %v315_v39 = vld [vmem:[%s9778_s15 + $0x108] sm:$0xff]  ;;  %v316_v40 = vld [vmem:[%s9778_s15 + $0x110] sm:$0xff]  ;;  %v317_v41 = vld [vmem:[%s9778_s15 + $0x118] sm:$0xff]  ;;  %v9914_v10 = vshrl.u32 %v351_v9, 7 }
  0x1f   : > { %v318_v42 = vld [vmem:[%s9778_s15 + $0x120] sm:$0xff]  ;;  %v319_v43 = vld [vmem:[%s9778_s15 + $0x128] sm:$0xff]  ;;  %v320_v44 = vld [vmem:[%s9778_s15 + $0x130] sm:$0xff] }
  0x20   : > { %8233 = vmatmul.mubr.msk.f32.gmra.mrb[4].mxu0 %vm355_vm0, %v287_v11  ;;  %v321_v45 = vld [vmem:[%s9778_s15 + $0x138] sm:$0xff]  ;;  %v322_v46 = vld [vmem:[%s9778_s15 + $0x140] sm:$0xff]  ;;  %v323_v47 = vld [vmem:[%s9778_s15 + $0x148] sm:$0xff]  ;;  %v9917_v11 = vsub.s32 0, %v9914_v10 }
  0x21   : > { %8235 = vmatprep.mubr.msk.f32.mxu0 %vm355_vm0, %v288_v12  ;;  %v324_v48 = vld [vmem:[%s9778_s15 + $0x150] sm:$0xff]  ;;  %v325_v49 = vld [vmem:[%s9778_s15 + $0x158] sm:$0xff]  ;;  %v326_v50 = vld [vmem:[%s9778_s15 + $0x160] sm:$0xff] }
  0x22   : > { %v327_v51 = vld [vmem:[%s9778_s15 + $0x168] sm:$0xff]  ;;  %v328_v52 = vld [vmem:[%s9778_s15 + $0x170] sm:$0xff]  ;;  %v329_v53 = vld [vmem:[%s9778_s15 + $0x178] sm:$0xff]  ;;  %15857 = vst [vmem:[#allocation2_spill] sm:$0xff] %v9917_v11 }
  0x23   : > { %v330_v54 = vld [vmem:[%s9778_s15 + $0x180] sm:$0xff]  ;;  %v331_v55 = vld [vmem:[%s9778_s15 + $0x188] sm:$0xff]  ;;  %v332_v56 = vld [vmem:[%s9778_s15 + $0x190] sm:$0xff] }
  0x24   : > { %8236 = vmatmul.mubr.msk.f32.gmra.mrb[6].mxu0 %vm355_vm0, %v289_v13  ;;  %v333_v57 = vld [vmem:[%s9778_s15 + $0x198] sm:$0xff]  ;;  %v334_v58 = vld [vmem:[%s9778_s15 + $0x1a0] sm:$0xff]  ;;  %v335_v59 = vld [vmem:[%s9778_s15 + $0x1a8] sm:$0xff] }
  0x25   : > { %8238 = vmatprep.mubr.msk.f32.mxu0 %vm355_vm0, %v290_v14  ;;  %v336_v60 = vld [vmem:[%s9778_s15 + $0x1b0] sm:$0xff]  ;;  %v337_v61 = vld [vmem:[%s9778_s15 + $0x1b8] sm:$0xff]  ;;  %v338_v62 = vld [vmem:[%s9778_s15 + $0x1c0] sm:$0xff] }
  0x26   : > { %v339_v63 = vld [vmem:[%s9778_s15 + $0x1c8] sm:$0xff]  ;;  %v340_v0 = vld [vmem:[%s9778_s15 + $0x1d0] sm:$0xff]  ;;  %v341_v1 = vld [vmem:[%s9778_s15 + $0x1d8] sm:$0xff] }
  0x27   : > { %v342_v2 = vld [vmem:[%s9778_s15 + $0x1e0] sm:$0xff]  ;;  %v343_v3 = vld [vmem:[%s9778_s15 + $0x1e8] sm:$0xff]  ;;  %v344_v4 = vld [vmem:[%s9778_s15 + $0x1f0] sm:$0xff] }
  0x28   : > { %8239 = vmatmul.mubr.msk.f32.gmra.mrb[8].mxu0 %vm355_vm0, %v291_v15  ;;  %v345_v5 = vld [vmem:[%s9778_s15 + $0x1f8] sm:$0xff]  ;;  %v2734_v6 = vld [vmem:[%s15559_s3] sm:$0xff]  ;;  %v2735_v7 = vld [vmem:[%s15559_s3 + $0x8] sm:$0xff] }
  0x29   : > { %8241 = vmatprep.mubr.msk.f32.mxu0 %vm355_vm0, %v292_v16  ;;  %v8530_v8 = vpack.c.bf16 %v2735_v7, %v2734_v6  ;;  %v9922_v12 = vld [vmem:[%s15558_s2] sm:$0x7] }
  0x2a   : > { %v9926_v13 = vrot.slane %v9922_v12, %v9917_v11 }
  0x2b   : > { %8531 = vmatprep.subr.bf16.mxu0 %v8530_v8  ;;  %8538 = vmatprep.subr.bf16.mxu1 %v8530_v8 }
  0x2c   : > { %8242 = vmatmul.mubr.msk.f32.gmra.mrb[10].mxu0 %vm355_vm0, %v293_v17  ;;  %8539 = vmatpush3.bf16.msra.mxu1 %v8530_v8 }
  0x2d   : > { %8244 = vmatprep.mubr.msk.f32.mxu0 %vm355_vm0, %v294_v18  ;;  %8533 = vmatpush3.bf16.msra.mxu0 %v8530_v8 }
  0x30   : > { %8245 = vmatmul.mubr.msk.f32.gmra.mrb[12].mxu0 %vm355_vm0, %v295_v19 }
  0x31   : > { %8247 = vmatprep.mubr.msk.f32.mxu0 %vm355_vm0, %v296_v20 }
  0x34   : > { %8248 = vmatmul.mubr.msk.f32.gmra.mrb[14].mxu0 %vm355_vm0, %v297_v21 }
  0x35   : > { %8250 = vmatprep.mubr.msk.f32.mxu0 %vm355_vm0, %v298_v22 }
  0x38   : > { %8251 = vmatmul.mubr.msk.f32.gmra.mrb[16].mxu0 %vm355_vm0, %v299_v23 }
  0x39   : > { %8253 = vmatprep.mubr.msk.f32.mxu0 %vm355_vm0, %v300_v24 }
  0x3c   : > { %8254 = vmatmul.mubr.msk.f32.gmra.mrb[18].mxu0 %vm355_vm0, %v301_v25 }
  0x3d   : > { %8256 = vmatprep.mubr.msk.f32.mxu0 %vm355_vm0, %v302_v26 }
  0x40   : > { %8257 = vmatmul.mubr.msk.f32.gmra.mrb[20].mxu0 %vm355_vm0, %v303_v27 }
  0x41   : > { %8259 = vmatprep.mubr.msk.f32.mxu0 %vm355_vm0, %v304_v28 }
  0x44   : > { %8260 = vmatmul.mubr.msk.f32.gmra.mrb[22].mxu0 %vm355_vm0, %v305_v29 }
  0x45   : > { %8262 = vmatprep.mubr.msk.f32.mxu0 %vm355_vm0, %v306_v30 }
  0x48   : > { %8263 = vmatmul.mubr.msk.f32.gmra.mrb[24].mxu0 %vm355_vm0, %v307_v31 }
  0x49   : > { %8265 = vmatprep.mubr.msk.f32.mxu0 %vm355_vm0, %v308_v32 }
  0x4c   : > { %8266 = vmatmul.mubr.msk.f32.gmra.mrb[26].mxu0 %vm355_vm0, %v309_v33 }
  0x4d   : > { %8268 = vmatprep.mubr.msk.f32.mxu0 %vm355_vm0, %v310_v34 }
  0x50   : > { %8269 = vmatmul.mubr.msk.f32.gmra.mrb[28].mxu0 %vm355_vm0, %v311_v35 }
  0x51   : > { %8271 = vmatprep.mubr.msk.f32.mxu0 %vm355_vm0, %v312_v36 }
  0x54   : > { %8272 = vmatmul.mubr.msk.f32.gmra.mrb[30].mxu0 %vm355_vm0, %v313_v37 }
  0x55   : > { %8274 = vmatprep.mubr.msk.f32.mxu0 %vm355_vm0, %v314_v38 }
  0x58   : > { %8275 = vmatmul.mubr.msk.f32.gmra.mrb[32].mxu0 %vm355_vm0, %v315_v39 }
  0x59   : > { %8277 = vmatprep.mubr.msk.f32.mxu0 %vm355_vm0, %v316_v40 }
  0x5c   : > { %8278 = vmatmul.mubr.msk.f32.gmra.mrb[34].mxu0 %vm355_vm0, %v317_v41 }
  0x5d   : > { %8280 = vmatprep.mubr.msk.f32.mxu0 %vm355_vm0, %v318_v42 }
  0x60   : > { %8281 = vmatmul.mubr.msk.f32.gmra.mrb[36].mxu0 %vm355_vm0, %v319_v43 }
  0x61   : > { %8283 = vmatprep.mubr.msk.f32.mxu0 %vm355_vm0, %v320_v44 }
  0x64   : > { %8284 = vmatmul.mubr.msk.f32.gmra.mrb[38].mxu0 %vm355_vm0, %v321_v45 }
  0x65   : > { %8286 = vmatprep.mubr.msk.f32.mxu0 %vm355_vm0, %v322_v46 }
  0x68   : > { %8287 = vmatmul.mubr.msk.f32.gmra.mrb[40].mxu0 %vm355_vm0, %v323_v47 }
  0x69   : > { %8289 = vmatprep.mubr.msk.f32.mxu0 %vm355_vm0, %v324_v48 }
  0x6c   : > { %8290 = vmatmul.mubr.msk.f32.gmra.mrb[42].mxu0 %vm355_vm0, %v325_v49 }
  0x6d   : > { %8292 = vmatprep.mubr.msk.f32.mxu0 %vm355_vm0, %v326_v50 }
  0x70   : > { %8293 = vmatmul.mubr.msk.f32.gmra.mrb[44].mxu0 %vm355_vm0, %v327_v51 }
  0x71   : > { %8295 = vmatprep.mubr.msk.f32.mxu0 %vm355_vm0, %v328_v52 }
  0x74   : > { %8296 = vmatmul.mubr.msk.f32.gmra.mrb[46].mxu0 %vm355_vm0, %v329_v53 }
  0x75   : > { %8298 = vmatprep.mubr.msk.f32.mxu0 %vm355_vm0, %v330_v54 }
  0x78   : > { %8299 = vmatmul.mubr.msk.f32.gmra.mrb[48].mxu0 %vm355_vm0, %v331_v55 }
  0x79   : > { %8301 = vmatprep.mubr.msk.f32.mxu0 %vm355_vm0, %v332_v56 }
  0x7c   : > { %8302 = vmatmul.mubr.msk.f32.gmra.mrb[50].mxu0 %vm355_vm0, %v333_v57 }
  0x7d   : > { %8304 = vmatprep.mubr.msk.f32.mxu0 %vm355_vm0, %v334_v58 }
  0x80   : > { %8305 = vmatmul.mubr.msk.f32.gmra.mrb[52].mxu0 %vm355_vm0, %v335_v59 }
  0x81   : > { %8307 = vmatprep.mubr.msk.f32.mxu0 %vm355_vm0, %v336_v60 }
  0x84   : > { %8308 = vmatmul.mubr.msk.f32.gmra.mrb[54].mxu0 %vm355_vm0, %v337_v61 }
  0x85   : > { %8310 = vmatprep.mubr.msk.f32.mxu0 %vm355_vm0, %v338_v62 }
  0x88   : > { %8311 = vmatmul.mubr.msk.f32.gmra.mrb[56].mxu0 %vm355_vm0, %v339_v63 }
  0x89   : > { %8313 = vmatprep.mubr.msk.f32.mxu0 %vm355_vm0, %v340_v0 }
  0x8c   : > { %8314 = vmatmul.mubr.msk.f32.gmra.mrb[58].mxu0 %vm355_vm0, %v341_v1 }
  0x8d   : > { %8316 = vmatprep.mubr.msk.f32.mxu0 %vm355_vm0, %v342_v2 }
  0x90   : > { %8317 = vmatmul.mubr.msk.f32.gmra.mrb[60].mxu0 %vm355_vm0, %v343_v3 }
  0x91   : > { %8319 = vmatprep.mubr.msk.f32.mxu0 %vm355_vm0, %v344_v4 }
  0x94   : > { %8320 = vmatmul.mubr.msk.f32.gmra.mrb[62].mxu0 %vm355_vm0, %v345_v5 }
  0xeb   : > { %v8228_v14 = vpop.f32.mrb[0].mxu0 }
  0xec   : > { %v9929_v15 = vadd.f32 %v8228_v14, %v9926_v13  ;;  %v614_v16 = vpop.f32.mrb[1].mxu0 }
  0xed   : > { %v9932_v17 = vadd.f32 %v614_v16, %v9926_v13 }
  0xee   : > { %v937_v18 = vsel %vm933_vm1, %v9929_v15, 0.0  ;;  %v1127_v19 = vmul.f32 %v9929_v15, %v9929_v15 }
  0xef   : > { %938 = vadd.xlane.f32.xlu0 %v937_v18  ;;  %v8231_v20 = vpop.f32.mrb[2].mxu0  ;;  %v1126_v23 = vmul.f32 %v9932_v17, %v9932_v17  ;;  %v934_v26 = vsel %vm933_vm1, %v9932_v17, 0.0 }
  0xf0   : > { %v1193_v21 = vsel %vm933_vm1, %v1127_v19, 0.0  ;;  %v624_v22 = vpop.f32.mrb[3].mxu0  ;;  %v9945_v25 = vadd.f32 %v8231_v20, %v9926_v13 }
  0xf1   : > { %1194 = vadd.xlane.f32.xlu1 %v1193_v21  ;;  %v9942_v24 = vadd.f32 %v624_v22, %v9926_v13  ;;  %v1190_v28 = vsel %vm933_vm1, %v1126_v23, 0.0 }
  0xf2   : > { %v943_v32 = vsel %vm933_vm1, %v9945_v25, 0.0  ;;  %v1129_v36 = vmul.f32 %v9945_v25, %v9945_v25 }
  0xf3   : > { %935 = vadd.xlane.f32.xlu0 %v934_v26  ;;  %v8234_v27 = vpop.f32.mrb[4].mxu0  ;;  %v940_v29 = vsel %vm933_vm1, %v9942_v24, 0.0  ;;  %v1128_v31 = vmul.f32 %v9942_v24, %v9942_v24 }
  0xf4   : > { %v634_v30 = vpop.f32.mrb[5].mxu0  ;;  %v9963_v38 = vadd.f32 %v8234_v27, %v9926_v13  ;;  %v1199_v40 = vsel %vm933_vm1, %v1129_v36, 0.0 }
  0xf5   : > { %1191 = vadd.xlane.f32.xlu1 %v1190_v28  ;;  %v9957_v34 = vadd.f32 %v634_v30, %v9926_v13  ;;  %v1196_v35 = vsel %vm933_vm1, %v1128_v31, 0.0 }
  0xf6   : > { %v949_v44 = vsel %vm933_vm1, %v9963_v38, 0.0  ;;  %v1131_v48 = vmul.f32 %v9963_v38, %v9963_v38 }
  0xf7   : > { %941 = vadd.xlane.f32.xlu0 %v940_v29  ;;  %v8237_v33 = vpop.f32.mrb[6].mxu0  ;;  %v946_v41 = vsel %vm933_vm1, %v9957_v34, 0.0  ;;  %v1130_v42 = vmul.f32 %v9957_v34, %v9957_v34 }
  0xf8   : > { %v644_v37 = vpop.f32.mrb[7].mxu0  ;;  %v9979_v50 = vadd.f32 %v8237_v33, %v9926_v13  ;;  %v1205_v52 = vsel %vm933_vm1, %v1131_v48, 0.0 }
  0xf9   : > { %944 = vadd.xlane.f32.xlu1 %v943_v32  ;;  %v9973_v46 = vadd.f32 %v644_v37, %v9926_v13  ;;  %v1202_v47 = vsel %vm933_vm1, %v1130_v42, 0.0 }
  0xfa   : > { %v955_v56 = vsel %vm933_vm1, %v9979_v50, 0.0  ;;  %v1133_v60 = vmul.f32 %v9979_v50, %v9979_v50 }
  0xfb   : > { %1197 = vadd.xlane.f32.xlu0 %v1196_v35  ;;  %v8240_v39 = vpop.f32.mrb[8].mxu0  ;;  %v952_v53 = vsel %vm933_vm1, %v9973_v46, 0.0  ;;  %v1132_v54 = vmul.f32 %v9973_v46, %v9973_v46 }
  0xfc   : > { %v654_v43 = vpop.f32.mrb[9].mxu0  ;;  %v9995_v62 = vadd.f32 %v8240_v39, %v9926_v13  ;;  %v1211_v0 = vsel %vm933_vm1, %v1133_v60, 0.0 }
  0xfd   : > { %1200 = vadd.xlane.f32.xlu1 %v1199_v40  ;;  %v9989_v58 = vadd.f32 %v654_v43, %v9926_v13  ;;  %v1208_v59 = vsel %vm933_vm1, %v1132_v54, 0.0 }
  0xfe   : > { %15858 = vst [vmem:[#allocation3_spill] sm:$0xff] %v9995_v62  ;;  %v961_v4 = vsel %vm933_vm1, %v9995_v62, 0.0  ;;  %v1135_v8 = vmul.f32 %v9995_v62, %v9995_v62 }
  0xff   : > { %947 = vadd.xlane.f32.xlu0 %v946_v41  ;;  %v8243_v45 = vpop.f32.mrb[10].mxu0  ;;  %v958_v1 = vsel %vm933_vm1, %v9989_v58, 0.0  ;;  %v1134_v2 = vmul.f32 %v9989_v58, %v9989_v58 }
 0x100   : > { %v664_v49 = vpop.f32.mrb[11].mxu0  ;;  %v10013_v14 = vadd.f32 %v8243_v45, %v9926_v13  ;;  %v1217_v18 = vsel %vm933_vm1, %v1135_v8, 0.0 }
 0x101   : > { %950 = vadd.xlane.f32.xlu1 %v949_v44  ;;  %v10007_v6 = vadd.f32 %v664_v49, %v9926_v13  ;;  %v1214_v7 = vsel %vm933_vm1, %v1134_v2, 0.0 }
 0x102   : > { %15860 = vst [vmem:[#allocation5_spill] sm:$0xff] %v10013_v14  ;;  %v967_v22 = vsel %vm933_vm1, %v10013_v14, 0.0  ;;  %v1137_v28 = vmul.f32 %v10013_v14, %v10013_v14 }
 0x103   : > { %1203 = vadd.xlane.f32.xlu0 %v1202_v47  ;;  %v8246_v51 = vpop.f32.mrb[12].mxu0  ;;  %15859 = vst [vmem:[#allocation4_spill] sm:$0xff] %v10007_v6  ;;  %v964_v19 = vsel %vm933_vm1, %v10007_v6, 0.0  ;;  %v1136_v20 = vmul.f32 %v10007_v6, %v10007_v6 }
 0x104   : > { %v674_v55 = vpop.f32.mrb[13].mxu0  ;;  %v10037_v30 = vadd.f32 %v8246_v51, %v9926_v13  ;;  %v1223_v32 = vsel %vm933_vm1, %v1137_v28, 0.0 }
 0x105   : > { %1206 = vadd.xlane.f32.xlu1 %v1205_v52  ;;  %v10029_v26 = vadd.f32 %v674_v55, %v9926_v13  ;;  %v1220_v27 = vsel %vm933_vm1, %v1136_v20, 0.0 }
 0x106   : > { %15862 = vst [vmem:[#allocation7_spill] sm:$0xff] %v10037_v30  ;;  %v973_v37 = vsel %vm933_vm1, %v10037_v30, 0.0  ;;  %v1139_v42 = vmul.f32 %v10037_v30, %v10037_v30 }
 0x107   : > { %953 = vadd.xlane.f32.xlu0 %v952_v53  ;;  %v8249_v57 = vpop.f32.mrb[14].mxu0  ;;  %15861 = vst [vmem:[#allocation6_spill] sm:$0xff] %v10029_v26  ;;  %v970_v33 = vsel %vm933_vm1, %v10029_v26, 0.0  ;;  %v1138_v35 = vmul.f32 %v10029_v26, %v10029_v26 }
 0x108   : > { %v684_v61 = vpop.f32.mrb[15].mxu0  ;;  %v10061_v44 = vadd.f32 %v8249_v57, %v9926_v13  ;;  %v1229_v47 = vsel %vm933_vm1, %v1139_v42, 0.0 }
 0x109   : > { %956 = vadd.xlane.f32.xlu1 %v955_v56  ;;  %v10053_v40 = vadd.f32 %v684_v61, %v9926_v13  ;;  %v1226_v41 = vsel %vm933_vm1, %v1138_v35, 0.0 }
 0x10a   : > { %15864 = vst [vmem:[#allocation9_spill] sm:$0xff] %v10061_v44  ;;  %v979_v52 = vsel %vm933_vm1, %v10061_v44, 0.0  ;;  %v1141_v56 = vmul.f32 %v10061_v44, %v10061_v44 }
 0x10b   : > { %1209 = vadd.xlane.f32.xlu0 %v1208_v59  ;;  %v8252_v63 = vpop.f32.mrb[16].mxu0  ;;  %15863 = vst [vmem:[#allocation8_spill] sm:$0xff] %v10053_v40  ;;  %v976_v48 = vsel %vm933_vm1, %v10053_v40, 0.0  ;;  %v1140_v49 = vmul.f32 %v10053_v40, %v10053_v40 }
 0x10c   : > { %v694_v3 = vpop.f32.mrb[17].mxu0  ;;  %v10085_v59 = vadd.f32 %v8252_v63, %v9926_v13  ;;  %v1235_v61 = vsel %vm933_vm1, %v1141_v56, 0.0 }
 0x10d   : > { %1212 = vadd.xlane.f32.xlu1 %v1211_v0  ;;  %v10077_v54 = vadd.f32 %v694_v3, %v9926_v13  ;;  %v1232_v55 = vsel %vm933_vm1, %v1140_v49, 0.0 }
 0x10e   : > { %15866 = vst [vmem:[#allocation11_spill] sm:$0xff] %v10085_v59  ;;  %v985_v3 = vsel %vm933_vm1, %v10085_v59, 0.0  ;;  %v1143_v8 = vmul.f32 %v10085_v59, %v10085_v59 }
 0x10f   : > { %959 = vadd.xlane.f32.xlu0 %v958_v1  ;;  %v10004_v5 = vpop.f32.mrb[18].mxu0  ;;  %15865 = vst [vmem:[#allocation10_spill] sm:$0xff] %v10077_v54  ;;  %v982_v0 = vsel %vm933_vm1, %v10077_v54, 0.0  ;;  %v1142_v1 = vmul.f32 %v10077_v54, %v10077_v54 }
 0x110   : > { %v704_v9 = vpop.f32.mrb[19].mxu0 }
 0x111   : > { %962 = vadd.xlane.f32.xlu1 %v961_v4  ;;  %v10101_v4 = vadd.f32 %v704_v9, %v9926_v13 }
 0x113   : > { %1215 = vadd.xlane.f32.xlu0 %v1214_v7  ;;  %v10015_v16 = vpop.f32.mrb[20].mxu0  ;;  %15867 = vst [vmem:[#allocation12_spill] sm:$0xff] %v10101_v4  ;;  %v1238_v7 = vsel %vm933_vm1, %v1142_v1, 0.0  ;;  %v988_v9 = vsel %vm933_vm1, %v10101_v4, 0.0 }
 0x114   : > { %v10022_v21 = vpop.f32.mrb[21].mxu0  ;;  %v10136_v42 = vadd.f32 %v10015_v16, %v9926_v13 }
 0x115   : > { %1218 = vadd.xlane.f32.xlu1 %v1217_v18 }
 0x116   : > { %15870 = vst [vmem:[#allocation15_spill] sm:$0xff] %v10136_v42 }
 0x117   : > { %965 = vadd.xlane.f32.xlu0 %v964_v19  ;;  %v10026_v23 = vpop.f32.mrb[22].mxu0  ;;  %v10110_v19 = vadd.f32 %v10004_v5, %v9926_v13 }
 0x118   : > { %v10034_v29 = vpop.f32.mrb[23].mxu0 }
 0x119   : > { %968 = vadd.xlane.f32.xlu1 %v967_v22  ;;  %15868 = vst [vmem:[#allocation13_spill] sm:$0xff] %v10110_v19  ;;  %v1241_v22 = vsel %vm933_vm1, %v1143_v8, 0.0  ;;  %v10153_v56 = vadd.f32 %v10034_v29, %v9926_v13 }
 0x11b   : > { %1221 = vadd.xlane.f32.xlu0 %v1220_v27  ;;  %v10039_v31 = vpop.f32.mrb[24].mxu0  ;;  %v1144_v27 = vmul.f32 %v10101_v4, %v10101_v4  ;;  %15871 = vst [vmem:[#allocation16_spill] sm:$0xff] %v10153_v56  ;;  %v1000_v29 = vsel %vm933_vm1, %v10153_v56, 0.0 }
 0x11c   : > { %v10046_v36 = vpop.f32.mrb[25].mxu0 }
 0x11d   : > { %1224 = vadd.xlane.f32.xlu1 %v1223_v32  ;;  %v991_v32 = vsel %vm933_vm1, %v10110_v19, 0.0  ;;  %v1244_v35 = vsel %vm933_vm1, %v1144_v27, 0.0 }
 0x11f   : > { %971 = vadd.xlane.f32.xlu0 %v970_v33  ;;  %v10050_v39 = vpop.f32.mrb[26].mxu0  ;;  %v10127_v33 = vadd.f32 %v10022_v21, %v9926_v13 }
 0x120   : > { %v10058_v43 = vpop.f32.mrb[27].mxu0 }
 0x121   : > { %974 = vadd.xlane.f32.xlu1 %v973_v37  ;;  %15869 = vst [vmem:[#allocation14_spill] sm:$0xff] %v10127_v33  ;;  %v1145_v37 = vmul.f32 %v10110_v19, %v10110_v19  ;;  %v994_v21 = vsel %vm933_vm1, %v10127_v33, 0.0  ;;  %v1146_v49 = vmul.f32 %v10127_v33, %v10127_v33 }
 0x123   : > { %1227 = vadd.xlane.f32.xlu0 %v1226_v41  ;;  %v10063_v45 = vpop.f32.mrb[28].mxu0 }
 0x124   : > { %v10070_v51 = vpop.f32.mrb[29].mxu0 }
 0x125   : > { %1230 = vadd.xlane.f32.xlu1 %v1229_v47 }
 0x127   : > { %977 = vadd.xlane.f32.xlu0 %v976_v48  ;;  %v10074_v53 = vpop.f32.mrb[30].mxu0  ;;  %v1247_v48 = vsel %vm933_vm1, %v1145_v37, 0.0 }
 0x128   : > { %v10082_v57 = vpop.f32.mrb[31].mxu0 }
 0x129   : > { %980 = vadd.xlane.f32.xlu1 %v979_v52 }
 0x12b   : > { %1233 = vadd.xlane.f32.xlu0 %v1232_v55  ;;  %v10087_v60 = vpop.f32.mrb[32].mxu0  ;;  %v997_v55 = vsel %vm933_vm1, %v10136_v42, 0.0 }
 0x12c   : > { %v10094_v2 = vpop.f32.mrb[33].mxu0 }
 0x12d   : > { %1236 = vadd.xlane.f32.xlu1 %v1235_v61  ;;  %v1250_v61 = vsel %vm933_vm1, %v1146_v49, 0.0 }
 0x12f   : > { %983 = vadd.xlane.f32.xlu0 %v982_v0  ;;  %v10098_v63 = vpop.f32.mrb[34].mxu0  ;;  %v1147_v0 = vmul.f32 %v10136_v42, %v10136_v42 }
 0x130   : > { %v10106_v18 = vpop.f32.mrb[35].mxu0 }
 0x131   : > { %986 = vadd.xlane.f32.xlu1 %v985_v3  ;;  %v10162_v3 = vadd.f32 %v10026_v23, %v9926_v13  ;;  %v1253_v8 = vsel %vm933_vm1, %v1147_v0, 0.0 }
 0x133   : > { %1239 = vadd.xlane.f32.xlu0 %v1238_v7  ;;  %v10112_v20 = vpop.f32.mrb[36].mxu0  ;;  %15872 = vst [vmem:[#allocation17_spill] sm:$0xff] %v10162_v3  ;;  %v1003_v27 = vsel %vm933_vm1, %v10162_v3, 0.0  ;;  %v1149_v37 = vmul.f32 %v10162_v3, %v10162_v3 }
 0x134   : > { %v10119_v28 = vpop.f32.mrb[37].mxu0 }
 0x135   : > { %1242 = vadd.xlane.f32.xlu1 %v1241_v22  ;;  %v1148_v22 = vmul.f32 %v10153_v56, %v10153_v56 }
 0x137   : > { %989 = vadd.xlane.f32.xlu0 %v988_v9  ;;  %v10123_v5 = vpop.f32.mrb[38].mxu0 }
 0x138   : > { %v10132_v41 = vpop.f32.mrb[39].mxu0 }
 0x139   : > { %992 = vadd.xlane.f32.xlu1 %v991_v32  ;;  %v10179_v32 = vadd.f32 %v10046_v36, %v9926_v13 }
 0x13b   : > { %1245 = vadd.xlane.f32.xlu0 %v1244_v35  ;;  %v10138_v47 = vpop.f32.mrb[40].mxu0  ;;  %15873 = vst [vmem:[#allocation18_spill] sm:$0xff] %v10179_v32  ;;  %v1256_v35 = vsel %vm933_vm1, %v1148_v22, 0.0  ;;  %v1006_v36 = vsel %vm933_vm1, %v10179_v32, 0.0 }
 0x13c   : > { %v10145_v52 = vpop.f32.mrb[41].mxu0 }
 0x13d   : > { %1248 = vadd.xlane.f32.xlu1 %v1247_v48 }
 0x13f   : > { %995 = vadd.xlane.f32.xlu0 %v994_v21  ;;  %v10149_v16 = vpop.f32.mrb[42].mxu0  ;;  %v10188_v21 = vadd.f32 %v10039_v31, %v9926_v13 }
 0x140   : > { %v10158_v1 = vpop.f32.mrb[43].mxu0 }
 0x141   : > { %998 = vadd.xlane.f32.xlu1 %v997_v55  ;;  %15874 = vst [vmem:[#allocation19_spill] sm:$0xff] %v10188_v21  ;;  %v1259_v55 = vsel %vm933_vm1, %v1149_v37, 0.0  ;;  %v10214_v37 = vadd.f32 %v10050_v39, %v9926_v13 }
 0x143   : > { %1251 = vadd.xlane.f32.xlu0 %v1250_v61  ;;  %v10164_v7 = vpop.f32.mrb[44].mxu0  ;;  %v1150_v61 = vmul.f32 %v10179_v32, %v10179_v32  ;;  %15876 = vst [vmem:[#allocation21_spill] sm:$0xff] %v10214_v37 }
 0x144   : > { %v10171_v9 = vpop.f32.mrb[45].mxu0 }
 0x145   : > { %1254 = vadd.xlane.f32.xlu1 %v1253_v8  ;;  %v1009_v8 = vsel %vm933_vm1, %v10188_v21, 0.0  ;;  %v1262_v22 = vsel %vm933_vm1, %v1150_v61, 0.0 }
 0x147   : > { %1001 = vadd.xlane.f32.xlu0 %v1000_v29  ;;  %v10175_v23 = vpop.f32.mrb[46].mxu0  ;;  %v10205_v29 = vadd.f32 %v10058_v43, %v9926_v13 }
 0x148   : > { %v10184_v48 = vpop.f32.mrb[47].mxu0 }
 0x149   : > { %1004 = vadd.xlane.f32.xlu1 %v1003_v27  ;;  %15875 = vst [vmem:[#allocation20_spill] sm:$0xff] %v10205_v29  ;;  %v1151_v27 = vmul.f32 %v10188_v21, %v10188_v21  ;;  %v1012_v43 = vsel %vm933_vm1, %v10205_v29, 0.0  ;;  %v1152_v61 = vmul.f32 %v10205_v29, %v10205_v29  ;;  %v1153_v21 = vmul.f32 %v10214_v37, %v10214_v37 }
 0x14b   : > { %1257 = vadd.xlane.f32.xlu0 %v1256_v35  ;;  %v10190_v49 = vpop.f32.mrb[48].mxu0  ;;  %v1271_v29 = vsel %vm933_vm1, %v1153_v21, 0.0 }
 0x14c   : > { %v10197_v0 = vpop.f32.mrb[49].mxu0 }
 0x14d   : > { %1260 = vadd.xlane.f32.xlu1 %v1259_v55 }
 0x14f   : > { %1007 = vadd.xlane.f32.xlu0 %v1006_v36  ;;  %v10201_v31 = vpop.f32.mrb[50].mxu0  ;;  %v1265_v36 = vsel %vm933_vm1, %v1151_v27, 0.0  ;;  %v1268_v27 = vsel %vm933_vm1, %v1152_v61, 0.0 }
 0x150   : > { %v10210_v35 = vpop.f32.mrb[51].mxu0 }
 0x151   : > { %1010 = vadd.xlane.f32.xlu1 %v1009_v8  ;;  %v1015_v8 = vsel %vm933_vm1, %v10214_v37, 0.0 }
 0x153   : > { %1263 = vadd.xlane.f32.xlu0 %v1262_v22  ;;  %v10216_v55 = vpop.f32.mrb[52].mxu0  ;;  %v10231_v22 = vadd.f32 %v10070_v51, %v9926_v13 }
 0x154   : > { %v10223_v11 = vpop.f32.mrb[53].mxu0 }
 0x155   : > { %1266 = vadd.xlane.f32.xlu1 %v1265_v36  ;;  %15877 = vst [vmem:[#allocation22_spill] sm:$0xff] %v10231_v22  ;;  %v10240_v36 = vadd.f32 %v10063_v45, %v9926_v13  ;;  %v1018_v51 = vsel %vm933_vm1, %v10231_v22, 0.0  ;;  %v1154_v61 = vmul.f32 %v10231_v22, %v10231_v22 }
 0x157   : > { %1013 = vadd.xlane.f32.xlu0 %v1012_v43  ;;  %v10227_v39 = vpop.f32.mrb[54].mxu0  ;;  %15878 = vst [vmem:[#allocation23_spill] sm:$0xff] %v10240_v36  ;;  %v1274_v21 = vsel %vm933_vm1, %v1154_v61, 0.0  ;;  %v1155_v37 = vmul.f32 %v10240_v36, %v10240_v36 }
 0x158   : > { %v10236_v32 = vpop.f32.mrb[55].mxu0 }
 0x159   : > { %1016 = vadd.xlane.f32.xlu1 %v1015_v8  ;;  %v1021_v8 = vsel %vm933_vm1, %v10240_v36, 0.0 }
 0x15b   : > { %1269 = vadd.xlane.f32.xlu0 %v1268_v27  ;;  %v10242_v43 = vpop.f32.mrb[56].mxu0  ;;  %v10257_v27 = vadd.f32 %v10082_v57, %v9926_v13 }
 0x15c   : > { %v10249_v3 = vpop.f32.mrb[57].mxu0 }
 0x15d   : > { %1272 = vadd.xlane.f32.xlu1 %v1271_v29  ;;  %15879 = vst [vmem:[#allocation24_spill] sm:$0xff] %v10257_v27  ;;  %v10266_v29 = vadd.f32 %v10074_v53, %v9926_v13  ;;  %v1024_v22 = vsel %vm933_vm1, %v10257_v27, 0.0  ;;  %v1156_v57 = vmul.f32 %v10257_v27, %v10257_v27 }
 0x15f   : > { %1019 = vadd.xlane.f32.xlu0 %v1018_v51  ;;  %v10253_v45 = vpop.f32.mrb[58].mxu0  ;;  %15880 = vst [vmem:[#allocation25_spill] sm:$0xff] %v10266_v29  ;;  %v1277_v51 = vsel %vm933_vm1, %v1155_v37, 0.0  ;;  %v1027_v36 = vsel %vm933_vm1, %v10266_v29, 0.0  ;;  %v1157_v53 = vmul.f32 %v10266_v29, %v10266_v29  ;;  %v10283_v37 = vadd.f32 %v10094_v2, %v9926_v13 }
 0x160   : > { %v10262_v56 = vpop.f32.mrb[59].mxu0  ;;  %v10295_v29 = vadd.f32 %v10098_v63, %v9926_v13  ;;  %v10299_v2 = vadd.f32 %v10106_v18, %v9926_v13  ;;  %v10315_v18 = vadd.f32 %v10112_v20, %v9926_v13  ;;  %v10332_v20 = vadd.f32 %v10123_v5, %v9926_v13 }
 0x161   : > { %1022 = vadd.xlane.f32.xlu1 %v1021_v8  ;;  %15881 = vst [vmem:[#allocation26_spill] sm:$0xff] %v10283_v37  ;;  %v1283_v27 = vsel %vm933_vm1, %v1157_v53, 0.0 }
 0x162   : > { %15883 = vst [vmem:[#allocation28_spill] sm:$0xff] %v10295_v29  ;;  %15884 = vst [vmem:[#allocation29_spill] sm:$0xff] %v10299_v2  ;;  %v1036_v5 = vsel %vm933_vm1, %v10299_v2, 0.0 }
 0x163   : > { %1275 = vadd.xlane.f32.xlu0 %v1274_v21  ;;  %v10273_v61 = vpop.f32.mrb[60].mxu0  ;;  %v1280_v21 = vsel %vm933_vm1, %v1156_v57, 0.0  ;;  %v10307_v57 = vsub.s32 2, %v9914_v10  ;;  %15887 = vst [vmem:[#allocation32_spill] sm:$0xff] %v10315_v18  ;;  %15889 = vst [vmem:[#allocation34_spill] sm:$0xff] %v10332_v20 }
 0x164   : > { %v10277_v8 = vpop.f32.mrb[61].mxu0 }
 0x165   : > { %1278 = vadd.xlane.f32.xlu1 %v1277_v51  ;;  %v10288_v51 = vadd.f32 %v10087_v60, %v9926_v13  ;;  %v10304_v60 = vsub.s32 1, %v9914_v10  ;;  %15886 = vst [vmem:[#allocation31_spill] sm:$0xff] %v10307_v57  ;;  %v1160_v10 = vmul.f32 %v10299_v2, %v10299_v2  ;;  %v10365_v2 = vadd.f32 %v10149_v16, %v9926_v13 }
 0x166   : > { %v10381_v16 = vadd.f32 %v10164_v7, %v9926_v13  ;;  %v10401_v7 = vsel %vm933_vm1, %v10332_v20, 0.0 }
 0x167   : > { %1025 = vadd.xlane.f32.xlu0 %v1024_v22  ;;  %15882 = vst [vmem:[#allocation27_spill] sm:$0xff] %v10288_v51  ;;  %v1030_v22 = vsel %vm933_vm1, %v10283_v37, 0.0  ;;  %15885 = vst [vmem:[#allocation30_spill] sm:$0xff] %v10304_v60  ;;  %v1033_v53 = vsel %vm933_vm1, %v10288_v51, 0.0  ;;  %v1159_v63 = vmul.f32 %v10288_v51, %v10288_v51  ;;  %v10328_v51 = vrot.slane %v9922_v12, %v10304_v60 }
 0x168   : > { %v10353_v60 = vadd.f32 %v10138_v47, %v9926_v13  ;;  %15893 = vst [vmem:[#allocation38_spill] sm:$0xff] %v10365_v2  ;;  %15895 = vst [vmem:[#allocation40_spill] sm:$0xff] %v10381_v16  ;;  %v1171_v54 = vmul.f32 %v10381_v16, %v10381_v16  ;;  %v10457_v44 = vsel %vm933_vm1, %v10365_v2, 0.0 }
 0x169   : > { %1028 = vadd.xlane.f32.xlu1 %v1027_v36  ;;  %v1158_v36 = vmul.f32 %v10283_v37, %v10283_v37 }
 0x16a   : > { %15891 = vst [vmem:[#allocation36_spill] sm:$0xff] %v10353_v60  ;;  %v10427_v59 = vsel %vm933_vm1, %v10353_v60, 0.0 }
 0x16b   : > { %1281 = vadd.xlane.f32.xlu0 %v1280_v21  ;;  %v10319_v21 = vadd.f32 %v10119_v28, %v9926_v13  ;;  %v1286_v37 = vsel %vm933_vm1, %v1158_v36, 0.0  ;;  %v10336_v28 = vadd.f32 %v10132_v41, %v9926_v13  ;;  %v1289_v36 = vsel %vm933_vm1, %v1159_v63, 0.0  ;;  %v10359_v63 = vpop.f32.mrb[62].mxu0 }
 0x16c   : > { %v1039_v41 = vsel %vm933_vm1, %v10295_v29, 0.0  ;;  %v10371_v47 = vpop.f32.mrb[63].mxu0 }
 0x16d   : > { %1284 = vadd.xlane.f32.xlu1 %v1283_v27  ;;  %15888 = vst [vmem:[#allocation33_spill] sm:$0xff] %v10319_v21  ;;  %v1161_v27 = vmul.f32 %v10295_v29, %v10295_v29  ;;  %15890 = vst [vmem:[#allocation35_spill] sm:$0xff] %v10336_v28  ;;  %v1162_v42 = vmul.f32 %v10319_v21, %v10319_v21  ;;  %v10369_v29 = vadd.f32 %v10158_v1, %v9926_v13 }
 0x16e   : > { %v1164_v33 = vmul.f32 %v10336_v28, %v10336_v28  ;;  %v1042_v1 = vsel %vm933_vm1, %v10319_v21, 0.0  ;;  %v10397_v19 = vsel %vm933_vm1, %v10336_v28, 0.0 }
 0x16f   : > { %1031 = vadd.xlane.f32.xlu0 %v1030_v22  ;;  %v10340_v22 = vrot.slane %v9922_v12, %v10307_v57  ;;  %v10357_v12 = vadd.f32 %v10145_v52, %v9926_v13  ;;  %v1292_v57 = vsel %vm933_vm1, %v1160_v10, 0.0  ;;  %15894 = vst [vmem:[#allocation39_spill] sm:$0xff] %v10369_v29  ;;  %v1045_v52 = vsel %vm933_vm1, %v10315_v18, 0.0 }
 0x170   : > { %v1165_v10 = vmul.f32 %v10332_v20, %v10332_v20  ;;  %v1168_v21 = vmul.f32 %v10369_v29, %v10369_v29  ;;  %v10417_v20 = vadd.f32 %v10184_v48, %v9926_v13  ;;  %v10420_v28 = vsel %vm933_vm1, %v1164_v33, 0.0 }
 0x171   : > { %1034 = vadd.xlane.f32.xlu1 %v1033_v53  ;;  %v1163_v53 = vmul.f32 %v10315_v18, %v10315_v18  ;;  %15892 = vst [vmem:[#allocation37_spill] sm:$0xff] %v10357_v12  ;;  %v10393_v18 = vadd.f32 %v10171_v9, %v9926_v13  ;;  %v1169_v9 = vmul.f32 %v10365_v2, %v10365_v2 }
 0x172   : > { %15898 = vst [vmem:[#allocation43_spill] sm:$0xff] %v10417_v20  ;;  %v10423_v4 = vsel %vm933_vm1, %v1165_v10, 0.0  ;;  %v10439_v33 = vadd.f32 %v10190_v49, %v9926_v13  ;;  %v10460_v40 = vsel %vm933_vm1, %v1168_v21, 0.0  ;;  %v10477_v21 = vsel %vm933_vm1, %v10381_v16, 0.0 }
 0x173   : > { %1287 = vadd.xlane.f32.xlu0 %v1286_v37  ;;  %v1295_v37 = vsel %vm933_vm1, %v1161_v27, 0.0  ;;  %v10386_v27 = vsel %vm933_vm1, %v1162_v42, 0.0  ;;  %15896 = vst [vmem:[#allocation41_spill] sm:$0xff] %v10393_v18  ;;  %v1166_v42 = vmul.f32 %v10357_v12, %v10357_v12  ;;  %v1170_v48 = vmul.f32 %v10393_v18, %v10393_v18 }
 0x174   : > { %15899 = vst [vmem:[#allocation44_spill] sm:$0xff] %v10439_v33  ;;  %v10473_v2 = vsel %vm933_vm1, %v10393_v18, 0.0  ;;  %v1175_v18 = vmul.f32 %v10439_v33, %v10439_v33  ;;  %v10505_v14 = vsel %vm933_vm1, %v10417_v20, 0.0 }
 0x175   : > { %1290 = vadd.xlane.f32.xlu1 %v1289_v36  ;;  %v10389_v36 = vsel %vm933_vm1, %v1163_v53, 0.0  ;;  %v1167_v53 = vmul.f32 %v10353_v60, %v10353_v60  ;;  %v10446_v10 = vsel %vm933_vm1, %v1166_v42, 0.0  ;;  %v10483_v30 = vsel %vm933_vm1, %v1170_v48, 0.0 }
 0x176   : > { %v10501_v48 = vadd.f32 %v10210_v35, %v9926_v13 }
 0x177   : > { %1037 = vadd.xlane.f32.xlu0 %v1036_v5  ;;  %v10413_v5 = vadd.f32 %v10175_v23, %v9926_v13  ;;  %v10433_v23 = vsel %vm933_vm1, %v10357_v12, 0.0  ;;  %v10449_v60 = vsel %vm933_vm1, %v1167_v53, 0.0  ;;  %v10453_v12 = vsel %vm933_vm1, %v10369_v29, 0.0 }
 0x178   : > { %15902 = vst [vmem:[#allocation47_spill] sm:$0xff] %v10501_v48 }
 0x179   : > { %15897 = vst [vmem:[#allocation42_spill] sm:$0xff] %v10413_v5  ;;  %1040 = vadd.xlane.f32.xlu1 %v1039_v41  ;;  %v10443_v41 = vadd.f32 %v10197_v0, %v9926_v13  ;;  %v10463_v0 = vsel %vm933_vm1, %v1169_v9, 0.0  ;;  %v1173_v42 = vmul.f32 %v10413_v5, %v10413_v5  ;;  %v10480_v9 = vsel %vm933_vm1, %v1171_v54, 0.0 }
 0x17a   : > { %v10497_v54 = vsel %vm933_vm1, %v10413_v5, 0.0 }
 0x17b   : > { %15900 = vst [vmem:[#allocation45_spill] sm:$0xff] %v10443_v41  ;;  %1293 = vadd.xlane.f32.xlu0 %v1292_v57  ;;  %v1172_v57 = vmul.f32 %v10417_v20, %v10417_v20  ;;  %v10511_v62 = vsel %vm933_vm1, %v1173_v42, 0.0  ;;  %v10521_v35 = vsel %vm933_vm1, %v10443_v41, 0.0  ;;  %v10525_v20 = vsel %vm933_vm1, %v10439_v33, 0.0 }
 0x17c   : > { %v939_v49 = vpop.xlane.xlu0 %938  ;;  %15903 = vst [vmem:[#allocation48_spill] sm:$0xff] %v10511_v62  ;;  %v10531_v62 = vsel %vm933_vm1, %v1175_v18, 0.0  ;;  %v10546_v18 = vsel %vm933_vm1, %v10501_v48, 0.0 }
 0x17d   : > { %v10469_v53 = vmul.f32 0.0625, %v939_v49  ;;  %1296 = vadd.xlane.f32.xlu1 %v1295_v37  ;;  %v10487_v49 = vadd.f32 %v10201_v31, %v9926_v13  ;;  %v1174_v37 = vmul.f32 %v10443_v41, %v10443_v41  ;;  %v10508_v6 = vsel %vm933_vm1, %v1172_v57, 0.0  ;;  %15905 = vst [vmem:[#allocation50_spill] sm:$0xff] %v10531_v62  ;;  %15907 = vst [vmem:[#allocation52_spill] sm:$0xff] %v10546_v18 }
 0x17e   : > { %v1195_v29 = vpop.xlane.xlu1 %1194 }
 0x17f   : > { %15901 = vst [vmem:[#allocation46_spill] sm:$0xff] %v10487_v49  ;;  %v1511_v16 = vmul.f32 %v10469_v53, %v10469_v53  ;;  %v1447_v26 = vmul.f32 0.0625, %v1195_v29  ;;  %1043 = vadd.xlane.f32.xlu0 %v1042_v1  ;;  %v10515_v29 = vadd.f32 %v10216_v55, %v9926_v13  ;;  %v10528_v42 = vsel %vm933_vm1, %v1174_v37, 0.0 }
 0x180   : > { %v936_v31 = vpop.xlane.xlu0 %935  ;;  %v1177_v55 = vmul.f32 %v10487_v49, %v10487_v49  ;;  %v1176_v37 = vmul.f32 %v10501_v48, %v10501_v48  ;;  %v10563_v48 = vadd.f32 %v10236_v32, %v9926_v13 }
 0x181   : > { %15904 = vst [vmem:[#allocation49_spill] sm:$0xff] %v10515_v29  ;;  %v1575_v1 = vsub.f32 %v1447_v26, %v1511_v16  ;;  %v10517_v5 = vmul.f32 0.0625, %v936_v31  ;;  %1046 = vadd.xlane.f32.xlu1 %v1045_v52  ;;  %v10535_v26 = vadd.f32 %v10223_v11, %v9926_v13  ;;  %v10550_v11 = vsel %vm933_vm1, %v10487_v49, 0.0 }
 0x182   : > { %v1192_v57 = vpop.xlane.xlu1 %1191  ;;  %15908 = vst [vmem:[#allocation53_spill] sm:$0xff] %v10550_v11  ;;  %15910 = vst [vmem:[#allocation55_spill] sm:$0xff] %v10563_v48  ;;  %v10566_v49 = vsel %vm933_vm1, %v1177_v55, 0.0  ;;  %v10572_v11 = vadd.f32 %v10242_v43, %v9926_v13  ;;  %v10582_v55 = vsel %vm933_vm1, %v1176_v37, 0.0  ;;  %v1180_v37 = vmul.f32 %v10563_v48, %v10563_v48 }
 0x183   : > { %15906 = vst [vmem:[#allocation51_spill] sm:$0xff] %v10535_v26  ;;  %v1639_v52 = vmax.f32 %v1575_v1, 0.0  ;;  %v1510_v16 = vmul.f32 %v10517_v5, %v10517_v5  ;;  %v1446_v31 = vmul.f32 0.0625, %v1192_v57  ;;  %1299 = vadd.xlane.f32.xlu0 %v10386_v27  ;;  %v10554_v1 = vadd.f32 %v10227_v39, %v9926_v13 }
 0x184   : > { %v942_v33 = vpop.xlane.xlu0 %941  ;;  %v1179_v57 = vmul.f32 %v10515_v29, %v10515_v29  ;;  %v1178_v39 = vmul.f32 %v10535_v26, %v10535_v26  ;;  %15911 = vst [vmem:[#allocation56_spill] sm:$0xff] %v10572_v11  ;;  %v10588_v43 = vsel %vm933_vm1, %v10535_v26, 0.0 }
 0x185   : > { %15909 = vst [vmem:[#allocation54_spill] sm:$0xff] %v10554_v1  ;;  %v1767_v27 = vadd.f32 1e-05, %v1639_v52  ;;  %v1574_v41 = vsub.f32 %v1446_v31, %v1510_v16  ;;  %v10558_v62 = vmul.f32 0.0625, %v942_v33  ;;  %1302 = vadd.xlane.f32.xlu1 %v10389_v36  ;;  %v10576_v33 = vadd.f32 %v10249_v3, %v9926_v13 }
 0x186   : > { %v945_v18 = vpop.xlane.xlu1 %944  ;;  %v10592_v3 = vsel %vm933_vm1, %v10515_v29, 0.0  ;;  %v10603_v26 = vsel %vm933_vm1, %v1178_v39, 0.0  ;;  %v10607_v29 = vadd.f32 %v10262_v56, %v9926_v13  ;;  %v10622_v56 = vsel %vm933_vm1, %v10554_v1, 0.0 }
 0x187   : > { %15912 = vst [vmem:[#allocation57_spill] sm:$0xff] %v10576_v33  ;;  %8548 = vrsqrt.f32 %v1767_v27  ;;  %v1638_v36 = vmax.f32 %v1574_v41, 0.0  ;;  %v1512_v32 = vmul.f32 %v10558_v62, %v10558_v62  ;;  %1049 = vadd.xlane.f32.xlu0 %v10397_v19  ;;  %v10584_v52 = vmul.f32 0.0625, %v945_v18  ;;  %15913 = vst [vmem:[#allocation58_spill] sm:$0xff] %v10592_v3 }
 0x188   : > { %v1198_v16 = vpop.xlane.xlu0 %1197  ;;  %v1181_v41 = vmul.f32 %v10554_v1, %v10554_v1  ;;  %v10598_v19 = vsel %vm933_vm1, %v1179_v57, 0.0  ;;  %15915 = vst [vmem:[#allocation60_spill] sm:$0xff] %v10603_v26  ;;  %15916 = vst [vmem:[#allocation61_spill] sm:$0xff] %v10607_v29  ;;  %v10618_v26 = vsel %vm933_vm1, %v10563_v48, 0.0  ;;  %v10639_v1 = vsel %vm933_vm1, %v10576_v33, 0.0 }
 0x189   : > { %v1766_v31 = vadd.f32 1e-05, %v1638_v36  ;;  %v1448_v27 = vmul.f32 0.0625, %v1198_v16  ;;  %1052 = vadd.xlane.f32.xlu1 %v10401_v7  ;;  %15914 = vst [vmem:[#allocation59_spill] sm:$0xff] %v10598_v19  ;;  %v1182_v36 = vmul.f32 %v10576_v33, %v10576_v33  ;;  %v1183_v7 = vmul.f32 %v10572_v11, %v10572_v11 }
 0x18a   : > { %v1201_v18 = vpop.xlane.xlu1 %1200  ;;  %v1513_v57 = vmul.f32 %v10584_v52, %v10584_v52  ;;  %v10625_v3 = vsel %vm933_vm1, %v1181_v41, 0.0  ;;  %v10643_v41 = vsel %vm933_vm1, %v10572_v11, 0.0  ;;  %v10662_v33 = vadd.f32 %v10277_v8, %v9926_v13 }
 0x18b   : > { %8550 = vrsqrt.f32 %v1766_v31  ;;  %v1576_v16 = vsub.f32 %v1448_v27, %v1512_v32  ;;  %v1449_v19 = vmul.f32 0.0625, %v1201_v18  ;;  %1305 = vadd.xlane.f32.xlu0 %v10420_v28  ;;  %v10629_v31 = vadd.f32 %v10253_v45, %v9926_v13 }
 0x18c   : > { %v948_v39 = vpop.xlane.xlu0 %947  ;;  %v10635_v28 = vsel %vm933_vm1, %v1180_v37, 0.0  ;;  %v10646_v45 = vsel %vm933_vm1, %v1183_v7, 0.0  ;;  %15919 = vst [vmem:[#allocation64_spill] sm:$0xff] %v10662_v33  ;;  %v10677_v8 = vadd.f32 %v10273_v61, %v9926_v13 }
 0x18d   : > { %15917 = vst [vmem:[#allocation62_spill] sm:$0xff] %v10629_v31  ;;  %v1640_v32 = vmax.f32 %v1576_v16, 0.0  ;;  %v1577_v27 = vsub.f32 %v1449_v19, %v1513_v57  ;;  %v10631_v18 = vmul.f32 0.0625, %v948_v39  ;;  %1308 = vadd.xlane.f32.xlu1 %v10423_v4  ;;  %15918 = vst [vmem:[#allocation63_spill] sm:$0xff] %v10646_v45  ;;  %v1184_v19 = vmul.f32 %v10607_v29, %v10607_v29 }
 0x18e   : > { %v951_v48 = vpop.xlane.xlu1 %950  ;;  %v10654_v16 = vsel %vm933_vm1, %v1182_v36, 0.0  ;;  %v1703_v39 = vsub.f32 %v9929_v15, %v10469_v53  ;;  %v10669_v36 = vsel %vm933_vm1, %v10607_v29, 0.0  ;;  %15921 = vst [vmem:[#allocation66_spill] sm:$0xff] %v10677_v8 }
 0x18f   : > { %v1768_v57 = vadd.f32 1e-05, %v1640_v32  ;;  %v1641_v4 = vmax.f32 %v1577_v27, 0.0  ;;  %v1514_v37 = vmul.f32 %v10631_v18, %v10631_v18  ;;  %1055 = vadd.xlane.f32.xlu0 %v10433_v23  ;;  %v10658_v11 = vmul.f32 0.0625, %v951_v48 }
 0x190   : > { %v1204_v7 = vpop.xlane.xlu0 %1203  ;;  %v1185_v32 = vmul.f32 %v10629_v31, %v10629_v31  ;;  %v10673_v48 = vsel %vm933_vm1, %v10629_v31, 0.0 }
 0x191   : > { %v8549_v27 = vpop.eup %8548  ;;  %8552 = vrsqrt.f32 %v1768_v57  ;;  %v1769_v45 = vadd.f32 1e-05, %v1641_v4  ;;  %v1450_v23 = vmul.f32 0.0625, %v1204_v7  ;;  %1058 = vadd.xlane.f32.xlu1 %v10427_v59  ;;  %15920 = vst [vmem:[#allocation65_spill] sm:$0xff] %v10673_v48  ;;  %v10680_v57 = vsel %vm933_vm1, %v1184_v19, 0.0 }
 0x192   : > { %v1895_v15 = vmul.f32 %v8549_v27, %v1703_v39  ;;  %v1207_v53 = vpop.xlane.xlu1 %1206  ;;  %15922 = vst [vmem:[#allocation67_spill] sm:$0xff] %v10680_v57  ;;  %v1515_v59 = vmul.f32 %v10658_v11, %v10658_v11  ;;  %v1702_v27 = vsub.f32 %v9932_v17, %v10517_v5  ;;  %v10689_v61 = vsel %vm933_vm1, %v1185_v32, 0.0 }
 0x193   : > { %8554 = vrsqrt.f32 %v1769_v45  ;;  %v1578_v4 = vsub.f32 %v1450_v23, %v1514_v37  ;;  %v1451_v7 = vmul.f32 0.0625, %v1207_v53  ;;  %1311 = vadd.xlane.f32.xlu0 %v10446_v10  ;;  %v1186_v19 = vmul.f32 %v10662_v33, %v10662_v33 }
 0x194   : > { %v1963_v39 = vmul.f32 %v10328_v51, %v1895_v15  ;;  %v954_v31 = vpop.xlane.xlu0 %953  ;;  %v10698_v10 = vsel %vm933_vm1, %v10662_v33, 0.0  ;;  %v10705_v32 = vsel %vm933_vm1, %v10677_v8, 0.0  ;;  %v1187_v23 = vmul.f32 %v10677_v8, %v10677_v8 }
 0x195   : > { %v8551_v45 = vpop.eup %8550  ;;  %v1642_v29 = vmax.f32 %v1578_v4, 0.0  ;;  %v1579_v57 = vsub.f32 %v1451_v7, %v1515_v59  ;;  %v10693_v48 = vmul.f32 0.0625, %v954_v31  ;;  %1314 = vadd.xlane.f32.xlu1 %v10449_v60  ;;  %v10714_v53 = vadd.f32 %v10359_v63, %v9926_v13 }
 0x196   : > { %v957_v37 = vpop.xlane.xlu1 %956  ;;  %v1894_v17 = vmul.f32 %v8551_v45, %v1702_v27  ;;  %v10701_v5 = vadd.f32 %v10340_v22, %v1963_v39  ;;  %v10721_v27 = vsel %vm933_vm1, %v1186_v19, 0.0  ;;  %v1704_v63 = vsub.f32 %v9942_v24, %v10558_v62 }
 0x197   : > { %v1770_v31 = vadd.f32 1e-05, %v1642_v29  ;;  %v1643_v15 = vmax.f32 %v1579_v57, 0.0  ;;  %v1516_v60 = vmul.f32 %v10693_v48, %v10693_v48  ;;  %1061 = vadd.xlane.f32.xlu0 %v10453_v12  ;;  %15923 = vst [vmem:[#allocation68_spill] sm:$0xff] %v10714_v53  ;;  %v10716_v59 = vmul.f32 0.0625, %v957_v37  ;;  %15924 = vst [vmem:[#allocation69_spill] sm:$0xff] %v10721_v27 }
 0x198   : > { %v1210_v4 = vpop.xlane.xlu0 %1209  ;;  %v1962_v7 = vmul.f32 %v10328_v51, %v1894_v17  ;;  %v2095_v39 = vmin.f32 %v10701_v5, 20.0  ;;  %v10726_v12 = vadd.f32 %v10371_v47, %v9926_v13  ;;  %v10734_v19 = vsel %vm933_vm1, %v1187_v23, 0.0 }
 0x199   : > { %8556 = vrsqrt.f32 %v1770_v31  ;;  %v1771_v29 = vadd.f32 1e-05, %v1643_v15  ;;  %v1452_v57 = vmul.f32 0.0625, %v1210_v4  ;;  %1064 = vadd.xlane.f32.xlu1 %v10457_v44  ;;  %15926 = vst [vmem:[#allocation71_spill] sm:$0xff] %v10734_v19  ;;  %v1517_v44 = vmul.f32 %v10716_v59, %v10716_v59 }
 0x19a   : > { %15925 = vst [vmem:[#allocation70_spill] sm:$0xff] %v10726_v12  ;;  %v1213_v45 = vpop.xlane.xlu1 %1212  ;;  %v10731_v37 = vadd.f32 %v10340_v22, %v1962_v7  ;;  %v2160_v17 = vmul.f32 1.442695, %v2095_v39  ;;  %v1705_v13 = vsub.f32 %v9945_v25, %v10584_v52  ;;  %v10750_v52 = vsel %vm933_vm1, %v10726_v12, 0.0 }
 0x19b   : > { %v8553_v31 = vpop.eup %8552  ;;  %8558 = vrsqrt.f32 %v1771_v29  ;;  %v1580_v15 = vsub.f32 %v1452_v57, %v1516_v60  ;;  %v1453_v4 = vmul.f32 0.0625, %v1213_v45  ;;  %1317 = vadd.xlane.f32.xlu0 %v10460_v40  ;;  %v1188_v60 = vmul.f32 %v10726_v12, %v10726_v12  ;;  %15927 = vst [vmem:[#allocation72_spill] sm:$0xff] %v10750_v52 }
 0x19c   : > { %v960_v24 = vpop.xlane.xlu0 %959  ;;  %v2094_v62 = vmin.f32 %v10731_v37, 20.0  ;;  %8560 = vpow2.f32 %v2160_v17  ;;  %v1896_v47 = vmul.f32 %v8553_v31, %v1704_v63 }
 0x19d   : > { %v8555_v7 = vpop.eup %8554  ;;  %v1644_v23 = vmax.f32 %v1580_v15, 0.0  ;;  %v1581_v39 = vsub.f32 %v1453_v4, %v1517_v44  ;;  %v10742_v8 = vmul.f32 0.0625, %v960_v24  ;;  %1320 = vadd.xlane.f32.xlu1 %v10463_v0  ;;  %v10757_v0 = vsel %vm933_vm1, %v10714_v53, 0.0 }
 0x19e   : > { %v963_v29 = vpop.xlane.xlu1 %962  ;;  %v2158_v40 = vmul.f32 1.442695, %v2094_v62  ;;  %v1964_v57 = vmul.f32 %v10328_v51, %v1896_v47  ;;  %v1897_v25 = vmul.f32 %v8555_v7, %v1705_v13  ;;  %15928 = vst [vmem:[#allocation73_spill] sm:$0xff] %v10757_v0  ;;  %v10767_v62 = vsel %vm933_vm1, %v1188_v60, 0.0 }
 0x19f   : > { %v1772_v63 = vadd.f32 1e-05, %v1644_v23  ;;  %v1645_v45 = vmax.f32 %v1581_v39, 0.0  ;;  %v1518_v17 = vmul.f32 %v10742_v8, %v10742_v8  ;;  %1067 = vadd.xlane.f32.xlu0 %v10473_v2  ;;  %v10759_v31 = vmul.f32 0.0625, %v963_v29  ;;  %15929 = vst [vmem:[#allocation74_spill] sm:$0xff] %v10767_v62 }
 0x1a0   : > { %v1216_v44 = vpop.xlane.xlu0 %1215  ;;  %8562 = vpow2.f32 %v2158_v40  ;;  %v10762_v15 = vadd.f32 %v10340_v22, %v1964_v57  ;;  %v1965_v4 = vmul.f32 %v10328_v51, %v1897_v25  ;;  %v1189_v2 = vmul.f32 %v10714_v53, %v10714_v53 }
 0x1a1   : > { %v1773_v13 = vadd.f32 1e-05, %v1645_v45  ;;  %v1454_v24 = vmul.f32 0.0625, %v1216_v44  ;;  %1070 = vadd.xlane.f32.xlu1 %v10477_v21  ;;  %v1706_v47 = vsub.f32 %v9957_v34, %v10631_v18  ;;  %8564 = vrsqrt.f32 %v1772_v63 }
 0x1a2   : > { %v1219_v7 = vpop.xlane.xlu1 %1218  ;;  %v2096_v23 = vmin.f32 %v10762_v15, 20.0  ;;  %v10775_v39 = vadd.f32 %v10340_v22, %v1965_v4  ;;  %v1519_v21 = vmul.f32 %v10759_v31, %v10759_v31  ;;  %v1707_v57 = vsub.f32 %v9963_v38, %v10658_v11 }
 0x1a3   : > { %v8557_v29 = vpop.eup %8556  ;;  %8566 = vrsqrt.f32 %v1773_v13  ;;  %v1582_v60 = vsub.f32 %v1454_v24, %v1518_v17  ;;  %v1455_v40 = vmul.f32 0.0625, %v1219_v7  ;;  %1323 = vadd.xlane.f32.xlu0 %v10483_v30  ;;  %v10787_v17 = vsel %vm933_vm1, %v1189_v2, 0.0 }
 0x1a4   : > { %v966_v34 = vpop.xlane.xlu0 %965  ;;  %v2162_v18 = vmul.f32 1.442695, %v2096_v23  ;;  %v2097_v25 = vmin.f32 %v10775_v39, 20.0  ;;  %v1898_v63 = vmul.f32 %v8557_v29, %v1706_v47  ;;  %15930 = vst [vmem:[#allocation75_spill] sm:$0xff] %v10787_v17  ;;  %v1708_v47 = vsub.f32 %v9973_v46, %v10693_v48  ;;  %v15932_v46 = vld [vmem:[#allocation48_spill] sm:$0xff]  ;;  %v15935_v17 = vld [vmem:[#allocation6_spill] sm:$0xff] }
 0x1a5   : > { %v8559_v45 = vpop.eup %8558  ;;  %v1646_v44 = vmax.f32 %v1582_v60, 0.0  ;;  %v1583_v4 = vsub.f32 %v1455_v40, %v1519_v21  ;;  %v10783_v53 = vmul.f32 0.0625, %v966_v34  ;;  %1326 = vadd.xlane.f32.xlu1 %v10480_v9  ;;  %v1709_v40 = vsub.f32 %v9979_v50, %v10716_v59  ;;  %v15931_v34 = vld [vmem:[#allocation3_spill] sm:$0xff] }
 0x1a6   : > { %v8561_v13 = vpop.eup %8560  ;;  %v969_v30 = vpop.xlane.xlu1 %968  ;;  %8568 = vpow2.f32 %v2162_v18  ;;  %v2164_v24 = vmul.f32 1.442695, %v2097_v25  ;;  %v1966_v38 = vmul.f32 %v10328_v51, %v1898_v63  ;;  %v1899_v11 = vmul.f32 %v8559_v45, %v1707_v57 }
 0x1a7   : > { %v1774_v7 = vadd.f32 1e-05, %v1646_v44  ;;  %v1647_v23 = vmax.f32 %v1583_v4, 0.0  ;;  %v1520_v29 = vmul.f32 %v10783_v53, %v10783_v53  ;;  %1073 = vadd.xlane.f32.xlu0 %v10505_v14  ;;  %v10795_v9 = vmul.f32 0.0625, %v969_v30 }
 0x1a8   : > { %v1222_v2 = vpop.xlane.xlu0 %1221  ;;  %v2287_v21 = vadd.f32 1.0, %v8561_v13  ;;  %8570 = vpow2.f32 %v2164_v24  ;;  %v10798_v60 = vadd.f32 %v10340_v22, %v1966_v38  ;;  %v1967_v57 = vmul.f32 %v10328_v51, %v1899_v11 }
 0x1a9   : > { %v1456_v48 = vmul.f32 0.0625, %v1222_v2  ;;  %1076 = vadd.xlane.f32.xlu1 %v10497_v54  ;;  %v1775_v25 = vadd.f32 1e-05, %v1647_v23  ;;  %v1521_v50 = vmul.f32 %v10795_v9, %v10795_v9  ;;  %8572 = vrsqrt.f32 %v1774_v7 }
 0x1aa   : > { %v8563_v14 = vpop.eup %8562  ;;  %v1225_v63 = vpop.xlane.xlu1 %1224  ;;  %v2351_v45 = vmul.f32 %v2287_v21, %v2287_v21  ;;  %v2098_v44 = vmin.f32 %v10798_v60, 20.0  ;;  %v10813_v11 = vadd.f32 %v10340_v22, %v1967_v57 }
 0x1ab   : > { %v1584_v59 = vsub.f32 %v1456_v48, %v1520_v29  ;;  %v1457_v4 = vmul.f32 0.0625, %v1225_v63  ;;  %1329 = vadd.xlane.f32.xlu0 %v10508_v6  ;;  %v2286_v13 = vadd.f32 1.0, %v8563_v14  ;;  %v8565_v54 = vpop.eup %8564  ;;  %v15933_v48 = vld [vmem:[#allocation4_spill] sm:$0xff]  ;;  %v15934_v14 = vld [vmem:[#allocation5_spill] sm:$0xff] }
 0x1ac   : > { %v972_v30 = vpop.xlane.xlu0 %971  ;;  %v2479_v24 = vadd.f32 1.0, %v2351_v45  ;;  %v2166_v38 = vmul.f32 1.442695, %v2098_v44  ;;  %v2099_v44 = vmin.f32 %v10813_v11, 20.0 }
 0x1ad   : > { %v8567_v23 = vpop.eup %8566  ;;  %v1648_v2 = vmax.f32 %v1584_v59, 0.0  ;;  %v1585_v21 = vsub.f32 %v1457_v4, %v1521_v50  ;;  %v10815_v18 = vmul.f32 0.0625, %v972_v30  ;;  %1332 = vadd.xlane.f32.xlu1 %v15932_v46  ;;  %v2350_v29 = vmul.f32 %v2286_v13, %v2286_v13 }
 0x1ae   : > { %v975_v63 = vpop.xlane.xlu1 %974  ;;  %8574 = vrcp.f32 %v2479_v24  ;;  %v1900_v59 = vmul.f32 %v8565_v54, %v1708_v47  ;;  %v1901_v6 = vmul.f32 %v8567_v23, %v1709_v40  ;;  %v7697_v24 = vadd.f32 -1.0, %v2351_v45 }
 0x1af   : > { %8576 = vrsqrt.f32 %v1775_v25  ;;  %v1649_v57 = vmax.f32 %v1585_v21, 0.0  ;;  %v1522_v50 = vmul.f32 %v10815_v18, %v10815_v18  ;;  %1079 = vadd.xlane.f32.xlu0 %v10521_v35  ;;  %v10826_v4 = vmul.f32 0.0625, %v975_v63 }
 0x1b0   : > { %v8569_v46 = vpop.eup %8568  ;;  %v1228_v13 = vpop.xlane.xlu0 %1227  ;;  %v2478_v30 = vadd.f32 1.0, %v2350_v29  ;;  %8578 = vpow2.f32 %v2166_v38  ;;  %v1776_v7 = vadd.f32 1e-05, %v1648_v2  ;;  %v2168_v47 = vmul.f32 1.442695, %v2099_v44  ;;  %v15937_v44 = vld [vmem:[#allocation50_spill] sm:$0xff] }
 0x1b1   : > { %v1458_v12 = vmul.f32 0.0625, %v1228_v13  ;;  %1082 = vadd.xlane.f32.xlu1 %v10525_v20  ;;  %v2288_v25 = vadd.f32 1.0, %v8569_v46  ;;  %v1777_v33 = vadd.f32 1e-05, %v1649_v57  ;;  %v1523_v54 = vmul.f32 %v10826_v4, %v10826_v4 }
 0x1b2   : > { %v8571_v21 = vpop.eup %8570  ;;  %v1231_v35 = vpop.xlane.xlu1 %1230  ;;  %8580 = vrcp.f32 %v2478_v30  ;;  %v1968_v45 = vmul.f32 %v10328_v51, %v1900_v59  ;;  %v1969_v2 = vmul.f32 %v10328_v51, %v1901_v6  ;;  %v7696_v30 = vadd.f32 -1.0, %v2350_v29 }
 0x1b3   : > { %v1586_v63 = vsub.f32 %v1458_v12, %v1522_v50  ;;  %v1459_v38 = vmul.f32 0.0625, %v1231_v35  ;;  %1335 = vadd.xlane.f32.xlu0 %v10528_v42  ;;  %v2352_v40 = vmul.f32 %v2288_v25, %v2288_v25  ;;  %v2289_v20 = vadd.f32 1.0, %v8571_v21  ;;  %v8573_v62 = vpop.eup %8572  ;;  %v15938_v35 = vld [vmem:[#allocation52_spill] sm:$0xff] }
 0x1b4   : > { %v978_v23 = vpop.xlane.xlu0 %977  ;;  %8582 = vpow2.f32 %v2168_v47  ;;  %v10840_v25 = vadd.f32 %v10340_v22, %v1968_v45  ;;  %v15940_v45 = vld [vmem:[#allocation53_spill] sm:$0xff] }
 0x1b5   : > { %v1650_v57 = vmax.f32 %v1586_v63, 0.0  ;;  %v1587_v46 = vsub.f32 %v1459_v38, %v1523_v54  ;;  %v10836_v13 = vmul.f32 0.0625, %v978_v23  ;;  %1338 = vadd.xlane.f32.xlu1 %v15937_v44  ;;  %8584 = vrsqrt.f32 %v1776_v7 }
 0x1b6   : > { %v981_v12 = vpop.xlane.xlu1 %980  ;;  %v2480_v50 = vadd.f32 1.0, %v2352_v40  ;;  %v2353_v42 = vmul.f32 %v2289_v20, %v2289_v20  ;;  %8586 = vrsqrt.f32 %v1777_v33  ;;  %v10848_v63 = vadd.f32 %v10340_v22, %v1969_v2  ;;  %v15939_v33 = vld [vmem:[#allocation7_spill] sm:$0xff] }
 0x1b7   : > { %15936 = vst [vmem:[#allocation3_spill] sm:$0xff] %v10836_v13  ;;  %v1778_v21 = vadd.f32 1e-05, %v1650_v57  ;;  %v1651_v59 = vmax.f32 %v1587_v46, 0.0  ;;  %v1524_v6 = vmul.f32 %v10836_v13, %v10836_v13  ;;  %1085 = vadd.xlane.f32.xlu0 %v15938_v35  ;;  %v10845_v54 = vmul.f32 0.0625, %v981_v12 }
 0x1b8   : > { %v8575_v47 = vpop.eup %8574  ;;  %v1234_v29 = vpop.xlane.xlu0 %1233  ;;  %8588 = vrcp.f32 %v2480_v50  ;;  %v2481_v7 = vadd.f32 1.0, %v2353_v42  ;;  %v7698_v57 = vadd.f32 -1.0, %v2352_v40  ;;  %v2100_v2 = vmin.f32 %v10840_v25, 20.0 }
 0x1b9   : > { %v10850_v38 = vpop.eup %8576  ;;  %8590 = vrsqrt.f32 %v1778_v21  ;;  %v1460_v20 = vmul.f32 0.0625, %v1234_v29  ;;  %1088 = vadd.xlane.f32.xlu1 %v15940_v45  ;;  %v1779_v44 = vadd.f32 1e-05, %v1651_v59  ;;  %v1525_v0 = vmul.f32 %v10845_v54, %v10845_v54 }
 0x1ba   : > { %v8579_v46 = vpop.eup %8578  ;;  %v1237_v50 = vpop.xlane.xlu1 %1236  ;;  %8592 = vrcp.f32 %v2481_v7  ;;  %v2545_v21 = vmul.f32 %v8575_v47, %v7697_v24  ;;  %v2170_v23 = vmul.f32 1.442695, %v2100_v2  ;;  %v2101_v59 = vmin.f32 %v10848_v63, 20.0 }
 0x1bb   : > { %v1588_v52 = vsub.f32 %v1460_v20, %v1524_v6  ;;  %v1461_v19 = vmul.f32 0.0625, %v1237_v50  ;;  %1341 = vadd.xlane.f32.xlu0 %v10582_v55  ;;  %v2290_v40 = vadd.f32 1.0, %v8579_v46  ;;  %v15942_v35 = vsub.f32 %v9989_v58, %v10742_v8  ;;  %v15944_v50 = vld [vmem:[#allocation9_spill] sm:$0xff] }
 0x1bc   : > { %v8581_v29 = vpop.eup %8580  ;;  %v984_v45 = vpop.xlane.xlu0 %983  ;;  %v7699_v24 = vadd.f32 -1.0, %v2353_v42  ;;  %8594 = vpow2.f32 %v2170_v23 }
 0x1bd   : > { %v1902_v7 = vmul.f32 %v8573_v62, %v15942_v35  ;;  %v1652_v13 = vmax.f32 %v1588_v52, 0.0  ;;  %v1589_v12 = vsub.f32 %v1461_v19, %v1525_v0  ;;  %v10865_v27 = vmul.f32 0.0625, %v984_v45  ;;  %1344 = vadd.xlane.f32.xlu1 %v10566_v49  ;;  %v15945_v35 = vld [vmem:[#allocation58_spill] sm:$0xff] }
 0x1be   : > { %v2543_v6 = vmul.f32 %v8581_v29, %v7696_v30  ;;  %v8583_v20 = vpop.eup %8582  ;;  %v987_v55 = vpop.xlane.xlu1 %986  ;;  %v2354_v47 = vmul.f32 %v2290_v40, %v2290_v40  ;;  %8596 = vrsqrt.f32 %v1779_v44  ;;  %v2172_v30 = vmul.f32 1.442695, %v2101_v59  ;;  %v15946_v40 = vld [vmem:[#allocation10_spill] sm:$0xff] }
 0x1bf   : > { %15943 = vst [vmem:[#allocation48_spill] sm:$0xff] %v10865_v27  ;;  %v1970_v46 = vmul.f32 %v10328_v51, %v1902_v7  ;;  %v1653_v58 = vmax.f32 %v1589_v12, 0.0  ;;  %v1526_v8 = vmul.f32 %v10865_v27, %v10865_v27  ;;  %1091 = vadd.xlane.f32.xlu0 %v10588_v43  ;;  %v10874_v19 = vpop.eup %8584  ;;  %v10876_v49 = vmul.f32 0.0625, %v987_v55 }
 0x1c0   : > { %v2670_v52 = vmul.f32 %v2543_v6, %v10731_v37  ;;  %v1240_v0 = vpop.xlane.xlu0 %1239  ;;  %v2482_v62 = vadd.f32 1.0, %v2354_v47  ;;  %v10879_v42 = vpop.eup %8586  ;;  %v1780_v23 = vadd.f32 1e-05, %v1652_v13  ;;  %v2671_v12 = vmul.f32 %v2545_v21, %v10701_v5  ;;  %v15947_v21 = vld [vmem:[#allocation60_spill] sm:$0xff] }
 0x1c1   : > { %v1462_v44 = vmul.f32 0.0625, %v1240_v0  ;;  %1094 = vadd.xlane.f32.xlu1 %v15945_v35  ;;  %v2291_v29 = vadd.f32 1.0, %v8583_v20  ;;  %v1781_v43 = vadd.f32 1e-05, %v1653_v58  ;;  %v10887_v59 = vadd.f32 %v10340_v22, %v1970_v46 }
 0x1c2   : > { %v8589_v45 = vpop.eup %8588  ;;  %8326 = vmatprep.mubr.msk.f32.mxu0 %vm933_vm1, %v2670_v52  ;;  %v1243_v37 = vpop.xlane.xlu1 %1242  ;;  %8598 = vrcp.f32 %v2482_v62  ;;  %v1527_v13 = vmul.f32 %v10876_v49, %v10876_v49  ;;  %v15948_v46 = vsub.f32 %v15931_v34, %v10759_v31 }
 0x1c3   : > { %v10889_v6 = vpop.eup %8590  ;;  %v1590_v55 = vsub.f32 %v1462_v44, %v1526_v8  ;;  %8327 = vmatmul.mubr.msk.f32.vlgmr.msra.gmra.mrb[64].mxu0 %vm933_vm1, %v2671_v12  ;;  %v1463_v5 = vmul.f32 0.0625, %v1243_v37  ;;  %1347 = vadd.xlane.f32.xlu0 %v15947_v21  ;;  %v2547_v20 = vmul.f32 %v8589_v45, %v7698_v57  ;;  %v2355_v52 = vmul.f32 %v2291_v29, %v2291_v29  ;;  %v15949_v44 = vld [vmem:[#allocation59_spill] sm:$0xff] }
 0x1c4   : > { %v8593_v58 = vpop.eup %8592  ;;  %v990_v0 = vpop.xlane.xlu0 %989  ;;  %8600 = vpow2.f32 %v2172_v30  ;;  %v2102_v62 = vmin.f32 %v10887_v59, 20.0  ;;  %v1903_v35 = vmul.f32 %v10850_v38, %v15948_v46  ;;  %v7700_v37 = vadd.f32 -1.0, %v2354_v47 }
 0x1c5   : > { %v1654_v7 = vmax.f32 %v1590_v55, 0.0  ;;  %v1591_v2 = vsub.f32 %v1463_v5, %v1527_v13  ;;  %v10900_v8 = vmul.f32 0.0625, %v990_v0  ;;  %1350 = vadd.xlane.f32.xlu1 %v15949_v44  ;;  %v2672_v12 = vmul.f32 %v2547_v20, %v10762_v15 }
 0x1c6   : > { %v993_v57 = vpop.xlane.xlu1 %992  ;;  %v2549_v45 = vmul.f32 %v8593_v58, %v7699_v24  ;;  %v2483_v29 = vadd.f32 1.0, %v2355_v52  ;;  %v2174_v30 = vmul.f32 1.442695, %v2102_v62  ;;  %8602 = vrsqrt.f32 %v1780_v23  ;;  %v8595_v34 = vpop.eup %8594 }
 0x1c7   : > { %v1782_v21 = vadd.f32 1e-05, %v1654_v7  ;;  %v1655_v27 = vmax.f32 %v1591_v2, 0.0  ;;  %v1528_v31 = vmul.f32 %v10900_v8, %v10900_v8  ;;  %8329 = vmatprep.mubr.msk.f32.mxu0 %vm933_vm1, %v2672_v12  ;;  %1097 = vadd.xlane.f32.xlu0 %v10618_v26  ;;  %v10908_v38 = vmul.f32 0.0625, %v993_v57  ;;  %v15950_v2 = vld [vmem:[#allocation11_spill] sm:$0xff]  ;;  %v15953_v57 = vld [vmem:[#allocation13_spill] sm:$0xff] }
 0x1c8   : > { %v2673_v15 = vmul.f32 %v2549_v45, %v10775_v39  ;;  %v1246_v13 = vpop.xlane.xlu0 %1245  ;;  %8604 = vrcp.f32 %v2483_v29  ;;  %v1971_v24 = vmul.f32 %v10328_v51, %v1903_v35  ;;  %v10912_v47 = vpop.eup %8596  ;;  %v2292_v55 = vadd.f32 1.0, %v8595_v34 }
 0x1c9   : > { %8606 = vrsqrt.f32 %v1781_v43  ;;  %v1464_v7 = vmul.f32 0.0625, %v1246_v13  ;;  %1100 = vadd.xlane.f32.xlu1 %v10622_v56  ;;  %v1783_v26 = vadd.f32 1e-05, %v1655_v27  ;;  %v7701_v20 = vadd.f32 -1.0, %v2355_v52  ;;  %v15951_v56 = vld [vmem:[#allocation12_spill] sm:$0xff]  ;;  %v15981_v27 = vld [vmem:[#allocation22_spill] sm:$0xff] }
 0x1ca   : > { %8330 = vmatmul.mubr.msk.f32.gmra.mrb[66].mxu0 %vm933_vm1, %v2673_v15  ;;  %v1249_v5 = vpop.xlane.xlu1 %1248  ;;  %8608 = vpow2.f32 %v2174_v30  ;;  %v10919_v39 = vadd.f32 %v10340_v22, %v1971_v24  ;;  %v1529_v58 = vmul.f32 %v10908_v38, %v10908_v38  ;;  %v2356_v62 = vmul.f32 %v2292_v55, %v2292_v55 }
 0x1cb   : > { %v1592_v43 = vsub.f32 %v1464_v7, %v1528_v31  ;;  %v1465_v0 = vmul.f32 0.0625, %v1249_v5  ;;  %1353 = vadd.xlane.f32.xlu0 %v10635_v28  ;;  %8610 = vrsqrt.f32 %v1782_v21  ;;  %v15952_v44 = vsub.f32 %v15933_v48, %v10783_v53 }
 0x1cc   : > { %v8599_v46 = vpop.eup %8598  ;;  %v996_v35 = vpop.xlane.xlu0 %995  ;;  %v2103_v52 = vmin.f32 %v10919_v39, 20.0  ;;  %v2484_v15 = vadd.f32 1.0, %v2356_v62  ;;  %8612 = vrsqrt.f32 %v1783_v26 }
 0x1cd   : > { %v1904_v12 = vmul.f32 %v10874_v19, %v15952_v44  ;;  %v1593_v29 = vsub.f32 %v1465_v0, %v1529_v58  ;;  %v10933_v30 = vmul.f32 0.0625, %v996_v35  ;;  %1356 = vadd.xlane.f32.xlu1 %v10625_v3  ;;  %v2551_v28 = vmul.f32 %v8599_v46, %v7700_v37 }
 0x1ce   : > { %v8601_v21 = vpop.eup %8600  ;;  %v1656_v31 = vmax.f32 %v1592_v43, 0.0  ;;  %v999_v34 = vpop.xlane.xlu1 %998  ;;  %v2176_v13 = vmul.f32 1.442695, %v2103_v52  ;;  %v15954_v19 = vsub.f32 %v15934_v14, %v10795_v9  ;;  %8614 = vrcp.f32 %v2484_v15 }
 0x1cf   : > { %v1972_v24 = vmul.f32 %v10328_v51, %v1904_v12  ;;  %v1657_v53 = vmax.f32 %v1593_v29, 0.0  ;;  %v1530_v48 = vmul.f32 %v10933_v30, %v10933_v30  ;;  %1103 = vadd.xlane.f32.xlu0 %v10639_v1  ;;  %v10944_v37 = vmul.f32 0.0625, %v999_v34 }
 0x1d0   : > { %v1905_v3 = vmul.f32 %v10879_v42, %v15954_v19  ;;  %v2674_v7 = vmul.f32 %v2551_v28, %v10798_v60  ;;  %v1252_v55 = vpop.xlane.xlu0 %1251  ;;  %v2293_v5 = vadd.f32 1.0, %v8601_v21  ;;  %v10947_v58 = vpop.eup %8602  ;;  %v7702_v43 = vadd.f32 -1.0, %v2356_v62  ;;  %v15956_v60 = vld [vmem:[#allocation14_spill] sm:$0xff]  ;;  %v15957_v19 = vld [vmem:[#allocation63_spill] sm:$0xff] }
 0x1d1   : > { %v1466_v26 = vmul.f32 0.0625, %v1252_v55  ;;  %1106 = vadd.xlane.f32.xlu1 %v10643_v41  ;;  %v10951_v1 = vadd.f32 %v10340_v22, %v1972_v24  ;;  %v15955_v9 = vsub.f32 %v15935_v17, %v10815_v18  ;;  %v1784_v0 = vadd.f32 1e-05, %v1656_v31 }
 0x1d2   : > { %v8605_v42 = vpop.eup %8604  ;;  %8332 = vmatprep.mubr.msk.f32.mxu0 %vm933_vm1, %v2674_v7  ;;  %v1255_v35 = vpop.xlane.xlu1 %1254  ;;  %v2357_v52 = vmul.f32 %v2293_v5, %v2293_v5  ;;  %8616 = vpow2.f32 %v2176_v13  ;;  %v1531_v62 = vmul.f32 %v10944_v37, %v10944_v37  ;;  %v1973_v31 = vmul.f32 %v10328_v51, %v1905_v3  ;;  %v15958_v3 = vld [vmem:[#allocation15_spill] sm:$0xff] }
 0x1d3   : > { %v1906_v14 = vmul.f32 %v10889_v6, %v15955_v9  ;;  %v10960_v41 = vpop.eup %8606  ;;  %v2553_v44 = vmul.f32 %v8605_v42, %v7701_v20  ;;  %v1594_v12 = vsub.f32 %v1466_v26, %v1530_v48  ;;  %v1467_v17 = vmul.f32 0.0625, %v1255_v35  ;;  %1359 = vadd.xlane.f32.xlu0 %v10654_v16 }
 0x1d4   : > { %v8609_v18 = vpop.eup %8608  ;;  %v1785_v6 = vadd.f32 1e-05, %v1657_v53  ;;  %v1002_v29 = vpop.xlane.xlu0 %1001  ;;  %v2485_v28 = vadd.f32 1.0, %v2357_v52  ;;  %v2104_v21 = vmin.f32 %v10951_v1, 20.0  ;;  %v10974_v7 = vadd.f32 %v10340_v22, %v1973_v31 }
 0x1d5   : > { %v2675_v34 = vmul.f32 %v2553_v44, %v10813_v11  ;;  %v1658_v15 = vmax.f32 %v1594_v12, 0.0  ;;  %v1595_v13 = vsub.f32 %v1467_v17, %v1531_v62  ;;  %v10968_v24 = vmul.f32 0.0625, %v1002_v29  ;;  %1362 = vadd.xlane.f32.xlu1 %v15957_v19  ;;  %v10971_v20 = vpop.eup %8610  ;;  %v15959_v12 = vld [vmem:[#allocation65_spill] sm:$0xff] }
 0x1d6   : > { %v1005_v48 = vpop.xlane.xlu1 %1004  ;;  %8618 = vrcp.f32 %v2485_v28  ;;  %v2294_v16 = vadd.f32 1.0, %v8609_v18  ;;  %v2178_v53 = vmul.f32 1.442695, %v2104_v21  ;;  %v2105_v35 = vmin.f32 %v10974_v7, 20.0  ;;  %v10985_v62 = vpop.eup %8612 }
 0x1d7   : > { %8620 = vrsqrt.f32 %v1784_v0  ;;  %8333 = vmatmul.mubr.msk.f32.gmra.mrb[68].mxu0 %vm933_vm1, %v2675_v34  ;;  %v1659_v11 = vmax.f32 %v1595_v13, 0.0  ;;  %v1532_v5 = vmul.f32 %v10968_v24, %v10968_v24  ;;  %1109 = vadd.xlane.f32.xlu0 %v10669_v36  ;;  %v10982_v26 = vmul.f32 0.0625, %v1005_v48  ;;  %v15960_v36 = vld [vmem:[#allocation16_spill] sm:$0xff] }
 0x1d8   : > { %v1258_v9 = vpop.xlane.xlu0 %1257  ;;  %v2358_v42 = vmul.f32 %v2294_v16, %v2294_v16  ;;  %8622 = vpow2.f32 %v2178_v53  ;;  %v7703_v0 = vadd.f32 -1.0, %v2357_v52  ;;  %v1974_v17 = vmul.f32 %v10328_v51, %v1906_v14  ;;  %v8615_v18 = vpop.eup %8614  ;;  %v15961_v52 = vld [vmem:[#allocation67_spill] sm:$0xff] }
 0x1d9   : > { %8624 = vrsqrt.f32 %v1785_v6  ;;  %v1468_v44 = vmul.f32 0.0625, %v1258_v9  ;;  %1112 = vadd.xlane.f32.xlu1 %v15959_v12  ;;  %v1786_v29 = vadd.f32 1e-05, %v1658_v15  ;;  %v1787_v28 = vadd.f32 1e-05, %v1659_v11 }
 0x1da   : > { %v1261_v31 = vpop.xlane.xlu1 %1260  ;;  %v2486_v34 = vadd.f32 1.0, %v2358_v42  ;;  %v1533_v13 = vmul.f32 %v10982_v26, %v10982_v26  ;;  %v2555_v19 = vmul.f32 %v8615_v18, %v7702_v43  ;;  %v2180_v14 = vmul.f32 1.442695, %v2105_v35 }
 0x1db   : > { %v1596_v48 = vsub.f32 %v1468_v44, %v1532_v5  ;;  %v1469_v6 = vmul.f32 0.0625, %v1261_v31  ;;  %1365 = vadd.xlane.f32.xlu0 %v15961_v52  ;;  %v10995_v15 = vadd.f32 %v10340_v22, %v1974_v17  ;;  %v15962_v11 = vsub.f32 %v15939_v33, %v10826_v4  ;;  %v15963_v4 = vld [vmem:[#allocation17_spill] sm:$0xff] }
 0x1dc   : > { %v8617_v16 = vpop.eup %8616  ;;  %v1008_v53 = vpop.xlane.xlu0 %1007  ;;  %8626 = vrcp.f32 %v2486_v34  ;;  %v2676_v12 = vmul.f32 %v2555_v19, %v10840_v25  ;;  %v7704_v34 = vadd.f32 -1.0, %v2358_v42 }
 0x1dd   : > { %v1907_v9 = vmul.f32 %v10912_v47, %v15962_v11  ;;  %v1660_v21 = vmax.f32 %v1596_v48, 0.0  ;;  %v1597_v43 = vsub.f32 %v1469_v6, %v1533_v13  ;;  %v11002_v5 = vmul.f32 0.0625, %v1008_v53  ;;  %1368 = vadd.xlane.f32.xlu1 %v10689_v61  ;;  %v15964_v11 = vld [vmem:[#allocation18_spill] sm:$0xff] }
 0x1de   : > { %v1011_v44 = vpop.xlane.xlu1 %1010  ;;  %v2295_v18 = vadd.f32 1.0, %v8617_v16  ;;  %8628 = vpow2.f32 %v2180_v14  ;;  %v2106_v35 = vmin.f32 %v10995_v15, 20.0  ;;  %8335 = vmatprep.mubr.msk.f32.mxu0 %vm933_vm1, %v2676_v12 }
 0x1df   : > { %v1975_v17 = vmul.f32 %v10328_v51, %v1907_v9  ;;  %8630 = vrsqrt.f32 %v1786_v29  ;;  %v1661_v25 = vmax.f32 %v1597_v43, 0.0  ;;  %v1534_v47 = vmul.f32 %v11002_v5, %v11002_v5  ;;  %1115 = vadd.xlane.f32.xlu0 %v10698_v10 }
 0x1e0   : > { %v8619_v61 = vpop.eup %8618  ;;  %v11013_v31 = vmul.f32 0.0625, %v1011_v44  ;;  %v2359_v13 = vmul.f32 %v2295_v18, %v2295_v18  ;;  %v1264_v19 = vpop.xlane.xlu0 %1263  ;;  %8632 = vrsqrt.f32 %v1787_v28  ;;  %v2182_v16 = vmul.f32 1.442695, %v2106_v35 }
 0x1e1   : > { %v11016_v48 = vadd.f32 %v10340_v22, %v1975_v17  ;;  %v11018_v29 = vpop.eup %8620  ;;  %v2557_v6 = vmul.f32 %v8619_v61, %v7703_v0  ;;  %v1470_v52 = vmul.f32 0.0625, %v1264_v19  ;;  %1118 = vadd.xlane.f32.xlu1 %v10705_v32  ;;  %v1788_v14 = vadd.f32 1e-05, %v1660_v21  ;;  %v15965_v17 = vld [vmem:[#allocation69_spill] sm:$0xff]  ;;  %v15967_v61 = vld [vmem:[#allocation3_spill] sm:$0xff] }
 0x1e2   : > { %v8623_v53 = vpop.eup %8622  ;;  %v1789_v10 = vadd.f32 1e-05, %v1661_v25  ;;  %v2487_v42 = vadd.f32 1.0, %v2359_v13  ;;  %v1267_v12 = vpop.xlane.xlu1 %1266  ;;  %v1535_v28 = vmul.f32 %v11013_v31, %v11013_v31  ;;  %v15966_v25 = vld [vmem:[#allocation8_spill] sm:$0xff] }
 0x1e3   : > { %v11023_v43 = vpop.eup %8624  ;;  %v2677_v44 = vmul.f32 %v2557_v6, %v10848_v63  ;;  %v1598_v0 = vsub.f32 %v1470_v52, %v1534_v47  ;;  %v1471_v18 = vmul.f32 0.0625, %v1267_v12  ;;  %1371 = vadd.xlane.f32.xlu0 %v15965_v17  ;;  %v2296_v21 = vadd.f32 1.0, %v8623_v53  ;;  %v15969_v47 = vld [vmem:[#allocation71_spill] sm:$0xff] }
 0x1e4   : > { %8634 = vrcp.f32 %v2487_v42  ;;  %v1014_v32 = vpop.xlane.xlu0 %1013  ;;  %v2107_v35 = vmin.f32 %v11016_v48, 20.0  ;;  %v15968_v19 = vsub.f32 %v15966_v25, %v15967_v61  ;;  %v15970_v53 = vld [vmem:[#allocation19_spill] sm:$0xff]  ;;  %v7705_v12 = vadd.f32 -1.0, %v2359_v13 }
 0x1e5   : > { %8336 = vmatmul.mubr.msk.f32.gmra.mrb[70].mxu0 %vm933_vm1, %v2677_v44  ;;  %v1662_v63 = vmax.f32 %v1598_v0, 0.0  ;;  %v1599_v6 = vsub.f32 %v1471_v18, %v1535_v28  ;;  %v11035_v33 = vmul.f32 0.0625, %v1014_v32  ;;  %1374 = vadd.xlane.f32.xlu1 %v15969_v47  ;;  %8636 = vpow2.f32 %v2182_v16  ;;  %v15975_v47 = vld [vmem:[#allocation20_spill] sm:$0xff] }
 0x1e6   : > { %v1908_v9 = vmul.f32 %v10947_v58, %v15968_v19  ;;  %v8627_v52 = vpop.eup %8626  ;;  %8638 = vrsqrt.f32 %v1788_v14  ;;  %v1017_v17 = vpop.xlane.xlu1 %1016  ;;  %v2360_v55 = vmul.f32 %v2296_v21, %v2296_v21  ;;  %v15971_v58 = vld [vmem:[#allocation72_spill] sm:$0xff]  ;;  %v2184_v44 = vmul.f32 1.442695, %v2107_v35  ;;  %v15974_v19 = vld [vmem:[#allocation73_spill] sm:$0xff] }
 0x1e7   : > { %8640 = vrsqrt.f32 %v1789_v10  ;;  %v2559_v25 = vmul.f32 %v8627_v52, %v7704_v34  ;;  %1121 = vadd.xlane.f32.xlu0 %v15971_v58  ;;  %v1536_v18 = vmul.f32 %v11035_v33, %v11035_v33  ;;  %v11044_v16 = vmul.f32 0.0625, %v1017_v17 }
 0x1e8   : > { %v1976_v28 = vmul.f32 %v10328_v51, %v1908_v9  ;;  %v8629_v0 = vpop.eup %8628  ;;  %v2488_v14 = vadd.f32 1.0, %v2360_v55  ;;  %v1270_v32 = vpop.xlane.xlu0 %1269  ;;  %v15973_v13 = vsub.f32 %v15944_v50, %v10845_v54  ;;  %v1790_v35 = vadd.f32 1e-05, %v1662_v63 }
 0x1e9   : > { %15972 = vst [vmem:[#allocation4_spill] sm:$0xff] %v11044_v16  ;;  %v11050_v10 = vpop.eup %8630  ;;  %v2678_v34 = vmul.f32 %v2559_v25, %v10887_v59  ;;  %v1663_v61 = vmax.f32 %v1599_v6, 0.0  ;;  %v2297_v9 = vadd.f32 1.0, %v8629_v0  ;;  %1124 = vadd.xlane.f32.xlu1 %v15974_v19  ;;  %v7706_v17 = vadd.f32 -1.0, %v2360_v55  ;;  %v15977_v0 = vld [vmem:[#allocation48_spill] sm:$0xff] }
 0x1ea   : > { %v1909_v21 = vmul.f32 %v10960_v41, %v15973_v13  ;;  %8642 = vrcp.f32 %v2488_v14  ;;  %v1472_v58 = vmul.f32 0.0625, %v1270_v32  ;;  %v1273_v42 = vpop.xlane.xlu1 %1272  ;;  %v11056_v46 = vpop.eup %8632  ;;  %v1537_v54 = vmul.f32 %v11044_v16, %v11044_v16  ;;  %v15976_v41 = vld [vmem:[#allocation74_spill] sm:$0xff] }
 0x1eb   : > { %8338 = vmatprep.mubr.msk.f32.mxu0 %vm933_vm1, %v2678_v34  ;;  %v2361_v50 = vmul.f32 %v2297_v9, %v2297_v9  ;;  %v1473_v59 = vmul.f32 0.0625, %v1273_v42  ;;  %1377 = vadd.xlane.f32.xlu0 %v15976_v41  ;;  %v11063_v63 = vadd.f32 %v10340_v22, %v1976_v28  ;;  %8644 = vpow2.f32 %v2184_v44  ;;  %v15979_v42 = vld [vmem:[#allocation75_spill] sm:$0xff] }
 0x1ec   : > { %v1600_v6 = vsub.f32 %v1472_v58, %v1536_v18  ;;  %v1020_v25 = vpop.xlane.xlu0 %1019  ;;  %v1977_v55 = vmul.f32 %v10328_v51, %v1909_v21  ;;  %v15978_v14 = vsub.f32 %v15946_v40, %v15977_v0  ;;  %v1791_v13 = vadd.f32 1e-05, %v1663_v61 }
 0x1ed   : > { %v2489_v34 = vadd.f32 1.0, %v2361_v50  ;;  %v1601_v19 = vsub.f32 %v1473_v59, %v1537_v54  ;;  %v11070_v9 = vmul.f32 0.0625, %v1020_v25  ;;  %1380 = vadd.xlane.f32.xlu1 %v15979_v42  ;;  %8646 = vrsqrt.f32 %v1790_v35 }
 0x1ee   : > { %v1910_v32 = vmul.f32 %v10971_v20, %v15978_v14  ;;  %v8635_v41 = vpop.eup %8634  ;;  %v1664_v28 = vmax.f32 %v1600_v6, 0.0  ;;  %v1023_v18 = vpop.xlane.xlu1 %1022  ;;  %v2108_v44 = vmin.f32 %v11063_v63, 20.0  ;;  %v11075_v21 = vadd.f32 %v10340_v22, %v1977_v55 }
 0x1ef   : > { %v8637_v58 = vpop.eup %8636  ;;  %v2561_v40 = vmul.f32 %v8635_v41, %v7705_v12  ;;  %8648 = vrcp.f32 %v2489_v34  ;;  %v1538_v20 = vmul.f32 %v11070_v9, %v11070_v9  ;;  %v1665_v25 = vmax.f32 %v1601_v19, 0.0 }
 0x1f0   : > { %v1978_v61 = vmul.f32 %v10328_v51, %v1910_v32  ;;  %v11080_v54 = vpop.eup %8638  ;;  %v1792_v59 = vadd.f32 1e-05, %v1664_v28  ;;  %v11082_v35 = vmul.f32 0.0625, %v1023_v18  ;;  %v2298_v6 = vadd.f32 1.0, %v8637_v58  ;;  %v1276_v0 = vpop.xlane.xlu0 %1275 }
 0x1f1   : > { %v11084_v14 = vpop.eup %8640  ;;  %v2679_v55 = vmul.f32 %v2561_v40, %v10919_v39  ;;  %8650 = vrsqrt.f32 %v1791_v13  ;;  %v1474_v12 = vmul.f32 0.0625, %v1276_v0  ;;  %v2186_v34 = vmul.f32 1.442695, %v2108_v44 }
 0x1f2   : > { %v7707_v52 = vadd.f32 -1.0, %v2361_v50  ;;  %8652 = vrsqrt.f32 %v1792_v59  ;;  %v2362_v32 = vmul.f32 %v2298_v6, %v2298_v6  ;;  %v1279_v45 = vpop.xlane.xlu1 %1278  ;;  %v1539_v19 = vmul.f32 %v11082_v35, %v11082_v35 }
 0x1f3   : > { %8339 = vmatmul.mubr.msk.f32.gmra.mrb[72].mxu0 %vm933_vm1, %v2679_v55  ;;  %v1602_v28 = vsub.f32 %v1474_v12, %v1538_v20  ;;  %v1475_v18 = vmul.f32 0.0625, %v1279_v45  ;;  %v2109_v58 = vmin.f32 %v11075_v21, 20.0  ;;  %v1793_v13 = vadd.f32 1e-05, %v1665_v25 }
 0x1f4   : > { %v8643_v39 = vpop.eup %8642  ;;  %v2490_v40 = vadd.f32 1.0, %v2362_v32  ;;  %v1026_v44 = vpop.xlane.xlu0 %1025  ;;  %8654 = vpow2.f32 %v2186_v34  ;;  %v11094_v0 = vadd.f32 %v10340_v22, %v1978_v61 }
 0x1f5   : > { %v2563_v50 = vmul.f32 %v8643_v39, %v7706_v17  ;;  %v1666_v59 = vmax.f32 %v1602_v28, 0.0  ;;  %v1603_v6 = vsub.f32 %v1475_v18, %v1539_v19  ;;  %v11096_v41 = vmul.f32 0.0625, %v1026_v44  ;;  %v8645_v55 = vpop.eup %8644 }
 0x1f6   : > { %8656 = vrcp.f32 %v2490_v40  ;;  %v1029_v45 = vpop.xlane.xlu1 %1028  ;;  %v2188_v12 = vmul.f32 1.442695, %v2109_v58  ;;  %v2110_v25 = vmin.f32 %v11094_v0, 20.0  ;;  %v2299_v34 = vadd.f32 1.0, %v8645_v55 }
 0x1f7   : > { %v2680_v23 = vmul.f32 %v2563_v50, %v10951_v1  ;;  %v1794_v16 = vadd.f32 1e-05, %v1666_v59  ;;  %v1667_v61 = vmax.f32 %v1603_v6, 0.0  ;;  %v11102_v42 = vpop.eup %8646  ;;  %v1540_v17 = vmul.f32 %v11096_v41, %v11096_v41  ;;  %v15984_v1 = vld [vmem:[#allocation23_spill] sm:$0xff] }
 0x1f8   : > { %v11106_v19 = vmul.f32 0.0625, %v1029_v45  ;;  %8658 = vpow2.f32 %v2188_v12  ;;  %v1282_v28 = vpop.xlane.xlu0 %1281  ;;  %v15983_v18 = vsub.f32 %v15950_v2, %v10876_v49  ;;  %v2363_v44 = vmul.f32 %v2299_v34, %v2299_v34 }
 0x1f9   : > { %v8649_v39 = vpop.eup %8648  ;;  %8341 = vmatprep.mubr.msk.f32.mxu0 %vm933_vm1, %v2680_v23  ;;  %8660 = vrsqrt.f32 %v1793_v13  ;;  %v1476_v50 = vmul.f32 0.0625, %v1282_v28  ;;  %v7708_v6 = vadd.f32 -1.0, %v2362_v32  ;;  %v2190_v45 = vmul.f32 1.442695, %v2110_v25 }
 0x1fa   : > { %15982 = vst [vmem:[#allocation5_spill] sm:$0xff] %v11106_v19  ;;  %v1911_v58 = vmul.f32 %v10985_v62, %v15983_v18  ;;  %v2565_v59 = vmul.f32 %v8649_v39, %v7707_v52  ;;  %8662 = vrsqrt.f32 %v1794_v16  ;;  %v1285_v55 = vpop.xlane.xlu1 %1284  ;;  %v2491_v20 = vadd.f32 1.0, %v2363_v44  ;;  %v15985_v16 = vld [vmem:[#allocation24_spill] sm:$0xff] }
 0x1fb   : > { %v11115_v12 = vpop.eup %8650  ;;  %v1795_v49 = vadd.f32 1e-05, %v1667_v61  ;;  %v1541_v2 = vmul.f32 %v11106_v19, %v11106_v19  ;;  %v1604_v62 = vsub.f32 %v1476_v50, %v1540_v17  ;;  %v1477_v18 = vmul.f32 0.0625, %v1285_v55 }
 0x1fc   : > { %v11119_v23 = vpop.eup %8652  ;;  %v2681_v13 = vmul.f32 %v2565_v59, %v10974_v7  ;;  %v1032_v34 = vpop.xlane.xlu0 %1031  ;;  %8664 = vpow2.f32 %v2190_v45  ;;  %v1979_v52 = vmul.f32 %v10328_v51, %v1911_v58  ;;  %v15987_v61 = vsub.f32 %v15951_v56, %v10900_v8  ;;  %v15988_v7 = vld [vmem:[#allocation25_spill] sm:$0xff] }
 0x1fd   : > { %8666 = vrcp.f32 %v2491_v20  ;;  %v11125_v25 = vmul.f32 0.0625, %v1032_v34  ;;  %v1668_v50 = vmax.f32 %v1604_v62, 0.0  ;;  %v1605_v59 = vsub.f32 %v1477_v18, %v1541_v2 }
 0x1fe   : > { %v1912_v17 = vmul.f32 %v11018_v29, %v15987_v61  ;;  %v8655_v28 = vpop.eup %8654  ;;  %8342 = vmatmul.mubr.msk.f32.gmra.mrb[74].mxu0 %vm933_vm1, %v2681_v13  ;;  %v1035_v58 = vpop.xlane.xlu1 %1034  ;;  %v11135_v20 = vadd.f32 %v10340_v22, %v1979_v52  ;;  %v7709_v55 = vadd.f32 -1.0, %v2363_v44  ;;  %8668 = vrsqrt.f32 %v1795_v49 }
 0x1ff   : > { %15986 = vst [vmem:[#allocation6_spill] sm:$0xff] %v11125_v25  ;;  %v2300_v45 = vadd.f32 1.0, %v8655_v28  ;;  %v1542_v8 = vmul.f32 %v11125_v25, %v11125_v25  ;;  %v1669_v29 = vmax.f32 %v1605_v59, 0.0  ;;  %v11139_v34 = vmul.f32 0.0625, %v1035_v58 }
 0x200   : > { %v8657_v56 = vpop.eup %8656  ;;  %v2111_v13 = vmin.f32 %v11135_v20, 20.0  ;;  %v1288_v61 = vpop.xlane.xlu0 %1287  ;;  %v1980_v62 = vmul.f32 %v10328_v51, %v1912_v17  ;;  %v15990_v44 = vsub.f32 %v15953_v57, %v10908_v38  ;;  %v1796_v28 = vadd.f32 1e-05, %v1668_v50 }
 0x201   : > { %15989 = vst [vmem:[#allocation50_spill] sm:$0xff] %v11139_v34  ;;  %v2567_v2 = vmul.f32 %v8657_v56, %v7708_v6  ;;  %v2364_v18 = vmul.f32 %v2300_v45, %v2300_v45  ;;  %v1478_v39 = vmul.f32 0.0625, %v1288_v61  ;;  %v15992_v19 = vsub.f32 %v15956_v60, %v10933_v30 }
 0x202   : > { %v1913_v49 = vmul.f32 %v11023_v43, %v15990_v44  ;;  %v8659_v52 = vpop.eup %8658  ;;  %v2192_v58 = vmul.f32 1.442695, %v2111_v13  ;;  %v1291_v40 = vpop.xlane.xlu1 %1290  ;;  %v1797_v57 = vadd.f32 1e-05, %v1669_v29  ;;  %v1543_v50 = vmul.f32 %v11139_v34, %v11139_v34 }
 0x203   : > { %v1914_v17 = vmul.f32 %v11050_v10, %v15992_v19  ;;  %v11153_v6 = vpop.eup %8660  ;;  %v2682_v45 = vmul.f32 %v2567_v2, %v10995_v15  ;;  %v2492_v56 = vadd.f32 1.0, %v2364_v18  ;;  %v2301_v38 = vadd.f32 1.0, %v8659_v52 }
 0x204   : > { %v11156_v43 = vpop.eup %8662  ;;  %v1606_v61 = vsub.f32 %v1478_v39, %v1542_v8  ;;  %v1479_v13 = vmul.f32 0.0625, %v1291_v40  ;;  %v1038_v44 = vpop.xlane.xlu0 %1037  ;;  %v11161_v59 = vadd.f32 %v10340_v22, %v1980_v62  ;;  %v1981_v15 = vmul.f32 %v10328_v51, %v1913_v49  ;;  %v15994_v62 = vld [vmem:[#allocation27_spill] sm:$0xff] }
 0x205   : > { %8344 = vmatprep.mubr.msk.f32.mxu0 %vm933_vm1, %v2682_v45  ;;  %8670 = vrcp.f32 %v2492_v56  ;;  %v2365_v30 = vmul.f32 %v2301_v38, %v2301_v38  ;;  %v11164_v60 = vmul.f32 0.0625, %v1038_v44 }
 0x206   : > { %v8665_v10 = vpop.eup %8664  ;;  %8672 = vpow2.f32 %v2192_v58  ;;  %v1670_v19 = vmax.f32 %v1606_v61, 0.0  ;;  %v1607_v29 = vsub.f32 %v1479_v13, %v1543_v50  ;;  %v1041_v2 = vpop.xlane.xlu1 %1040  ;;  %v2112_v39 = vmin.f32 %v11161_v59, 20.0 }
 0x207   : > { %15993 = vst [vmem:[#allocation52_spill] sm:$0xff] %v11164_v60  ;;  %v8667_v40 = vpop.eup %8666  ;;  %v2493_v8 = vadd.f32 1.0, %v2365_v30  ;;  %8674 = vrsqrt.f32 %v1796_v28  ;;  %v2302_v45 = vadd.f32 1.0, %v8665_v10  ;;  %v7710_v58 = vadd.f32 -1.0, %v2364_v18 }
 0x208   : > { %v2569_v56 = vmul.f32 %v8667_v40, %v7709_v55  ;;  %8676 = vrsqrt.f32 %v1797_v57  ;;  %v1798_v38 = vadd.f32 1e-05, %v1670_v19  ;;  %v1671_v44 = vmax.f32 %v1607_v29, 0.0  ;;  %v1294_v25 = vpop.xlane.xlu0 %1293  ;;  %v11170_v49 = vpop.eup %8668 }
 0x209   : > { %8678 = vrcp.f32 %v2493_v8  ;;  %v2366_v50 = vmul.f32 %v2302_v45, %v2302_v45  ;;  %v11172_v61 = vmul.f32 0.0625, %v1041_v2  ;;  %v1544_v28 = vmul.f32 %v11164_v60, %v11164_v60 }
 0x20a   : > { %v2683_v13 = vmul.f32 %v2569_v56, %v11016_v48  ;;  %v2194_v32 = vmul.f32 1.442695, %v2112_v39  ;;  %v11178_v10 = vadd.f32 %v10340_v22, %v1981_v15  ;;  %v1297_v55 = vpop.xlane.xlu1 %1296  ;;  %v7711_v57 = vadd.f32 -1.0, %v2365_v30 }
 0x20b   : > { %15995 = vst [vmem:[#allocation7_spill] sm:$0xff] %v11172_v61  ;;  %v2494_v19 = vadd.f32 1.0, %v2366_v50  ;;  %8680 = vrsqrt.f32 %v1798_v38  ;;  %v1799_v29 = vadd.f32 1e-05, %v1671_v44  ;;  %v1545_v18 = vmul.f32 %v11172_v61, %v11172_v61 }
 0x20c   : > { %8345 = vmatmul.mubr.msk.f32.gmra.mrb[76].mxu0 %vm933_vm1, %v2683_v13  ;;  %v2113_v2 = vmin.f32 %v11178_v10, 20.0  ;;  %v1480_v48 = vmul.f32 0.0625, %v1294_v25  ;;  %v1481_v40 = vmul.f32 0.0625, %v1297_v55  ;;  %v1044_v8 = vpop.xlane.xlu0 %1043  ;;  %v1982_v15 = vmul.f32 %v10328_v51, %v1914_v17  ;;  %v15998_v25 = vld [vmem:[#allocation29_spill] sm:$0xff] }
 0x20d   : > { %8682 = vrcp.f32 %v2494_v19  ;;  %v11184_v39 = vmul.f32 0.0625, %v1044_v8  ;;  %v15997_v30 = vsub.f32 %v15958_v3, %v10944_v37  ;;  %v7712_v34 = vadd.f32 -1.0, %v2366_v50 }
 0x20e   : > { %8684 = vpow2.f32 %v2194_v32  ;;  %v2196_v56 = vmul.f32 1.442695, %v2113_v2  ;;  %v1608_v38 = vsub.f32 %v1480_v48, %v1544_v28  ;;  %v1609_v44 = vsub.f32 %v1481_v40, %v1545_v18  ;;  %v1047_v13 = vpop.xlane.xlu1 %1046 }
 0x20f   : > { %15996 = vst [vmem:[#allocation53_spill] sm:$0xff] %v11184_v39  ;;  %v1915_v45 = vmul.f32 %v11056_v46, %v15997_v30  ;;  %v8671_v52 = vpop.eup %8670  ;;  %8686 = vrsqrt.f32 %v1799_v29  ;;  %v11194_v19 = vadd.f32 %v10340_v22, %v1982_v15  ;;  %v11198_v46 = vmul.f32 0.0625, %v1047_v13 }
 0x210   : > { %v8673_v17 = vpop.eup %8672  ;;  %v2571_v8 = vmul.f32 %v8671_v52, %v7710_v58  ;;  %8688 = vpow2.f32 %v2196_v56  ;;  %v1300_v32 = vpop.xlane.xlu0 %1299  ;;  %v1672_v50 = vmax.f32 %v1608_v38, 0.0  ;;  %v1546_v29 = vmul.f32 %v11184_v39, %v11184_v39 }
 0x211   : > { %v11200_v28 = vpop.eup %8674  ;;  %v2303_v18 = vadd.f32 1.0, %v8673_v17  ;;  %v2114_v2 = vmin.f32 %v11194_v19, 20.0  ;;  %v1673_v58 = vmax.f32 %v1609_v44, 0.0  ;;  %v1983_v30 = vmul.f32 %v10328_v51, %v1915_v45 }
 0x212   : > { %v11205_v48 = vpop.eup %8676  ;;  %v2684_v52 = vmul.f32 %v2571_v8, %v11063_v63  ;;  %v1303_v56 = vpop.xlane.xlu1 %1302  ;;  %v1482_v38 = vmul.f32 0.0625, %v1300_v32  ;;  %v1547_v37 = vmul.f32 %v11198_v46, %v11198_v46  ;;  %v16001_v8 = vsub.f32 %v15960_v36, %v10968_v24 }
 0x213   : > { %v8679_v13 = vpop.eup %8678  ;;  %v2367_v3 = vmul.f32 %v2303_v18, %v2303_v18  ;;  %v2198_v17 = vmul.f32 1.442695, %v2114_v2  ;;  %v1483_v55 = vmul.f32 0.0625, %v1303_v56  ;;  %v11215_v63 = vadd.f32 %v10340_v22, %v1983_v30  ;;  %v16002_v2 = vld [vmem:[#allocation32_spill] sm:$0xff] }
 0x214   : > { %8347 = vmatprep.mubr.msk.f32.mxu0 %vm933_vm1, %v2684_v52  ;;  %v2573_v61 = vmul.f32 %v8679_v13, %v7711_v57  ;;  %v1050_v44 = vpop.xlane.xlu0 %1049  ;;  %v1916_v45 = vmul.f32 %v11080_v54, %v16001_v8  ;;  %v1800_v32 = vadd.f32 1e-05, %v1672_v50  ;;  %v1610_v57 = vsub.f32 %v1482_v38, %v1546_v29 }
 0x215   : > { %v11221_v15 = vpop.eup %8680  ;;  %v2495_v18 = vadd.f32 1.0, %v2367_v3  ;;  %8690 = vpow2.f32 %v2198_v17  ;;  %v2115_v30 = vmin.f32 %v11215_v63, 20.0  ;;  %v1611_v13 = vsub.f32 %v1483_v55, %v1547_v37 }
 0x216   : > { %v2685_v56 = vmul.f32 %v2573_v61, %v11075_v21  ;;  %v1053_v39 = vpop.xlane.xlu1 %1052  ;;  %v1801_v24 = vadd.f32 1e-05, %v1673_v58  ;;  %v1674_v36 = vmax.f32 %v1610_v57, 0.0  ;;  %v11227_v54 = vmul.f32 0.0625, %v1050_v44 }
 0x217   : > { %v8683_v40 = vpop.eup %8682  ;;  %8692 = vrcp.f32 %v2495_v18  ;;  %v2200_v60 = vmul.f32 1.442695, %v2115_v30  ;;  %v1675_v52 = vmax.f32 %v1611_v13, 0.0  ;;  %v1984_v29 = vmul.f32 %v10328_v51, %v1916_v45  ;;  %v16005_v45 = vld [vmem:[#allocation35_spill] sm:$0xff] }
 0x218   : > { %16003 = vst [vmem:[#allocation9_spill] sm:$0xff] %v11227_v54  ;;  %v8685_v8 = vpop.eup %8684  ;;  %8348 = vmatmul.mubr.msk.f32.gmra.mrb[78].mxu0 %vm933_vm1, %v2685_v56  ;;  %v2575_v50 = vmul.f32 %v8683_v40, %v7712_v34  ;;  %v1306_v21 = vpop.xlane.xlu0 %1305  ;;  %v7713_v17 = vadd.f32 -1.0, %v2367_v3  ;;  %8694 = vrsqrt.f32 %v1800_v32  ;;  %v11233_v37 = vmul.f32 0.0625, %v1053_v39 }
 0x219   : > { %v11231_v61 = vpop.eup %8686  ;;  %v2304_v55 = vadd.f32 1.0, %v8685_v8  ;;  %8696 = vpow2.f32 %v2200_v60  ;;  %v1802_v44 = vadd.f32 1e-05, %v1674_v36  ;;  %v1548_v34 = vmul.f32 %v11227_v54, %v11227_v54 }
 0x21a   : > { %16004 = vst [vmem:[#allocation58_spill] sm:$0xff] %v11233_v37  ;;  %v8689_v58 = vpop.eup %8688  ;;  %v2686_v38 = vmul.f32 %v2575_v50, %v11094_v0  ;;  %v1309_v40 = vpop.xlane.xlu1 %1308  ;;  %8698 = vrsqrt.f32 %v1801_v24  ;;  %v1803_v3 = vadd.f32 1e-05, %v1675_v52  ;;  %v11242_v39 = vadd.f32 %v10340_v22, %v1984_v29 }
 0x21b   : > { %v2368_v18 = vmul.f32 %v2304_v55, %v2304_v55  ;;  %v2305_v57 = vadd.f32 1.0, %v8689_v58  ;;  %v16006_v0 = vsub.f32 %v15963_v4, %v10982_v26  ;;  %v1484_v32 = vmul.f32 0.0625, %v1306_v21 }
 0x21c   : > { %8350 = vmatprep.mubr.msk.f32.mxu0 %vm933_vm1, %v2686_v38  ;;  %v1056_v30 = vpop.xlane.xlu0 %1055  ;;  %v1549_v24 = vmul.f32 %v11233_v37, %v11233_v37  ;;  %v1485_v8 = vmul.f32 0.0625, %v1309_v40  ;;  %8700 = vrsqrt.f32 %v1802_v44  ;;  %v2116_v50 = vmin.f32 %v11242_v39, 20.0 }
 0x21d   : > { %v1917_v60 = vmul.f32 %v11084_v14, %v16006_v0  ;;  %v2496_v13 = vadd.f32 1.0, %v2368_v18  ;;  %v2369_v36 = vmul.f32 %v2305_v57, %v2305_v57  ;;  %v1612_v29 = vsub.f32 %v1484_v32, %v1548_v34 }
 0x21e   : > { %v1059_v55 = vpop.xlane.xlu1 %1058  ;;  %v1613_v26 = vsub.f32 %v1485_v8, %v1549_v24  ;;  %v11252_v4 = vmul.f32 0.0625, %v1056_v30  ;;  %v2202_v21 = vmul.f32 1.442695, %v2116_v50  ;;  %v7714_v50 = vadd.f32 -1.0, %v2368_v18 }
 0x21f   : > { %v1985_v52 = vmul.f32 %v10328_v51, %v1917_v60  ;;  %8702 = vrcp.f32 %v2496_v13  ;;  %v2497_v58 = vadd.f32 1.0, %v2369_v36  ;;  %v8691_v14 = vpop.eup %8690  ;;  %v1676_v57 = vmax.f32 %v1612_v29, 0.0 }
 0x220   : > { %16007 = vst [vmem:[#allocation10_spill] sm:$0xff] %v11252_v4  ;;  %8704 = vrsqrt.f32 %v1803_v3  ;;  %v1312_v40 = vpop.xlane.xlu0 %1311  ;;  %v2306_v0 = vadd.f32 1.0, %v8691_v14  ;;  %v1677_v32 = vmax.f32 %v1613_v26, 0.0  ;;  %v1550_v29 = vmul.f32 %v11252_v4, %v11252_v4  ;;  %v16016_v4 = vld [vmem:[#allocation39_spill] sm:$0xff] }
 0x221   : > { %v11255_v38 = vadd.f32 %v10340_v22, %v1985_v52  ;;  %v8693_v44 = vpop.eup %8692  ;;  %8706 = vrcp.f32 %v2497_v58  ;;  %v1804_v24 = vadd.f32 1e-05, %v1676_v57  ;;  %v16009_v58 = vsub.f32 %v15964_v11, %v11002_v5 }
 0x222   : > { %v2577_v13 = vmul.f32 %v8693_v44, %v7713_v17  ;;  %8708 = vpow2.f32 %v2202_v21  ;;  %v1315_v8 = vpop.xlane.xlu1 %1314  ;;  %v11260_v3 = vpop.eup %8694  ;;  %v2370_v52 = vmul.f32 %v2306_v0, %v2306_v0  ;;  %v11269_v21 = vmul.f32 0.0625, %v1059_v55 }
 0x223   : > { %v2117_v30 = vmin.f32 %v11255_v38, 20.0  ;;  %v1918_v14 = vmul.f32 %v11102_v42, %v16009_v58  ;;  %v8697_v34 = vpop.eup %8696  ;;  %v16011_v57 = vsub.f32 %v15970_v53, %v11013_v31  ;;  %8710 = vrsqrt.f32 %v1804_v24 }
 0x224   : > { %v2687_v17 = vmul.f32 %v2577_v13, %v11135_v20  ;;  %16010 = vst [vmem:[#allocation60_spill] sm:$0xff] %v11269_v21  ;;  %v1062_v44 = vpop.xlane.xlu0 %1061  ;;  %v11275_v0 = vpop.eup %8698  ;;  %v2498_v56 = vadd.f32 1.0, %v2370_v52  ;;  %v2307_v37 = vadd.f32 1.0, %v8697_v34  ;;  %v1805_v5 = vadd.f32 1e-05, %v1677_v32 }
 0x225   : > { %v2204_v26 = vmul.f32 1.442695, %v2117_v30  ;;  %v1919_v18 = vmul.f32 %v11115_v12, %v16011_v57  ;;  %v7715_v11 = vadd.f32 -1.0, %v2369_v36  ;;  %v1986_v55 = vmul.f32 %v10328_v51, %v1918_v14 }
 0x226   : > { %8351 = vmatmul.mubr.msk.f32.gmra.mrb[80].mxu0 %vm933_vm1, %v2687_v17  ;;  %v1065_v13 = vpop.xlane.xlu1 %1064  ;;  %v2371_v31 = vmul.f32 %v2307_v37, %v2307_v37  ;;  %v1486_v12 = vmul.f32 0.0625, %v1312_v40  ;;  %v11282_v30 = vpop.eup %8700  ;;  %v7716_v34 = vadd.f32 -1.0, %v2370_v52  ;;  %v1551_v32 = vmul.f32 %v11269_v21, %v11269_v21 }
 0x227   : > { %8712 = vpow2.f32 %v2204_v26  ;;  %v1987_v53 = vmul.f32 %v10328_v51, %v1919_v18  ;;  %v11287_v36 = vadd.f32 %v10340_v22, %v1986_v55  ;;  %v1487_v24 = vmul.f32 0.0625, %v1315_v8  ;;  %v16014_v8 = vld [vmem:[#allocation36_spill] sm:$0xff] }
 0x228   : > { %8714 = vrcp.f32 %v2498_v56  ;;  %v1318_v58 = vpop.xlane.xlu0 %1317  ;;  %v2499_v26 = vadd.f32 1.0, %v2371_v31  ;;  %v1614_v37 = vsub.f32 %v1486_v12, %v1550_v29  ;;  %v11295_v18 = vmul.f32 0.0625, %v1062_v44 }
 0x229   : > { %v8703_v17 = vpop.eup %8702  ;;  %8716 = vrsqrt.f32 %v1805_v5  ;;  %v11290_v56 = vadd.f32 %v10340_v22, %v1987_v53  ;;  %v2118_v52 = vmin.f32 %v11287_v36, 20.0  ;;  %v1615_v57 = vsub.f32 %v1487_v24, %v1551_v32 }
 0x22a   : > { %v11292_v14 = vpop.eup %8704  ;;  %v2579_v40 = vmul.f32 %v8703_v17, %v7714_v50  ;;  %16013 = vst [vmem:[#allocation59_spill] sm:$0xff] %v11295_v18  ;;  %v1321_v20 = vpop.xlane.xlu1 %1320  ;;  %8718 = vrcp.f32 %v2499_v26  ;;  %v11300_v42 = vmul.f32 0.0625, %v1065_v13  ;;  %v1678_v17 = vmax.f32 %v1614_v37, 0.0 }
 0x22b   : > { %v8707_v55 = vpop.eup %8706  ;;  %v2119_v5 = vmin.f32 %v11290_v56, 20.0  ;;  %v2206_v50 = vmul.f32 1.442695, %v2118_v52  ;;  %v7717_v32 = vadd.f32 -1.0, %v2371_v31  ;;  %v1679_v54 = vmax.f32 %v1615_v57, 0.0  ;;  %v16018_v52 = vld [vmem:[#allocation21_spill] sm:$0xff] }
 0x22c   : > { %16015 = vst [vmem:[#allocation11_spill] sm:$0xff] %v11300_v42  ;;  %v8709_v53 = vpop.eup %8708  ;;  %v2688_v29 = vmul.f32 %v2579_v40, %v11161_v59  ;;  %v2581_v12 = vmul.f32 %v8707_v55, %v7715_v11  ;;  %v1068_v60 = vpop.xlane.xlu0 %1067  ;;  %v1552_v13 = vmul.f32 %v11295_v18, %v11295_v18  ;;  %v16017_v31 = vsub.f32 %v15975_v47, %v11035_v33  ;;  %v16019_v57 = vld [vmem:[#allocation4_spill] sm:$0xff] }
 0x22d   : > { %v2308_v44 = vadd.f32 1.0, %v8709_v53  ;;  %v2208_v24 = vmul.f32 1.442695, %v2119_v5  ;;  %8720 = vpow2.f32 %v2206_v50  ;;  %v11309_v11 = vpop.eup %8710  ;;  %v1806_v53 = vadd.f32 1e-05, %v1678_v17 }
 0x22e   : > { %8353 = vmatprep.mubr.msk.f32.mxu0 %vm933_vm1, %v2688_v29  ;;  %v2689_v26 = vmul.f32 %v2581_v12, %v11178_v10  ;;  %v1071_v59 = vpop.xlane.xlu1 %1070  ;;  %v1920_v40 = vmul.f32 %v11119_v23, %v16017_v31  ;;  %v16020_v10 = vsub.f32 %v16018_v52, %v16019_v57  ;;  %v1553_v29 = vmul.f32 %v11300_v42, %v11300_v42  ;;  %v16021_v23 = vld [vmem:[#allocation38_spill] sm:$0xff] }
 0x22f   : > { %v2372_v37 = vmul.f32 %v2308_v44, %v2308_v44  ;;  %8722 = vpow2.f32 %v2208_v24  ;;  %v1488_v12 = vmul.f32 0.0625, %v1318_v58  ;;  %v1489_v50 = vmul.f32 0.0625, %v1321_v20 }
 0x230   : > { %v1921_v55 = vmul.f32 %v11153_v6, %v16020_v10  ;;  %8354 = vmatmul.mubr.msk.f32.gmra.mrb[82].mxu0 %vm933_vm1, %v2689_v26  ;;  %v1324_v44 = vpop.xlane.xlu0 %1323  ;;  %v1807_v47 = vadd.f32 1e-05, %v1679_v54  ;;  %v1988_v6 = vmul.f32 %v10328_v51, %v1920_v40  ;;  %v11328_v18 = vmul.f32 0.0625, %v1068_v60 }
 0x231   : > { %v8713_v5 = vpop.eup %8712  ;;  %v2500_v21 = vadd.f32 1.0, %v2372_v37  ;;  %v1616_v26 = vsub.f32 %v1488_v12, %v1552_v13  ;;  %v1617_v20 = vsub.f32 %v1489_v50, %v1553_v29  ;;  %v7718_v13 = vadd.f32 -1.0, %v2372_v37 }
 0x232   : > { %v8715_v24 = vpop.eup %8714  ;;  %v2309_v33 = vadd.f32 1.0, %v8713_v5  ;;  %v1989_v57 = vmul.f32 %v10328_v51, %v1921_v55  ;;  %v1327_v17 = vpop.xlane.xlu1 %1326  ;;  %v11332_v54 = vadd.f32 %v10340_v22, %v1988_v6  ;;  %v1554_v50 = vmul.f32 %v11328_v18, %v11328_v18 }
 0x233   : > { %v2583_v52 = vmul.f32 %v8715_v24, %v7716_v34  ;;  %v11326_v10 = vpop.eup %8716  ;;  %8724 = vrcp.f32 %v2500_v21  ;;  %v1680_v40 = vmax.f32 %v1616_v26, 0.0  ;;  %v1681_v31 = vmax.f32 %v1617_v20, 0.0 }
 0x234   : > { %v2373_v58 = vmul.f32 %v2309_v33, %v2309_v33  ;;  %v11335_v34 = vadd.f32 %v10340_v22, %v1989_v57  ;;  %v1074_v24 = vpop.xlane.xlu0 %1073  ;;  %v8719_v55 = vpop.eup %8718  ;;  %8726 = vrsqrt.f32 %v1806_v53  ;;  %v2120_v60 = vmin.f32 %v11332_v54, 20.0 }
 0x235   : > { %v2690_v5 = vmul.f32 %v2583_v52, %v11194_v19  ;;  %v2585_v21 = vmul.f32 %v8719_v55, %v7717_v32  ;;  %8728 = vrsqrt.f32 %v1807_v47  ;;  %v11342_v33 = vmul.f32 0.0625, %v1071_v59 }
 0x236   : > { %v2501_v12 = vadd.f32 1.0, %v2373_v58  ;;  %v2121_v19 = vmin.f32 %v11335_v34, 20.0  ;;  %v1077_v29 = vpop.xlane.xlu1 %1076  ;;  %v16022_v37 = vsub.f32 %v15981_v27, %v11070_v9  ;;  %v2210_v47 = vmul.f32 1.442695, %v2120_v60 }
 0x237   : > { %8356 = vmatprep.mubr.msk.f32.mxu0 %vm933_vm1, %v2690_v5  ;;  %v8721_v52 = vpop.eup %8720  ;;  %v2691_v32 = vmul.f32 %v2585_v21, %v11215_v63  ;;  %v1808_v57 = vadd.f32 1e-05, %v1680_v40  ;;  %v7719_v5 = vadd.f32 -1.0, %v2373_v58  ;;  %v1555_v59 = vmul.f32 %v11342_v33, %v11342_v33 }
 0x238   : > { %8730 = vrcp.f32 %v2501_v12  ;;  %v1922_v53 = vmul.f32 %v11156_v43, %v16022_v37  ;;  %v2212_v6 = vmul.f32 1.442695, %v2121_v19  ;;  %v1330_v26 = vpop.xlane.xlu0 %1329  ;;  %v2310_v55 = vadd.f32 1.0, %v8721_v52 }
 0x239   : > { %v8723_v20 = vpop.eup %8722  ;;  %v1809_v12 = vadd.f32 1e-05, %v1681_v31  ;;  %8357 = vmatmul.mubr.msk.f32.gmra.mrb[84].mxu0 %vm933_vm1, %v2691_v32  ;;  %8732 = vpow2.f32 %v2210_v47  ;;  %v16023_v9 = vsub.f32 %v15984_v1, %v11082_v35  ;;  %v1490_v58 = vmul.f32 0.0625, %v1324_v44 }
 0x23a   : > { %v2311_v42 = vadd.f32 1.0, %v8723_v20  ;;  %v1990_v27 = vmul.f32 %v10328_v51, %v1922_v53  ;;  %v1333_v63 = vpop.xlane.xlu1 %1332  ;;  %v2374_v40 = vmul.f32 %v2310_v55, %v2310_v55  ;;  %8734 = vpow2.f32 %v2212_v6  ;;  %v16025_v6 = vld [vmem:[#allocation41_spill] sm:$0xff] }
 0x23b   : > { %v1923_v43 = vmul.f32 %v11170_v49, %v16023_v9  ;;  %v1491_v21 = vmul.f32 0.0625, %v1327_v17  ;;  %8736 = vrsqrt.f32 %v1808_v57  ;;  %v1618_v32 = vsub.f32 %v1490_v58, %v1554_v50  ;;  %v16026_v9 = vld [vmem:[#allocation40_spill] sm:$0xff] }
 0x23c   : > { %v2375_v31 = vmul.f32 %v2311_v42, %v2311_v42  ;;  %v11358_v60 = vadd.f32 %v10340_v22, %v1990_v27  ;;  %v1080_v37 = vpop.xlane.xlu0 %1079  ;;  %v2502_v53 = vadd.f32 1.0, %v2374_v40  ;;  %v11361_v35 = vmul.f32 0.0625, %v1074_v24 }
 0x23d   : > { %v1991_v19 = vmul.f32 %v10328_v51, %v1923_v43  ;;  %v8725_v52 = vpop.eup %8724  ;;  %v1619_v47 = vsub.f32 %v1491_v21, %v1555_v59  ;;  %8738 = vrsqrt.f32 %v1809_v12  ;;  %v1682_v55 = vmax.f32 %v1618_v32, 0.0 }
 0x23e   : > { %16024 = vst [vmem:[#allocation12_spill] sm:$0xff] %v11361_v35  ;;  %v2587_v1 = vmul.f32 %v8725_v52, %v7718_v13  ;;  %v2503_v49 = vadd.f32 1.0, %v2375_v31  ;;  %v2122_v44 = vmin.f32 %v11358_v60, 20.0  ;;  %v1083_v17 = vpop.xlane.xlu1 %1082  ;;  %v11364_v42 = vpop.eup %8726  ;;  %8740 = vrcp.f32 %v2502_v53 }
 0x23f   : > { %v11369_v20 = vadd.f32 %v10340_v22, %v1991_v19  ;;  %v11371_v50 = vpop.eup %8728  ;;  %v1683_v12 = vmax.f32 %v1619_v47, 0.0  ;;  %v7720_v27 = vadd.f32 -1.0, %v2374_v40  ;;  %v1556_v21 = vmul.f32 %v11361_v35, %v11361_v35 }
 0x240   : > { %v2692_v24 = vmul.f32 %v2587_v1, %v11242_v39  ;;  %8742 = vrcp.f32 %v2503_v49  ;;  %v2214_v13 = vmul.f32 1.442695, %v2122_v44  ;;  %v11379_v19 = vpop.xlane.xlu0 %1335  ;;  %v1810_v39 = vadd.f32 1e-05, %v1682_v55  ;;  %v16029_v1 = vld [vmem:[#allocation5_spill] sm:$0xff] }
 0x241   : > { %v2123_v58 = vmin.f32 %v11369_v20, 20.0  ;;  %v16027_v53 = vsub.f32 %v15985_v16, %v11096_v41  ;;  %v11386_v47 = vmul.f32 0.0625, %v1077_v29  ;;  %v16030_v49 = vsub.f32 %v15988_v7, %v16029_v1 }
 0x242   : > { %v8731_v59 = vpop.eup %8730  ;;  %8359 = vmatprep.mubr.msk.f32.mxu0 %vm933_vm1, %v2692_v24  ;;  %8744 = vpow2.f32 %v2214_v13  ;;  %v1492_v43 = vmul.f32 0.0625, %v1330_v26  ;;  %v11392_v57 = vpop.xlane.xlu1 %1338  ;;  %v7721_v55 = vadd.f32 -1.0, %v2375_v31  ;;  %v1811_v13 = vadd.f32 1e-05, %v1683_v12 }
 0x243   : > { %v2589_v52 = vmul.f32 %v8731_v59, %v7719_v5  ;;  %v1924_v40 = vmul.f32 %v11200_v28, %v16027_v53  ;;  %v2216_v32 = vmul.f32 1.442695, %v2123_v58  ;;  %16028 = vst [vmem:[#allocation13_spill] sm:$0xff] %v11386_v47  ;;  %v1925_v44 = vmul.f32 %v11205_v48, %v16030_v49  ;;  %v8733_v24 = vpop.eup %8732 }
 0x244   : > { %v8735_v28 = vpop.eup %8734  ;;  %v2312_v59 = vadd.f32 1.0, %v8733_v24  ;;  %v1620_v26 = vsub.f32 %v1492_v43, %v1556_v21  ;;  %v1557_v12 = vmul.f32 %v11386_v47, %v11386_v47  ;;  %v11414_v43 = vmul.f32 0.0625, %v1080_v37 }
 0x245   : > { %v2693_v5 = vmul.f32 %v2589_v52, %v11255_v38  ;;  %8746 = vpow2.f32 %v2216_v32  ;;  %v1992_v29 = vmul.f32 %v10328_v51, %v1924_v40  ;;  %v1993_v7 = vmul.f32 %v10328_v51, %v1925_v44  ;;  %v11399_v58 = vpop.eup %8736  ;;  %v1086_v40 = vpop.xlane.xlu0 %1085 }
 0x246   : > { %v2313_v48 = vadd.f32 1.0, %v8735_v28  ;;  %8748 = vrsqrt.f32 %v1810_v39  ;;  %v1493_v38 = vmul.f32 0.0625, %v1333_v63  ;;  %v2376_v31 = vmul.f32 %v2312_v59, %v2312_v59  ;;  %16033 = vst [vmem:[#allocation14_spill] sm:$0xff] %v11414_v43  ;;  %v1089_v28 = vpop.xlane.xlu1 %1088 }
 0x247   : > { %8360 = vmatmul.mubr.msk.f32.gmra.mrb[86].mxu0 %vm933_vm1, %v2693_v5  ;;  %v11405_v52 = vadd.f32 %v10340_v22, %v1992_v29  ;;  %v11408_v53 = vadd.f32 %v10340_v22, %v1993_v7  ;;  %v11410_v32 = vpop.eup %8738  ;;  %8750 = vrsqrt.f32 %v1811_v13  ;;  %v1684_v16 = vmax.f32 %v1620_v26, 0.0 }
 0x248   : > { %v2377_v1 = vmul.f32 %v2313_v48, %v2313_v48  ;;  %v8741_v63 = vpop.eup %8740  ;;  %v2504_v21 = vadd.f32 1.0, %v2376_v31  ;;  %v1621_v5 = vsub.f32 %v1493_v38, %v1557_v12  ;;  %v11418_v35 = vmul.f32 0.0625, %v1083_v17 }
 0x249   : > { %v2124_v44 = vmin.f32 %v11405_v52, 20.0  ;;  %v2125_v24 = vmin.f32 %v11408_v53, 20.0  ;;  %v2591_v29 = vmul.f32 %v8741_v63, %v7720_v27  ;;  %v7722_v49 = vadd.f32 -1.0, %v2376_v31  ;;  %v11424_v26 = vpop.xlane.xlu0 %1341  ;;  %v16035_v63 = vld [vmem:[#allocation26_spill] sm:$0xff] }
 0x24a   : > { %v8743_v59 = vpop.eup %8742  ;;  %v2505_v7 = vadd.f32 1.0, %v2377_v1  ;;  %16034 = vst [vmem:[#allocation63_spill] sm:$0xff] %v11418_v35  ;;  %8752 = vrcp.f32 %v2504_v21  ;;  %v1558_v41 = vmul.f32 %v11414_v43, %v11414_v43  ;;  %v1685_v27 = vmax.f32 %v1621_v5, 0.0  ;;  %v16036_v21 = vld [vmem:[#allocation6_spill] sm:$0xff] }
 0x24b   : > { %v2593_v13 = vmul.f32 %v8743_v59, %v7721_v55  ;;  %v2218_v48 = vmul.f32 1.442695, %v2124_v44  ;;  %v2220_v39 = vmul.f32 1.442695, %v2125_v24  ;;  %v2694_v47 = vmul.f32 %v2591_v29, %v11287_v36  ;;  %v16039_v5 = vld [vmem:[#allocation50_spill] sm:$0xff] }
 0x24c   : > { %v8745_v37 = vpop.eup %8744  ;;  %8754 = vrcp.f32 %v2505_v7  ;;  %v7723_v17 = vadd.f32 -1.0, %v2377_v1  ;;  %v1812_v55 = vadd.f32 1e-05, %v1684_v16  ;;  %v16037_v36 = vsub.f32 %v16035_v63, %v16036_v21  ;;  %v1345_v16 = vpop.xlane.xlu1 %1344 }
 0x24d   : > { %v2695_v38 = vmul.f32 %v2593_v13, %v11290_v56  ;;  %v2314_v12 = vadd.f32 1.0, %v8745_v37  ;;  %8756 = vpow2.f32 %v2218_v48  ;;  %8362 = vmatprep.mubr.msk.f32.mxu0 %vm933_vm1, %v2694_v47  ;;  %v16040_v29 = vsub.f32 %v15994_v62, %v16039_v5 }
 0x24e   : > { %8758 = vpow2.f32 %v2220_v39  ;;  %v1926_v31 = vmul.f32 %v11221_v15, %v16037_v36  ;;  %v1494_v1 = vmul.f32 0.0625, %v11379_v19  ;;  %v1559_v15 = vmul.f32 %v11418_v35, %v11418_v35 }
 0x24f   : > { %v8747_v44 = vpop.eup %8746  ;;  %8363 = vmatmul.mubr.msk.f32.gmra.mrb[88].mxu0 %vm933_vm1, %v2695_v38  ;;  %v2378_v24 = vmul.f32 %v2314_v12, %v2314_v12  ;;  %v1927_v47 = vmul.f32 %v11231_v61, %v16040_v29  ;;  %v1495_v48 = vmul.f32 0.0625, %v11392_v57  ;;  %v1813_v38 = vadd.f32 1e-05, %v1685_v27  ;;  %v1092_v27 = vpop.xlane.xlu0 %1091 }
 0x250   : > { %v11439_v39 = vpop.eup %8748  ;;  %v2315_v7 = vadd.f32 1.0, %v8747_v44  ;;  %v1994_v13 = vmul.f32 %v10328_v51, %v1926_v31  ;;  %v1622_v62 = vsub.f32 %v1494_v1, %v1558_v41  ;;  %v11456_v5 = vmul.f32 0.0625, %v1086_v40 }
 0x251   : > { %v2506_v37 = vadd.f32 1.0, %v2378_v24  ;;  %v1995_v12 = vmul.f32 %v10328_v51, %v1927_v47  ;;  %v11446_v63 = vpop.eup %8750  ;;  %v1623_v44 = vsub.f32 %v1495_v48, %v1559_v15  ;;  %v11460_v21 = vmul.f32 0.0625, %v1089_v28  ;;  %v11462_v15 = vpop.xlane.xlu1 %1094 }
 0x252   : > { %v2379_v61 = vmul.f32 %v2315_v7, %v2315_v7  ;;  %v11451_v36 = vadd.f32 %v10340_v22, %v1994_v13  ;;  %v1686_v57 = vmax.f32 %v1622_v62, 0.0  ;;  %v7724_v7 = vadd.f32 -1.0, %v2378_v24 }
 0x253   : > { %8760 = vrcp.f32 %v2506_v37  ;;  %v11454_v31 = vadd.f32 %v10340_v22, %v1995_v12  ;;  %v1687_v47 = vmax.f32 %v1623_v44, 0.0  ;;  %v1560_v44 = vmul.f32 %v11456_v5, %v11456_v5 }
 0x254   : > { %v2507_v29 = vadd.f32 1.0, %v2379_v61  ;;  %8762 = vrsqrt.f32 %v1812_v55  ;;  %v2126_v41 = vmin.f32 %v11451_v36, 20.0  ;;  %v8753_v1 = vpop.eup %8752  ;;  %v1814_v12 = vadd.f32 1e-05, %v1686_v57 }
 0x255   : > { %8764 = vrsqrt.f32 %v1813_v38  ;;  %v2127_v13 = vmin.f32 %v11454_v31, 20.0  ;;  %v2595_v37 = vmul.f32 %v8753_v1, %v7722_v49  ;;  %v7725_v55 = vadd.f32 -1.0, %v2379_v61  ;;  %v16042_v49 = vld [vmem:[#allocation52_spill] sm:$0xff]  ;;  %v1348_v61 = vpop.xlane.xlu0 %1347  ;;  %v16045_v1 = vld [vmem:[#allocation7_spill] sm:$0xff] }
 0x256   : > { %v8755_v48 = vpop.eup %8754  ;;  %8766 = vrcp.f32 %v2507_v29  ;;  %v2222_v40 = vmul.f32 1.442695, %v2126_v41  ;;  %v1815_v28 = vadd.f32 1e-05, %v1687_v47  ;;  %v16043_v57 = vsub.f32 %v15998_v25, %v16042_v49  ;;  %v16044_v41 = vld [vmem:[#allocation28_spill] sm:$0xff] }
 0x257   : > { %v8757_v62 = vpop.eup %8756  ;;  %v2597_v59 = vmul.f32 %v8755_v48, %v7723_v17  ;;  %v2224_v35 = vmul.f32 1.442695, %v2127_v13  ;;  %v2696_v38 = vmul.f32 %v2595_v37, %v11332_v54  ;;  %v16046_v54 = vsub.f32 %v16044_v41, %v16045_v1 }
 0x258   : > { %v8759_v24 = vpop.eup %8758  ;;  %v2316_v19 = vadd.f32 1.0, %v8757_v62  ;;  %8768 = vpow2.f32 %v2222_v40  ;;  %v1928_v17 = vmul.f32 %v11260_v3, %v16043_v57  ;;  %v1496_v47 = vmul.f32 0.0625, %v11424_v26 }
 0x259   : > { %v2697_v43 = vmul.f32 %v2597_v59, %v11335_v34  ;;  %v2317_v56 = vadd.f32 1.0, %v8759_v24  ;;  %8770 = vpow2.f32 %v2224_v35  ;;  %8365 = vmatprep.mubr.msk.f32.mxu0 %vm933_vm1, %v2696_v38  ;;  %v1929_v13 = vmul.f32 %v11275_v0, %v16046_v54  ;;  %v1351_v59 = vpop.xlane.xlu1 %1350 }
 0x25a   : > { %v2380_v29 = vmul.f32 %v2316_v19, %v2316_v19  ;;  %8772 = vrsqrt.f32 %v1814_v12  ;;  %v1561_v25 = vmul.f32 %v11460_v21, %v11460_v21  ;;  %v1996_v3 = vmul.f32 %v10328_v51, %v1928_v17  ;;  %v1098_v17 = vpop.xlane.xlu0 %1097 }
 0x25b   : > { %8366 = vmatmul.mubr.msk.f32.gmra.mrb[90].mxu0 %vm933_vm1, %v2697_v43  ;;  %v2381_v34 = vmul.f32 %v2317_v56, %v2317_v56  ;;  %v1497_v35 = vmul.f32 0.0625, %v1345_v16  ;;  %8774 = vrsqrt.f32 %v1815_v28  ;;  %v1997_v19 = vmul.f32 %v10328_v51, %v1929_v13  ;;  %v16048_v16 = vld [vmem:[#allocation47_spill] sm:$0xff] }
 0x25c   : > { %v2508_v48 = vadd.f32 1.0, %v2380_v29  ;;  %v1624_v37 = vsub.f32 %v1496_v47, %v1560_v44  ;;  %v11484_v0 = vadd.f32 %v10340_v22, %v1996_v3  ;;  %v11486_v43 = vmul.f32 0.0625, %v1092_v27  ;;  %v16049_v44 = vld [vmem:[#allocation46_spill] sm:$0xff] }
 0x25d   : > { %v8761_v40 = vpop.eup %8760  ;;  %v2509_v12 = vadd.f32 1.0, %v2381_v34  ;;  %v1625_v26 = vsub.f32 %v1497_v35, %v1561_v25  ;;  %v11493_v38 = vadd.f32 %v10340_v22, %v1997_v19  ;;  %v7726_v1 = vadd.f32 -1.0, %v2380_v29 }
 0x25e   : > { %16047 = vst [vmem:[#allocation15_spill] sm:$0xff] %v11486_v43  ;;  %v11488_v56 = vpop.eup %8762  ;;  %v2599_v62 = vmul.f32 %v8761_v40, %v7724_v7  ;;  %8776 = vrcp.f32 %v2508_v48  ;;  %v2128_v57 = vmin.f32 %v11484_v0, 20.0  ;;  %v1688_v27 = vmax.f32 %v1624_v37, 0.0  ;;  %v1101_v48 = vpop.xlane.xlu1 %1100 }
 0x25f   : > { %v11495_v28 = vpop.eup %8764  ;;  %8778 = vrcp.f32 %v2509_v12  ;;  %v7727_v54 = vadd.f32 -1.0, %v2381_v34  ;;  %v2129_v13 = vmin.f32 %v11493_v38, 20.0  ;;  %v1689_v3 = vmax.f32 %v1625_v26, 0.0  ;;  %v16051_v12 = vld [vmem:[#allocation33_spill] sm:$0xff] }
 0x260   : > { %v8767_v41 = vpop.eup %8766  ;;  %v2698_v7 = vmul.f32 %v2599_v62, %v11358_v60  ;;  %v2226_v25 = vmul.f32 1.442695, %v2128_v57  ;;  %v1562_v35 = vmul.f32 %v11486_v43, %v11486_v43  ;;  %v11506_v37 = vmul.f32 0.0625, %v11462_v15  ;;  %v16052_v60 = vld [vmem:[#allocation53_spill] sm:$0xff] }
 0x261   : > { %v2601_v47 = vmul.f32 %v8767_v41, %v7725_v55  ;;  %v2228_v40 = vmul.f32 1.442695, %v2129_v13  ;;  %v16053_v29 = vsub.f32 %v16051_v12, %v16052_v60  ;;  %v16054_v55 = vsub.f32 %v16002_v2, %v11198_v46 }
 0x262   : > { %v8769_v19 = vpop.eup %8768  ;;  %8368 = vmatprep.mubr.msk.f32.mxu0 %vm933_vm1, %v2698_v7  ;;  %16050 = vst [vmem:[#allocation65_spill] sm:$0xff] %v11506_v37  ;;  %8780 = vpow2.f32 %v2226_v25  ;;  %v1816_v7 = vadd.f32 1e-05, %v1688_v27  ;;  %v1817_v2 = vadd.f32 1e-05, %v1689_v3  ;;  %v1498_v60 = vmul.f32 0.0625, %v1348_v61 }
 0x263   : > { %v1930_v34 = vmul.f32 %v11282_v30, %v16053_v29  ;;  %v1931_v26 = vmul.f32 %v11292_v14, %v16054_v55  ;;  %v8771_v62 = vpop.eup %8770  ;;  %v2699_v57 = vmul.f32 %v2601_v47, %v11369_v20  ;;  %v2318_v41 = vadd.f32 1.0, %v8769_v19  ;;  %v1354_v20 = vpop.xlane.xlu0 %1353 }
 0x264   : > { %v11517_v13 = vpop.eup %8772  ;;  %v2319_v15 = vadd.f32 1.0, %v8771_v62  ;;  %8782 = vpow2.f32 %v2228_v40  ;;  %v1563_v25 = vmul.f32 %v11506_v37, %v11506_v37  ;;  %v1499_v40 = vmul.f32 0.0625, %v1351_v59  ;;  %v1357_v55 = vpop.xlane.xlu1 %1356 }
 0x265   : > { %v1998_v30 = vmul.f32 %v10328_v51, %v1930_v34  ;;  %8369 = vmatmul.mubr.msk.f32.gmra.mrb[92].mxu0 %vm933_vm1, %v2699_v57  ;;  %v2382_v46 = vmul.f32 %v2318_v41, %v2318_v41  ;;  %v1999_v14 = vmul.f32 %v10328_v51, %v1931_v26  ;;  %v11524_v47 = vpop.eup %8774  ;;  %8784 = vrsqrt.f32 %v1816_v7 }
 0x266   : > { %v2383_v27 = vmul.f32 %v2319_v15, %v2319_v15  ;;  %v1626_v3 = vsub.f32 %v1498_v60, %v1562_v35  ;;  %v1627_v57 = vsub.f32 %v1499_v40, %v1563_v25  ;;  %v11535_v41 = vmul.f32 0.0625, %v1098_v17  ;;  %v16057_v60 = vld [vmem:[#allocation49_spill] sm:$0xff] }
 0x267   : > { %v11529_v19 = vadd.f32 %v10340_v22, %v1998_v30  ;;  %v2510_v29 = vadd.f32 1.0, %v2382_v46  ;;  %v11532_v34 = vadd.f32 %v10340_v22, %v1999_v14  ;;  %v1104_v25 = vpop.xlane.xlu0 %1103 }
 0x268   : > { %v8777_v26 = vpop.eup %8776  ;;  %v2511_v61 = vadd.f32 1.0, %v2383_v27  ;;  %16056 = vst [vmem:[#allocation16_spill] sm:$0xff] %v11535_v41  ;;  %v1690_v59 = vmax.f32 %v1626_v3, 0.0  ;;  %v1691_v14 = vmax.f32 %v1627_v57, 0.0  ;;  %v1564_v40 = vmul.f32 %v11535_v41, %v11535_v41  ;;  %v16060_v3 = vld [vmem:[#allocation34_spill] sm:$0xff] }
 0x269   : > { %v2130_v62 = vmin.f32 %v11529_v19, 20.0  ;;  %v8779_v15 = vpop.eup %8778  ;;  %v2603_v12 = vmul.f32 %v8777_v26, %v7726_v1  ;;  %8786 = vrcp.f32 %v2510_v29  ;;  %v2131_v30 = vmin.f32 %v11532_v34, 20.0  ;;  %v16061_v26 = vld [vmem:[#allocation58_spill] sm:$0xff] }
 0x26a   : > { %v2605_v24 = vmul.f32 %v8779_v15, %v7727_v54  ;;  %8788 = vrcp.f32 %v2511_v61  ;;  %v1818_v1 = vadd.f32 1e-05, %v1690_v59  ;;  %v11545_v54 = vmul.f32 0.0625, %v1101_v48 }
 0x26b   : > { %v2230_v7 = vmul.f32 1.442695, %v2130_v62  ;;  %v2700_v35 = vmul.f32 %v2603_v12, %v11405_v52  ;;  %8790 = vrsqrt.f32 %v1817_v2  ;;  %v2232_v49 = vmul.f32 1.442695, %v2131_v30  ;;  %v16058_v52 = vld [vmem:[#allocation9_spill] sm:$0xff] }
 0x26c   : > { %v2701_v17 = vmul.f32 %v2605_v24, %v11408_v53  ;;  %v8781_v29 = vpop.eup %8780  ;;  %v16059_v12 = vsub.f32 %v16005_v45, %v16058_v52  ;;  %v16062_v61 = vsub.f32 %v16060_v3, %v16061_v26  ;;  %v1107_v24 = vpop.xlane.xlu1 %1106  ;;  %v1819_v15 = vadd.f32 1e-05, %v1691_v14 }
 0x26d   : > { %8792 = vpow2.f32 %v2230_v7  ;;  %8371 = vmatprep.mubr.msk.f32.mxu1 %vm933_vm1, %v2700_v35  ;;  %v2320_v57 = vadd.f32 1.0, %v8781_v29  ;;  %v1500_v30 = vmul.f32 0.0625, %v1354_v20  ;;  %v7728_v48 = vadd.f32 -1.0, %v2382_v46  ;;  %v1360_v46 = vpop.xlane.xlu0 %1359 }
 0x26e   : > { %8794 = vpow2.f32 %v2232_v49  ;;  %v1932_v2 = vmul.f32 %v11309_v11, %v16059_v12  ;;  %v1933_v53 = vmul.f32 %v11326_v10, %v16062_v61  ;;  %v8783_v62 = vpop.eup %8782  ;;  %8372 = vmatmul.mubr.msk.f32.vlgmr.msra.gmra.mrb[0].mxu1 %vm933_vm1, %v2701_v17  ;;  %v1501_v49 = vmul.f32 0.0625, %v1357_v55 }
 0x26f   : > { %v7729_v59 = vadd.f32 -1.0, %v2383_v27  ;;  %v2321_v7 = vadd.f32 1.0, %v8783_v62  ;;  %v1565_v45 = vmul.f32 %v11545_v54, %v11545_v54  ;;  %v2384_v11 = vmul.f32 %v2320_v57, %v2320_v57  ;;  %v11560_v12 = vpop.eup %8784 }
 0x270   : > { %v2000_v35 = vmul.f32 %v10328_v51, %v1932_v2  ;;  %v2001_v52 = vmul.f32 %v10328_v51, %v1933_v53  ;;  %v1628_v10 = vsub.f32 %v1500_v30, %v1564_v40  ;;  %8796 = vrsqrt.f32 %v1818_v1  ;;  %v1363_v1 = vpop.xlane.xlu1 %1362 }
 0x271   : > { %v2385_v3 = vmul.f32 %v2321_v7, %v2321_v7  ;;  %v1629_v55 = vsub.f32 %v1501_v49, %v1565_v45  ;;  %v2512_v27 = vadd.f32 1.0, %v2384_v11  ;;  %8798 = vrsqrt.f32 %v1819_v15  ;;  %v16065_v45 = vld [vmem:[#allocation54_spill] sm:$0xff]  ;;  %v1110_v37 = vpop.xlane.xlu0 %1109 }
 0x272   : > { %v11565_v17 = vadd.f32 %v10340_v22, %v2000_v35  ;;  %v11568_v29 = vadd.f32 %v10340_v22, %v2001_v52  ;;  %v1692_v40 = vmax.f32 %v1628_v10, 0.0  ;;  %v11570_v53 = vmul.f32 0.0625, %v1104_v25 }
 0x273   : > { %v8787_v2 = vpop.eup %8786  ;;  %v2513_v26 = vadd.f32 1.0, %v2385_v3  ;;  %v1693_v61 = vmax.f32 %v1629_v55, 0.0  ;;  %8800 = vrcp.f32 %v2512_v27  ;;  %v11578_v52 = vmul.f32 0.0625, %v1107_v24 }
 0x274   : > { %16064 = vst [vmem:[#allocation67_spill] sm:$0xff] %v11570_v53  ;;  %v8789_v62 = vpop.eup %8788  ;;  %v2607_v57 = vmul.f32 %v8787_v2, %v7728_v48  ;;  %v2132_v30 = vmin.f32 %v11565_v17, 20.0  ;;  %v2133_v15 = vmin.f32 %v11568_v29, 20.0  ;;  %v7730_v55 = vadd.f32 -1.0, %v2384_v11  ;;  %v16066_v11 = vld [vmem:[#allocation37_spill] sm:$0xff] }
 0x275   : > { %v11574_v49 = vpop.eup %8790  ;;  %v2609_v7 = vmul.f32 %v8789_v62, %v7729_v59  ;;  %8802 = vrcp.f32 %v2513_v26  ;;  %v7731_v43 = vadd.f32 -1.0, %v2385_v3  ;;  %v1820_v14 = vadd.f32 1e-05, %v1692_v40  ;;  %v16067_v62 = vld [vmem:[#allocation10_spill] sm:$0xff]  ;;  %v16069_v3 = vld [vmem:[#allocation60_spill] sm:$0xff] }
 0x276   : > { %v2702_v25 = vmul.f32 %v2607_v57, %v11451_v36  ;;  %v2234_v20 = vmul.f32 1.442695, %v2132_v30  ;;  %v2236_v48 = vmul.f32 1.442695, %v2133_v15  ;;  %v1821_v26 = vadd.f32 1e-05, %v1693_v61  ;;  %v1113_v15 = vpop.xlane.xlu1 %1112 }
 0x277   : > { %v8793_v10 = vpop.eup %8792  ;;  %v2703_v2 = vmul.f32 %v2609_v7, %v11454_v31  ;;  %v1566_v24 = vmul.f32 %v11570_v53, %v11570_v53  ;;  %v16068_v57 = vsub.f32 %v16066_v11, %v16067_v62  ;;  %v16070_v40 = vsub.f32 %v16014_v8, %v16069_v3  ;;  %v1366_v62 = vpop.xlane.xlu0 %1365  ;;  %v16073_v3 = vld [vmem:[#allocation59_spill] sm:$0xff] }
 0x278   : > { %v8795_v27 = vpop.eup %8794  ;;  %v2322_v41 = vadd.f32 1.0, %v8793_v10  ;;  %8374 = vmatprep.mubr.msk.f32.mxu1 %vm933_vm1, %v2702_v25  ;;  %8804 = vpow2.f32 %v2234_v20  ;;  %v1567_v61 = vmul.f32 %v11578_v52, %v11578_v52  ;;  %v1502_v7 = vmul.f32 0.0625, %v1360_v46 }
 0x279   : > { %v2323_v59 = vadd.f32 1.0, %v8795_v27  ;;  %8375 = vmatmul.mubr.msk.f32.gmra.mrb[2].mxu1 %vm933_vm1, %v2703_v2  ;;  %8806 = vpow2.f32 %v2236_v48  ;;  %v1934_v31 = vmul.f32 %v11364_v42, %v16068_v57  ;;  %v1935_v30 = vmul.f32 %v11371_v50, %v16070_v40  ;;  %v16071_v50 = vld [vmem:[#allocation57_spill] sm:$0xff] }
 0x27a   : > { %v2386_v36 = vmul.f32 %v2322_v41, %v2322_v41  ;;  %v1503_v10 = vmul.f32 0.0625, %v1363_v1  ;;  %v11596_v25 = vpop.eup %8796  ;;  %8808 = vrsqrt.f32 %v1820_v14  ;;  %v11610_v14 = vmul.f32 0.0625, %v1110_v37 }
 0x27b   : > { %v2387_v20 = vmul.f32 %v2323_v59, %v2323_v59  ;;  %v2002_v48 = vmul.f32 %v10328_v51, %v1934_v31  ;;  %v2003_v42 = vmul.f32 %v10328_v51, %v1935_v30  ;;  %v11600_v27 = vpop.eup %8798  ;;  %v1630_v59 = vsub.f32 %v1502_v7, %v1566_v24  ;;  %v16072_v31 = vld [vmem:[#allocation56_spill] sm:$0xff] }
 0x27c   : > { %v2514_v41 = vadd.f32 1.0, %v2386_v36  ;;  %v1631_v11 = vsub.f32 %v1503_v10, %v1567_v61  ;;  %v11614_v30 = vmul.f32 0.0625, %v1113_v15  ;;  %v7732_v37 = vadd.f32 -1.0, %v2386_v36 }
 0x27d   : > { %v2515_v8 = vadd.f32 1.0, %v2387_v20  ;;  %v11605_v46 = vadd.f32 %v10340_v22, %v2002_v48  ;;  %v11608_v1 = vadd.f32 %v10340_v22, %v2003_v42  ;;  %v8801_v57 = vpop.eup %8800  ;;  %v1694_v40 = vmax.f32 %v1630_v59, 0.0 }
 0x27e   : > { %8810 = vrcp.f32 %v2514_v41  ;;  %v2611_v61 = vmul.f32 %v8801_v57, %v7730_v55  ;;  %v1369_v41 = vpop.xlane.xlu1 %1368  ;;  %v7733_v42 = vadd.f32 -1.0, %v2387_v20  ;;  %v1695_v2 = vmax.f32 %v1631_v11, 0.0  ;;  %v16075_v11 = vld [vmem:[#allocation11_spill] sm:$0xff] }
 0x27f   : > { %8812 = vrcp.f32 %v2515_v8  ;;  %v8803_v24 = vpop.eup %8802  ;;  %v2134_v7 = vmin.f32 %v11605_v46, 20.0  ;;  %v2135_v10 = vmin.f32 %v11608_v1, 20.0  ;;  %v1568_v15 = vmul.f32 %v11610_v14, %v11610_v14 }
 0x280   : > { %8814 = vrsqrt.f32 %v1821_v26  ;;  %v2613_v48 = vmul.f32 %v8803_v24, %v7731_v43  ;;  %v2704_v8 = vmul.f32 %v2611_v61, %v11484_v0  ;;  %v1822_v26 = vadd.f32 1e-05, %v1694_v40  ;;  %v1116_v40 = vpop.xlane.xlu0 %1115 }
 0x281   : > { %v2238_v35 = vmul.f32 1.442695, %v2134_v7  ;;  %v2240_v53 = vmul.f32 1.442695, %v2135_v10  ;;  %v1569_v57 = vmul.f32 %v11614_v30, %v11614_v30  ;;  %v16074_v43 = vsub.f32 %v16016_v4, %v16073_v3 }
 0x282   : > { %v8805_v59 = vpop.eup %8804  ;;  %v2705_v55 = vmul.f32 %v2613_v48, %v11493_v38  ;;  %8377 = vmatprep.mubr.msk.f32.mxu1 %vm933_vm1, %v2704_v8  ;;  %v16076_v24 = vsub.f32 %v16021_v23, %v16075_v11  ;;  %v1504_v38 = vmul.f32 0.0625, %v1366_v62  ;;  %v1505_v3 = vmul.f32 0.0625, %v1369_v41 }
 0x283   : > { %v1936_v36 = vmul.f32 %v11399_v58, %v16074_v43  ;;  %v8807_v20 = vpop.eup %8806  ;;  %v2324_v0 = vadd.f32 1.0, %v8805_v59  ;;  %8816 = vpow2.f32 %v2238_v35  ;;  %v1823_v48 = vadd.f32 1e-05, %v1695_v2  ;;  %v1119_v59 = vpop.xlane.xlu1 %1118 }
 0x284   : > { %v1937_v61 = vmul.f32 %v11410_v32, %v16076_v24  ;;  %8378 = vmatmul.mubr.msk.f32.gmra.mrb[4].mxu1 %vm933_vm1, %v2705_v55  ;;  %v2325_v7 = vadd.f32 1.0, %v8807_v20  ;;  %8818 = vpow2.f32 %v2240_v53  ;;  %v11635_v58 = vpop.eup %8808  ;;  %v1632_v8 = vsub.f32 %v1504_v38, %v1568_v15  ;;  %v16077_v32 = vld [vmem:[#allocation61_spill] sm:$0xff] }
 0x285   : > { %v2004_v4 = vmul.f32 %v10328_v51, %v1936_v36  ;;  %v2388_v10 = vmul.f32 %v2324_v0, %v2324_v0  ;;  %v1633_v55 = vsub.f32 %v1505_v3, %v1569_v57  ;;  %v11646_v0 = vmul.f32 0.0625, %v1116_v40 }
 0x286   : > { %v2005_v35 = vmul.f32 %v10328_v51, %v1937_v61  ;;  %v2389_v23 = vmul.f32 %v2325_v7, %v2325_v7  ;;  %v1696_v36 = vmax.f32 %v1632_v8, 0.0  ;;  %8820 = vrsqrt.f32 %v1822_v26 }
 0x287   : > { %v11641_v43 = vadd.f32 %v10340_v22, %v2004_v4  ;;  %v2516_v20 = vadd.f32 1.0, %v2388_v10  ;;  %16078 = vst [vmem:[#allocation17_spill] sm:$0xff] %v11646_v0  ;;  %v1372_v4 = vpop.xlane.xlu0 %1371  ;;  %v1697_v40 = vmax.f32 %v1633_v55, 0.0  ;;  %v1570_v26 = vmul.f32 %v11646_v0, %v11646_v0 }
 0x288   : > { %v8811_v53 = vpop.eup %8810  ;;  %v11644_v41 = vadd.f32 %v10340_v22, %v2005_v35  ;;  %v2517_v15 = vadd.f32 1.0, %v2389_v23  ;;  %v1824_v7 = vadd.f32 1e-05, %v1696_v36  ;;  %v16082_v55 = vsub.f32 %v16026_v9, %v11342_v33 }
 0x289   : > { %v8813_v2 = vpop.eup %8812  ;;  %v2615_v11 = vmul.f32 %v8811_v53, %v7732_v37  ;;  %v2136_v24 = vmin.f32 %v11641_v43, 20.0  ;;  %8822 = vrcp.f32 %v2516_v20  ;;  %v1375_v53 = vpop.xlane.xlu1 %1374  ;;  %v1825_v36 = vadd.f32 1e-05, %v1697_v40 }
 0x28a   : > { %v11649_v61 = vpop.eup %8814  ;;  %v2617_v38 = vmul.f32 %v8813_v2, %v7733_v42  ;;  %v2137_v57 = vmin.f32 %v11644_v41, 20.0  ;;  %8824 = vrcp.f32 %v2517_v15  ;;  %v16079_v42 = vld [vmem:[#allocation62_spill] sm:$0xff]  ;;  %v11659_v2 = vmul.f32 0.0625, %v1119_v59 }
 0x28b   : > { %v2706_v3 = vmul.f32 %v2615_v11, %v11529_v19  ;;  %v2242_v35 = vmul.f32 1.442695, %v2136_v24  ;;  %8826 = vrsqrt.f32 %v1823_v48  ;;  %v1939_v11 = vmul.f32 %v11446_v63, %v16082_v55 }
 0x28c   : > { %v2707_v8 = vmul.f32 %v2617_v38, %v11532_v34  ;;  %v2244_v37 = vmul.f32 1.442695, %v2137_v57  ;;  %16080 = vst [vmem:[#allocation18_spill] sm:$0xff] %v11659_v2  ;;  %v16081_v34 = vsub.f32 %v16025_v6, %v11328_v18  ;;  %v1506_v15 = vmul.f32 0.0625, %v1372_v4  ;;  %v1122_v18 = vpop.xlane.xlu0 %1121 }
 0x28d   : > { %8380 = vmatprep.mubr.msk.f32.mxu1 %vm933_vm1, %v2706_v3  ;;  %8828 = vpow2.f32 %v2242_v35  ;;  %v8817_v19 = vpop.eup %8816  ;;  %v7734_v38 = vadd.f32 -1.0, %v2388_v10  ;;  %v7735_v57 = vadd.f32 -1.0, %v2389_v23  ;;  %v2007_v40 = vmul.f32 %v10328_v51, %v1939_v11 }
 0x28e   : > { %8381 = vmatmul.mubr.msk.f32.gmra.mrb[6].mxu1 %vm933_vm1, %v2707_v8  ;;  %8830 = vpow2.f32 %v2244_v37  ;;  %v1938_v48 = vmul.f32 %v11439_v39, %v16081_v34  ;;  %v8819_v24 = vpop.eup %8818  ;;  %v2326_v59 = vadd.f32 1.0, %v8817_v19  ;;  %v1634_v8 = vsub.f32 %v1506_v15, %v1570_v26  ;;  %v16093_v39 = vld [vmem:[#allocation45_spill] sm:$0xff] }
 0x28f   : > { %8832 = vrsqrt.f32 %v1824_v7  ;;  %v2327_v3 = vadd.f32 1.0, %v8819_v24  ;;  %v1571_v33 = vmul.f32 %v11659_v2, %v11659_v2  ;;  %v1507_v9 = vmul.f32 0.0625, %v1375_v53  ;;  %v1125_v7 = vpop.xlane.xlu1 %1124 }
 0x290   : > { %v2006_v35 = vmul.f32 %v10328_v51, %v1938_v48  ;;  %v2390_v6 = vmul.f32 %v2326_v59, %v2326_v59  ;;  %8834 = vrsqrt.f32 %v1825_v36  ;;  %v11680_v23 = vadd.f32 %v10340_v22, %v2007_v40  ;;  %v11682_v4 = vpop.eup %8820  ;;  %v1378_v19 = vpop.xlane.xlu0 %1377 }
 0x291   : > { %v2391_v63 = vmul.f32 %v2327_v3, %v2327_v3  ;;  %v1635_v48 = vsub.f32 %v1507_v9, %v1571_v33  ;;  %v11686_v55 = vmul.f32 0.0625, %v1122_v18  ;;  %v1698_v24 = vmax.f32 %v1634_v8, 0.0 }
 0x292   : > { %v11677_v10 = vadd.f32 %v10340_v22, %v2006_v35  ;;  %v2518_v26 = vadd.f32 1.0, %v2390_v6  ;;  %v2139_v15 = vmin.f32 %v11680_v23, 20.0  ;;  %v11690_v40 = vmul.f32 0.0625, %v1125_v7 }
 0x293   : > { %16085 = vst [vmem:[#allocation69_spill] sm:$0xff] %v11686_v55  ;;  %v8823_v11 = vpop.eup %8822  ;;  %v2519_v53 = vadd.f32 1.0, %v2391_v63  ;;  %v1699_v35 = vmax.f32 %v1635_v48, 0.0  ;;  %v7736_v62 = vadd.f32 -1.0, %v2390_v6  ;;  %v7737_v2 = vadd.f32 -1.0, %v2391_v63  ;;  %v16087_v63 = vld [vmem:[#allocation43_spill] sm:$0xff] }
 0x294   : > { %v2138_v36 = vmin.f32 %v11677_v10, 20.0  ;;  %v8825_v59 = vpop.eup %8824  ;;  %v2619_v3 = vmul.f32 %v8823_v11, %v7734_v38  ;;  %8836 = vrcp.f32 %v2518_v26  ;;  %16086 = vst [vmem:[#allocation8_spill] sm:$0xff] %v11690_v40  ;;  %v2248_v18 = vmul.f32 1.442695, %v2139_v15  ;;  %v1381_v11 = vpop.xlane.xlu1 %1380  ;;  %v16088_v15 = vld [vmem:[#allocation12_spill] sm:$0xff] }
 0x295   : > { %v11692_v37 = vpop.eup %8826  ;;  %v2621_v20 = vmul.f32 %v8825_v59, %v7735_v57  ;;  %8838 = vrcp.f32 %v2519_v53  ;;  %v1572_v8 = vmul.f32 %v11686_v55, %v11686_v55  ;;  %v1826_v57 = vadd.f32 1e-05, %v1698_v24  ;;  %v16090_v24 = vld [vmem:[#allocation42_spill] sm:$0xff] }
 0x296   : > { %v2246_v33 = vmul.f32 1.442695, %v2138_v36  ;;  %v2708_v34 = vmul.f32 %v2619_v3, %v11565_v17  ;;  %v11697_v38 = vpop.f32.mrb[64].mxu0  ;;  %v1827_v6 = vadd.f32 1e-05, %v1699_v35  ;;  %v16089_v59 = vsub.f32 %v16087_v63, %v16088_v15  ;;  %v16094_v63 = vld [vmem:[#allocation14_spill] sm:$0xff] }
 0x297   : > { %v8829_v9 = vpop.eup %8828  ;;  %v2709_v7 = vmul.f32 %v2621_v20, %v11568_v29  ;;  %v11700_v53 = vpop.f32.mrb[65].mxu0  ;;  %v1573_v20 = vmul.f32 %v11690_v40, %v11690_v40  ;;  %v16095_v15 = vsub.f32 %v16093_v39, %v16094_v63 }
 0x298   : > { %v8831_v26 = vpop.eup %8830  ;;  %v2328_v48 = vadd.f32 1.0, %v8829_v9  ;;  %8840 = vpow2.f32 %v2246_v33  ;;  %8383 = vmatprep.mubr.msk.f32.mxu1 %vm933_vm1, %v2708_v34  ;;  %v1940_v3 = vmul.f32 %v11488_v56, %v16089_v59  ;;  %v16091_v33 = vld [vmem:[#allocation13_spill] sm:$0xff]  ;;  %v1508_v34 = vmul.f32 0.0625, %v1378_v19 }
 0x299   : > { %v11702_v36 = vpop.eup %8832  ;;  %v2329_v17 = vadd.f32 1.0, %v8831_v26  ;;  %8842 = vpow2.f32 %v2248_v18  ;;  %8384 = vmatmul.mubr.msk.f32.gmra.mrb[8].mxu1 %vm933_vm1, %v2709_v7  ;;  %v16092_v9 = vsub.f32 %v16090_v24, %v16091_v33  ;;  %v1509_v18 = vmul.f32 0.0625, %v1381_v11  ;;  %v16098_v33 = vld [vmem:[#allocation63_spill] sm:$0xff] }
 0x29a   : > { %v2392_v29 = vmul.f32 %v2328_v48, %v2328_v48  ;;  %v2008_v35 = vmul.f32 %v10328_v51, %v1940_v3  ;;  %v1942_v56 = vmul.f32 %v11517_v13, %v16095_v15  ;;  %v11721_v7 = vpop.eup %8834  ;;  %8844 = vrsqrt.f32 %v1826_v57 }
 0x29b   : > { %v1941_v0 = vmul.f32 %v11495_v28, %v16092_v9  ;;  %v2393_v26 = vmul.f32 %v2329_v17, %v2329_v17  ;;  %v1636_v40 = vsub.f32 %v1508_v34, %v1572_v8  ;;  %8846 = vrsqrt.f32 %v1827_v6  ;;  %v16097_v6 = vld [vmem:[#allocation44_spill] sm:$0xff] }
 0x29c   : > { %v2520_v48 = vadd.f32 1.0, %v2392_v29  ;;  %v11725_v28 = vadd.f32 %v10340_v22, %v2008_v35  ;;  %v1637_v19 = vsub.f32 %v1509_v18, %v1573_v20  ;;  %v2010_v13 = vmul.f32 %v10328_v51, %v1942_v56 }
 0x29d   : > { %v2009_v59 = vmul.f32 %v10328_v51, %v1941_v0  ;;  %v2521_v24 = vadd.f32 1.0, %v2393_v26  ;;  %v1700_v39 = vmax.f32 %v1636_v40, 0.0  ;;  %v11731_v17 = vpop.f32.mrb[66].mxu0  ;;  %v16096_v0 = vld [vmem:[#allocation70_spill] sm:$0xff]  ;;  %v16099_v9 = vsub.f32 %v16097_v6, %v16098_v33 }
 0x29e   : > { %8848 = vrcp.f32 %v2520_v48  ;;  %v8837_v3 = vpop.eup %8836  ;;  %v2140_v57 = vmin.f32 %v11725_v28, 20.0  ;;  %v11740_v34 = vpop.f32.mrb[67].mxu0  ;;  %v7738_v18 = vadd.f32 -1.0, %v2392_v29  ;;  %v11744_v15 = vadd.f32 %v10340_v22, %v2010_v13 }
 0x29f   : > { %v11728_v11 = vadd.f32 %v10340_v22, %v2009_v59  ;;  %8850 = vrcp.f32 %v2521_v24  ;;  %v1943_v20 = vmul.f32 %v11524_v47, %v16099_v9  ;;  %v8839_v35 = vpop.eup %8838  ;;  %v2623_v40 = vmul.f32 %v8837_v3, %v7736_v62 }
 0x2a0   : > { %v2625_v56 = vmul.f32 %v8839_v35, %v7737_v2  ;;  %v2250_v48 = vmul.f32 1.442695, %v2140_v57  ;;  %v1701_v59 = vmax.f32 %v1637_v19, 0.0  ;;  %v1828_v47 = vadd.f32 1e-05, %v1700_v39 }
 0x2a1   : > { %v2141_v63 = vmin.f32 %v11728_v11, 20.0  ;;  %v2011_v24 = vmul.f32 %v10328_v51, %v1943_v20  ;;  %v2710_v6 = vmul.f32 %v2623_v40, %v11605_v46  ;;  %v2142_v9 = vmin.f32 %v11744_v15, 20.0 }
 0x2a2   : > { %v8841_v8 = vpop.eup %8840  ;;  %v2711_v62 = vmul.f32 %v2625_v56, %v11608_v1  ;;  %8852 = vpow2.f32 %v2250_v48  ;;  %v16100_v46 = vsub.f32 %v16048_v16, %v11456_v5  ;;  %v7739_v3 = vadd.f32 -1.0, %v2393_v26  ;;  %v16102_v16 = vld [vmem:[#allocation51_spill] sm:$0xff] }
 0x2a3   : > { %v2252_v33 = vmul.f32 1.442695, %v2141_v63  ;;  %v8843_v55 = vpop.eup %8842  ;;  %v2330_v29 = vadd.f32 1.0, %v8841_v8  ;;  %v11751_v13 = vadd.f32 %v10340_v22, %v2011_v24  ;;  %8386 = vmatprep.mubr.msk.f32.mxu1 %vm933_vm1, %v2710_v6  ;;  %v2254_v19 = vmul.f32 1.442695, %v2142_v9 }
 0x2a4   : > { %v2331_v2 = vadd.f32 1.0, %v8843_v55  ;;  %v1944_v39 = vmul.f32 %v11560_v12, %v16100_v46  ;;  %8387 = vmatmul.mubr.msk.f32.gmra.mrb[10].mxu1 %vm933_vm1, %v2711_v62  ;;  %v16101_v8 = vsub.f32 %v16049_v44, %v11460_v21  ;;  %v11766_v55 = vpop.eup %8844  ;;  %v16103_v12 = vld [vmem:[#allocation15_spill] sm:$0xff]  ;;  %v1829_v48 = vadd.f32 1e-05, %v1701_v59  ;;  %v16105_v59 = vld [vmem:[#allocation65_spill] sm:$0xff] }
 0x2a5   : > { %8854 = vpow2.f32 %v2252_v33  ;;  %v11759_v57 = vmul.f32 %v2330_v29, %v2330_v29  ;;  %v2143_v1 = vmin.f32 %v11751_v13, 20.0  ;;  %v16104_v40 = vsub.f32 %v16102_v16, %v16103_v12  ;;  %v11775_v63 = vpop.eup %8846 }
 0x2a6   : > { %v1945_v20 = vmul.f32 %v11574_v49, %v16101_v8  ;;  %v11768_v35 = vmul.f32 %v2331_v2, %v2331_v2  ;;  %8856 = vpow2.f32 %v2254_v19  ;;  %v2012_v5 = vmul.f32 %v10328_v51, %v1944_v39 }
 0x2a7   : > { %v1946_v26 = vmul.f32 %v11596_v25, %v16104_v40  ;;  %v2522_v56 = vadd.f32 1.0, %v11759_v57  ;;  %v2256_v21 = vmul.f32 1.442695, %v2143_v1  ;;  %8858 = vrsqrt.f32 %v1828_v47  ;;  %v2736_v47 = vld [vmem:[%s15560_s4] sm:$0x7] }
 0x2a8   : > { %v2013_v44 = vmul.f32 %v10328_v51, %v1945_v20  ;;  %v8849_v49 = vpop.eup %8848  ;;  %v2523_v24 = vadd.f32 1.0, %v11768_v35  ;;  %v11781_v6 = vadd.f32 %v10340_v22, %v2012_v5  ;;  %v16106_v29 = vsub.f32 %v16057_v60, %v16105_v59  ;;  %v16107_v5 = vld [vmem:[#allocation2_spill] sm:$0xff] }
 0x2a9   : > { %v2014_v33 = vmul.f32 %v10328_v51, %v1946_v26  ;;  %v8851_v9 = vpop.eup %8850  ;;  %v2627_v62 = vmul.f32 %v8849_v49, %v7738_v18  ;;  %8860 = vrcp.f32 %v2522_v56  ;;  %v11806_v16 = vrot.slane %v2736_v47, %v16107_v5  ;;  %v16108_v56 = vld [vmem:[#allocation55_spill] sm:$0xff] }
 0x2aa   : > { %v11785_v25 = vadd.f32 %v10340_v22, %v2013_v44  ;;  %v1947_v2 = vmul.f32 %v11600_v27, %v16106_v29  ;;  %v2629_v19 = vmul.f32 %v8851_v9, %v7739_v3  ;;  %8862 = vrcp.f32 %v2523_v24  ;;  %v11801_v8 = vpop.f32.mrb[68].mxu0 }
 0x2ab   : > { %v2144_v46 = vmin.f32 %v11781_v6, 20.0  ;;  %v11796_v39 = vadd.f32 %v10340_v22, %v2014_v33  ;;  %v2712_v18 = vmul.f32 %v2627_v62, %v11641_v43  ;;  %8864 = vpow2.f32 %v2256_v21  ;;  %v11808_v12 = vpop.f32.mrb[69].mxu0  ;;  %v16109_v21 = vld [vmem:[#allocation16_spill] sm:$0xff] }
 0x2ac   : > { %v2145_v1 = vmin.f32 %v11785_v25, 20.0  ;;  %v2015_v60 = vmul.f32 %v10328_v51, %v1947_v2  ;;  %v2713_v27 = vmul.f32 %v2629_v19, %v11644_v41  ;;  %v8853_v40 = vpop.eup %8852  ;;  %8866 = vrsqrt.f32 %v1829_v48 }
 0x2ad   : > { %v2258_v20 = vmul.f32 1.442695, %v2144_v46  ;;  %v2146_v3 = vmin.f32 %v11796_v39, 20.0  ;;  %8389 = vmatprep.mubr.msk.f32.mxu1 %vm933_vm1, %v2712_v18  ;;  %v16110_v44 = vsub.f32 %v16108_v56, %v16109_v21  ;;  %v2332_v24 = vadd.f32 1.0, %v8853_v40 }
 0x2ae   : > { %v2260_v43 = vmul.f32 1.442695, %v2145_v1  ;;  %v11812_v26 = vadd.f32 %v10340_v22, %v2015_v60  ;;  %8390 = vmatmul.mubr.msk.f32.gmra.mrb[12].mxu1 %vm933_vm1, %v2713_v27  ;;  %v11821_v9 = vadd.f32 %v11697_v38, %v11806_v16  ;;  %v11826_v59 = vadd.f32 %v11700_v53, %v11806_v16 }
 0x2af   : > { %v1948_v41 = vmul.f32 %v11635_v58, %v16110_v44  ;;  %v8855_v49 = vpop.eup %8854  ;;  %8868 = vpow2.f32 %v2258_v20  ;;  %v2262_v33 = vmul.f32 1.442695, %v2146_v3  ;;  %v2396_v58 = vmul.f32 %v2332_v24, %v2332_v24 }
 0x2b0   : > { %v2333_v48 = vadd.f32 1.0, %v8855_v49  ;;  %8870 = vpow2.f32 %v2260_v43  ;;  %v2147_v62 = vmin.f32 %v11812_v26, 20.0  ;;  %v8857_v29 = vpop.eup %8856  ;;  %v3321_v47 = vsel %vm933_vm1, %v11821_v9, 0.0 }
 0x2b1   : > { %8872 = vpow2.f32 %v2262_v33  ;;  %v2016_v2 = vmul.f32 %v10328_v51, %v1948_v41  ;;  %v2334_v46 = vadd.f32 1.0, %v8857_v29  ;;  %3322 = vadd.xlane.f32.xlu1 %v3321_v47  ;;  %v16111_v18 = vsub.f32 %v16065_v45, %v11545_v54  ;;  %v11835_v60 = vpop.eup %8858 }
 0x2b2   : > { %v2397_v19 = vmul.f32 %v2333_v48, %v2333_v48  ;;  %v2264_v38 = vmul.f32 1.442695, %v2147_v62  ;;  %v7740_v53 = vadd.f32 -1.0, %v11759_v57  ;;  %v2524_v27 = vadd.f32 1.0, %v2396_v58 }
 0x2b3   : > { %v1949_v1 = vmul.f32 %v11649_v61, %v16111_v18  ;;  %v11839_v20 = vadd.f32 %v10340_v22, %v2016_v2  ;;  %v3318_v3 = vsel %vm933_vm1, %v11826_v59, 0.0  ;;  %v8861_v40 = vpop.eup %8860  ;;  %v7741_v43 = vadd.f32 -1.0, %v11768_v35 }
 0x2b4   : > { %v2525_v56 = vadd.f32 1.0, %v2397_v19  ;;  %v2398_v21 = vmul.f32 %v2334_v46, %v2334_v46  ;;  %8874 = vpow2.f32 %v2264_v38  ;;  %3319 = vadd.xlane.f32.xlu0 %v3318_v3  ;;  %v8863_v54 = vpop.eup %8862  ;;  %v2631_v45 = vmul.f32 %v8861_v40, %v7740_v53 }
 0x2b5   : > { %8876 = vrcp.f32 %v2524_v27  ;;  %v2148_v61 = vmin.f32 %v11839_v20, 20.0  ;;  %v2017_v57 = vmul.f32 %v10328_v51, %v1949_v1  ;;  %v8865_v44 = vpop.eup %8864  ;;  %v2633_v41 = vmul.f32 %v8863_v54, %v7741_v43  ;;  %v16112_v27 = vld [vmem:[#allocation67_spill] sm:$0xff] }
 0x2b6   : > { %v7742_v49 = vadd.f32 -1.0, %v2396_v58  ;;  %8878 = vrcp.f32 %v2525_v56  ;;  %v2526_v24 = vadd.f32 1.0, %v2398_v21  ;;  %v2714_v33 = vmul.f32 %v2631_v45, %v11677_v10  ;;  %v11850_v29 = vpop.eup %8866 }
 0x2b7   : > { %v2335_v48 = vadd.f32 1.0, %v8865_v44  ;;  %v2266_v35 = vmul.f32 1.442695, %v2148_v61  ;;  %v11848_v62 = vadd.f32 %v10340_v22, %v2017_v57  ;;  %v2715_v2 = vmul.f32 %v2633_v41, %v11680_v23 }
 0x2b8   : > { %v7743_v47 = vadd.f32 -1.0, %v2397_v19  ;;  %8880 = vrcp.f32 %v2526_v24  ;;  %v3511_v46 = vmul.f32 %v11821_v9, %v11821_v9  ;;  %8392 = vmatprep.mubr.msk.f32.mxu1 %vm933_vm1, %v2714_v33  ;;  %v11859_v18 = vadd.f32 %v11731_v17, %v11806_v16  ;;  %v11869_v43 = vpop.f32.mrb[70].mxu0 }
 0x2b9   : > { %v8869_v38 = vpop.eup %8868  ;;  %v2399_v58 = vmul.f32 %v2335_v48, %v2335_v48  ;;  %8882 = vpow2.f32 %v2266_v35  ;;  %v2149_v10 = vmin.f32 %v11848_v62, 20.0  ;;  %8393 = vmatmul.mubr.msk.f32.gmra.mrb[14].mxu1 %vm933_vm1, %v2715_v2  ;;  %v3510_v53 = vmul.f32 %v11826_v59, %v11826_v59  ;;  %v11871_v57 = vpop.f32.mrb[71].mxu0 }
 0x2ba   : > { %v8871_v1 = vpop.eup %8870  ;;  %v2336_v23 = vadd.f32 1.0, %v8869_v38  ;;  %v3577_v19 = vsel %vm933_vm1, %v3511_v46, 0.0  ;;  %v16113_v3 = vsub.f32 %v16071_v50, %v16112_v27  ;;  %v7744_v54 = vadd.f32 -1.0, %v2398_v21 }
 0x2bb   : > { %v8873_v56 = vpop.eup %8872  ;;  %v2527_v17 = vadd.f32 1.0, %v2399_v58  ;;  %v2337_v45 = vadd.f32 1.0, %v8871_v1  ;;  %v2268_v61 = vmul.f32 1.442695, %v2149_v10  ;;  %3578 = vadd.xlane.f32.xlu1 %v3577_v19  ;;  %v3574_v24 = vsel %vm933_vm1, %v3510_v53, 0.0 }
 0x2bc   : > { %v1950_v40 = vmul.f32 %v11682_v4, %v16113_v3  ;;  %v2400_v44 = vmul.f32 %v2336_v23, %v2336_v23  ;;  %v2338_v41 = vadd.f32 1.0, %v8873_v56  ;;  %v11877_v4 = vadd.f32 %v11740_v34, %v11806_v16  ;;  %3575 = vadd.xlane.f32.xlu0 %v3574_v24 }
 0x2bd   : > { %8884 = vrcp.f32 %v2527_v17  ;;  %v2401_v50 = vmul.f32 %v2337_v45, %v2337_v45  ;;  %v3327_v21 = vsel %vm933_vm1, %v11859_v18, 0.0  ;;  %v16114_v46 = vsub.f32 %v16072_v31, %v11578_v52 }
 0x2be   : > { %v2018_v33 = vmul.f32 %v10328_v51, %v1950_v40  ;;  %v8875_v48 = vpop.eup %8874  ;;  %v2528_v35 = vadd.f32 1.0, %v2400_v44  ;;  %v2402_v2 = vmul.f32 %v2338_v41, %v2338_v41  ;;  %8886 = vpow2.f32 %v2268_v61 }
 0x2bf   : > { %v1951_v38 = vmul.f32 %v11692_v37, %v16114_v46  ;;  %v8877_v10 = vpop.eup %8876  ;;  %v7745_v1 = vadd.f32 -1.0, %v2399_v58  ;;  %v2529_v23 = vadd.f32 1.0, %v2401_v50  ;;  %v2339_v19 = vadd.f32 1.0, %v8875_v48  ;;  %3328 = vadd.xlane.f32.xlu1 %v3327_v21 }
 0x2c0   : > { %v11886_v34 = vadd.f32 %v10340_v22, %v2018_v33  ;;  %v8879_v53 = vpop.eup %8878  ;;  %v2635_v27 = vmul.f32 %v8877_v10, %v7742_v49  ;;  %v7746_v3 = vadd.f32 -1.0, %v2400_v44  ;;  %8888 = vrcp.f32 %v2528_v35 }
 0x2c1   : > { %v2530_v40 = vadd.f32 1.0, %v2402_v2  ;;  %v2637_v56 = vmul.f32 %v8879_v53, %v7743_v47  ;;  %8890 = vrcp.f32 %v2529_v23  ;;  %v2403_v17 = vmul.f32 %v2339_v19, %v2339_v19 }
 0x2c2   : > { %v2150_v52 = vmin.f32 %v11886_v34, 20.0  ;;  %v8881_v31 = vpop.eup %8880  ;;  %v2716_v37 = vmul.f32 %v2635_v27, %v11725_v28  ;;  %v2019_v58 = vmul.f32 %v10328_v51, %v1951_v38  ;;  %v3324_v45 = vsel %vm933_vm1, %v11877_v4, 0.0 }
 0x2c3   : > { %8892 = vrcp.f32 %v2530_v40  ;;  %v8883_v61 = vpop.eup %8882  ;;  %v2717_v49 = vmul.f32 %v2637_v56, %v11728_v11  ;;  %v2639_v44 = vmul.f32 %v8881_v31, %v7744_v54  ;;  %v7747_v41 = vadd.f32 -1.0, %v2401_v50  ;;  %3325 = vadd.xlane.f32.xlu0 %v3324_v45 }
 0x2c4   : > { %v2531_v24 = vadd.f32 1.0, %v2403_v17  ;;  %8395 = vmatprep.mubr.msk.f32.mxu1 %vm933_vm1, %v2716_v37  ;;  %v2340_v47 = vadd.f32 1.0, %v8883_v61  ;;  %v2270_v33 = vmul.f32 1.442695, %v2150_v52  ;;  %v11896_v21 = vadd.f32 %v10340_v22, %v2019_v58 }
 0x2c5   : > { %v11900_v28 = vadd.f32 %v11801_v8, %v11806_v16  ;;  %8396 = vmatmul.mubr.msk.f32.gmra.mrb[16].mxu1 %vm933_vm1, %v2717_v49  ;;  %v2718_v48 = vmul.f32 %v2639_v44, %v11744_v15  ;;  %v3513_v11 = vmul.f32 %v11859_v18, %v11859_v18  ;;  %v11908_v54 = vadd.f32 %v11808_v12, %v11806_v16 }
 0x2c6   : > { %8894 = vrcp.f32 %v2531_v24  ;;  %v2404_v50 = vmul.f32 %v2340_v47, %v2340_v47  ;;  %v2151_v35 = vmin.f32 %v11896_v21, 20.0  ;;  %v3512_v8 = vmul.f32 %v11877_v4, %v11877_v4  ;;  %v11925_v52 = vpop.f32.mrb[72].mxu0 }
 0x2c7   : > { %8896 = vpow2.f32 %v2270_v33  ;;  %v8885_v46 = vpop.eup %8884  ;;  %8398 = vmatprep.mubr.msk.f32.mxu1 %vm933_vm1, %v2718_v48  ;;  %v7748_v38 = vadd.f32 -1.0, %v2402_v2  ;;  %v3583_v15 = vsel %vm933_vm1, %v3513_v11, 0.0  ;;  %v16115_v10 = vsub.f32 %v16077_v32, %v11610_v14 }
 0x2c8   : > { %v16116_v12 = vsub.f32 %v16079_v42, %v11614_v30  ;;  %v8887_v53 = vpop.eup %8886  ;;  %v2641_v27 = vmul.f32 %v8885_v46, %v7745_v1  ;;  %v2532_v40 = vadd.f32 1.0, %v2404_v50  ;;  %v2272_v56 = vmul.f32 1.442695, %v2151_v35  ;;  %3584 = vadd.xlane.f32.xlu1 %v3583_v15  ;;  %v11930_v30 = vpop.f32.mrb[73].mxu0 }
 0x2c9   : > { %v1952_v23 = vmul.f32 %v11702_v36, %v16115_v10  ;;  %v3333_v2 = vsel %vm933_vm1, %v11900_v28, 0.0  ;;  %v2341_v31 = vadd.f32 1.0, %v8887_v53  ;;  %v3580_v14 = vsel %vm933_vm1, %v3512_v8, 0.0 }
 0x2ca   : > { %v1953_v19 = vmul.f32 %v11721_v7, %v16116_v12  ;;  %v8889_v42 = vpop.eup %8888  ;;  %v2719_v7 = vmul.f32 %v2641_v27, %v11751_v13  ;;  %v7749_v1 = vadd.f32 -1.0, %v2403_v17  ;;  %8898 = vrcp.f32 %v2532_v40  ;;  %3581 = vadd.xlane.f32.xlu0 %v3580_v14  ;;  %v16117_v12 = vld [vmem:[#allocation64_spill] sm:$0xff] }
 0x2cb   : > { %v2020_v32 = vmul.f32 %v10328_v51, %v1952_v23  ;;  %v3330_v37 = vsel %vm933_vm1, %v11908_v54, 0.0  ;;  %v8891_v58 = vpop.eup %8890  ;;  %v2643_v45 = vmul.f32 %v8889_v42, %v7746_v3  ;;  %v11935_v61 = vmul.f32 %v2341_v31, %v2341_v31 }
 0x2cc   : > { %v2021_v36 = vmul.f32 %v10328_v51, %v1953_v19  ;;  %8900 = vpow2.f32 %v2272_v56  ;;  %8399 = vmatmul.mubr.msk.f32.gmra.mrb[18].mxu1 %vm933_vm1, %v2719_v7  ;;  %v2645_v24 = vmul.f32 %v8891_v58, %v7747_v41  ;;  %v7750_v47 = vadd.f32 -1.0, %v2404_v50  ;;  %3334 = vadd.xlane.f32.xlu1 %v3333_v2  ;;  %v16118_v19 = vld [vmem:[#allocation17_spill] sm:$0xff]  ;;  %v16120_v56 = vld [vmem:[#allocation66_spill] sm:$0xff] }
 0x2cd   : > { %v11938_v49 = vadd.f32 %v10340_v22, %v2020_v32  ;;  %v8893_v44 = vpop.eup %8892  ;;  %v3515_v17 = vmul.f32 %v11900_v28, %v11900_v28  ;;  %v2720_v3 = vmul.f32 %v2643_v45, %v11781_v6  ;;  %v2533_v48 = vadd.f32 1.0, %v11935_v61  ;;  %v16121_v2 = vld [vmem:[#allocation18_spill] sm:$0xff]  ;;  %v16124_v45 = vld [vmem:[#allocation68_spill] sm:$0xff] }
 0x2ce   : > { %v11942_v13 = vadd.f32 %v10340_v22, %v2021_v36  ;;  %v2647_v33 = vmul.f32 %v8893_v44, %v7748_v38  ;;  %v11950_v11 = vadd.f32 %v11869_v43, %v11806_v16  ;;  %v2721_v35 = vmul.f32 %v2645_v24, %v11785_v25  ;;  %3331 = vadd.xlane.f32.xlu0 %v3330_v37 }
 0x2cf   : > { %v2152_v41 = vmin.f32 %v11938_v49, 20.0  ;;  %v3589_v8 = vsel %vm933_vm1, %v3515_v17, 0.0  ;;  %8401 = vmatprep.mubr.msk.f32.mxu1 %vm933_vm1, %v2720_v3  ;;  %8902 = vrcp.f32 %v2533_v48  ;;  %v11960_v38 = vadd.f32 %v11871_v57, %v11806_v16 }
 0x2d0   : > { %v2153_v50 = vmin.f32 %v11942_v13, 20.0  ;;  %v8895_v46 = vpop.eup %8894  ;;  %v2722_v6 = vmul.f32 %v2647_v33, %v11796_v39  ;;  %v3514_v25 = vmul.f32 %v11908_v54, %v11908_v54  ;;  %8402 = vmatmul.mubr.msk.f32.gmra.mrb[20].mxu1 %vm933_vm1, %v2721_v35  ;;  %3590 = vadd.xlane.f32.xlu1 %v3589_v8  ;;  %v16119_v53 = vsub.f32 %v16117_v12, %v16118_v19 }
 0x2d1   : > { %v8897_v43 = vpop.eup %8896  ;;  %v2649_v15 = vmul.f32 %v8895_v46, %v7749_v1  ;;  %v2274_v10 = vmul.f32 1.442695, %v2152_v41  ;;  %v3339_v40 = vsel %vm933_vm1, %v11950_v11, 0.0  ;;  %v16122_v31 = vsub.f32 %v16120_v56, %v16121_v2  ;;  %v8343_v37 = vpop.f32.mrb[74].mxu0 }
 0x2d2   : > { %v2276_v23 = vmul.f32 1.442695, %v2153_v50  ;;  %v1954_v39 = vmul.f32 %v11766_v55, %v16119_v53  ;;  %8404 = vmatprep.mubr.msk.f32.mxu1 %vm933_vm1, %v2722_v6  ;;  %v2342_v27 = vadd.f32 1.0, %v8897_v43  ;;  %v3586_v57 = vsel %vm933_vm1, %v3514_v25, 0.0  ;;  %v3049_v17 = vpop.f32.mrb[75].mxu0  ;;  %v16125_v25 = vld [vmem:[#allocation69_spill] sm:$0xff] }
 0x2d3   : > { %v1955_v14 = vmul.f32 %v11775_v63, %v16122_v31  ;;  %v2723_v32 = vmul.f32 %v2649_v15, %v11812_v26  ;;  %8904 = vpow2.f32 %v2274_v10  ;;  %3587 = vadd.xlane.f32.xlu0 %v3586_v57  ;;  %v3336_v55 = vsel %vm933_vm1, %v11960_v38, 0.0  ;;  %v16123_v63 = vld [vmem:[#allocation8_spill] sm:$0xff] }
 0x2d4   : > { %v2022_v36 = vmul.f32 %v10328_v51, %v1954_v39  ;;  %v11981_v42 = vmul.f32 %v2342_v27, %v2342_v27  ;;  %8906 = vpow2.f32 %v2276_v23  ;;  %v3517_v1 = vmul.f32 %v11950_v11, %v11950_v11  ;;  %v8899_v58 = vpop.eup %8898  ;;  %3340 = vadd.xlane.f32.xlu1 %v3339_v40 }
 0x2d5   : > { %v2023_v7 = vmul.f32 %v10328_v51, %v1955_v14  ;;  %v1765_v26 = vsub.f32 %v16124_v45, %v16123_v63  ;;  %8405 = vmatmul.mubr.msk.f32.gmra.mrb[22].mxu1 %vm933_vm1, %v2723_v32  ;;  %v11994_v24 = vadd.f32 %v11925_v52, %v11806_v16  ;;  %v2651_v33 = vmul.f32 %v8899_v58, %v7750_v47 }
 0x2d6   : > { %v11990_v44 = vadd.f32 %v10340_v22, %v2022_v36  ;;  %v8901_v3 = vpop.eup %8900  ;;  %v2534_v48 = vadd.f32 1.0, %v11981_v42  ;;  %v3516_v41 = vmul.f32 %v11960_v38, %v11960_v38  ;;  %v3595_v46 = vsel %vm933_vm1, %v3517_v1, 0.0 }
 0x2d7   : > { %v11998_v35 = vadd.f32 %v10340_v22, %v2023_v7  ;;  %v2343_v50 = vadd.f32 1.0, %v8901_v3  ;;  %3337 = vadd.xlane.f32.xlu0 %v3336_v55  ;;  %v12006_v52 = vadd.f32 %v11930_v30, %v11806_v16  ;;  %v2724_v47 = vmul.f32 %v2651_v33, %v11839_v20 }
 0x2d8   : > { %v2154_v8 = vmin.f32 %v11990_v44, 20.0  ;;  %8908 = vrcp.f32 %v2534_v48  ;;  %v16126_v43 = vsub.f32 %v16096_v0, %v16125_v25  ;;  %v7751_v10 = vadd.f32 -1.0, %v11935_v61  ;;  %3596 = vadd.xlane.f32.xlu1 %v3595_v46  ;;  %v5119_v25 = vld [vmem:[%s15561_s5 + $0x8] sm:$0xff] }
 0x2d9   : > { %v2155_v6 = vmin.f32 %v11998_v35, 20.0  ;;  %v2407_v23 = vmul.f32 %v2343_v50, %v2343_v50  ;;  %v1957_v19 = vmul.f32 %v11850_v29, %v1765_v26  ;;  %v8903_v53 = vpop.eup %8902  ;;  %8407 = vmatprep.mubr.msk.f32.mxu1 %vm933_vm1, %v2724_v47  ;;  %v3592_v20 = vsel %vm933_vm1, %v3516_v41, 0.0 }
 0x2da   : > { %v1956_v15 = vmul.f32 %v11835_v60, %v16126_v43  ;;  %v2278_v12 = vmul.f32 1.442695, %v2154_v8  ;;  %v3345_v0 = vsel %vm933_vm1, %v11994_v24, 0.0  ;;  %v2653_v27 = vmul.f32 %v8903_v53, %v7751_v10 }
 0x2db   : > { %v2280_v30 = vmul.f32 1.442695, %v2155_v6  ;;  %v2535_v60 = vadd.f32 1.0, %v2407_v23  ;;  %3593 = vadd.xlane.f32.xlu0 %v3592_v20  ;;  %v3519_v61 = vmul.f32 %v11994_v24, %v11994_v24  ;;  %v2025_v57 = vmul.f32 %v10328_v51, %v1957_v19  ;;  %v5118_v6 = vld [vmem:[%s15561_s5] sm:$0xff] }
 0x2dc   : > { %v2024_v39 = vmul.f32 %v10328_v51, %v1956_v15  ;;  %8910 = vpow2.f32 %v2278_v12  ;;  %v3342_v40 = vsel %vm933_vm1, %v12006_v52, 0.0  ;;  %v2725_v2 = vmul.f32 %v2653_v27, %v11848_v62  ;;  %3346 = vadd.xlane.f32.xlu1 %v3345_v0 }
 0x2dd   : > { %8912 = vpow2.f32 %v2280_v30  ;;  %v8905_v56 = vpop.eup %8904  ;;  %v12031_v31 = vadd.f32 %v8343_v37, %v11806_v16  ;;  %v12035_v55 = vadd.f32 %v10340_v22, %v2025_v57  ;;  %v3518_v51 = vmul.f32 %v12006_v52, %v12006_v52 }
 0x2de   : > { %v12024_v29 = vadd.f32 %v10340_v22, %v2024_v39  ;;  %8914 = vrcp.f32 %v2535_v60  ;;  %v8907_v14 = vpop.eup %8906  ;;  %v2344_v32 = vadd.f32 1.0, %v8905_v56  ;;  %8408 = vmatmul.mubr.msk.f32.gmra.mrb[24].mxu1 %vm933_vm1, %v2725_v2  ;;  %v3601_v62 = vsel %vm933_vm1, %v3519_v61, 0.0 }
 0x2df   : > { %v2345_v7 = vadd.f32 1.0, %v8907_v14  ;;  %3343 = vadd.xlane.f32.xlu0 %v3342_v40  ;;  %v2157_v37 = vmin.f32 %v12035_v55, 20.0  ;;  %v12043_v63 = vadd.f32 %v3049_v17, %v11806_v16  ;;  %v7752_v45 = vadd.f32 -1.0, %v11981_v42  ;;  %v8346_v50 = vpop.f32.mrb[76].mxu0 }
 0x2e0   : > { %v2156_v36 = vmin.f32 %v12024_v29, 20.0  ;;  %v2408_v1 = vmul.f32 %v2344_v32, %v2344_v32  ;;  %3602 = vadd.xlane.f32.xlu1 %v3601_v62  ;;  %v3351_v26 = vsel %vm933_vm1, %v12031_v31, 0.0  ;;  %v3598_v41 = vsel %vm933_vm1, %v3518_v51, 0.0  ;;  %v3059_v47 = vpop.f32.mrb[77].mxu0 }
 0x2e1   : > { %v2409_v22 = vmul.f32 %v2345_v7, %v2345_v7  ;;  %v2284_v48 = vmul.f32 1.442695, %v2157_v37  ;;  %v3348_v42 = vsel %vm933_vm1, %v12043_v63, 0.0  ;;  %v3521_v17 = vmul.f32 %v12031_v31, %v12031_v31 }
 0x2e2   : > { %v2282_v58 = vmul.f32 1.442695, %v2156_v36  ;;  %v8909_v3 = vpop.eup %8908  ;;  %v2536_v33 = vadd.f32 1.0, %v2408_v1  ;;  %v7753_v10 = vadd.f32 -1.0, %v2407_v23  ;;  %v12061_v53 = vadd.f32 %v8346_v50, %v11806_v16 }
 0x2e3   : > { %v2655_v8 = vmul.f32 %v8909_v3, %v7752_v45  ;;  %v2537_v46 = vadd.f32 1.0, %v2409_v22  ;;  %3599 = vadd.xlane.f32.xlu0 %v3598_v41  ;;  %v3520_v30 = vmul.f32 %v12043_v63, %v12043_v63  ;;  %v8534_v0 = vpack.c.bf16 %v5119_v25, %v5118_v6 }
 0x2e4   : > { %8916 = vpow2.f32 %v2282_v58  ;;  %3352 = vadd.xlane.f32.xlu1 %v3351_v26  ;;  %16127 = vst [vmem:[#allocation3_spill] sm:$0xff] %v12061_v53  ;;  %v3607_v23 = vsel %vm933_vm1, %v3521_v17, 0.0  ;;  %v12068_v60 = vadd.f32 %v3059_v47, %v11806_v16  ;;  %v3357_v2 = vsel %vm933_vm1, %v12061_v53, 0.0 }
 0x2e5   : > { %8918 = vrcp.f32 %v2536_v33  ;;  %v2726_v15 = vmul.f32 %v2655_v8, %v11886_v34  ;;  %8535 = vmatprep.subr.bf16.mxu1 %v8534_v0  ;;  %v3604_v56 = vsel %vm933_vm1, %v3520_v30, 0.0  ;;  %v3523_v51 = vmul.f32 %v12061_v53, %v12061_v53 }
 0x2e6   : > { %v8911_v43 = vpop.eup %8910  ;;  %8920 = vrcp.f32 %v2537_v46  ;;  %16128 = vst [vmem:[#allocation71_spill] sm:$0xff] %v12068_v60  ;;  %8537 = vmatpush3.bf16.msra.mxu1 %v8534_v0  ;;  %v3354_v36 = vsel %vm933_vm1, %v12068_v60, 0.0  ;;  %v7755_v58 = vadd.f32 -1.0, %v2409_v22  ;;  %v3522_v45 = vmul.f32 %v12068_v60, %v12068_v60 }
 0x2e7   : > { %v8913_v12 = vpop.eup %8912  ;;  %v2346_v19 = vadd.f32 1.0, %v8911_v43  ;;  %8922 = vpow2.f32 %v2284_v48  ;;  %8410 = vmatprep.mubr.msk.f32.mxu1 %vm933_vm1, %v2726_v15  ;;  %3349 = vadd.xlane.f32.xlu0 %v3348_v42 }
 0x2e8   : > { %v8915_v20 = vpop.eup %8914  ;;  %v2347_v39 = vadd.f32 1.0, %v8913_v12  ;;  %3608 = vadd.xlane.f32.xlu1 %v3607_v23  ;;  %v3610_v6 = vsel %vm933_vm1, %v3522_v45, 0.0 }
 0x2e9   : > { %v2657_v27 = vmul.f32 %v8915_v20, %v7753_v10  ;;  %v2410_v34 = vmul.f32 %v2346_v19, %v2346_v19 }
 0x2ea   : > { %v2411_v61 = vmul.f32 %v2347_v39, %v2347_v39 }
 0x2eb   : > { %v2727_v57 = vmul.f32 %v2657_v27, %v11896_v21  ;;  %v2538_v40 = vadd.f32 1.0, %v2410_v34  ;;  %3605 = vadd.xlane.f32.xlu0 %v3604_v56  ;;  %v7754_v21 = vadd.f32 -1.0, %v2408_v1  ;;  %v8349_v37 = vpop.f32.mrb[78].mxu0  ;;  %v3613_v1 = vsel %vm933_vm1, %v3523_v51, 0.0 }
 0x2ec   : > { %v2539_v14 = vadd.f32 1.0, %v2411_v61  ;;  %3358 = vadd.xlane.f32.xlu1 %v3357_v2  ;;  %v12082_v48 = vadd.f32 %v8349_v37, %v11806_v16  ;;  %v3069_v41 = vpop.f32.mrb[79].mxu0  ;;  %v7756_v10 = vadd.f32 -1.0, %v2410_v34  ;;  %v7757_v19 = vadd.f32 -1.0, %v2411_v61 }
 0x2ed   : > { %8411 = vmatmul.mubr.msk.f32.gmra.mrb[26].mxu1 %vm933_vm1, %v2727_v57  ;;  %8924 = vrcp.f32 %v2538_v40  ;;  %v12086_v46 = vadd.f32 %v3069_v41, %v11806_v16 }
 0x2ee   : > { %v8917_v32 = vpop.eup %8916  ;;  %8926 = vrcp.f32 %v2539_v14  ;;  %v3363_v25 = vsel %vm933_vm1, %v12082_v48, 0.0  ;;  %v3525_v15 = vmul.f32 %v12082_v48, %v12082_v48 }
 0x2ef   : > { %v2348_v7 = vadd.f32 1.0, %v8917_v32  ;;  %v8919_v62 = vpop.eup %8918  ;;  %3355 = vadd.xlane.f32.xlu0 %v3354_v36  ;;  %v3524_v30 = vmul.f32 %v12086_v46, %v12086_v46 }
 0x2f0   : > { %v8921_v26 = vpop.eup %8920  ;;  %v2659_v3 = vmul.f32 %v8919_v62, %v7754_v21  ;;  %3614 = vadd.xlane.f32.xlu1 %v3613_v1  ;;  %v3619_v27 = vsel %vm933_vm1, %v3525_v15, 0.0 }
 0x2f1   : > { %v2412_v33 = vmul.f32 %v2348_v7, %v2348_v7  ;;  %v8923_v50 = vpop.eup %8922  ;;  %v2661_v8 = vmul.f32 %v8921_v26, %v7755_v58  ;;  %v3616_v34 = vsel %vm933_vm1, %v3524_v30, 0.0 }
 0x2f2   : > { %v2728_v22 = vmul.f32 %v2659_v3, %v11938_v49  ;;  %v2349_v42 = vadd.f32 1.0, %v8923_v50  ;;  %v3360_v49 = vsel %vm933_vm1, %v12086_v46, 0.0 }
 0x2f3   : > { %v2540_v47 = vadd.f32 1.0, %v2412_v33  ;;  %v2729_v17 = vmul.f32 %v2661_v8, %v11942_v13  ;;  %3611 = vadd.xlane.f32.xlu0 %v3610_v6  ;;  %v7758_v61 = vadd.f32 -1.0, %v2412_v33 }
 0x2f4   : > { %8413 = vmatprep.mubr.msk.f32.mxu1 %vm933_vm1, %v2728_v22  ;;  %v2413_v43 = vmul.f32 %v2349_v42, %v2349_v42  ;;  %3364 = vadd.xlane.f32.xlu1 %v3363_v25 }
 0x2f5   : > { %8928 = vrcp.f32 %v2540_v47  ;;  %8414 = vmatmul.mubr.msk.f32.gmra.mrb[28].mxu1 %vm933_vm1, %v2729_v17 }
 0x2f6   : > { %v2541_v13 = vadd.f32 1.0, %v2413_v43  ;;  %v7759_v21 = vadd.f32 -1.0, %v2413_v43 }
 0x2f7   : > { %v8925_v12 = vpop.eup %8924  ;;  %3361 = vadd.xlane.f32.xlu0 %v3360_v49 }
 0x2f8   : > { %v8927_v20 = vpop.eup %8926  ;;  %v2663_v39 = vmul.f32 %v8925_v12, %v7756_v10  ;;  %8930 = vrcp.f32 %v2541_v13  ;;  %3620 = vadd.xlane.f32.xlu1 %v3619_v27 }
 0x2f9   : > { %v2665_v0 = vmul.f32 %v8927_v20, %v7757_v19  ;;  %v8352_v40 = vpop.f32.mrb[80].mxu0 }
 0x2fa   : > { %v2730_v23 = vmul.f32 %v2663_v39, %v11990_v44  ;;  %v12108_v2 = vadd.f32 %v8352_v40, %v11806_v16  ;;  %v3079_v14 = vpop.f32.mrb[81].mxu0 }
 0x2fb   : > { %v2731_v57 = vmul.f32 %v2665_v0, %v11998_v35  ;;  %3617 = vadd.xlane.f32.xlu0 %v3616_v34  ;;  %v12111_v44 = vadd.f32 %v3079_v14, %v11806_v16 }
 0x2fc   : > { %8416 = vmatprep.mubr.msk.f32.mxu1 %vm933_vm1, %v2730_v23  ;;  %v3369_v35 = vsel %vm933_vm1, %v12108_v2, 0.0  ;;  %v3527_v36 = vmul.f32 %v12108_v2, %v12108_v2 }
 0x2fd   : > { %8417 = vmatmul.mubr.msk.f32.gmra.mrb[30].mxu1 %vm933_vm1, %v2731_v57  ;;  %3370 = vadd.xlane.f32.xlu1 %v3369_v35  ;;  %v3366_v7 = vsel %vm933_vm1, %v12111_v44, 0.0  ;;  %v3526_v62 = vmul.f32 %v12111_v44, %v12111_v44 }
 0x2fe   : > { %v3625_v45 = vsel %vm933_vm1, %v3527_v36, 0.0 }
 0x2ff   : > { %v8929_v56 = vpop.eup %8928  ;;  %3367 = vadd.xlane.f32.xlu0 %v3366_v7 }
 0x300   : > { %v2667_v32 = vmul.f32 %v8929_v56, %v7758_v61 }
 0x301   : > { %3626 = vadd.xlane.f32.xlu1 %v3625_v45 }
 0x302   : > { %v2732_v51 = vmul.f32 %v2667_v32, %v12024_v29  ;;  %v8931_v58 = vpop.eup %8930  ;;  %v3622_v29 = vsel %vm933_vm1, %v3526_v62, 0.0 }
 0x303   : > { %v2669_v37 = vmul.f32 %v8931_v58, %v7759_v21  ;;  %3623 = vadd.xlane.f32.xlu0 %v3622_v29  ;;  %v8355_v3 = vpop.f32.mrb[82].mxu0 }
 0x304   : > { %8419 = vmatprep.mubr.msk.f32.mxu1 %vm933_vm1, %v2732_v51  ;;  %v12128_v33 = vadd.f32 %v8355_v3, %v11806_v16  ;;  %v3089_v41 = vpop.f32.mrb[83].mxu0 }
 0x305   : > { %v2733_v26 = vmul.f32 %v2669_v37, %v12035_v55  ;;  %v12131_v50 = vadd.f32 %v3089_v41, %v11806_v16 }
 0x306   : > { %v3375_v8 = vsel %vm933_vm1, %v12128_v33, 0.0  ;;  %v3529_v55 = vmul.f32 %v12128_v33, %v12128_v33 }
 0x307   : > { %8420 = vmatmul.mubr.msk.f32.gmra.mrb[32].mxu1 %vm933_vm1, %v2733_v26  ;;  %3376 = vadd.xlane.f32.xlu1 %v3375_v8  ;;  %v3372_v1 = vsel %vm933_vm1, %v12131_v50, 0.0  ;;  %v3528_v22 = vmul.f32 %v12131_v50, %v12131_v50 }
 0x308   : > { %3373 = vadd.xlane.f32.xlu0 %v3372_v1  ;;  %v3631_v47 = vsel %vm933_vm1, %v3529_v55, 0.0 }
 0x309   : > { %v3628_v42 = vsel %vm933_vm1, %v3528_v22, 0.0 }
 0x30b   : > { %3632 = vadd.xlane.f32.xlu1 %v3631_v47 }
 0x30c   : > { %3629 = vadd.xlane.f32.xlu0 %v3628_v42  ;;  %v8358_v17 = vpop.f32.mrb[84].mxu0 }
 0x30d   : > { %v12144_v6 = vadd.f32 %v8358_v17, %v11806_v16  ;;  %v3099_v25 = vpop.f32.mrb[85].mxu0 }
 0x30e   : > { %v12147_v43 = vadd.f32 %v3099_v25, %v11806_v16 }
 0x30f   : > { %v3381_v49 = vsel %vm933_vm1, %v12144_v6, 0.0  ;;  %v3531_v15 = vmul.f32 %v12144_v6, %v12144_v6 }
 0x310   : > { %3382 = vadd.xlane.f32.xlu1 %v3381_v49  ;;  %v3378_v10 = vsel %vm933_vm1, %v12147_v43, 0.0  ;;  %v3530_v13 = vmul.f32 %v12147_v43, %v12147_v43 }
 0x311   : > { %3379 = vadd.xlane.f32.xlu0 %v3378_v10  ;;  %v3637_v12 = vsel %vm933_vm1, %v3531_v15, 0.0 }
 0x312   : > { %v3634_v19 = vsel %vm933_vm1, %v3530_v13, 0.0 }
 0x314   : > { %3638 = vadd.xlane.f32.xlu1 %v3637_v12 }
 0x315   : > { %3635 = vadd.xlane.f32.xlu0 %v3634_v19 }
 0x31a   : > { %v8361_v30 = vpop.f32.mrb[86].mxu0 }
 0x31b   : > { %v12160_v20 = vadd.f32 %v8361_v30, %v11806_v16  ;;  %v3109_v39 = vpop.f32.mrb[87].mxu0 }
 0x31c   : > { %v12163_v0 = vadd.f32 %v3109_v39, %v11806_v16 }
 0x31d   : > { %16129 = vst [vmem:[#allocation19_spill] sm:$0xff] %v12160_v20  ;;  %v3387_v27 = vsel %vm933_vm1, %v12160_v20, 0.0  ;;  %v3533_v23 = vmul.f32 %v12160_v20, %v12160_v20 }
 0x31e   : > { %16130 = vst [vmem:[#allocation72_spill] sm:$0xff] %v12163_v0  ;;  %3388 = vadd.xlane.f32.xlu1 %v3387_v27  ;;  %v3384_v57 = vsel %vm933_vm1, %v12163_v0, 0.0  ;;  %v3532_v34 = vmul.f32 %v12163_v0, %v12163_v0 }
 0x31f   : > { %3385 = vadd.xlane.f32.xlu0 %v3384_v57  ;;  %v3643_v61 = vsel %vm933_vm1, %v3533_v23, 0.0 }
 0x320   : > { %v3640_v40 = vsel %vm933_vm1, %v3532_v34, 0.0 }
 0x322   : > { %3644 = vadd.xlane.f32.xlu1 %v3643_v61  ;;  %v8364_v56 = vpop.f32.mrb[88].mxu0 }
 0x323   : > { %3641 = vadd.xlane.f32.xlu0 %v3640_v40  ;;  %v12176_v14 = vadd.f32 %v8364_v56, %v11806_v16  ;;  %v3119_v32 = vpop.f32.mrb[89].mxu0 }
 0x324   : > { %v12179_v35 = vadd.f32 %v3119_v32, %v11806_v16 }
 0x325   : > { %16131 = vst [vmem:[#allocation73_spill] sm:$0xff] %v12176_v14  ;;  %v3393_v36 = vsel %vm933_vm1, %v12176_v14, 0.0  ;;  %v3535_v51 = vmul.f32 %v12176_v14, %v12176_v14 }
 0x326   : > { %16132 = vst [vmem:[#allocation20_spill] sm:$0xff] %v12179_v35  ;;  %3394 = vadd.xlane.f32.xlu1 %v3393_v36  ;;  %v3390_v21 = vsel %vm933_vm1, %v12179_v35, 0.0  ;;  %v3534_v7 = vmul.f32 %v12179_v35, %v12179_v35 }
 0x327   : > { %3391 = vadd.xlane.f32.xlu0 %v3390_v21  ;;  %v3649_v62 = vsel %vm933_vm1, %v3535_v51, 0.0 }
 0x328   : > { %v3646_v58 = vsel %vm933_vm1, %v3534_v7, 0.0 }
 0x32a   : > { %3650 = vadd.xlane.f32.xlu1 %v3649_v62 }
 0x32b   : > { %3647 = vadd.xlane.f32.xlu0 %v3646_v58 }
 0x32e   : > { %v8367_v37 = vpop.f32.mrb[90].mxu0 }
 0x32f   : > { %v12192_v45 = vadd.f32 %v8367_v37, %v11806_v16  ;;  %v3129_v26 = vpop.f32.mrb[91].mxu0 }
 0x330   : > { %v12195_v29 = vadd.f32 %v3129_v26, %v11806_v16 }
 0x331   : > { %16133 = vst [vmem:[#allocation74_spill] sm:$0xff] %v12192_v45  ;;  %v3399_v3 = vsel %vm933_vm1, %v12192_v45, 0.0  ;;  %v3537_v41 = vmul.f32 %v12192_v45, %v12192_v45 }
 0x332   : > { %16134 = vst [vmem:[#allocation48_spill] sm:$0xff] %v12195_v29  ;;  %3400 = vadd.xlane.f32.xlu1 %v3399_v3  ;;  %v3396_v8 = vsel %vm933_vm1, %v12195_v29, 0.0  ;;  %v3536_v55 = vmul.f32 %v12195_v29, %v12195_v29 }
 0x333   : > { %3397 = vadd.xlane.f32.xlu0 %v3396_v8  ;;  %v3655_v1 = vsel %vm933_vm1, %v3537_v41, 0.0 }
 0x334   : > { %v3652_v22 = vsel %vm933_vm1, %v3536_v55, 0.0 }
 0x336   : > { %3656 = vadd.xlane.f32.xlu1 %v3655_v1 }
 0x337   : > { %3653 = vadd.xlane.f32.xlu0 %v3652_v22 }
 0x338   : > { %v8370_v47 = vpop.f32.mrb[92].mxu0 }
 0x339   : > { %v12208_v42 = vadd.f32 %v8370_v47, %v11806_v16  ;;  %v3139_v17 = vpop.f32.mrb[93].mxu0 }
 0x33a   : > { %v12211_v25 = vadd.f32 %v3139_v17, %v11806_v16 }
 0x33b   : > { %16135 = vst [vmem:[#allocation75_spill] sm:$0xff] %v12208_v42  ;;  %v3405_v49 = vsel %vm933_vm1, %v12208_v42, 0.0  ;;  %v3539_v15 = vmul.f32 %v12208_v42, %v12208_v42 }
 0x33c   : > { %16136 = vst [vmem:[#allocation22_spill] sm:$0xff] %v12211_v25  ;;  %3406 = vadd.xlane.f32.xlu1 %v3405_v49  ;;  %v3402_v10 = vsel %vm933_vm1, %v12211_v25, 0.0  ;;  %v3538_v13 = vmul.f32 %v12211_v25, %v12211_v25 }
 0x33d   : > { %3403 = vadd.xlane.f32.xlu0 %v3402_v10  ;;  %v3661_v12 = vsel %vm933_vm1, %v3539_v15, 0.0 }
 0x33e   : > { %v3658_v19 = vsel %vm933_vm1, %v3538_v13, 0.0  ;;  %v3323_v30 = vpop.xlane.xlu1 %3322 }
 0x33f   : > { %v12229_v61 = vmul.f32 0.0625, %v3323_v30 }
 0x340   : > { %3662 = vadd.xlane.f32.xlu1 %v3661_v12 }
 0x341   : > { %v8373_v39 = vpop.f32.mrb[0].mxu1  ;;  %3659 = vadd.xlane.f32.xlu0 %v3658_v19  ;;  %v3320_v57 = vpop.xlane.xlu0 %3319  ;;  %v3895_v7 = vmul.f32 %v12229_v61, %v12229_v61 }
 0x342   : > { %v12224_v27 = vadd.f32 %v8373_v39, %v11806_v16  ;;  %v3149_v23 = vpop.f32.mrb[1].mxu1  ;;  %v12239_v51 = vmul.f32 0.0625, %v3320_v57 }
 0x343   : > { %v12227_v34 = vadd.f32 %v3149_v23, %v11806_v16 }
 0x344   : > { %16137 = vst [vmem:[#allocation23_spill] sm:$0xff] %v12224_v27  ;;  %v3411_v40 = vsel %vm933_vm1, %v12224_v27, 0.0  ;;  %v3541_v56 = vmul.f32 %v12224_v27, %v12224_v27  ;;  %v3894_v3 = vmul.f32 %v12239_v51, %v12239_v51 }
 0x345   : > { %16138 = vst [vmem:[#allocation24_spill] sm:$0xff] %v12227_v34  ;;  %3412 = vadd.xlane.f32.xlu1 %v3411_v40  ;;  %v3408_v32 = vsel %vm933_vm1, %v12227_v34, 0.0  ;;  %v3540_v36 = vmul.f32 %v12227_v34, %v12227_v34 }
 0x346   : > { %3409 = vadd.xlane.f32.xlu0 %v3408_v32  ;;  %v3667_v58 = vsel %vm933_vm1, %v3541_v56, 0.0 }
 0x347   : > { %v3664_v26 = vsel %vm933_vm1, %v3540_v36, 0.0 }
 0x348   : > { %v3579_v21 = vpop.xlane.xlu1 %3578 }
 0x349   : > { %v3831_v62 = vmul.f32 0.0625, %v3579_v21  ;;  %v3576_v37 = vpop.xlane.xlu0 %3575  ;;  %3668 = vadd.xlane.f32.xlu1 %v3667_v58 }
 0x34a   : > { %v3830_v8 = vmul.f32 0.0625, %v3576_v37  ;;  %3665 = vadd.xlane.f32.xlu0 %v3664_v26 }
 0x34b   : > { %v3959_v41 = vsub.f32 %v3831_v62, %v3895_v7 }
 0x34c   : > { %v3958_v1 = vsub.f32 %v3830_v8, %v3894_v3  ;;  %v8376_v22 = vpop.f32.mrb[2].mxu1  ;;  %v3329_v10 = vpop.xlane.xlu1 %3328  ;;  %v16141_v8 = vld [vmem:[#allocation30_spill] sm:$0xff] }
 0x34d   : > { %v4023_v55 = vmax.f32 %v3959_v41, 0.0  ;;  %v12248_v47 = vadd.f32 %v8376_v22, %v11806_v16  ;;  %v3159_v17 = vpop.f32.mrb[3].mxu1  ;;  %v12261_v40 = vmul.f32 0.0625, %v3329_v10  ;;  %v9700_v41 = vld [vmem:[%s15560_s4] sm:$0x7] }
 0x34e   : > { %v4022_v15 = vmax.f32 %v3958_v1, 0.0  ;;  %v12251_v13 = vadd.f32 %v3159_v17, %v11806_v16 }
 0x34f   : > { %16139 = vst [vmem:[#allocation25_spill] sm:$0xff] %v12248_v47  ;;  %v4151_v49 = vadd.f32 1e-05, %v4023_v55  ;;  %v3417_v12 = vsel %vm933_vm1, %v12248_v47, 0.0  ;;  %v3543_v19 = vmul.f32 %v12248_v47, %v12248_v47  ;;  %v3897_v7 = vmul.f32 %v12261_v40, %v12261_v40 }
 0x350   : > { %16140 = vst [vmem:[#allocation27_spill] sm:$0xff] %v12251_v13  ;;  %v4150_v30 = vadd.f32 1e-05, %v4022_v15  ;;  %v3326_v39 = vpop.xlane.xlu0 %3325  ;;  %3418 = vadd.xlane.f32.xlu1 %v3417_v12  ;;  %v3414_v23 = vsel %vm933_vm1, %v12251_v13, 0.0  ;;  %v3542_v57 = vmul.f32 %v12251_v13, %v12251_v13  ;;  %v12275_v55 = vrot.slane %v9700_v41, %v16141_v8 }
 0x351   : > { %8932 = vrsqrt.f32 %v4151_v49  ;;  %3415 = vadd.xlane.f32.xlu0 %v3414_v23  ;;  %v12263_v56 = vmul.f32 0.0625, %v3326_v39  ;;  %v3673_v32 = vsel %vm933_vm1, %v3543_v19, 0.0  ;;  %v4087_v15 = vsub.f32 %v11821_v9, %v12229_v61 }
 0x352   : > { %8934 = vrsqrt.f32 %v4150_v30  ;;  %v3670_v21 = vsel %vm933_vm1, %v3542_v57, 0.0  ;;  %v16144_v57 = vld [vmem:[#allocation31_spill] sm:$0xff] }
 0x353   : > { %v3896_v37 = vmul.f32 %v12263_v56, %v12263_v56 }
 0x354   : > { %3674 = vadd.xlane.f32.xlu1 %v3673_v32  ;;  %v12288_v32 = vrot.slane %v9700_v41, %v16144_v57 }
 0x355   : > { %v3585_v36 = vpop.xlane.xlu1 %3584  ;;  %3671 = vadd.xlane.f32.xlu0 %v3670_v21 }
 0x356   : > { %v3833_v62 = vmul.f32 0.0625, %v3585_v36 }
 0x357   : > { %v3582_v58 = vpop.xlane.xlu0 %3581  ;;  %v8379_v1 = vpop.f32.mrb[4].mxu1 }
 0x358   : > { %v3961_v26 = vsub.f32 %v3833_v62, %v3897_v7  ;;  %v3832_v3 = vmul.f32 0.0625, %v3582_v58  ;;  %v12278_v17 = vadd.f32 %v8379_v1, %v11806_v16  ;;  %v3169_v49 = vpop.f32.mrb[5].mxu1 }
 0x359   : > { %v3335_v22 = vpop.xlane.xlu1 %3334  ;;  %v12283_v30 = vadd.f32 %v3169_v49, %v11806_v16 }
 0x35a   : > { %16142 = vst [vmem:[#allocation29_spill] sm:$0xff] %v12278_v17  ;;  %v4025_v10 = vmax.f32 %v3961_v26, 0.0  ;;  %v3960_v12 = vsub.f32 %v3832_v3, %v3896_v37  ;;  %v12285_v39 = vmul.f32 0.0625, %v3335_v22  ;;  %v3423_v36 = vsel %vm933_vm1, %v12278_v17, 0.0 }
 0x35b   : > { %v8933_v19 = vpop.eup %8932  ;;  %16143 = vst [vmem:[#allocation32_spill] sm:$0xff] %v12283_v30  ;;  %v3332_v23 = vpop.xlane.xlu0 %3331  ;;  %v3545_v21 = vmul.f32 %v12278_v17, %v12278_v17  ;;  %3424 = vadd.xlane.f32.xlu1 %v3423_v36  ;;  %v3420_v62 = vsel %vm933_vm1, %v12283_v30, 0.0  ;;  %v3544_v58 = vmul.f32 %v12283_v30, %v12283_v30  ;;  %v4086_v3 = vsub.f32 %v11826_v59, %v12239_v51 }
 0x35c   : > { %v4279_v7 = vmul.f32 %v8933_v19, %v4087_v15  ;;  %v4153_v9 = vadd.f32 1e-05, %v4025_v10  ;;  %v8935_v61 = vpop.eup %8934  ;;  %v4024_v37 = vmax.f32 %v3960_v12, 0.0  ;;  %3421 = vadd.xlane.f32.xlu0 %v3420_v62  ;;  %v3899_v22 = vmul.f32 %v12285_v39, %v12285_v39 }
 0x35d   : > { %v3591_v26 = vpop.xlane.xlu1 %3590  ;;  %v12303_v49 = vmul.f32 0.0625, %v3332_v23  ;;  %v3679_v19 = vsel %vm933_vm1, %v3545_v21, 0.0  ;;  %v4278_v12 = vmul.f32 %v8935_v61, %v4086_v3  ;;  %v3676_v59 = vsel %vm933_vm1, %v3544_v58, 0.0 }
 0x35e   : > { %v4347_v41 = vmul.f32 %v12275_v55, %v4279_v7  ;;  %8936 = vrsqrt.f32 %v4153_v9  ;;  %v4152_v1 = vadd.f32 1e-05, %v4024_v37  ;;  %v3835_v15 = vmul.f32 0.0625, %v3591_v26 }
 0x35f   : > { %3680 = vadd.xlane.f32.xlu1 %v3679_v19  ;;  %v3898_v51 = vmul.f32 %v12303_v49, %v12303_v49 }
 0x360   : > { %v3588_v10 = vpop.xlane.xlu0 %3587  ;;  %v12307_v62 = vadd.f32 %v12288_v32, %v4347_v41  ;;  %8938 = vrsqrt.f32 %v4152_v1  ;;  %v3963_v7 = vsub.f32 %v3835_v15, %v3899_v22  ;;  %3677 = vadd.xlane.f32.xlu0 %v3676_v59  ;;  %v4346_v1 = vmul.f32 %v12275_v55, %v4278_v12 }
 0x361   : > { %v3834_v36 = vmul.f32 0.0625, %v3588_v10  ;;  %v3341_v9 = vpop.xlane.xlu1 %3340  ;;  %v8382_v23 = vpop.f32.mrb[6].mxu1 }
 0x362   : > { %v12312_v37 = vmul.f32 0.0625, %v3341_v9  ;;  %v12315_v21 = vadd.f32 %v8382_v23, %v11806_v16  ;;  %v3179_v61 = vpop.f32.mrb[7].mxu1  ;;  %v4027_v26 = vmax.f32 %v3963_v7, 0.0  ;;  %v4479_v22 = vmin.f32 %v12307_v62, 20.0 }
 0x363   : > { %v3962_v3 = vsub.f32 %v3834_v36, %v3898_v51  ;;  %v12318_v10 = vadd.f32 %v3179_v61, %v11806_v16  ;;  %v4089_v51 = vsub.f32 %v11859_v18, %v12261_v40  ;;  %v12340_v18 = vadd.f32 %v12288_v32, %v4346_v1 }
 0x364   : > { %16145 = vst [vmem:[#allocation35_spill] sm:$0xff] %v12315_v21  ;;  %v3338_v41 = vpop.xlane.xlu0 %3337  ;;  %v3429_v15 = vsel %vm933_vm1, %v12315_v21, 0.0  ;;  %v3547_v19 = vmul.f32 %v12315_v21, %v12315_v21  ;;  %v3901_v7 = vmul.f32 %v12312_v37, %v12312_v37  ;;  %v4155_v23 = vadd.f32 1e-05, %v4027_v26 }
 0x365   : > { %16146 = vst [vmem:[#allocation36_spill] sm:$0xff] %v12318_v10  ;;  %v12320_v58 = vmul.f32 0.0625, %v3338_v41  ;;  %v4026_v59 = vmax.f32 %v3962_v3, 0.0  ;;  %v3597_v9 = vpop.xlane.xlu1 %3596  ;;  %3430 = vadd.xlane.f32.xlu1 %v3429_v15  ;;  %v3426_v36 = vsel %vm933_vm1, %v12318_v10, 0.0  ;;  %v3546_v12 = vmul.f32 %v12318_v10, %v12318_v10 }
 0x366   : > { %3427 = vadd.xlane.f32.xlu0 %v3426_v36  ;;  %v3837_v41 = vmul.f32 0.0625, %v3597_v9  ;;  %v3685_v8 = vsel %vm933_vm1, %v3547_v19, 0.0  ;;  %v4544_v40 = vmul.f32 1.442695, %v4479_v22  ;;  %v4478_v9 = vmin.f32 %v12340_v18, 20.0 }
 0x367   : > { %v4154_v61 = vadd.f32 1e-05, %v4026_v59  ;;  %v3900_v3 = vmul.f32 %v12320_v58, %v12320_v58  ;;  %v3682_v10 = vsel %vm933_vm1, %v3546_v12, 0.0  ;;  %v4088_v1 = vsub.f32 %v11877_v4, %v12263_v56 }
 0x368   : > { %v3594_v15 = vpop.xlane.xlu0 %3593  ;;  %v8937_v57 = vpop.eup %8936  ;;  %v3965_v21 = vsub.f32 %v3837_v41, %v3901_v7 }
 0x369   : > { %v3836_v5 = vmul.f32 0.0625, %v3594_v15  ;;  %8940 = vrsqrt.f32 %v4154_v61  ;;  %v3347_v36 = vpop.xlane.xlu1 %3346  ;;  %v4281_v26 = vmul.f32 %v8937_v57, %v4089_v51  ;;  %3686 = vadd.xlane.f32.xlu1 %v3685_v8  ;;  %v4542_v61 = vmul.f32 1.442695, %v4478_v9 }
 0x36a   : > { %v12343_v30 = vmul.f32 0.0625, %v3347_v36  ;;  %8942 = vpow2.f32 %v4544_v40  ;;  %v8939_v17 = vpop.eup %8938  ;;  %3683 = vadd.xlane.f32.xlu0 %v3682_v10  ;;  %v4029_v19 = vmax.f32 %v3965_v21, 0.0 }
 0x36b   : > { %v3964_v59 = vsub.f32 %v3836_v5, %v3900_v3  ;;  %v4349_v12 = vmul.f32 %v12275_v55, %v4281_v26  ;;  %v4090_v5 = vsub.f32 %v11908_v54, %v12303_v49  ;;  %8944 = vrsqrt.f32 %v4155_v23 }
 0x36c   : > { %v3344_v22 = vpop.xlane.xlu0 %3343  ;;  %v4280_v10 = vmul.f32 %v8939_v17, %v4088_v1  ;;  %v8385_v4 = vpop.f32.mrb[8].mxu1  ;;  %v4157_v21 = vadd.f32 1e-05, %v4029_v19  ;;  %v3903_v41 = vmul.f32 %v12343_v30, %v12343_v30  ;;  %8946 = vpow2.f32 %v4542_v61 }
 0x36d   : > { %v4028_v8 = vmax.f32 %v3964_v59, 0.0  ;;  %v12353_v57 = vmul.f32 0.0625, %v3344_v22  ;;  %v3603_v51 = vpop.xlane.xlu1 %3602  ;;  %v12356_v3 = vadd.f32 %v12288_v32, %v4349_v12  ;;  %v12363_v54 = vadd.f32 %v8385_v4, %v11806_v16  ;;  %v3189_v49 = vpop.f32.mrb[9].mxu1 }
 0x36e   : > { %v3839_v15 = vmul.f32 0.0625, %v3603_v51  ;;  %v4348_v36 = vmul.f32 %v12275_v55, %v4280_v10  ;;  %v12369_v26 = vadd.f32 %v3189_v49, %v11806_v16  ;;  %8948 = vrsqrt.f32 %v4157_v21 }
 0x36f   : > { %16147 = vst [vmem:[#allocation39_spill] sm:$0xff] %v12363_v54  ;;  %v4156_v23 = vadd.f32 1e-05, %v4028_v8  ;;  %v3902_v17 = vmul.f32 %v12353_v57, %v12353_v57  ;;  %v4481_v1 = vmin.f32 %v12356_v3, 20.0  ;;  %v3435_v19 = vsel %vm933_vm1, %v12363_v54, 0.0 }
 0x370   : > { %v3600_v40 = vpop.xlane.xlu0 %3599  ;;  %16148 = vst [vmem:[#allocation21_spill] sm:$0xff] %v12369_v26  ;;  %v3967_v59 = vsub.f32 %v3839_v15, %v3903_v41  ;;  %v3549_v22 = vmul.f32 %v12363_v54, %v12363_v54  ;;  %v12377_v8 = vadd.f32 %v12288_v32, %v4348_v36  ;;  %3436 = vadd.xlane.f32.xlu1 %v3435_v19  ;;  %v3432_v51 = vsel %vm933_vm1, %v12369_v26, 0.0 }
 0x371   : > { %v3838_v9 = vmul.f32 0.0625, %v3600_v40  ;;  %v3353_v12 = vpop.xlane.xlu1 %3352  ;;  %v3548_v10 = vmul.f32 %v12369_v26, %v12369_v26  ;;  %3433 = vadd.xlane.f32.xlu0 %v3432_v51  ;;  %8950 = vrsqrt.f32 %v4156_v23  ;;  %v4548_v21 = vmul.f32 1.442695, %v4481_v1 }
 0x372   : > { %v4031_v4 = vmax.f32 %v3967_v59, 0.0  ;;  %v12387_v40 = vmul.f32 0.0625, %v3353_v12  ;;  %v4480_v19 = vmin.f32 %v12377_v8, 20.0 }
 0x373   : > { %v3966_v41 = vsub.f32 %v3838_v9, %v3902_v17  ;;  %v8941_v15 = vpop.eup %8940  ;;  %v3691_v9 = vsel %vm933_vm1, %v3549_v22, 0.0  ;;  %v3688_v12 = vsel %vm933_vm1, %v3548_v10, 0.0 }
 0x374   : > { %v3350_v36 = vpop.xlane.xlu0 %3349  ;;  %v8943_v56 = vpop.eup %8942  ;;  %v4159_v59 = vadd.f32 1e-05, %v4031_v4  ;;  %v4546_v54 = vmul.f32 1.442695, %v4480_v19  ;;  %3692 = vadd.xlane.f32.xlu1 %v3691_v9  ;;  %v3905_v61 = vmul.f32 %v12387_v40, %v12387_v40  ;;  %v4282_v47 = vmul.f32 %v8941_v15, %v4090_v5 }
 0x375   : > { %v12392_v17 = vmul.f32 0.0625, %v3350_v36  ;;  %v4030_v51 = vmax.f32 %v3966_v41, 0.0  ;;  %v3609_v49 = vpop.xlane.xlu1 %3608  ;;  %v4671_v26 = vadd.f32 1.0, %v8943_v56  ;;  %v8945_v13 = vpop.eup %8944  ;;  %3689 = vadd.xlane.f32.xlu0 %v3688_v12 }
 0x376   : > { %v3841_v7 = vmul.f32 0.0625, %v3609_v49  ;;  %8952 = vpow2.f32 %v4546_v54 }
 0x377   : > { %v4735_v36 = vmul.f32 %v4671_v26, %v4671_v26  ;;  %8954 = vrsqrt.f32 %v4159_v59  ;;  %v3904_v22 = vmul.f32 %v12392_v17, %v12392_v17  ;;  %v8388_v23 = vpop.f32.mrb[10].mxu1  ;;  %v4158_v41 = vadd.f32 1e-05, %v4030_v51 }
 0x378   : > { %v3606_v4 = vpop.xlane.xlu0 %3605  ;;  %v3969_v19 = vsub.f32 %v3841_v7, %v3905_v61  ;;  %v12405_v26 = vadd.f32 %v8388_v23, %v11806_v16  ;;  %v3199_v5 = vpop.f32.mrb[11].mxu1  ;;  %v16151_v59 = vsub.f32 %v11900_v28, %v12285_v39  ;;  %8956 = vpow2.f32 %v4548_v21 }
 0x379   : > { %v3840_v10 = vmul.f32 0.0625, %v3606_v4  ;;  %v3359_v9 = vpop.xlane.xlu1 %3358  ;;  %v4863_v49 = vadd.f32 1.0, %v4735_v36  ;;  %v8947_v4 = vpop.eup %8946  ;;  %v12413_v51 = vadd.f32 %v3199_v5, %v11806_v16  ;;  %v4350_v7 = vmul.f32 %v12275_v55, %v4282_v47 }
 0x37a   : > { %16149 = vst [vmem:[#allocation4_spill] sm:$0xff] %v12405_v26  ;;  %v12407_v15 = vmul.f32 0.0625, %v3359_v9  ;;  %v4283_v12 = vmul.f32 %v8945_v13, %v16151_v59  ;;  %v4033_v56 = vmax.f32 %v3969_v19, 0.0  ;;  %v3441_v61 = vsel %vm933_vm1, %v12405_v26, 0.0  ;;  %v12424_v23 = vpop.eup %8948 }
 0x37b   : > { %v3968_v54 = vsub.f32 %v3840_v10, %v3904_v22  ;;  %16152 = vst [vmem:[#allocation41_spill] sm:$0xff] %v12413_v51  ;;  %v3551_v22 = vmul.f32 %v12405_v26, %v12405_v26  ;;  %8958 = vrcp.f32 %v4863_v49  ;;  %3442 = vadd.xlane.f32.xlu1 %v3441_v61  ;;  %v3438_v28 = vsel %vm933_vm1, %v12413_v51, 0.0 }
 0x37c   : > { %16150 = vst [vmem:[#allocation38_spill] sm:$0xff] %v12407_v15  ;;  %v3356_v1 = vpop.xlane.xlu0 %3355  ;;  %v3550_v13 = vmul.f32 %v12413_v51, %v12413_v51  ;;  %8960 = vrsqrt.f32 %v4158_v41  ;;  %v4161_v39 = vadd.f32 1e-05, %v4033_v56  ;;  %3439 = vadd.xlane.f32.xlu0 %v3438_v28  ;;  %v3907_v19 = vmul.f32 %v12407_v15, %v12407_v15  ;;  %v8951_v56 = vpop.eup %8950 }
 0x37d   : > { %v4032_v10 = vmax.f32 %v3968_v54, 0.0  ;;  %v3615_v21 = vpop.xlane.xlu1 %3614  ;;  %v12428_v9 = vmul.f32 0.0625, %v3356_v1  ;;  %v4670_v54 = vadd.f32 1.0, %v8947_v4  ;;  %v7825_v59 = vadd.f32 -1.0, %v4735_v36 }
 0x37e   : > { %v3843_v49 = vmul.f32 0.0625, %v3615_v21  ;;  %v12431_v61 = vadd.f32 %v12288_v32, %v4350_v7  ;;  %v4351_v41 = vmul.f32 %v12275_v55, %v4283_v12  ;;  %v3697_v51 = vsel %vm933_vm1, %v3551_v22, 0.0 }
 0x37f   : > { %v4160_v47 = vadd.f32 1e-05, %v4032_v10  ;;  %16153 = vst [vmem:[#allocation40_spill] sm:$0xff] %v12428_v9  ;;  %v3694_v28 = vsel %vm933_vm1, %v3550_v13, 0.0  ;;  %3698 = vadd.xlane.f32.xlu1 %v3697_v51  ;;  %8962 = vrsqrt.f32 %v4161_v39  ;;  %v3906_v36 = vmul.f32 %v12428_v9, %v12428_v9 }
 0x380   : > { %v3612_v5 = vpop.xlane.xlu0 %3611  ;;  %v3971_v26 = vsub.f32 %v3843_v49, %v3907_v19  ;;  %v8953_v1 = vpop.eup %8952  ;;  %v4734_v21 = vmul.f32 %v4670_v54, %v4670_v54  ;;  %3695 = vadd.xlane.f32.xlu0 %v3694_v28  ;;  %v12451_v54 = vadd.f32 %v12288_v32, %v4351_v41 }
 0x381   : > { %v3842_v4 = vmul.f32 0.0625, %v3612_v5  ;;  %v3365_v7 = vpop.xlane.xlu1 %3364  ;;  %v12440_v34 = vpop.eup %8954  ;;  %8964 = vrsqrt.f32 %v4160_v47  ;;  %v4482_v5 = vmin.f32 %v12431_v61, 20.0  ;;  %v4672_v22 = vadd.f32 1.0, %v8953_v1 }
 0x382   : > { %v8391_v12 = vpop.f32.mrb[12].mxu1  ;;  %v4035_v13 = vmax.f32 %v3971_v26, 0.0  ;;  %v12444_v10 = vmul.f32 0.0625, %v3365_v7  ;;  %v4862_v27 = vadd.f32 1.0, %v4734_v21  ;;  %v8957_v26 = vpop.eup %8956  ;;  %v4483_v9 = vmin.f32 %v12451_v54, 20.0 }
 0x383   : > { %v12447_v51 = vadd.f32 %v8391_v12, %v11806_v16  ;;  %v3209_v39 = vpop.f32.mrb[13].mxu1  ;;  %v3970_v19 = vsub.f32 %v3842_v4, %v3906_v36  ;;  %v4736_v53 = vmul.f32 %v4672_v22, %v4672_v22  ;;  %v16182_v20 = vld [vmem:[#allocation38_spill] sm:$0xff] }
 0x384   : > { %v3362_v49 = vpop.xlane.xlu0 %3361  ;;  %v12454_v28 = vadd.f32 %v3209_v39, %v11806_v16  ;;  %v4163_v47 = vadd.f32 1e-05, %v4035_v13  ;;  %v3909_v1 = vmul.f32 %v12444_v10, %v12444_v10 }
 0x385   : > { %16154 = vst [vmem:[#allocation5_spill] sm:$0xff] %v12447_v51  ;;  %v3447_v7 = vsel %vm933_vm1, %v12447_v51, 0.0  ;;  %v3553_v12 = vmul.f32 %v12447_v51, %v12447_v51  ;;  %v4034_v36 = vmax.f32 %v3970_v19, 0.0  ;;  %v12460_v4 = vmul.f32 0.0625, %v3362_v49  ;;  %v3621_v25 = vpop.xlane.xlu1 %3620  ;;  %v8959_v42 = vpop.eup %8958 }
 0x386   : > { %16155 = vst [vmem:[#allocation26_spill] sm:$0xff] %v12454_v28  ;;  %3448 = vadd.xlane.f32.xlu1 %v3447_v7  ;;  %v3444_v41 = vsel %vm933_vm1, %v12454_v28, 0.0  ;;  %v3552_v13 = vmul.f32 %v12454_v28, %v12454_v28  ;;  %v3845_v39 = vmul.f32 0.0625, %v3621_v25  ;;  %v12468_v29 = vpop.eup %8960  ;;  %8966 = vrsqrt.f32 %v4163_v47 }
 0x387   : > { %3445 = vadd.xlane.f32.xlu0 %v3444_v41  ;;  %v3703_v19 = vsel %vm933_vm1, %v3553_v12, 0.0  ;;  %v4162_v49 = vadd.f32 1e-05, %v4034_v36  ;;  %v16156_v7 = vsub.f32 %v11960_v38, %v12320_v58  ;;  %v3908_v35 = vmul.f32 %v12460_v4, %v12460_v4 }
 0x388   : > { %v3618_v51 = vpop.xlane.xlu0 %3617  ;;  %v3973_v28 = vsub.f32 %v3845_v39, %v3909_v1  ;;  %8968 = vrcp.f32 %v4862_v27  ;;  %v3700_v25 = vsel %vm933_vm1, %v3552_v13, 0.0  ;;  %v4929_v15 = vmul.f32 %v8959_v42, %v7825_v59 }
 0x389   : > { %v4284_v45 = vmul.f32 %v8951_v56, %v16156_v7  ;;  %v3844_v14 = vmul.f32 0.0625, %v3618_v51  ;;  %v4673_v41 = vadd.f32 1.0, %v8957_v26  ;;  %v4550_v36 = vmul.f32 1.442695, %v4482_v5  ;;  %v12478_v60 = vpop.eup %8962 }
 0x38a   : > { %3704 = vadd.xlane.f32.xlu1 %v3703_v19  ;;  %v4037_v12 = vmax.f32 %v3973_v28, 0.0  ;;  %8970 = vrsqrt.f32 %v4162_v49  ;;  %v7824_v38 = vadd.f32 -1.0, %v4734_v21  ;;  %v4864_v58 = vadd.f32 1.0, %v4736_v53  ;;  %v3371_v22 = vpop.xlane.xlu1 %3370 }
 0x38b   : > { %v3972_v47 = vsub.f32 %v3844_v14, %v3908_v35  ;;  %3701 = vadd.xlane.f32.xlu0 %v3700_v25  ;;  %v4737_v56 = vmul.f32 %v4673_v41, %v4673_v41  ;;  %v12480_v51 = vpop.eup %8964  ;;  %8972 = vpow2.f32 %v4550_v36  ;;  %v12486_v5 = vmul.f32 0.0625, %v3371_v22 }
 0x38c   : > { %v4165_v27 = vadd.f32 1e-05, %v4037_v12  ;;  %v8394_v14 = vpop.f32.mrb[14].mxu1  ;;  %v3368_v28 = vpop.xlane.xlu0 %3367  ;;  %8974 = vrcp.f32 %v4864_v58  ;;  %v5055_v39 = vmul.f32 %v4929_v15, %v12307_v62  ;;  %v4552_v19 = vmul.f32 1.442695, %v4483_v9 }
 0x38d   : > { %v4036_v59 = vmax.f32 %v3972_v47, 0.0  ;;  %v4865_v21 = vadd.f32 1.0, %v4737_v56  ;;  %v12489_v26 = vadd.f32 %v8394_v14, %v11806_v16  ;;  %v3219_v13 = vpop.f32.mrb[15].mxu1  ;;  %v12491_v1 = vmul.f32 0.0625, %v3368_v28 }
 0x38e   : > { %v12495_v49 = vadd.f32 %v3219_v13, %v11806_v16  ;;  %v7826_v7 = vadd.f32 -1.0, %v4736_v53  ;;  %v12497_v25 = vadd.f32 -1.0, %v4737_v56  ;;  %v3627_v36 = vpop.xlane.xlu1 %3626  ;;  %v3911_v15 = vmul.f32 %v12486_v5, %v12486_v5 }
 0x38f   : > { %16157 = vst [vmem:[#allocation6_spill] sm:$0xff] %v12489_v26  ;;  %8976 = vrcp.f32 %v4865_v21  ;;  %v3453_v41 = vsel %vm933_vm1, %v12489_v26, 0.0  ;;  %v3555_v12 = vmul.f32 %v12489_v26, %v12489_v26  ;;  %v4164_v47 = vadd.f32 1e-05, %v4036_v59 }
 0x390   : > { %16158 = vst [vmem:[#allocation50_spill] sm:$0xff] %v12495_v49  ;;  %8978 = vrsqrt.f32 %v4165_v27  ;;  %v12503_v58 = vpop.eup %8966  ;;  %3454 = vadd.xlane.f32.xlu1 %v3453_v41  ;;  %v3450_v62 = vsel %vm933_vm1, %v12495_v49, 0.0  ;;  %v3554_v53 = vmul.f32 %v12495_v49, %v12495_v49  ;;  %v3847_v9 = vmul.f32 0.0625, %v3627_v36  ;;  %v3624_v56 = vpop.xlane.xlu0 %3623 }
 0x391   : > { %3451 = vadd.xlane.f32.xlu0 %v3450_v62  ;;  %v3910_v27 = vmul.f32 %v12491_v1, %v12491_v1  ;;  %v3846_v59 = vmul.f32 0.0625, %v3624_v56  ;;  %8980 = vpow2.f32 %v4552_v19  ;;  %v4352_v14 = vmul.f32 %v12275_v55, %v4284_v45 }
 0x392   : > { %v8969_v22 = vpop.eup %8968  ;;  %v3709_v28 = vsel %vm933_vm1, %v3555_v12, 0.0  ;;  %v3975_v13 = vsub.f32 %v3847_v9, %v3911_v15  ;;  %v16159_v41 = vsub.f32 %v11950_v11, %v12312_v37  ;;  %v16160_v62 = vsub.f32 %v12006_v52, %v12353_v57 }
 0x393   : > { %v4927_v21 = vmul.f32 %v8969_v22, %v7824_v38  ;;  %v3974_v36 = vsub.f32 %v3846_v59, %v3910_v27  ;;  %v12520_v35 = vadd.f32 %v12288_v32, %v4352_v14  ;;  %v16161_v45 = vsub.f32 %v11994_v24, %v12343_v30 }
 0x394   : > { %v4285_v42 = vmul.f32 %v12424_v23, %v16159_v41  ;;  %v4286_v19 = vmul.f32 %v12468_v29, %v16160_v62  ;;  %v12530_v12 = vpop.eup %8970  ;;  %3710 = vadd.xlane.f32.xlu1 %v3709_v28  ;;  %v3706_v11 = vsel %vm933_vm1, %v3554_v53, 0.0  ;;  %v4039_v15 = vmax.f32 %v3975_v13, 0.0  ;;  %v3377_v29 = vpop.xlane.xlu1 %3376 }
 0x395   : > { %v4287_v38 = vmul.f32 %v12440_v34, %v16161_v45  ;;  %v5054_v23 = vmul.f32 %v4927_v21, %v12340_v18  ;;  %v8973_v9 = vpop.eup %8972  ;;  %3707 = vadd.xlane.f32.xlu0 %v3706_v11  ;;  %8982 = vrsqrt.f32 %v4164_v47  ;;  %v4038_v24 = vmax.f32 %v3974_v36, 0.0  ;;  %v3374_v56 = vpop.xlane.xlu0 %3373 }
 0x396   : > { %v4484_v34 = vmin.f32 %v12520_v35, 20.0  ;;  %v8975_v30 = vpop.eup %8974  ;;  %v4167_v57 = vadd.f32 1e-05, %v4039_v15  ;;  %v12540_v53 = vmul.f32 0.0625, %v3377_v29  ;;  %v4353_v18 = vmul.f32 %v12275_v55, %v4285_v42 }
 0x397   : > { %8426 = vmatprep.mubr.msk.f32.mxu1 %vm933_vm1, %v5054_v23  ;;  %v16162_v22 = vsub.f32 %v12043_v63, %v12392_v17  ;;  %v12550_v59 = vmul.f32 0.0625, %v3374_v56  ;;  %v4931_v14 = vmul.f32 %v8975_v30, %v7826_v7  ;;  %v12553_v28 = vmul.f32 %v12275_v55, %v4286_v19 }
 0x398   : > { %v8397_v27 = vpop.f32.mrb[16].mxu1  ;;  %8427 = vmatmul.mubr.msk.f32.vlgmr.msra.gmra.mrb[34].mxu1 %vm933_vm1, %v5055_v39  ;;  %v12556_v21 = vmul.f32 %v12275_v55, %v4287_v38  ;;  %v4166_v17 = vadd.f32 1e-05, %v4038_v24  ;;  %v4554_v41 = vmul.f32 1.442695, %v4484_v34  ;;  %8984 = vrsqrt.f32 %v4167_v57  ;;  %v3633_v19 = vpop.xlane.xlu1 %3632 }
 0x399   : > { %v12547_v47 = vmul.f32 %v12480_v51, %v16162_v22  ;;  %v8977_v13 = vpop.eup %8976  ;;  %v12559_v42 = vadd.f32 %v8397_v27, %v11806_v16  ;;  %v3229_v63 = vpop.f32.mrb[17].mxu1  ;;  %v4674_v51 = vadd.f32 1.0, %v8973_v9  ;;  %v3913_v7 = vmul.f32 %v12540_v53, %v12540_v53 }
 0x39a   : > { %v12561_v36 = vpop.eup %8978  ;;  %v12564_v39 = vadd.f32 %v3229_v63, %v11806_v16  ;;  %v3912_v62 = vmul.f32 %v12550_v59, %v12550_v59  ;;  %v5056_v11 = vmul.f32 %v4931_v14, %v12377_v8  ;;  %v3849_v23 = vmul.f32 0.0625, %v3633_v19  ;;  %v3630_v15 = vpop.xlane.xlu0 %3629 }
 0x39b   : > { %16163 = vst [vmem:[#allocation52_spill] sm:$0xff] %v12559_v42  ;;  %v3459_v45 = vsel %vm933_vm1, %v12559_v42, 0.0  ;;  %v3557_v38 = vmul.f32 %v12559_v42, %v12559_v42  ;;  %v8981_v9 = vpop.eup %8980  ;;  %v4933_v34 = vmul.f32 %v8977_v13, %v12497_v25  ;;  %v3848_v30 = vmul.f32 0.0625, %v3630_v15 }
 0x39c   : > { %16164 = vst [vmem:[#allocation28_spill] sm:$0xff] %v12564_v39  ;;  %3460 = vadd.xlane.f32.xlu1 %v3459_v45  ;;  %v3456_v24 = vsel %vm933_vm1, %v12564_v39, 0.0  ;;  %v3556_v29 = vmul.f32 %v12564_v39, %v12564_v39  ;;  %8986 = vrsqrt.f32 %v4166_v17  ;;  %8429 = vmatprep.mubr.msk.f32.mxu1 %vm933_vm1, %v5056_v11  ;;  %v3977_v57 = vsub.f32 %v3849_v23, %v3913_v7 }
 0x39d   : > { %3457 = vadd.xlane.f32.xlu0 %v3456_v24  ;;  %v4738_v56 = vmul.f32 %v4674_v51, %v4674_v51  ;;  %v12582_v8 = vadd.f32 %v12288_v32, %v4353_v18  ;;  %v5057_v27 = vmul.f32 %v4933_v34, %v12356_v3  ;;  %v3976_v14 = vsub.f32 %v3848_v30, %v3912_v62  ;;  %v3383_v62 = vpop.xlane.xlu1 %3382 }
 0x39e   : > { %8988 = vpow2.f32 %v4554_v41  ;;  %v3715_v25 = vsel %vm933_vm1, %v3557_v38, 0.0  ;;  %v4041_v13 = vmax.f32 %v3977_v57, 0.0  ;;  %v4675_v17 = vadd.f32 1.0, %v8981_v9  ;;  %v3380_v15 = vpop.xlane.xlu0 %3379 }
 0x39f   : > { %v8400_v63 = vpop.f32.mrb[18].mxu1  ;;  %v4866_v19 = vadd.f32 1.0, %v4738_v56  ;;  %v12588_v45 = vpop.eup %8982  ;;  %v3712_v7 = vsel %vm933_vm1, %v3556_v29, 0.0  ;;  %8430 = vmatmul.mubr.msk.f32.gmra.mrb[36].mxu1 %vm933_vm1, %v5057_v27  ;;  %v4040_v41 = vmax.f32 %v3976_v14, 0.0  ;;  %v12600_v23 = vmul.f32 0.0625, %v3383_v62 }
 0x3a0   : > { %v12591_v51 = vadd.f32 %v8400_v63, %v11806_v16  ;;  %3716 = vadd.xlane.f32.xlu1 %v3715_v25  ;;  %v3239_v18 = vpop.f32.mrb[19].mxu1  ;;  %v4169_v11 = vadd.f32 1e-05, %v4041_v13  ;;  %v12606_v34 = vmul.f32 0.0625, %v3380_v15  ;;  %v7828_v14 = vadd.f32 -1.0, %v4738_v56 }
 0x3a1   : > { %v12598_v38 = vadd.f32 %v3239_v18, %v11806_v16  ;;  %3713 = vadd.xlane.f32.xlu0 %v3712_v7  ;;  %8990 = vrcp.f32 %v4866_v19  ;;  %v4168_v29 = vadd.f32 1e-05, %v4040_v41  ;;  %v4739_v63 = vmul.f32 %v4675_v17, %v4675_v17  ;;  %v3639_v18 = vpop.xlane.xlu1 %3638 }
 0x3a2   : > { %16165 = vst [vmem:[#allocation7_spill] sm:$0xff] %v12591_v51  ;;  %v3465_v9 = vsel %vm933_vm1, %v12591_v51, 0.0  ;;  %v3559_v24 = vmul.f32 %v12591_v51, %v12591_v51  ;;  %v12612_v25 = vpop.eup %8984  ;;  %8992 = vrsqrt.f32 %v4169_v11  ;;  %v4485_v7 = vmin.f32 %v12582_v8, 20.0  ;;  %v3636_v15 = vpop.xlane.xlu0 %3635 }
 0x3a3   : > { %16166 = vst [vmem:[#allocation47_spill] sm:$0xff] %v12598_v38  ;;  %v3462_v30 = vsel %vm933_vm1, %v12598_v38, 0.0  ;;  %v8403_v57 = vpop.f32.mrb[20].mxu1  ;;  %v3558_v27 = vmul.f32 %v12598_v38, %v12598_v38  ;;  %v12620_v41 = vadd.f32 %v12288_v32, %v12553_v28  ;;  %8994 = vrsqrt.f32 %v4168_v29 }
 0x3a4   : > { %3466 = vadd.xlane.f32.xlu1 %v3465_v9  ;;  %v12615_v13 = vadd.f32 %v8403_v57, %v11806_v16  ;;  %v3249_v19 = vpop.f32.mrb[21].mxu1  ;;  %v3721_v62 = vsel %vm933_vm1, %v3559_v24, 0.0  ;;  %v3915_v17 = vmul.f32 %v12600_v23, %v12600_v23  ;;  %v3914_v28 = vmul.f32 %v12606_v34, %v12606_v34 }
 0x3a5   : > { %3463 = vadd.xlane.f32.xlu0 %v3462_v30  ;;  %v12624_v56 = vadd.f32 %v3249_v19, %v11806_v16  ;;  %v3718_v11 = vsel %vm933_vm1, %v3558_v27, 0.0  ;;  %v3851_v57 = vmul.f32 0.0625, %v3639_v18  ;;  %v4867_v22 = vadd.f32 1.0, %v4739_v63 }
 0x3a6   : > { %16167 = vst [vmem:[#allocation46_spill] sm:$0xff] %v12615_v13  ;;  %v12633_v30 = vpop.eup %8986  ;;  %v3471_v24 = vsel %vm933_vm1, %v12615_v13, 0.0  ;;  %v3850_v3 = vmul.f32 0.0625, %v3636_v15  ;;  %v3561_v9 = vmul.f32 %v12615_v13, %v12615_v13  ;;  %v4556_v38 = vmul.f32 1.442695, %v4485_v7 }
 0x3a7   : > { %16168 = vst [vmem:[#allocation33_spill] sm:$0xff] %v12624_v56  ;;  %v3979_v52 = vsub.f32 %v3851_v57, %v3915_v17  ;;  %v3560_v29 = vmul.f32 %v12624_v56, %v12624_v56  ;;  %8996 = vrcp.f32 %v4867_v22  ;;  %v7829_v17 = vadd.f32 -1.0, %v4739_v63 }
 0x3a8   : > { %v8406_v19 = vpop.f32.mrb[22].mxu1  ;;  %v8989_v37 = vpop.eup %8988  ;;  %3722 = vadd.xlane.f32.xlu1 %v3721_v62  ;;  %v3978_v15 = vsub.f32 %v3850_v3, %v3914_v28  ;;  %v3468_v62 = vsel %vm933_vm1, %v12624_v56, 0.0  ;;  %8998 = vpow2.f32 %v4556_v38  ;;  %v3727_v57 = vsel %vm933_vm1, %v3561_v9, 0.0 }
 0x3a9   : > { %v12640_v27 = vadd.f32 %v8406_v19, %v11806_v16  ;;  %v3259_v18 = vpop.f32.mrb[23].mxu1  ;;  %3719 = vadd.xlane.f32.xlu0 %v3718_v11  ;;  %v4043_v39 = vmax.f32 %v3979_v52, 0.0  ;;  %v4676_v13 = vadd.f32 1.0, %v8989_v37  ;;  %v3724_v56 = vsel %vm933_vm1, %v3560_v29, 0.0 }
 0x3aa   : > { %v12645_v51 = vadd.f32 %v3259_v18, %v11806_v16  ;;  %v4042_v11 = vmax.f32 %v3978_v15, 0.0  ;;  %v4486_v63 = vmin.f32 %v12620_v41, 20.0 }
 0x3ab   : > { %16169 = vst [vmem:[#allocation53_spill] sm:$0xff] %v12640_v27  ;;  %v3563_v19 = vmul.f32 %v12640_v27, %v12640_v27  ;;  %v8991_v42 = vpop.eup %8990  ;;  %v4171_v3 = vadd.f32 1e-05, %v4043_v39  ;;  %v3389_v28 = vpop.xlane.xlu1 %3388  ;;  %v4740_v18 = vmul.f32 %v4676_v13, %v4676_v13  ;;  %v3477_v37 = vsel %vm933_vm1, %v12640_v27, 0.0 }
 0x3ac   : > { %16170 = vst [vmem:[#allocation49_spill] sm:$0xff] %v12645_v51  ;;  %v3562_v7 = vmul.f32 %v12645_v51, %v12645_v51  ;;  %3472 = vadd.xlane.f32.xlu1 %v3471_v24  ;;  %v4935_v22 = vmul.f32 %v8991_v42, %v7828_v14  ;;  %v12659_v52 = vmul.f32 0.0625, %v3389_v28  ;;  %v3386_v49 = vpop.xlane.xlu0 %3385  ;;  %v12662_v15 = vpop.eup %8992  ;;  %v3474_v38 = vsel %vm933_vm1, %v12645_v51, 0.0 }
 0x3ad   : > { %3469 = vadd.xlane.f32.xlu0 %v3468_v62  ;;  %v3733_v42 = vsel %vm933_vm1, %v3563_v19, 0.0  ;;  %v12668_v14 = vmul.f32 0.0625, %v3386_v49  ;;  %v12670_v13 = vpop.eup %8994  ;;  %9000 = vrsqrt.f32 %v4171_v3  ;;  %v4170_v24 = vadd.f32 1e-05, %v4042_v11 }
 0x3ae   : > { %16171 = vst [vmem:[#allocation9_spill] sm:$0xff] %v12659_v52  ;;  %v5058_v39 = vmul.f32 %v4935_v22, %v12431_v61  ;;  %v3730_v9 = vsel %vm933_vm1, %v3562_v7, 0.0  ;;  %v4868_v29 = vadd.f32 1.0, %v4740_v18  ;;  %v3917_v62 = vmul.f32 %v12659_v52, %v12659_v52  ;;  %v16181_v52 = vld [vmem:[#allocation3_spill] sm:$0xff] }
 0x3af   : > { %16172 = vst [vmem:[#allocation34_spill] sm:$0xff] %v12668_v14  ;;  %v12676_v28 = vadd.f32 -1.0, %v4740_v18  ;;  %v3645_v19 = vpop.xlane.xlu1 %3644  ;;  %v4558_v51 = vmul.f32 1.442695, %v4486_v63  ;;  %v12680_v61 = vadd.f32 %v12288_v32, %v12556_v21  ;;  %v3916_v7 = vmul.f32 %v12668_v14, %v12668_v14 }
 0x3b0   : > { %3728 = vadd.xlane.f32.xlu1 %v3727_v57  ;;  %8432 = vmatprep.mubr.msk.f32.mxu1 %vm933_vm1, %v5058_v39  ;;  %9002 = vrcp.f32 %v4868_v29  ;;  %v3853_v11 = vmul.f32 0.0625, %v3645_v19  ;;  %v3642_v57 = vpop.xlane.xlu0 %3641  ;;  %v4356_v22 = vmul.f32 %v12275_v55, %v12547_v47  ;;  %v16175_v29 = vsub.f32 %v12031_v31, %v12387_v40 }
 0x3b1   : > { %3725 = vadd.xlane.f32.xlu0 %v3724_v56  ;;  %v8409_v49 = vpop.f32.mrb[24].mxu1  ;;  %v3852_v63 = vmul.f32 0.0625, %v3642_v57  ;;  %9004 = vpow2.f32 %v4558_v51  ;;  %v4487_v21 = vmin.f32 %v12680_v61, 20.0  ;;  %v8997_v39 = vpop.eup %8996  ;;  %v16183_v14 = vsub.f32 %v16181_v52, %v16182_v20 }
 0x3b2   : > { %v12687_v3 = vadd.f32 %v8409_v49, %v11806_v16  ;;  %v3269_v18 = vpop.f32.mrb[25].mxu1  ;;  %9006 = vrsqrt.f32 %v4170_v24  ;;  %v3981_v27 = vsub.f32 %v3853_v11, %v3917_v62  ;;  %v4289_v19 = vmul.f32 %v12478_v60, %v16175_v29  ;;  %v8999_v26 = vpop.eup %8998 }
 0x3b3   : > { %v12691_v56 = vadd.f32 %v3269_v18, %v11806_v16  ;;  %v4937_v47 = vmul.f32 %v8997_v39, %v7829_v17  ;;  %v3980_v57 = vsub.f32 %v3852_v63, %v3916_v7  ;;  %v12700_v51 = vadd.f32 %v12288_v32, %v4356_v22  ;;  %v3395_v40 = vpop.xlane.xlu1 %3394 }
 0x3b4   : > { %16173 = vst [vmem:[#allocation58_spill] sm:$0xff] %v12687_v3  ;;  %3478 = vadd.xlane.f32.xlu1 %v3477_v37  ;;  %v3565_v24 = vmul.f32 %v12687_v3, %v12687_v3  ;;  %v4045_v31 = vmax.f32 %v3981_v27, 0.0  ;;  %v4560_v60 = vmul.f32 1.442695, %v4487_v21  ;;  %v4677_v7 = vadd.f32 1.0, %v8999_v26  ;;  %v3392_v22 = vpop.xlane.xlu0 %3391 }
 0x3b5   : > { %16174 = vst [vmem:[#allocation54_spill] sm:$0xff] %v12691_v56  ;;  %3475 = vadd.xlane.f32.xlu0 %v3474_v38  ;;  %v3564_v62 = vmul.f32 %v12691_v56, %v12691_v56  ;;  %v5059_v17 = vmul.f32 %v4937_v47, %v12451_v54  ;;  %v4044_v11 = vmax.f32 %v3980_v57, 0.0  ;;  %v12709_v63 = vmul.f32 0.0625, %v3395_v40 }
 0x3b6   : > { %v4173_v18 = vadd.f32 1e-05, %v4045_v31  ;;  %v12711_v38 = vmul.f32 0.0625, %v3392_v22  ;;  %v4357_v39 = vmul.f32 %v12275_v55, %v4289_v19  ;;  %v3483_v27 = vsel %vm933_vm1, %v12687_v3, 0.0 }
 0x3b7   : > { %16176 = vst [vmem:[#allocation37_spill] sm:$0xff] %v12709_v63  ;;  %8433 = vmatmul.mubr.msk.f32.gmra.mrb[38].mxu1 %vm933_vm1, %v5059_v17  ;;  %v4741_v54 = vmul.f32 %v4677_v7, %v4677_v7  ;;  %9008 = vpow2.f32 %v4560_v60  ;;  %v4488_v21 = vmin.f32 %v12700_v51, 20.0  ;;  %v12718_v26 = vpop.eup %9000  ;;  %v3480_v29 = vsel %vm933_vm1, %v12691_v56, 0.0  ;;  %v3651_v57 = vpop.xlane.xlu1 %3650 }
 0x3b8   : > { %16177 = vst [vmem:[#allocation10_spill] sm:$0xff] %v12711_v38  ;;  %3734 = vadd.xlane.f32.xlu1 %v3733_v42  ;;  %v3739_v47 = vsel %vm933_vm1, %v3565_v24, 0.0  ;;  %v3736_v19 = vsel %vm933_vm1, %v3564_v62, 0.0  ;;  %v4172_v42 = vadd.f32 1e-05, %v4044_v11  ;;  %9010 = vrsqrt.f32 %v4173_v18  ;;  %v3648_v17 = vpop.xlane.xlu0 %3647  ;;  %v16178_v11 = vld [vmem:[#allocation71_spill] sm:$0xff] }
 0x3b9   : > { %3731 = vadd.xlane.f32.xlu0 %v3730_v9  ;;  %v4869_v31 = vadd.f32 1.0, %v4741_v54  ;;  %v3919_v40 = vmul.f32 %v12709_v63, %v12709_v63  ;;  %v3918_v60 = vmul.f32 %v12711_v38, %v12711_v38  ;;  %v3855_v9 = vmul.f32 0.0625, %v3651_v57  ;;  %v16179_v18 = vld [vmem:[#allocation40_spill] sm:$0xff] }
 0x3ba   : > { %v9003_v7 = vpop.eup %9002  ;;  %v3854_v22 = vmul.f32 0.0625, %v3648_v17  ;;  %v4562_v49 = vmul.f32 1.442695, %v4488_v21  ;;  %v12729_v37 = vadd.f32 %v12288_v32, %v4357_v39  ;;  %v16180_v56 = vsub.f32 %v16178_v11, %v16179_v18 }
 0x3bb   : > { %v9005_v24 = vpop.eup %9004  ;;  %v4939_v62 = vmul.f32 %v9003_v7, %v12676_v28  ;;  %9012 = vrcp.f32 %v4869_v31  ;;  %v4291_v57 = vmul.f32 %v12503_v58, %v16183_v14  ;;  %v3983_v21 = vsub.f32 %v3855_v9, %v3919_v40 }
 0x3bc   : > { %3484 = vadd.xlane.f32.xlu1 %v3483_v27  ;;  %v4290_v3 = vmul.f32 %v12530_v12, %v16180_v56  ;;  %v12740_v17 = vpop.eup %9006  ;;  %v4678_v39 = vadd.f32 1.0, %v9005_v24  ;;  %v3982_v0 = vsub.f32 %v3854_v22, %v3918_v60  ;;  %9014 = vpow2.f32 %v4562_v49 }
 0x3bd   : > { %3481 = vadd.xlane.f32.xlu0 %v3480_v29  ;;  %v5060_v28 = vmul.f32 %v4939_v62, %v12520_v35  ;;  %v4489_v12 = vmin.f32 %v12729_v37, 20.0  ;;  %v4047_v14 = vmax.f32 %v3983_v21, 0.0  ;;  %v7831_v35 = vadd.f32 -1.0, %v4741_v54 }
 0x3be   : > { %v4358_v56 = vmul.f32 %v12275_v55, %v4290_v3  ;;  %v4742_v52 = vmul.f32 %v4678_v39, %v4678_v39  ;;  %v4046_v29 = vmax.f32 %v3982_v0, 0.0  ;;  %9016 = vrsqrt.f32 %v4172_v42 }
 0x3bf   : > { %8435 = vmatprep.mubr.msk.f32.mxu1 %vm933_vm1, %v5060_v28  ;;  %v4359_v40 = vmul.f32 %v12275_v55, %v4291_v57  ;;  %v3401_v22 = vpop.xlane.xlu1 %3400  ;;  %v4564_v0 = vmul.f32 1.442695, %v4489_v12  ;;  %v4175_v42 = vadd.f32 1e-05, %v4047_v14 }
 0x3c0   : > { %v8412_v27 = vpop.f32.mrb[26].mxu1  ;;  %3740 = vadd.xlane.f32.xlu1 %v3739_v47  ;;  %v4870_v9 = vadd.f32 1.0, %v4742_v52  ;;  %v3398_v62 = vpop.xlane.xlu0 %3397  ;;  %v4174_v18 = vadd.f32 1e-05, %v4046_v29  ;;  %v12766_v57 = vmul.f32 0.0625, %v3401_v22  ;;  %v7832_v12 = vadd.f32 -1.0, %v4742_v52 }
 0x3c1   : > { %v12748_v20 = vadd.f32 %v8412_v27, %v11806_v16  ;;  %v3279_v58 = vpop.f32.mrb[27].mxu1  ;;  %3737 = vadd.xlane.f32.xlu0 %v3736_v19  ;;  %v9009_v47 = vpop.eup %9008  ;;  %v12764_v19 = vadd.f32 %v12288_v32, %v4358_v56  ;;  %v16188_v27 = vld [vmem:[#allocation20_spill] sm:$0xff]  ;;  %v12777_v29 = vmul.f32 0.0625, %v3398_v62 }
 0x3c2   : > { %v12751_v49 = vadd.f32 %v3279_v58, %v11806_v16  ;;  %9018 = vrcp.f32 %v4870_v9  ;;  %v4679_v11 = vadd.f32 1.0, %v9009_v47  ;;  %16187 = vst [vmem:[#allocation56_spill] sm:$0xff] %v12766_v57  ;;  %v12768_v39 = vpop.eup %9010  ;;  %v12774_v58 = vadd.f32 %v12288_v32, %v4359_v40 }
 0x3c3   : > { %16185 = vst [vmem:[#allocation60_spill] sm:$0xff] %v12748_v20  ;;  %v3489_v3 = vsel %vm933_vm1, %v12748_v20, 0.0  ;;  %v3567_v60 = vmul.f32 %v12748_v20, %v12748_v20  ;;  %9020 = vrsqrt.f32 %v4175_v42  ;;  %v3657_v9 = vpop.xlane.xlu1 %3656  ;;  %v4490_v52 = vmin.f32 %v12764_v19, 20.0 }
 0x3c4   : > { %16186 = vst [vmem:[#allocation57_spill] sm:$0xff] %v12751_v49  ;;  %v3486_v24 = vsel %vm933_vm1, %v12751_v49, 0.0  ;;  %v3566_v54 = vmul.f32 %v12751_v49, %v12751_v49  ;;  %3490 = vadd.xlane.f32.xlu1 %v3489_v3  ;;  %v4743_v14 = vmul.f32 %v4679_v11, %v4679_v11  ;;  %v3921_v3 = vmul.f32 %v12766_v57, %v12766_v57  ;;  %v3654_v7 = vpop.xlane.xlu0 %3653 }
 0x3c5   : > { %v3745_v21 = vsel %vm933_vm1, %v3567_v60, 0.0  ;;  %3487 = vadd.xlane.f32.xlu0 %v3486_v24  ;;  %v9013_v22 = vpop.eup %9012  ;;  %v3857_v60 = vmul.f32 0.0625, %v3657_v9  ;;  %9022 = vpow2.f32 %v4564_v0  ;;  %v3856_v20 = vmul.f32 0.0625, %v3654_v7 }
 0x3c6   : > { %v3742_v56 = vsel %vm933_vm1, %v3566_v54, 0.0  ;;  %v9015_v40 = vpop.eup %9014  ;;  %v4941_v42 = vmul.f32 %v9013_v22, %v7831_v35  ;;  %v4871_v11 = vadd.f32 1.0, %v4743_v14  ;;  %9024 = vrsqrt.f32 %v4174_v18 }
 0x3c7   : > { %v4680_v28 = vadd.f32 1.0, %v9015_v40  ;;  %v3985_v49 = vsub.f32 %v3857_v60, %v3921_v3  ;;  %v4566_v60 = vmul.f32 1.442695, %v4490_v52  ;;  %v4491_v40 = vmin.f32 %v12774_v58, 20.0 }
 0x3c8   : > { %v8415_v47 = vpop.f32.mrb[28].mxu1  ;;  %3746 = vadd.xlane.f32.xlu1 %v3745_v21  ;;  %v5061_v9 = vmul.f32 %v4941_v42, %v12582_v8  ;;  %9026 = vrcp.f32 %v4871_v11  ;;  %v12793_v35 = vpop.eup %9016  ;;  %v16192_v11 = vld [vmem:[#allocation48_spill] sm:$0xff] }
 0x3c9   : > { %v12783_v24 = vadd.f32 %v8415_v47, %v11806_v16  ;;  %v3289_v54 = vpop.f32.mrb[29].mxu1  ;;  %3743 = vadd.xlane.f32.xlu0 %v3742_v56  ;;  %v3920_v47 = vmul.f32 %v12777_v29, %v12777_v29  ;;  %v4744_v22 = vmul.f32 %v4680_v28, %v4680_v28  ;;  %v4049_v7 = vmax.f32 %v3985_v49, 0.0  ;;  %v3407_v3 = vpop.xlane.xlu1 %3406 }
 0x3ca   : > { %v12786_v62 = vadd.f32 %v3289_v54, %v11806_v16  ;;  %8436 = vmatmul.mubr.msk.f32.gmra.mrb[40].mxu1 %vm933_vm1, %v5061_v9  ;;  %v3404_v49 = vpop.xlane.xlu0 %3403  ;;  %v7833_v9 = vadd.f32 -1.0, %v4743_v14  ;;  %9028 = vpow2.f32 %v4566_v60 }
 0x3cb   : > { %16189 = vst [vmem:[#allocation59_spill] sm:$0xff] %v12783_v24  ;;  %v3495_v0 = vsel %vm933_vm1, %v12783_v24, 0.0  ;;  %v3569_v21 = vmul.f32 %v12783_v24, %v12783_v24  ;;  %v3984_v8 = vsub.f32 %v3856_v20, %v3920_v47  ;;  %v4872_v24 = vadd.f32 1.0, %v4744_v22 }
 0x3cc   : > { %16190 = vst [vmem:[#allocation11_spill] sm:$0xff] %v12786_v62  ;;  %v3492_v18 = vsel %vm933_vm1, %v12786_v62, 0.0  ;;  %v3568_v56 = vmul.f32 %v12786_v62, %v12786_v62  ;;  %3496 = vadd.xlane.f32.xlu1 %v3495_v0  ;;  %v4177_v28 = vadd.f32 1e-05, %v4049_v7  ;;  %v9019_v31 = vpop.eup %9018  ;;  %v12807_v62 = vmul.f32 0.0625, %v3407_v3 }
 0x3cd   : > { %3493 = vadd.xlane.f32.xlu0 %v3492_v18  ;;  %v4048_v38 = vmax.f32 %v3984_v8, 0.0  ;;  %v3751_v52 = vsel %vm933_vm1, %v3569_v21, 0.0  ;;  %v4943_v0 = vmul.f32 %v9019_v31, %v7832_v12  ;;  %9030 = vrcp.f32 %v4872_v24  ;;  %v12812_v42 = vpop.eup %9020  ;;  %v3663_v8 = vpop.xlane.xlu1 %3662 }
 0x3ce   : > { %16193 = vst [vmem:[#allocation61_spill] sm:$0xff] %v12807_v62  ;;  %v12810_v47 = vmul.f32 0.0625, %v3404_v49  ;;  %v3748_v18 = vsel %vm933_vm1, %v3568_v56, 0.0  ;;  %v7834_v14 = vadd.f32 -1.0, %v4744_v22  ;;  %v4568_v3 = vmul.f32 1.442695, %v4491_v40  ;;  %v3660_v12 = vpop.xlane.xlu0 %3659 }
 0x3cf   : > { %v9023_v57 = vpop.eup %9022  ;;  %v5062_v31 = vmul.f32 %v4943_v0, %v12620_v41  ;;  %9032 = vrsqrt.f32 %v4177_v28  ;;  %v16196_v24 = vsub.f32 %v12086_v46, %v12460_v4  ;;  %v4176_v40 = vadd.f32 1e-05, %v4048_v38 }
 0x3d0   : > { %v8418_v20 = vpop.f32.mrb[30].mxu1  ;;  %3752 = vadd.xlane.f32.xlu1 %v3751_v52  ;;  %v12826_v49 = vpop.eup %9024  ;;  %v4681_v56 = vadd.f32 1.0, %v9023_v57  ;;  %v3859_v28 = vmul.f32 0.0625, %v3663_v8  ;;  %9034 = vpow2.f32 %v4568_v3  ;;  %v3858_v0 = vmul.f32 0.0625, %v3660_v12  ;;  %v16198_v8 = vld [vmem:[#allocation22_spill] sm:$0xff] }
 0x3d1   : > { %v12815_v63 = vadd.f32 %v8418_v20, %v11806_v16  ;;  %v3299_v7 = vpop.f32.mrb[31].mxu1  ;;  %v4292_v21 = vmul.f32 %v12588_v45, %v16196_v24  ;;  %3749 = vadd.xlane.f32.xlu0 %v3748_v18  ;;  %v3923_v20 = vmul.f32 %v12807_v62, %v12807_v62  ;;  %8438 = vmatprep.mubr.msk.f32.mxu1 %vm933_vm1, %v5062_v31  ;;  %9036 = vrsqrt.f32 %v4176_v40 }
 0x3d2   : > { %v12819_v60 = vadd.f32 %v3299_v7, %v11806_v16  ;;  %v3922_v45 = vmul.f32 %v12810_v47, %v12810_v47  ;;  %v9027_v52 = vpop.eup %9026  ;;  %v4745_v38 = vmul.f32 %v4681_v56, %v4681_v56  ;;  %v3413_v24 = vpop.xlane.xlu1 %3412 }
 0x3d3   : > { %16194 = vst [vmem:[#allocation62_spill] sm:$0xff] %v12815_v63  ;;  %v3501_v22 = vsel %vm933_vm1, %v12815_v63, 0.0  ;;  %v3571_v57 = vmul.f32 %v12815_v63, %v12815_v63  ;;  %v4945_v7 = vmul.f32 %v9027_v52, %v7833_v9  ;;  %v3987_v31 = vsub.f32 %v3859_v28, %v3923_v20  ;;  %v3410_v63 = vpop.xlane.xlu0 %3409 }
 0x3d4   : > { %16195 = vst [vmem:[#allocation43_spill] sm:$0xff] %v12819_v60  ;;  %v3498_v41 = vsel %vm933_vm1, %v12819_v60, 0.0  ;;  %3502 = vadd.xlane.f32.xlu1 %v3501_v22  ;;  %v3570_v18 = vmul.f32 %v12819_v60, %v12819_v60  ;;  %v4360_v4 = vmul.f32 %v12275_v55, %v4292_v21  ;;  %v4873_v62 = vadd.f32 1.0, %v4745_v38  ;;  %v9029_v56 = vpop.eup %9028 }
 0x3d5   : > { %3499 = vadd.xlane.f32.xlu0 %v3498_v41  ;;  %v3986_v54 = vsub.f32 %v3858_v0, %v3922_v45  ;;  %v5063_v3 = vmul.f32 %v4945_v7, %v12680_v61  ;;  %v4051_v12 = vmax.f32 %v3987_v31, 0.0  ;;  %v12847_v22 = vmul.f32 0.0625, %v3413_v24 }
 0x3d6   : > { %v12850_v9 = vadd.f32 %v12288_v32, %v4360_v4  ;;  %v3757_v20 = vsel %vm933_vm1, %v3571_v57, 0.0  ;;  %9038 = vrcp.f32 %v4873_v62  ;;  %v12853_v41 = vmul.f32 0.0625, %v3410_v63  ;;  %v3669_v7 = vpop.xlane.xlu1 %3668 }
 0x3d7   : > { %v4050_v21 = vmax.f32 %v3986_v54, 0.0  ;;  %v9031_v40 = vpop.eup %9030  ;;  %8439 = vmatmul.mubr.msk.f32.gmra.mrb[42].mxu1 %vm933_vm1, %v5063_v3  ;;  %v3754_v61 = vsel %vm933_vm1, %v3570_v18, 0.0  ;;  %v7835_v28 = vadd.f32 -1.0, %v4745_v38  ;;  %v4682_v52 = vadd.f32 1.0, %v9029_v56 }
 0x3d8   : > { %3758 = vadd.xlane.f32.xlu1 %v3757_v20  ;;  %v4179_v0 = vadd.f32 1e-05, %v4051_v12  ;;  %v4947_v62 = vmul.f32 %v9031_v40, %v7834_v14  ;;  %v4492_v63 = vmin.f32 %v12850_v9, 20.0  ;;  %v3925_v38 = vmul.f32 %v12847_v22, %v12847_v22  ;;  %v3666_v12 = vpop.xlane.xlu0 %3665 }
 0x3d9   : > { %3755 = vadd.xlane.f32.xlu0 %v3754_v61  ;;  %v4178_v54 = vadd.f32 1e-05, %v4050_v21  ;;  %v12861_v57 = vpop.eup %9032  ;;  %v4746_v3 = vmul.f32 %v4682_v52, %v4682_v52  ;;  %v3861_v18 = vmul.f32 0.0625, %v3669_v7  ;;  %v3924_v21 = vmul.f32 %v12853_v41, %v12853_v41 }
 0x3da   : > { %v8421_v45 = vpop.f32.mrb[32].mxu1  ;;  %v5064_v20 = vmul.f32 %v4947_v62, %v12700_v51  ;;  %9040 = vrsqrt.f32 %v4179_v0  ;;  %v9035_v61 = vpop.eup %9034  ;;  %v4570_v51 = vmul.f32 1.442695, %v4492_v63  ;;  %v16201_v7 = vsub.f32 %v12082_v48, %v12444_v10 }
 0x3db   : > { %v12858_v4 = vadd.f32 %v8421_v45, %v11806_v16  ;;  %v3309_v31 = vpop.f32.mrb[33].mxu1  ;;  %v4874_v45 = vadd.f32 1.0, %v4746_v3  ;;  %9042 = vrsqrt.f32 %v4178_v54  ;;  %v3989_v52 = vsub.f32 %v3861_v18, %v3925_v38 }
 0x3dc   : > { %v12864_v24 = vadd.f32 %v3309_v31, %v11806_v16  ;;  %8441 = vmatprep.mubr.msk.f32.mxu1 %vm933_vm1, %v5064_v20  ;;  %v4293_v31 = vmul.f32 %v12561_v36, %v16201_v7  ;;  %v3860_v46 = vmul.f32 0.0625, %v3666_v12  ;;  %v16202_v54 = vsub.f32 %v12111_v44, %v12491_v1  ;;  %v16205_v7 = vld [vmem:[#allocation24_spill] sm:$0xff] }
 0x3dd   : > { %16199 = vst [vmem:[#allocation12_spill] sm:$0xff] %v12858_v4  ;;  %v3507_v56 = vsel %vm933_vm1, %v12858_v4, 0.0  ;;  %v3573_v14 = vmul.f32 %v12858_v4, %v12858_v4  ;;  %9044 = vrcp.f32 %v4874_v45  ;;  %v4053_v0 = vmax.f32 %v3989_v52, 0.0 }
 0x3de   : > { %16200 = vst [vmem:[#allocation42_spill] sm:$0xff] %v12864_v24  ;;  %3508 = vadd.xlane.f32.xlu1 %v3507_v56  ;;  %v3504_v16 = vsel %vm933_vm1, %v12864_v24, 0.0  ;;  %v3572_v40 = vmul.f32 %v12864_v24, %v12864_v24  ;;  %v4683_v56 = vadd.f32 1.0, %v9035_v61  ;;  %v12885_v24 = vpop.eup %9036  ;;  %9046 = vpow2.f32 %v4570_v51  ;;  %v3416_v18 = vpop.xlane.xlu0 %3415 }
 0x3df   : > { %3505 = vadd.xlane.f32.xlu0 %v3504_v16  ;;  %v3763_v62 = vsel %vm933_vm1, %v3573_v14, 0.0  ;;  %v4361_v20 = vmul.f32 %v12275_v55, %v4293_v31  ;;  %v3419_v16 = vpop.xlane.xlu1 %3418  ;;  %v4294_v63 = vmul.f32 %v12633_v30, %v16202_v54  ;;  %v3988_v36 = vsub.f32 %v3860_v46, %v3924_v21  ;;  %v16204_v21 = vld [vmem:[#allocation23_spill] sm:$0xff] }
 0x3e0   : > { %v3760_v48 = vsel %vm933_vm1, %v3572_v40, 0.0  ;;  %v4747_v10 = vmul.f32 %v4683_v56, %v4683_v56  ;;  %v12893_v38 = vmul.f32 0.0625, %v3419_v16  ;;  %v9039_v12 = vpop.eup %9038  ;;  %v4181_v14 = vadd.f32 1e-05, %v4053_v0 }
 0x3e1   : > { %v12896_v45 = vadd.f32 %v12288_v32, %v4361_v20  ;;  %v4362_v61 = vmul.f32 %v12275_v55, %v4294_v63  ;;  %v16203_v44 = vsub.f32 %v12108_v2, %v12486_v5  ;;  %v4949_v30 = vmul.f32 %v9039_v12, %v7835_v28 }
 0x3e2   : > { %3764 = vadd.xlane.f32.xlu1 %v3763_v62  ;;  %v4875_v40 = vadd.f32 1.0, %v4747_v10  ;;  %v4052_v51 = vmax.f32 %v3988_v36, 0.0  ;;  %v12903_v46 = vmul.f32 0.0625, %v3416_v18  ;;  %9048 = vrsqrt.f32 %v4181_v14 }
 0x3e3   : > { %3761 = vadd.xlane.f32.xlu0 %v3760_v48  ;;  %v4295_v1 = vmul.f32 %v12612_v25, %v16203_v44  ;;  %v4493_v62 = vmin.f32 %v12896_v45, 20.0  ;;  %v3675_v56 = vpop.xlane.xlu1 %3674  ;;  %v5065_v0 = vmul.f32 %v4949_v30, %v12729_v37  ;;  %v7836_v2 = vadd.f32 -1.0, %v4746_v3  ;;  %v3672_v25 = vpop.xlane.xlu0 %3671 }
 0x3e4   : > { %9050 = vrcp.f32 %v4875_v40  ;;  %v3927_v5 = vmul.f32 %v12893_v38, %v12893_v38  ;;  %v4180_v20 = vadd.f32 1e-05, %v4052_v51  ;;  %v12914_v16 = vadd.f32 %v12288_v32, %v4362_v61  ;;  %v12916_v63 = vpop.eup %9040 }
 0x3e5   : > { %v4572_v28 = vmul.f32 1.442695, %v4493_v62  ;;  %v3863_v54 = vmul.f32 0.0625, %v3675_v56  ;;  %8442 = vmatmul.mubr.msk.f32.gmra.mrb[44].mxu1 %vm933_vm1, %v5065_v0  ;;  %v3926_v48 = vmul.f32 %v12903_v46, %v12903_v46  ;;  %v4363_v37 = vmul.f32 %v12275_v55, %v4295_v1  ;;  %v12926_v12 = vpop.eup %9042 }
 0x3e6   : > { %v3862_v3 = vmul.f32 0.0625, %v3672_v25  ;;  %v16206_v36 = vsub.f32 %v12131_v50, %v12550_v59  ;;  %v7837_v14 = vadd.f32 -1.0, %v4747_v10  ;;  %v4494_v61 = vmin.f32 %v12914_v16, 20.0 }
 0x3e7   : > { %9052 = vpow2.f32 %v4572_v28  ;;  %v3991_v44 = vsub.f32 %v3863_v54, %v3927_v5  ;;  %v9045_v30 = vpop.eup %9044  ;;  %v12930_v40 = vadd.f32 %v12288_v32, %v4363_v37  ;;  %v16207_v62 = vsub.f32 %v12128_v33, %v12540_v53 }
 0x3e8   : > { %v4296_v18 = vmul.f32 %v12670_v13, %v16206_v36  ;;  %v3990_v51 = vsub.f32 %v3862_v3, %v3926_v48  ;;  %v9047_v59 = vpop.eup %9046  ;;  %v4951_v13 = vmul.f32 %v9045_v30, %v7836_v2  ;;  %9054 = vrsqrt.f32 %v4180_v20  ;;  %v3425_v28 = vpop.xlane.xlu1 %3424 }
 0x3e9   : > { %v4297_v50 = vmul.f32 %v12662_v15, %v16207_v62  ;;  %v4574_v10 = vmul.f32 1.442695, %v4494_v61  ;;  %v4055_v56 = vmax.f32 %v3991_v44, 0.0  ;;  %v4684_v0 = vadd.f32 1.0, %v9047_v59  ;;  %v3422_v53 = vpop.xlane.xlu0 %3421  ;;  %v16212_v62 = vld [vmem:[#allocation27_spill] sm:$0xff]  ;;  %v16222_v61 = vld [vmem:[#allocation9_spill] sm:$0xff] }
 0x3ea   : > { %v4364_v1 = vmul.f32 %v12275_v55, %v4296_v18  ;;  %v4495_v5 = vmin.f32 %v12930_v40, 20.0  ;;  %v4054_v25 = vmax.f32 %v3990_v51, 0.0  ;;  %v5066_v48 = vmul.f32 %v4951_v13, %v12764_v19  ;;  %v16210_v18 = vld [vmem:[#allocation25_spill] sm:$0xff] }
 0x3eb   : > { %9056 = vpow2.f32 %v4574_v10  ;;  %v4183_v37 = vadd.f32 1e-05, %v4055_v56  ;;  %v12942_v33 = vmul.f32 0.0625, %v3425_v28  ;;  %v4748_v15 = vmul.f32 %v4684_v0, %v4684_v0 }
 0x3ec   : > { %v12939_v54 = vadd.f32 %v12288_v32, %v4364_v1  ;;  %v4576_v2 = vmul.f32 1.442695, %v4495_v5  ;;  %v12944_v20 = vmul.f32 0.0625, %v3422_v53  ;;  %v4365_v3 = vmul.f32 %v12275_v55, %v4297_v50  ;;  %v12947_v36 = vpop.eup %9048  ;;  %8444 = vmatprep.mubr.msk.f32.mxu1 %vm933_vm1, %v5066_v48  ;;  %v3681_v13 = vpop.xlane.xlu1 %3680 }
 0x3ed   : > { %16208 = vst [vmem:[#allocation13_spill] sm:$0xff] %v12942_v33  ;;  %9058 = vrsqrt.f32 %v4183_v37  ;;  %v16211_v44 = vsub.f32 %v12147_v43, %v12606_v34  ;;  %v4876_v1 = vadd.f32 1.0, %v4748_v15  ;;  %v4182_v59 = vadd.f32 1e-05, %v4054_v25  ;;  %v3678_v28 = vpop.xlane.xlu0 %3677 }
 0x3ee   : > { %16209 = vst [vmem:[#allocation45_spill] sm:$0xff] %v12944_v20  ;;  %v4496_v19 = vmin.f32 %v12939_v54, 20.0  ;;  %v9051_v51 = vpop.eup %9050  ;;  %9060 = vpow2.f32 %v4576_v2  ;;  %v3929_v56 = vmul.f32 %v12942_v33, %v12942_v33  ;;  %v3928_v0 = vmul.f32 %v12944_v20, %v12944_v20 }
 0x3ef   : > { %v4298_v30 = vmul.f32 %v12740_v17, %v16211_v44  ;;  %v4953_v10 = vmul.f32 %v9051_v51, %v7837_v14  ;;  %9062 = vrcp.f32 %v4876_v1  ;;  %v3865_v43 = vmul.f32 0.0625, %v3681_v13 }
 0x3f0   : > { %v4578_v5 = vmul.f32 1.442695, %v4496_v19  ;;  %v12964_v34 = vadd.f32 %v12288_v32, %v4365_v3  ;;  %v3864_v17 = vmul.f32 0.0625, %v3678_v28  ;;  %v16213_v25 = vsub.f32 %v12144_v6, %v12600_v23 }
 0x3f1   : > { %v9053_v48 = vpop.eup %9052  ;;  %v5067_v37 = vmul.f32 %v4953_v10, %v12774_v58  ;;  %v4366_v14 = vmul.f32 %v12275_v55, %v4298_v30  ;;  %v3993_v19 = vsub.f32 %v3865_v43, %v3929_v56  ;;  %v7838_v3 = vadd.f32 -1.0, %v4748_v15  ;;  %v16215_v43 = vld [vmem:[#allocation32_spill] sm:$0xff] }
 0x3f2   : > { %9064 = vpow2.f32 %v4578_v5  ;;  %v4299_v53 = vmul.f32 %v12718_v26, %v16213_v25  ;;  %v4685_v2 = vadd.f32 1.0, %v9053_v48  ;;  %v4497_v44 = vmin.f32 %v12964_v34, 20.0  ;;  %v12973_v1 = vpop.eup %9054  ;;  %v3431_v10 = vpop.xlane.xlu1 %3430 }
 0x3f3   : > { %v3992_v51 = vsub.f32 %v3864_v17, %v3928_v0  ;;  %8445 = vmatmul.mubr.msk.f32.gmra.mrb[46].mxu1 %vm933_vm1, %v5067_v37  ;;  %v12979_v30 = vadd.f32 %v12288_v32, %v4366_v14  ;;  %v4057_v26 = vmax.f32 %v3993_v19, 0.0  ;;  %v3428_v28 = vpop.xlane.xlu0 %3427  ;;  %9066 = vrsqrt.f32 %v4182_v59  ;;  %v16218_v59 = vld [vmem:[#allocation72_spill] sm:$0xff]  ;;  %v16221_v17 = vld [vmem:[#allocation19_spill] sm:$0xff] }
 0x3f4   : > { %v4367_v6 = vmul.f32 %v12275_v55, %v4299_v53  ;;  %v4749_v23 = vmul.f32 %v4685_v2, %v4685_v2  ;;  %v4580_v56 = vmul.f32 1.442695, %v4497_v44  ;;  %v12984_v15 = vmul.f32 0.0625, %v3431_v10 }
 0x3f5   : > { %v4056_v5 = vmax.f32 %v3992_v51, 0.0  ;;  %v9057_v0 = vpop.eup %9056  ;;  %v4498_v48 = vmin.f32 %v12979_v30, 20.0  ;;  %v12987_v14 = vmul.f32 0.0625, %v3428_v28  ;;  %v16219_v51 = vld [vmem:[#allocation34_spill] sm:$0xff]  ;;  %v16223_v50 = vsub.f32 %v16221_v17, %v16222_v61 }
 0x3f6   : > { %16216 = vst [vmem:[#allocation14_spill] sm:$0xff] %v12984_v15  ;;  %v4877_v37 = vadd.f32 1.0, %v4749_v23  ;;  %v4686_v25 = vadd.f32 1.0, %v9057_v0  ;;  %v12990_v53 = vadd.f32 %v12288_v32, %v4367_v6  ;;  %v7839_v19 = vadd.f32 -1.0, %v4749_v23  ;;  %v3687_v44 = vpop.xlane.xlu1 %3686 }
 0x3f7   : > { %16217 = vst [vmem:[#allocation70_spill] sm:$0xff] %v12987_v14  ;;  %v12992_v2 = vpop.eup %9058  ;;  %9068 = vpow2.f32 %v4580_v56  ;;  %v16220_v13 = vsub.f32 %v16218_v59, %v16219_v51  ;;  %v4301_v0 = vmul.f32 %v12768_v39, %v16223_v50  ;;  %v4185_v6 = vadd.f32 1e-05, %v4057_v26  ;;  %v3684_v33 = vpop.xlane.xlu0 %3683 }
 0x3f8   : > { %v9061_v28 = vpop.eup %9060  ;;  %9070 = vrcp.f32 %v4877_v37  ;;  %v4750_v52 = vmul.f32 %v4686_v25, %v4686_v25  ;;  %v4184_v31 = vadd.f32 1e-05, %v4056_v5  ;;  %v3931_v23 = vmul.f32 %v12984_v15, %v12984_v15 }
 0x3f9   : > { %v4300_v10 = vmul.f32 %v12793_v35, %v16220_v13  ;;  %v4687_v4 = vadd.f32 1.0, %v9061_v28  ;;  %v4582_v56 = vmul.f32 1.442695, %v4498_v48  ;;  %v3867_v60 = vmul.f32 0.0625, %v3687_v44  ;;  %v9063_v59 = vpop.eup %9062 }
 0x3fa   : > { %v4878_v51 = vadd.f32 1.0, %v4750_v52  ;;  %v3930_v39 = vmul.f32 %v12987_v14, %v12987_v14  ;;  %v4499_v61 = vmin.f32 %v12990_v53, 20.0  ;;  %v4955_v26 = vmul.f32 %v9063_v59, %v7838_v3 }
 0x3fb   : > { %v4751_v5 = vmul.f32 %v4687_v4, %v4687_v4  ;;  %9072 = vpow2.f32 %v4582_v56  ;;  %v3995_v17 = vsub.f32 %v3867_v60, %v3931_v23  ;;  %v3866_v25 = vmul.f32 0.0625, %v3684_v33 }
 0x3fc   : > { %v9065_v50 = vpop.eup %9064  ;;  %9074 = vrcp.f32 %v4878_v51  ;;  %v4584_v48 = vmul.f32 1.442695, %v4499_v61  ;;  %v5068_v44 = vmul.f32 %v4955_v26, %v12850_v9  ;;  %v4368_v35 = vmul.f32 %v12275_v55, %v4300_v10 }
 0x3fd   : > { %v4688_v37 = vadd.f32 1.0, %v9065_v50  ;;  %v4879_v28 = vadd.f32 1.0, %v4751_v5  ;;  %9076 = vrsqrt.f32 %v4185_v6  ;;  %v4059_v58 = vmax.f32 %v3995_v17, 0.0  ;;  %v13011_v20 = vpop.eup %9066  ;;  %v3437_v33 = vpop.xlane.xlu1 %3436 }
 0x3fe   : > { %9078 = vpow2.f32 %v4584_v48  ;;  %v3994_v15 = vsub.f32 %v3866_v25, %v3930_v39  ;;  %8447 = vmatprep.mubr.msk.f32.mxu1 %vm933_vm1, %v5068_v44  ;;  %v4369_v9 = vmul.f32 %v12275_v55, %v4301_v0  ;;  %v7840_v23 = vadd.f32 -1.0, %v4750_v52  ;;  %v3434_v59 = vpop.xlane.xlu0 %3433 }
 0x3ff   : > { %v4752_v13 = vmul.f32 %v4688_v37, %v4688_v37  ;;  %9080 = vrcp.f32 %v4879_v28  ;;  %v4187_v3 = vadd.f32 1e-05, %v4059_v58  ;;  %v13017_v56 = vmul.f32 0.0625, %v3437_v33  ;;  %v16226_v58 = vld [vmem:[#allocation10_spill] sm:$0xff] }
 0x400   : > { %9082 = vrsqrt.f32 %v4184_v31  ;;  %v13019_v10 = vmul.f32 0.0625, %v3434_v59  ;;  %v13022_v39 = vadd.f32 %v12288_v32, %v4368_v35  ;;  %v13025_v61 = vadd.f32 %v12288_v32, %v4369_v9 }
 0x401   : > { %v4880_v6 = vadd.f32 1.0, %v4752_v13  ;;  %v9069_v51 = vpop.eup %9068  ;;  %v16227_v50 = vsub.f32 %v16188_v27, %v16226_v58  ;;  %v7841_v26 = vadd.f32 -1.0, %v4751_v5  ;;  %v4058_v17 = vmax.f32 %v3994_v15, 0.0  ;;  %v3693_v25 = vpop.xlane.xlu1 %3692 }
 0x402   : > { %v9071_v52 = vpop.eup %9070  ;;  %v4689_v31 = vadd.f32 1.0, %v9069_v51  ;;  %v7842_v48 = vadd.f32 -1.0, %v4752_v13  ;;  %v3933_v35 = vmul.f32 %v13017_v56, %v13017_v56  ;;  %v3932_v28 = vmul.f32 %v13019_v10, %v13019_v10 }
 0x403   : > { %v4302_v0 = vmul.f32 %v12826_v49, %v16227_v50  ;;  %9084 = vrcp.f32 %v4880_v6  ;;  %v4957_v37 = vmul.f32 %v9071_v52, %v7839_v19  ;;  %v4500_v27 = vmin.f32 %v13022_v39, 20.0  ;;  %v3690_v49 = vpop.xlane.xlu0 %3689 }
 0x404   : > { %9086 = vrsqrt.f32 %v4187_v3  ;;  %v4753_v44 = vmul.f32 %v4689_v31, %v4689_v31  ;;  %v3869_v33 = vmul.f32 0.0625, %v3693_v25  ;;  %v4501_v15 = vmin.f32 %v13025_v61, 20.0 }
 0x405   : > { %v9073_v9 = vpop.eup %9072  ;;  %v5069_v5 = vmul.f32 %v4957_v37, %v12896_v45  ;;  %v3868_v19 = vmul.f32 0.0625, %v3690_v49  ;;  %v4370_v13 = vmul.f32 %v12275_v55, %v4302_v0  ;;  %v4186_v51 = vadd.f32 1e-05, %v4058_v17  ;;  %v16228_v37 = vld [vmem:[#allocation39_spill] sm:$0xff] }
 0x406   : > { %v9075_v3 = vpop.eup %9074  ;;  %v4881_v6 = vadd.f32 1.0, %v4753_v44  ;;  %v4690_v59 = vadd.f32 1.0, %v9073_v9  ;;  %v4586_v58 = vmul.f32 1.442695, %v4500_v27  ;;  %v3997_v31 = vsub.f32 %v3869_v33, %v3933_v35  ;;  %v16229_v33 = vld [vmem:[#allocation73_spill] sm:$0xff] }
 0x407   : > { %v13039_v50 = vpop.eup %9076  ;;  %8448 = vmatmul.mubr.msk.f32.gmra.mrb[48].mxu1 %vm933_vm1, %v5069_v5  ;;  %v4959_v52 = vmul.f32 %v9075_v3, %v7840_v23  ;;  %v4588_v25 = vmul.f32 1.442695, %v4501_v15  ;;  %v3996_v4 = vsub.f32 %v3868_v19, %v3932_v28  ;;  %v13045_v0 = vadd.f32 %v12288_v32, %v4370_v13  ;;  %v16230_v15 = vld [vmem:[#allocation37_spill] sm:$0xff] }
 0x408   : > { %v9079_v14 = vpop.eup %9078  ;;  %9088 = vrcp.f32 %v4881_v6  ;;  %v4754_v45 = vmul.f32 %v4690_v59, %v4690_v59  ;;  %v4061_v60 = vmax.f32 %v3997_v31, 0.0  ;;  %v3443_v28 = vpop.xlane.xlu1 %3442  ;;  %v16231_v19 = vsub.f32 %v16229_v33, %v16230_v15 }
 0x409   : > { %v9081_v9 = vpop.eup %9080  ;;  %v5070_v17 = vmul.f32 %v4959_v52, %v12914_v16  ;;  %v4691_v27 = vadd.f32 1.0, %v9079_v14  ;;  %9090 = vpow2.f32 %v4586_v58  ;;  %v4060_v59 = vmax.f32 %v3996_v4, 0.0  ;;  %v3440_v14 = vpop.xlane.xlu0 %3439 }
 0x40a   : > { %v13048_v5 = vpop.eup %9082  ;;  %v4961_v23 = vmul.f32 %v9081_v9, %v7841_v26  ;;  %v4882_v35 = vadd.f32 1.0, %v4754_v45  ;;  %9092 = vpow2.f32 %v4588_v25  ;;  %v4303_v3 = vmul.f32 %v12812_v42, %v16231_v19 }
 0x40b   : > { %8450 = vmatprep.mubr.msk.f32.mxu1 %vm933_vm1, %v5070_v17  ;;  %v4755_v13 = vmul.f32 %v4691_v27, %v4691_v27  ;;  %v4189_v6 = vadd.f32 1e-05, %v4061_v60  ;;  %v13055_v16 = vmul.f32 0.0625, %v3443_v28  ;;  %v13058_v26 = vmul.f32 0.0625, %v3440_v14  ;;  %v16232_v17 = vld [vmem:[#allocation21_spill] sm:$0xff] }
 0x40c   : > { %v5071_v52 = vmul.f32 %v4961_v23, %v12930_v40  ;;  %9094 = vrcp.f32 %v4882_v35  ;;  %v4502_v31 = vmin.f32 %v13045_v0, 20.0  ;;  %v7843_v4 = vadd.f32 -1.0, %v4753_v44  ;;  %v3699_v40 = vpop.xlane.xlu1 %3698 }
 0x40d   : > { %v9085_v58 = vpop.eup %9084  ;;  %v4883_v42 = vadd.f32 1.0, %v4755_v13  ;;  %9096 = vrsqrt.f32 %v4186_v51  ;;  %v7844_v27 = vadd.f32 -1.0, %v4754_v45  ;;  %v4188_v28 = vadd.f32 1e-05, %v4060_v59  ;;  %v16233_v45 = vld [vmem:[#allocation4_spill] sm:$0xff] }
 0x40e   : > { %v13061_v25 = vpop.eup %9086  ;;  %v4963_v9 = vmul.f32 %v9085_v58, %v7842_v48  ;;  %8451 = vmatmul.mubr.msk.f32.gmra.mrb[50].mxu1 %vm933_vm1, %v5071_v52  ;;  %9098 = vrsqrt.f32 %v4189_v6  ;;  %v3935_v35 = vmul.f32 %v13055_v16, %v13055_v16  ;;  %v4590_v33 = vmul.f32 1.442695, %v4502_v31  ;;  %v3696_v48 = vpop.xlane.xlu0 %3695  ;;  %v16237_v6 = vld [vmem:[#allocation56_spill] sm:$0xff] }
 0x40f   : > { %9100 = vrcp.f32 %v4883_v42  ;;  %v3934_v51 = vmul.f32 %v13058_v26, %v13058_v26  ;;  %v3871_v15 = vmul.f32 0.0625, %v3699_v40  ;;  %v4371_v19 = vmul.f32 %v12275_v55, %v4303_v3 }
 0x410   : > { %v5072_v23 = vmul.f32 %v4963_v9, %v12939_v54  ;;  %v3870_v14 = vmul.f32 0.0625, %v3696_v48  ;;  %v7845_v44 = vadd.f32 -1.0, %v4755_v13  ;;  %v16234_v54 = vld [vmem:[#allocation41_spill] sm:$0xff]  ;;  %9102 = vpow2.f32 %v4590_v33  ;;  %v16236_v48 = vld [vmem:[#allocation74_spill] sm:$0xff] }
 0x411   : > { %v3999_v52 = vsub.f32 %v3871_v15, %v3935_v35  ;;  %v13078_v31 = vadd.f32 %v12288_v32, %v4371_v19  ;;  %v16235_v3 = vsub.f32 %v16192_v11, %v12777_v29  ;;  %9104 = vrsqrt.f32 %v4188_v28 }
 0x412   : > { %8453 = vmatprep.mubr.msk.f32.mxu1 %vm933_vm1, %v5072_v23  ;;  %v9089_v58 = vpop.eup %9088  ;;  %v3998_v9 = vsub.f32 %v3870_v14, %v3934_v51  ;;  %v16238_v49 = vsub.f32 %v16236_v48, %v16237_v6  ;;  %v16239_v35 = vsub.f32 %v16198_v8, %v12810_v47  ;;  %v16241_v6 = vld [vmem:[#allocation75_spill] sm:$0xff] }
 0x413   : > { %v4304_v42 = vmul.f32 %v12885_v24, %v16235_v3  ;;  %v9091_v40 = vpop.eup %9090  ;;  %v4965_v13 = vmul.f32 %v9089_v58, %v7843_v4  ;;  %v3449_v23 = vpop.xlane.xlu1 %3448  ;;  %v4063_v14 = vmax.f32 %v3999_v52, 0.0  ;;  %v4503_v29 = vmin.f32 %v13078_v31, 20.0  ;;  %v16242_v3 = vld [vmem:[#allocation61_spill] sm:$0xff] }
 0x414   : > { %v4305_v33 = vmul.f32 %v12861_v57, %v16238_v49  ;;  %v4306_v15 = vmul.f32 %v12926_v12, %v16239_v35  ;;  %v9093_v51 = vpop.eup %9092  ;;  %v4692_v19 = vadd.f32 1.0, %v9091_v40  ;;  %v4062_v11 = vmax.f32 %v3998_v9, 0.0  ;;  %v3446_v24 = vpop.xlane.xlu0 %3445 }
 0x415   : > { %v5073_v4 = vmul.f32 %v4965_v13, %v12964_v34  ;;  %v4693_v28 = vadd.f32 1.0, %v9093_v51  ;;  %v13094_v58 = vmul.f32 0.0625, %v3449_v23  ;;  %v16243_v57 = vsub.f32 %v16241_v6, %v16242_v3 }
 0x416   : > { %v9095_v47 = vpop.eup %9094  ;;  %v4756_v8 = vmul.f32 %v4692_v19, %v4692_v19  ;;  %v4592_v12 = vmul.f32 1.442695, %v4503_v29  ;;  %v13100_v48 = vmul.f32 0.0625, %v3446_v24  ;;  %v4372_v52 = vmul.f32 %v12275_v55, %v4304_v42 }
 0x417   : > { %16240 = vst [vmem:[#allocation44_spill] sm:$0xff] %v13094_v58  ;;  %v4307_v49 = vmul.f32 %v12916_v63, %v16243_v57  ;;  %v13103_v40 = vpop.eup %9096  ;;  %8454 = vmatmul.mubr.msk.f32.gmra.mrb[52].mxu1 %vm933_vm1, %v5073_v4  ;;  %v4967_v34 = vmul.f32 %v9095_v47, %v7844_v27  ;;  %v4757_v9 = vmul.f32 %v4693_v28, %v4693_v28  ;;  %v4191_v51 = vadd.f32 1e-05, %v4063_v14  ;;  %v3705_v24 = vpop.xlane.xlu1 %3704 }
 0x418   : > { %16244 = vst [vmem:[#allocation63_spill] sm:$0xff] %v13100_v48  ;;  %v4373_v13 = vmul.f32 %v12275_v55, %v4305_v33  ;;  %v4374_v23 = vmul.f32 %v12275_v55, %v4306_v15  ;;  %v13108_v35 = vpop.eup %9098  ;;  %v4884_v63 = vadd.f32 1.0, %v4756_v8  ;;  %v4190_v19 = vadd.f32 1e-05, %v4062_v11  ;;  %v3702_v42 = vpop.xlane.xlu0 %3701 }
 0x419   : > { %v3937_v29 = vmul.f32 %v13094_v58, %v13094_v58  ;;  %v9101_v6 = vpop.eup %9100  ;;  %v5074_v3 = vmul.f32 %v4967_v34, %v12979_v30  ;;  %v4885_v4 = vadd.f32 1.0, %v4757_v9  ;;  %9106 = vpow2.f32 %v4592_v12 }
 0x41a   : > { %v4969_v28 = vmul.f32 %v9101_v6, %v7845_v44  ;;  %9108 = vrcp.f32 %v4884_v63  ;;  %v3936_v15 = vmul.f32 %v13100_v48, %v13100_v48  ;;  %v13118_v14 = vadd.f32 %v12288_v32, %v4372_v52  ;;  %v9103_v11 = vpop.eup %9102 }
 0x41b   : > { %8456 = vmatprep.mubr.msk.f32.mxu1 %vm933_vm1, %v5074_v3  ;;  %9110 = vrcp.f32 %v4885_v4  ;;  %v3873_v57 = vmul.f32 0.0625, %v3705_v24  ;;  %v13122_v30 = vadd.f32 %v12288_v32, %v4373_v13  ;;  %v3872_v47 = vmul.f32 0.0625, %v3702_v42  ;;  %v13126_v63 = vpop.eup %9104 }
 0x41c   : > { %v5075_v12 = vmul.f32 %v4969_v28, %v12990_v53  ;;  %v4694_v34 = vadd.f32 1.0, %v9103_v11  ;;  %9112 = vrsqrt.f32 %v4191_v51  ;;  %v4504_v44 = vmin.f32 %v13118_v14, 20.0 }
 0x41d   : > { %9114 = vrsqrt.f32 %v4190_v19  ;;  %v4001_v52 = vsub.f32 %v3873_v57, %v3937_v29  ;;  %v4505_v6 = vmin.f32 %v13122_v30, 20.0  ;;  %v4000_v33 = vsub.f32 %v3872_v47, %v3936_v15  ;;  %v3455_v13 = vpop.xlane.xlu1 %3454 }
 0x41e   : > { %8457 = vmatmul.mubr.msk.f32.gmra.mrb[54].mxu1 %vm933_vm1, %v5075_v12  ;;  %v4758_v24 = vmul.f32 %v4694_v34, %v4694_v34  ;;  %v4594_v3 = vmul.f32 1.442695, %v4504_v44  ;;  %v13131_v42 = vadd.f32 %v12288_v32, %v4374_v23  ;;  %v4375_v53 = vmul.f32 %v12275_v55, %v4307_v49  ;;  %v3452_v19 = vpop.xlane.xlu0 %3451  ;;  %v16247_v34 = vld [vmem:[#allocation26_spill] sm:$0xff] }
 0x41f   : > { %v4065_v51 = vmax.f32 %v4001_v52, 0.0  ;;  %v4596_v4 = vmul.f32 1.442695, %v4505_v6  ;;  %v4064_v28 = vmax.f32 %v4000_v33, 0.0  ;;  %v13134_v11 = vmul.f32 0.0625, %v3455_v13 }
 0x420   : > { %v4886_v29 = vadd.f32 1.0, %v4758_v24  ;;  %9116 = vpow2.f32 %v4594_v3  ;;  %v13136_v57 = vmul.f32 0.0625, %v3452_v19  ;;  %v16246_v15 = vsub.f32 %v16205_v7, %v12853_v41 }
 0x421   : > { %v7846_v12 = vadd.f32 -1.0, %v4756_v8  ;;  %v7847_v23 = vadd.f32 -1.0, %v4757_v9  ;;  %9118 = vpow2.f32 %v4596_v4  ;;  %v7848_v44 = vadd.f32 -1.0, %v4758_v24  ;;  %v3711_v6 = vpop.xlane.xlu1 %3710 }
 0x422   : > { %v4308_v47 = vmul.f32 %v12973_v1, %v16246_v15  ;;  %9120 = vrcp.f32 %v4886_v29  ;;  %v4193_v33 = vadd.f32 1e-05, %v4065_v51  ;;  %v4192_v52 = vadd.f32 1e-05, %v4064_v28  ;;  %v3708_v1 = vpop.xlane.xlu0 %3707 }
 0x423   : > { %v9107_v13 = vpop.eup %9106  ;;  %v3939_v3 = vmul.f32 %v13134_v11, %v13134_v11  ;;  %v4506_v19 = vmin.f32 %v13131_v42, 20.0  ;;  %v3875_v41 = vmul.f32 0.0625, %v3711_v6  ;;  %v13148_v7 = vadd.f32 %v12288_v32, %v4375_v53 }
 0x424   : > { %v9109_v8 = vpop.eup %9108  ;;  %v4695_v9 = vadd.f32 1.0, %v9107_v13  ;;  %v3938_v24 = vmul.f32 %v13136_v57, %v13136_v57  ;;  %v3874_v4 = vmul.f32 0.0625, %v3708_v1  ;;  %v4376_v51 = vmul.f32 %v12275_v55, %v4308_v47 }
 0x425   : > { %v9111_v28 = vpop.eup %9110  ;;  %v4971_v29 = vmul.f32 %v9109_v8, %v7846_v12  ;;  %v4598_v15 = vmul.f32 1.442695, %v4506_v19  ;;  %v4003_v49 = vsub.f32 %v3875_v41, %v3939_v3  ;;  %v4507_v59 = vmin.f32 %v13148_v7, 20.0 }
 0x426   : > { %v13154_v60 = vpop.eup %9112  ;;  %v4973_v6 = vmul.f32 %v9111_v28, %v7847_v23  ;;  %v4759_v53 = vmul.f32 %v4695_v9, %v4695_v9  ;;  %v4002_v58 = vsub.f32 %v3874_v4, %v3938_v24  ;;  %v13157_v27 = vadd.f32 %v12288_v32, %v4376_v51  ;;  %v16248_v23 = vld [vmem:[#allocation6_spill] sm:$0xff] }
 0x427   : > { %v13159_v13 = vpop.eup %9114  ;;  %v5076_v1 = vmul.f32 %v4971_v29, %v13022_v39  ;;  %9122 = vpow2.f32 %v4598_v15  ;;  %v4067_v47 = vmax.f32 %v4003_v49, 0.0  ;;  %v4600_v48 = vmul.f32 1.442695, %v4507_v59  ;;  %v16249_v39 = vld [vmem:[#allocation50_spill] sm:$0xff] }
 0x428   : > { %v5077_v12 = vmul.f32 %v4973_v6, %v13025_v61  ;;  %v4887_v3 = vadd.f32 1.0, %v4759_v53  ;;  %9124 = vrsqrt.f32 %v4193_v33  ;;  %v4066_v19 = vmax.f32 %v4002_v58, 0.0 }
 0x429   : > { %8459 = vmatprep.mubr.msk.f32.mxu1 %vm933_vm1, %v5076_v1  ;;  %v4195_v8 = vadd.f32 1e-05, %v4067_v47  ;;  %9126 = vpow2.f32 %v4600_v48  ;;  %v3461_v9 = vpop.xlane.xlu1 %3460  ;;  %v4508_v24 = vmin.f32 %v13157_v27, 20.0  ;;  %v16251_v49 = vsub.f32 %v16204_v21, %v12847_v22 }
 0x42a   : > { %v9117_v4 = vpop.eup %9116  ;;  %8460 = vmatmul.mubr.msk.f32.gmra.mrb[56].mxu1 %vm933_vm1, %v5077_v12  ;;  %9128 = vrcp.f32 %v4887_v3  ;;  %v13170_v59 = vmul.f32 0.0625, %v3461_v9  ;;  %v3458_v58 = vpop.xlane.xlu0 %3457  ;;  %v7849_v6 = vadd.f32 -1.0, %v4759_v53  ;;  %v4194_v47 = vadd.f32 1e-05, %v4066_v19 }
 0x42b   : > { %v4309_v33 = vmul.f32 %v12947_v36, %v16251_v49  ;;  %v9119_v51 = vpop.eup %9118  ;;  %v4696_v48 = vadd.f32 1.0, %v9117_v4  ;;  %9130 = vrsqrt.f32 %v4192_v52  ;;  %v13176_v28 = vmul.f32 0.0625, %v3458_v58 }
 0x42c   : > { %16250 = vst [vmem:[#allocation51_spill] sm:$0xff] %v13170_v59  ;;  %v4602_v29 = vmul.f32 1.442695, %v4508_v24  ;;  %v9121_v15 = vpop.eup %9120  ;;  %v4697_v1 = vadd.f32 1.0, %v9119_v51  ;;  %v16253_v12 = vsub.f32 %v16212_v62, %v12903_v46  ;;  %9132 = vrsqrt.f32 %v4195_v8 }
 0x42d   : > { %16252 = vst [vmem:[#allocation15_spill] sm:$0xff] %v13176_v28  ;;  %v4975_v9 = vmul.f32 %v9121_v15, %v7848_v44  ;;  %v4760_v41 = vmul.f32 %v4696_v48, %v4696_v48  ;;  %v3941_v22 = vmul.f32 %v13170_v59, %v13170_v59  ;;  %v3717_v21 = vpop.xlane.xlu1 %3716  ;;  %v4377_v24 = vmul.f32 %v12275_v55, %v4309_v33 }
 0x42e   : > { %v4310_v3 = vmul.f32 %v13011_v20, %v16253_v12  ;;  %v4761_v36 = vmul.f32 %v4697_v1, %v4697_v1  ;;  %9134 = vpow2.f32 %v4602_v29  ;;  %v3877_v52 = vmul.f32 0.0625, %v3717_v21  ;;  %v3714_v53 = vpop.xlane.xlu0 %3713 }
 0x42f   : > { %v5078_v19 = vmul.f32 %v4975_v9, %v13045_v0  ;;  %v4888_v4 = vadd.f32 1.0, %v4760_v41  ;;  %v3940_v46 = vmul.f32 %v13176_v28, %v13176_v28  ;;  %v3876_v20 = vmul.f32 0.0625, %v3714_v53 }
 0x430   : > { %v4889_v62 = vadd.f32 1.0, %v4761_v36  ;;  %9136 = vrsqrt.f32 %v4194_v47  ;;  %v4005_v44 = vsub.f32 %v3877_v52, %v3941_v22  ;;  %v13189_v8 = vadd.f32 %v12288_v32, %v4377_v24 }
 0x431   : > { %v9123_v58 = vpop.eup %9122  ;;  %8462 = vmatprep.mubr.msk.f32.mxu1 %vm933_vm1, %v5078_v19  ;;  %9138 = vrcp.f32 %v4888_v4  ;;  %v4004_v51 = vsub.f32 %v3876_v20, %v3940_v46  ;;  %v3467_v0 = vpop.xlane.xlu1 %3466  ;;  %v4378_v48 = vmul.f32 %v12275_v55, %v4310_v3  ;;  %v7850_v22 = vadd.f32 -1.0, %v4760_v41 }
 0x432   : > { %v13195_v29 = vpop.eup %9124  ;;  %9140 = vrcp.f32 %v4889_v62  ;;  %v4698_v15 = vadd.f32 1.0, %v9123_v58  ;;  %v4069_v1 = vmax.f32 %v4005_v44, 0.0  ;;  %v4509_v47 = vmin.f32 %v13189_v8, 20.0  ;;  %v3464_v12 = vpop.xlane.xlu0 %3463 }
 0x433   : > { %v9127_v9 = vpop.eup %9126  ;;  %v4068_v24 = vmax.f32 %v4004_v51, 0.0  ;;  %v13200_v53 = vmul.f32 0.0625, %v3467_v0  ;;  %v13203_v20 = vadd.f32 %v12288_v32, %v4378_v48  ;;  %v7851_v58 = vadd.f32 -1.0, %v4761_v36  ;;  %v16260_v36 = vld [vmem:[#allocation47_spill] sm:$0xff] }
 0x434   : > { %v9129_v19 = vpop.eup %9128  ;;  %v4762_v4 = vmul.f32 %v4698_v15, %v4698_v15  ;;  %v4699_v46 = vadd.f32 1.0, %v9127_v9  ;;  %v4604_v3 = vmul.f32 1.442695, %v4509_v47  ;;  %v4197_v33 = vadd.f32 1e-05, %v4069_v1 }
 0x435   : > { %16256 = vst [vmem:[#allocation65_spill] sm:$0xff] %v13200_v53  ;;  %v13205_v62 = vpop.eup %9130  ;;  %v4977_v44 = vmul.f32 %v9129_v19, %v7849_v6  ;;  %v3723_v61 = vpop.xlane.xlu1 %3722  ;;  %v16257_v41 = vsub.f32 %v16210_v18, %v12893_v38  ;;  %v4196_v59 = vadd.f32 1e-05, %v4068_v24  ;;  %v13211_v15 = vmul.f32 0.0625, %v3464_v12 }
 0x436   : > { %v4890_v0 = vadd.f32 1.0, %v4762_v4  ;;  %v4763_v52 = vmul.f32 %v4699_v46, %v4699_v46  ;;  %v3720_v47 = vpop.xlane.xlu0 %3719  ;;  %v13213_v9 = vpop.eup %9132  ;;  %9142 = vpow2.f32 %v4604_v3  ;;  %v3943_v6 = vmul.f32 %v13200_v53, %v13200_v53 }
 0x437   : > { %v4311_v51 = vmul.f32 %v12992_v2, %v16257_v41  ;;  %16258 = vst [vmem:[#allocation55_spill] sm:$0xff] %v13213_v9  ;;  %v5079_v48 = vmul.f32 %v4977_v44, %v13078_v31  ;;  %v7852_v18 = vadd.f32 -1.0, %v4762_v4  ;;  %v4510_v24 = vmin.f32 %v13203_v20, 20.0 }
 0x438   : > { %v9135_v38 = vpop.eup %9134  ;;  %9144 = vrcp.f32 %v4890_v0  ;;  %v4891_v2 = vadd.f32 1.0, %v4763_v52  ;;  %v3879_v19 = vmul.f32 0.0625, %v3723_v61  ;;  %v3942_v44 = vmul.f32 %v13211_v15, %v13211_v15 }
 0x439   : > { %8463 = vmatmul.mubr.msk.f32.gmra.mrb[58].mxu1 %vm933_vm1, %v5079_v48  ;;  %v4700_v12 = vadd.f32 1.0, %v9135_v38  ;;  %9146 = vrsqrt.f32 %v4197_v33  ;;  %v4379_v31 = vmul.f32 %v12275_v55, %v4311_v51  ;;  %v3473_v46 = vpop.xlane.xlu1 %3472  ;;  %v4606_v41 = vmul.f32 1.442695, %v4510_v24 }
 0x43a   : > { %v13223_v3 = vpop.eup %9136  ;;  %9148 = vrcp.f32 %v4891_v2  ;;  %v3878_v4 = vmul.f32 0.0625, %v3720_v47  ;;  %v3470_v0 = vpop.xlane.xlu0 %3469  ;;  %v4007_v38 = vsub.f32 %v3879_v19, %v3943_v6  ;;  %v13232_v2 = vmul.f32 0.0625, %v3473_v46 }
 0x43b   : > { %v9139_v1 = vpop.eup %9138  ;;  %v4764_v53 = vmul.f32 %v4700_v12, %v4700_v12  ;;  %v13230_v61 = vadd.f32 %v12288_v32, %v4379_v31  ;;  %9150 = vpow2.f32 %v4606_v41  ;;  %v13234_v47 = vmul.f32 0.0625, %v3470_v0  ;;  %v16262_v41 = vld [vmem:[#allocation45_spill] sm:$0xff] }
 0x43c   : > { %v9141_v33 = vpop.eup %9140  ;;  %v4979_v51 = vmul.f32 %v9139_v1, %v7850_v22  ;;  %v4006_v49 = vsub.f32 %v3878_v4, %v3942_v44  ;;  %16261 = vst [vmem:[#allocation16_spill] sm:$0xff] %v13232_v2  ;;  %v4071_v24 = vmax.f32 %v4007_v38, 0.0  ;;  %9152 = vrsqrt.f32 %v4196_v59 }
 0x43d   : > { %v4981_v28 = vmul.f32 %v9141_v33, %v7851_v58  ;;  %v4892_v21 = vadd.f32 1.0, %v4764_v53  ;;  %v3729_v9 = vpop.xlane.xlu1 %3728  ;;  %v4511_v6 = vmin.f32 %v13230_v61, 20.0  ;;  %v7853_v22 = vadd.f32 -1.0, %v4763_v52 }
 0x43e   : > { %v5080_v12 = vmul.f32 %v4979_v51, %v13118_v14  ;;  %v4070_v19 = vmax.f32 %v4006_v49, 0.0  ;;  %v3726_v31 = vpop.xlane.xlu0 %3725  ;;  %v4199_v1 = vadd.f32 1e-05, %v4071_v24  ;;  %v7854_v58 = vadd.f32 -1.0, %v4764_v53  ;;  %v16264_v49 = vld [vmem:[#allocation29_spill] sm:$0xff] }
 0x43f   : > { %v5081_v48 = vmul.f32 %v4981_v28, %v13122_v30  ;;  %9154 = vrcp.f32 %v4892_v21  ;;  %v4608_v46 = vmul.f32 1.442695, %v4511_v6  ;;  %v3945_v44 = vmul.f32 %v13232_v2, %v13232_v2  ;;  %v16265_v21 = vld [vmem:[#allocation13_spill] sm:$0xff] }
 0x440   : > { %8465 = vmatprep.mubr.msk.f32.mxu1 %vm933_vm1, %v5080_v12  ;;  %v16263_v14 = vsub.f32 %v16215_v43, %v16262_v41  ;;  %v9143_v4 = vpop.eup %9142  ;;  %v3944_v30 = vmul.f32 %v13234_v47, %v13234_v47  ;;  %v3881_v28 = vmul.f32 0.0625, %v3729_v9  ;;  %v16266_v52 = vsub.f32 %v16264_v49, %v16265_v21 }
 0x441   : > { %8466 = vmatmul.mubr.msk.f32.gmra.mrb[60].mxu1 %vm933_vm1, %v5081_v48  ;;  %v3880_v0 = vmul.f32 0.0625, %v3726_v31  ;;  %v3479_v38 = vpop.xlane.xlu1 %3478  ;;  %v4701_v51 = vadd.f32 1.0, %v9143_v4  ;;  %9156 = vpow2.f32 %v4608_v46  ;;  %v4198_v43 = vadd.f32 1e-05, %v4070_v19 }
 0x442   : > { %v4312_v59 = vmul.f32 %v13048_v5, %v16263_v14  ;;  %v4313_v53 = vmul.f32 %v13039_v50, %v16266_v52  ;;  %v9145_v33 = vpop.eup %9144  ;;  %v3476_v24 = vpop.xlane.xlu0 %3475  ;;  %9158 = vrsqrt.f32 %v4199_v1  ;;  %v4009_v6 = vsub.f32 %v3881_v28, %v3945_v44  ;;  %v16268_v28 = vld [vmem:[#allocation46_spill] sm:$0xff] }
 0x443   : > { %v13254_v12 = vpop.eup %9146  ;;  %v4983_v48 = vmul.f32 %v9145_v33, %v7852_v18  ;;  %v4765_v14 = vmul.f32 %v4701_v51, %v4701_v51  ;;  %v4008_v31 = vsub.f32 %v3880_v0, %v3944_v30  ;;  %v13260_v49 = vmul.f32 0.0625, %v3479_v38  ;;  %v16269_v33 = vld [vmem:[#allocation33_spill] sm:$0xff] }
 0x444   : > { %v4380_v5 = vmul.f32 %v12275_v55, %v4312_v59  ;;  %v4381_v9 = vmul.f32 %v12275_v55, %v4313_v53  ;;  %v9149_v41 = vpop.eup %9148  ;;  %v4073_v59 = vmax.f32 %v4009_v6, 0.0  ;;  %9160 = vrsqrt.f32 %v4198_v43 }
 0x445   : > { %16267 = vst [vmem:[#allocation67_spill] sm:$0xff] %v13260_v49  ;;  %v5082_v19 = vmul.f32 %v4983_v48, %v13131_v42  ;;  %v4985_v46 = vmul.f32 %v9149_v41, %v7853_v22  ;;  %v3735_v18 = vpop.xlane.xlu1 %3734  ;;  %v9151_v1 = vpop.eup %9150  ;;  %v4893_v44 = vadd.f32 1.0, %v4765_v14  ;;  %v4072_v0 = vmax.f32 %v4008_v31, 0.0  ;;  %v16270_v31 = vld [vmem:[#allocation36_spill] sm:$0xff] }
 0x446   : > { %v13258_v50 = vadd.f32 %v12288_v32, %v4380_v5  ;;  %v13264_v4 = vadd.f32 %v12288_v32, %v4381_v9  ;;  %v3732_v53 = vpop.xlane.xlu0 %3731  ;;  %v4702_v42 = vadd.f32 1.0, %v9151_v1  ;;  %v13272_v38 = vpop.eup %9152  ;;  %v4201_v5 = vadd.f32 1e-05, %v4073_v59  ;;  %v16271_v1 = vld [vmem:[#allocation70_spill] sm:$0xff] }
 0x447   : > { %8468 = vmatprep.mubr.msk.f32.mxu1 %vm933_vm1, %v5082_v19  ;;  %v5083_v30 = vmul.f32 %v4985_v46, %v13148_v7  ;;  %9162 = vrcp.f32 %v4893_v44  ;;  %v7855_v6 = vadd.f32 -1.0, %v4765_v14  ;;  %v3947_v7 = vmul.f32 %v13260_v49, %v13260_v49 }
 0x448   : > { %v4512_v52 = vmin.f32 %v13258_v50, 20.0  ;;  %v4513_v22 = vmin.f32 %v13264_v4, 20.0  ;;  %v4766_v9 = vmul.f32 %v4702_v42, %v4702_v42  ;;  %v16272_v44 = vsub.f32 %v16270_v31, %v16271_v1  ;;  %v16275_v31 = vld [vmem:[#allocation35_spill] sm:$0xff]  ;;  %v16276_v1 = vld [vmem:[#allocation14_spill] sm:$0xff] }
 0x449   : > { %v9155_v48 = vpop.eup %9154  ;;  %8469 = vmatmul.mubr.msk.f32.gmra.mrb[62].mxu1 %vm933_vm1, %v5083_v30  ;;  %v3485_v19 = vpop.xlane.xlu1 %3484  ;;  %v3883_v51 = vmul.f32 0.0625, %v3735_v18  ;;  %v4200_v2 = vadd.f32 1e-05, %v4072_v0  ;;  %v13283_v30 = vmul.f32 0.0625, %v3476_v24 }
 0x44a   : > { %v4610_v43 = vmul.f32 1.442695, %v4512_v52  ;;  %v4612_v41 = vmul.f32 1.442695, %v4513_v22  ;;  %v4987_v46 = vmul.f32 %v9155_v48, %v7854_v58  ;;  %v4314_v21 = vmul.f32 %v13103_v40, %v16272_v44  ;;  %v3482_v52 = vpop.xlane.xlu0 %3481 }
 0x44b   : > { %v4894_v59 = vadd.f32 1.0, %v4766_v9  ;;  %16273 = vst [vmem:[#allocation64_spill] sm:$0xff] %v13283_v30  ;;  %v9157_v14 = vpop.eup %9156  ;;  %v4011_v18 = vsub.f32 %v3883_v51, %v3947_v7  ;;  %v13299_v44 = vmul.f32 0.0625, %v3485_v19  ;;  %v3946_v51 = vmul.f32 %v13283_v30, %v13283_v30 }
 0x44c   : > { %9164 = vpow2.f32 %v4610_v43  ;;  %v5084_v42 = vmul.f32 %v4987_v46, %v13157_v27  ;;  %v4382_v43 = vmul.f32 %v12275_v55, %v4314_v21  ;;  %v13289_v48 = vpop.eup %9158  ;;  %v4703_v40 = vadd.f32 1.0, %v9157_v14 }
 0x44d   : > { %9166 = vpow2.f32 %v4612_v41  ;;  %v16277_v41 = vsub.f32 %v16275_v31, %v16276_v1  ;;  %v3741_v0 = vpop.xlane.xlu1 %3740  ;;  %v7856_v27 = vadd.f32 -1.0, %v4766_v9  ;;  %v3882_v46 = vmul.f32 0.0625, %v3732_v53  ;;  %16278 = vst [vmem:[#allocation17_spill] sm:$0xff] %v13299_v44  ;;  %v16280_v9 = vld [vmem:[#allocation49_spill] sm:$0xff] }
 0x44e   : > { %9168 = vrsqrt.f32 %v4201_v5  ;;  %8471 = vmatprep.mubr.msk.f32.mxu1 %vm933_vm1, %v5084_v42  ;;  %v13297_v5 = vadd.f32 %v12288_v32, %v4382_v43  ;;  %v3738_v21 = vpop.xlane.xlu0 %3737  ;;  %v4767_v58 = vmul.f32 %v4703_v40, %v4703_v40  ;;  %v13308_v14 = vpop.eup %9160  ;;  %v4075_v42 = vmax.f32 %v4011_v18, 0.0 }
 0x44f   : > { %9170 = vrcp.f32 %v4894_v59  ;;  %v4315_v24 = vmul.f32 %v13061_v25, %v16277_v41  ;;  %v16279_v25 = vsub.f32 %v16232_v17, %v13019_v10  ;;  %v4010_v31 = vsub.f32 %v3882_v46, %v3946_v51 }
 0x450   : > { %9172 = vrsqrt.f32 %v4200_v2  ;;  %v4514_v19 = vmin.f32 %v13297_v5, 20.0  ;;  %v4895_v43 = vadd.f32 1.0, %v4767_v58  ;;  %v13316_v1 = vmul.f32 0.0625, %v3482_v52 }
 0x451   : > { %v4383_v7 = vmul.f32 %v12275_v55, %v4315_v24  ;;  %v4316_v59 = vmul.f32 %v13126_v63, %v16279_v25  ;;  %v3491_v41 = vpop.xlane.xlu1 %3490  ;;  %v9163_v10 = vpop.eup %9162  ;;  %v7857_v17 = vadd.f32 -1.0, %v4767_v58  ;;  %v3949_v2 = vmul.f32 %v13299_v44, %v13299_v44  ;;  %v16281_v24 = vld [vmem:[#allocation58_spill] sm:$0xff] }
 0x452   : > { %v4614_v63 = vmul.f32 1.442695, %v4514_v19  ;;  %v4989_v53 = vmul.f32 %v9163_v10, %v7855_v6  ;;  %9174 = vrcp.f32 %v4895_v43  ;;  %v4203_v52 = vadd.f32 1e-05, %v4075_v42  ;;  %v3488_v19 = vpop.xlane.xlu0 %3487 }
 0x453   : > { %v13314_v40 = vadd.f32 %v12288_v32, %v4383_v7  ;;  %v4384_v7 = vmul.f32 %v12275_v55, %v4316_v59  ;;  %v3885_v46 = vmul.f32 0.0625, %v3741_v0  ;;  %v16282_v58 = vsub.f32 %v16228_v37, %v13017_v56 }
 0x454   : > { %9176 = vpow2.f32 %v4614_v63  ;;  %v5085_v30 = vmul.f32 %v4989_v53, %v13189_v8  ;;  %v4074_v43 = vmax.f32 %v4010_v31, 0.0  ;;  %v3948_v59 = vmul.f32 %v13316_v1, %v13316_v1 }
 0x455   : > { %v4515_v18 = vmin.f32 %v13314_v40, 20.0  ;;  %v4317_v51 = vmul.f32 %v13108_v35, %v16282_v58  ;;  %v13334_v0 = vadd.f32 %v12288_v32, %v4384_v7  ;;  %v4013_v42 = vsub.f32 %v3885_v46, %v3949_v2 }
 0x456   : > { %v9165_v49 = vpop.eup %9164  ;;  %8472 = vmatmul.mubr.msk.f32.gmra.mrb[64].mxu1 %vm933_vm1, %v5085_v30  ;;  %v3884_v8 = vmul.f32 0.0625, %v3738_v21  ;;  %v4202_v58 = vadd.f32 1e-05, %v4074_v43  ;;  %v3744_v21 = vpop.xlane.xlu0 %3743 }
 0x457   : > { %v9167_v22 = vpop.eup %9166  ;;  %v4704_v25 = vadd.f32 1.0, %v9165_v49  ;;  %v4616_v6 = vmul.f32 1.442695, %v4515_v18  ;;  %v4385_v35 = vmul.f32 %v12275_v55, %v4317_v51  ;;  %v3747_v49 = vpop.xlane.xlu1 %3746  ;;  %v4077_v63 = vmax.f32 %v4013_v42, 0.0 }
 0x458   : > { %v13329_v10 = vpop.eup %9168  ;;  %v4705_v44 = vadd.f32 1.0, %v9167_v22  ;;  %v4516_v22 = vmin.f32 %v13334_v0, 20.0  ;;  %v4012_v2 = vsub.f32 %v3884_v8, %v3948_v59  ;;  %v13349_v59 = vmul.f32 0.0625, %v3491_v41 }
 0x459   : > { %v9171_v56 = vpop.eup %9170  ;;  %v4768_v37 = vmul.f32 %v4704_v25, %v4704_v25  ;;  %9178 = vpow2.f32 %v4616_v6  ;;  %v13340_v7 = vadd.f32 %v12288_v32, %v4385_v35  ;;  %v4205_v43 = vadd.f32 1e-05, %v4077_v63 }
 0x45a   : > { %v4991_v53 = vmul.f32 %v9171_v56, %v7856_v27  ;;  %v4769_v31 = vmul.f32 %v4705_v44, %v4705_v44  ;;  %v13342_v46 = vpop.eup %9172  ;;  %9180 = vrsqrt.f32 %v4203_v52  ;;  %v4618_v51 = vmul.f32 1.442695, %v4516_v22  ;;  %v16283_v27 = vld [vmem:[#allocation54_spill] sm:$0xff]  ;;  %16284 = vst [vmem:[#allocation66_spill] sm:$0xff] %v13349_v59 }
 0x45b   : > { %v4896_v18 = vadd.f32 1.0, %v4768_v37  ;;  %v4517_v6 = vmin.f32 %v13340_v7, 20.0  ;;  %v4076_v42 = vmax.f32 %v4012_v2, 0.0  ;;  %v13355_v8 = vmul.f32 0.0625, %v3488_v19  ;;  %v3497_v22 = vpop.xlane.xlu1 %3496 }
 0x45c   : > { %v5086_v30 = vmul.f32 %v4991_v53, %v13203_v20  ;;  %v4897_v25 = vadd.f32 1.0, %v4769_v31  ;;  %v16285_v20 = vsub.f32 %v16234_v54, %v13058_v26  ;;  %v9175_v56 = vpop.eup %9174  ;;  %v3887_v53 = vmul.f32 0.0625, %v3747_v49 }
 0x45d   : > { %9182 = vrcp.f32 %v4896_v18  ;;  %v4620_v35 = vmul.f32 1.442695, %v4517_v6  ;;  %v4993_v2 = vmul.f32 %v9175_v56, %v7857_v17  ;;  %v7858_v44 = vadd.f32 -1.0, %v4768_v37 }
 0x45e   : > { %8474 = vmatprep.mubr.msk.f32.mxu1 %vm933_vm1, %v5086_v30  ;;  %9184 = vrcp.f32 %v4897_v25  ;;  %v4318_v52 = vmul.f32 %v13159_v13, %v16285_v20  ;;  %v9177_v18 = vpop.eup %9176  ;;  %v3951_v41 = vmul.f32 %v13349_v59, %v13349_v59  ;;  %v7859_v63 = vadd.f32 -1.0, %v4769_v31  ;;  %v3494_v25 = vpop.xlane.xlu0 %3493 }
 0x45f   : > { %9186 = vpow2.f32 %v4618_v51  ;;  %v4706_v30 = vadd.f32 1.0, %v9177_v18  ;;  %v4204_v26 = vadd.f32 1e-05, %v4076_v42  ;;  %v5087_v54 = vmul.f32 %v4993_v2, %v13230_v61 }
 0x460   : > { %9188 = vrsqrt.f32 %v4202_v58  ;;  %v4386_v13 = vmul.f32 %v12275_v55, %v4318_v52  ;;  %v4015_v19 = vsub.f32 %v3887_v53, %v3951_v41  ;;  %v3950_v17 = vmul.f32 %v13355_v8, %v13355_v8 }
 0x461   : > { %9190 = vpow2.f32 %v4620_v35  ;;  %v4770_v51 = vmul.f32 %v4706_v30, %v4706_v30  ;;  %v16286_v37 = vsub.f32 %v16233_v45, %v13055_v16  ;;  %v3886_v58 = vmul.f32 0.0625, %v3744_v21  ;;  %8475 = vmatmul.mubr.msk.f32.gmra.mrb[66].mxu1 %vm933_vm1, %v5087_v54  ;;  %v3753_v16 = vpop.xlane.xlu1 %3752  ;;  %v16289_v21 = vld [vmem:[#allocation57_spill] sm:$0xff] }
 0x462   : > { %9192 = vrsqrt.f32 %v4205_v43  ;;  %v13371_v43 = vadd.f32 %v12288_v32, %v4386_v13  ;;  %v13373_v20 = vmul.f32 0.0625, %v3497_v22  ;;  %v4079_v56 = vmax.f32 %v4015_v19, 0.0 }
 0x463   : > { %v9179_v49 = vpop.eup %9178  ;;  %v4319_v31 = vmul.f32 %v13154_v60, %v16286_v37  ;;  %v4898_v52 = vadd.f32 1.0, %v4770_v51  ;;  %v4014_v53 = vsub.f32 %v3886_v58, %v3950_v17  ;;  %9194 = vrsqrt.f32 %v4204_v26 }
 0x464   : > { %v4707_v6 = vadd.f32 1.0, %v9179_v49  ;;  %16288 = vst [vmem:[#allocation18_spill] sm:$0xff] %v13373_v20  ;;  %v13376_v45 = vpop.eup %9180  ;;  %v4518_v2 = vmin.f32 %v13371_v43, 20.0  ;;  %v13384_v54 = vmul.f32 0.0625, %v3494_v25  ;;  %v7860_v49 = vadd.f32 -1.0, %v4770_v51 }
 0x465   : > { %v4387_v35 = vmul.f32 %v12275_v55, %v4319_v31  ;;  %9196 = vrcp.f32 %v4898_v52  ;;  %v4078_v30 = vmax.f32 %v4014_v53, 0.0  ;;  %v3750_v31 = vpop.xlane.xlu0 %3749  ;;  %v3953_v52 = vmul.f32 %v13373_v20, %v13373_v20 }
 0x466   : > { %v4771_v60 = vmul.f32 %v4707_v6, %v4707_v6  ;;  %16290 = vst [vmem:[#allocation8_spill] sm:$0xff] %v13384_v54  ;;  %v4622_v37 = vmul.f32 1.442695, %v4518_v2  ;;  %v4207_v6 = vadd.f32 1e-05, %v4079_v56 }
 0x467   : > { %v9183_v41 = vpop.eup %9182  ;;  %v13382_v22 = vadd.f32 %v12288_v32, %v4387_v35  ;;  %v4206_v56 = vadd.f32 1e-05, %v4078_v30  ;;  %v16295_v30 = vld [vmem:[#allocation44_spill] sm:$0xff] }
 0x468   : > { %v9185_v13 = vpop.eup %9184  ;;  %v4995_v19 = vmul.f32 %v9183_v41, %v7858_v44  ;;  %v4899_v17 = vadd.f32 1.0, %v4771_v60  ;;  %v3503_v41 = vpop.xlane.xlu1 %3502 }
 0x469   : > { %v9187_v26 = vpop.eup %9186  ;;  %v4997_v58 = vmul.f32 %v9185_v13, %v7859_v63  ;;  %v4519_v42 = vmin.f32 %v13382_v22, 20.0 }
 0x46a   : > { %v13389_v18 = vpop.eup %9188  ;;  %v5088_v35 = vmul.f32 %v4995_v19, %v13258_v50  ;;  %9198 = vrcp.f32 %v4899_v17  ;;  %v4708_v25 = vadd.f32 1.0, %v9187_v26  ;;  %v3952_v50 = vmul.f32 %v13384_v54, %v13384_v54  ;;  %v16292_v19 = vld [vmem:[#allocation63_spill] sm:$0xff] }
 0x46b   : > { %v9191_v53 = vpop.eup %9190  ;;  %v5089_v2 = vmul.f32 %v4997_v58, %v13264_v4  ;;  %9200 = vpow2.f32 %v4622_v37  ;;  %v4624_v63 = vmul.f32 1.442695, %v4519_v42  ;;  %v16293_v17 = vsub.f32 %v16247_v34, %v16292_v19  ;;  %v16294_v42 = vld [vmem:[#allocation5_spill] sm:$0xff]  ;;  %v3500_v34 = vpop.xlane.xlu0 %3499 }
 0x46c   : > { %v13395_v13 = vpop.eup %9192  ;;  %8477 = vmatprep.mubr.msk.f32.mxu1 %vm933_vm1, %v5088_v35  ;;  %v4772_v59 = vmul.f32 %v4708_v25, %v4708_v25  ;;  %v4709_v61 = vadd.f32 1.0, %v9191_v53  ;;  %v3889_v4 = vmul.f32 0.0625, %v3753_v16  ;;  %v16296_v37 = vsub.f32 %v16294_v42, %v16295_v30  ;;  %v13409_v25 = vpop.f32.mrb[34].mxu1 }
 0x46d   : > { %v4320_v26 = vmul.f32 %v13205_v62, %v16293_v17  ;;  %8478 = vmatmul.mubr.msk.f32.gmra.mrb[68].mxu1 %vm933_vm1, %v5089_v2  ;;  %9202 = vpow2.f32 %v4624_v63  ;;  %v3888_v35 = vmul.f32 0.0625, %v3750_v31  ;;  %v13412_v19 = vpop.f32.mrb[35].mxu1  ;;  %v13415_v63 = vmul.f32 0.0625, %v3503_v41  ;;  %v13417_v17 = vpop.eup %9194 }
 0x46e   : > { %v4321_v58 = vmul.f32 %v13195_v29, %v16296_v37  ;;  %v4900_v53 = vadd.f32 1.0, %v4772_v59  ;;  %v4773_v51 = vmul.f32 %v4709_v61, %v4709_v61  ;;  %9204 = vrsqrt.f32 %v4207_v6 }
 0x46f   : > { %v4388_v20 = vmul.f32 %v12275_v55, %v4320_v26  ;;  %v4017_v62 = vsub.f32 %v3889_v4, %v3953_v52  ;;  %v4016_v16 = vsub.f32 %v3888_v35, %v3952_v50  ;;  %16297 = vst [vmem:[#allocation68_spill] sm:$0xff] %v13415_v63  ;;  %v7861_v29 = vadd.f32 -1.0, %v4771_v60  ;;  %v9197_v61 = vpop.eup %9196  ;;  %v3759_v50 = vpop.xlane.xlu1 %3758 }
 0x470   : > { %v4389_v2 = vmul.f32 %v12275_v55, %v4321_v58  ;;  %9206 = vrcp.f32 %v4900_v53  ;;  %v4901_v31 = vadd.f32 1.0, %v4773_v51  ;;  %v4999_v41 = vmul.f32 %v9197_v61, %v7860_v49 }
 0x471   : > { %v13420_v42 = vadd.f32 %v12288_v32, %v4388_v20  ;;  %9208 = vrsqrt.f32 %v4206_v56  ;;  %v4081_v30 = vmax.f32 %v4017_v62, 0.0  ;;  %v7862_v4 = vadd.f32 -1.0, %v4772_v59 }
 0x472   : > { %v13425_v52 = vadd.f32 %v12288_v32, %v4389_v2  ;;  %9210 = vrcp.f32 %v4901_v31  ;;  %v7863_v37 = vadd.f32 -1.0, %v4773_v51  ;;  %v4080_v20 = vmax.f32 %v4016_v16, 0.0  ;;  %v3756_v31 = vpop.xlane.xlu0 %3755  ;;  %v13438_v16 = vpop.f32.mrb[36].mxu1 }
 0x473   : > { %v4520_v60 = vmin.f32 %v13420_v42, 20.0  ;;  %v3955_v56 = vmul.f32 %v13415_v63, %v13415_v63  ;;  %v5090_v53 = vmul.f32 %v4999_v41, %v13297_v5  ;;  %v16299_v2 = vsub.f32 %v16249_v39, %v13136_v57  ;;  %v13444_v39 = vpop.f32.mrb[37].mxu1 }
 0x474   : > { %v4521_v58 = vmin.f32 %v13425_v52, 20.0  ;;  %v9199_v35 = vpop.eup %9198  ;;  %v3891_v59 = vmul.f32 0.0625, %v3759_v50  ;;  %v4209_v51 = vadd.f32 1e-05, %v4081_v30  ;;  %v13436_v54 = vmul.f32 0.0625, %v3500_v34  ;;  %v16302_v50 = vld [vmem:[#allocation55_spill] sm:$0xff] }
 0x475   : > { %v4626_v62 = vmul.f32 1.442695, %v4520_v60  ;;  %v4322_v49 = vmul.f32 %v13223_v3, %v16299_v2  ;;  %v9201_v61 = vpop.eup %9200  ;;  %v5001_v26 = vmul.f32 %v9199_v35, %v7861_v29  ;;  %8480 = vmatprep.mubr.msk.f32.mxu1 %vm933_vm1, %v5090_v53  ;;  %v16301_v34 = vsub.f32 %v16248_v23, %v13134_v11 }
 0x476   : > { %v4628_v44 = vmul.f32 1.442695, %v4521_v58  ;;  %v4710_v6 = vadd.f32 1.0, %v9201_v61  ;;  %v4019_v30 = vsub.f32 %v3891_v59, %v3955_v56  ;;  %v3509_v58 = vpop.xlane.xlu1 %3508  ;;  %v4208_v2 = vadd.f32 1e-05, %v4080_v20  ;;  %v3506_v61 = vpop.xlane.xlu0 %3505 }
 0x477   : > { %9212 = vpow2.f32 %v4626_v62  ;;  %v4390_v57 = vmul.f32 %v12275_v55, %v4322_v49  ;;  %v9203_v3 = vpop.eup %9202  ;;  %v5091_v29 = vmul.f32 %v5001_v26, %v13314_v40  ;;  %v4323_v60 = vmul.f32 %v16302_v50, %v16301_v34 }
 0x478   : > { %9214 = vpow2.f32 %v4628_v44  ;;  %v13451_v35 = vpop.eup %9204  ;;  %v4774_v53 = vmul.f32 %v4710_v6, %v4710_v6  ;;  %v4711_v62 = vadd.f32 1.0, %v9203_v3  ;;  %v3954_v40 = vmul.f32 %v13436_v54, %v13436_v54  ;;  %v16303_v3 = vld [vmem:[#allocation43_spill] sm:$0xff] }
 0x479   : > { %v13454_v49 = vadd.f32 %v12288_v32, %v4390_v57  ;;  %8481 = vmatmul.mubr.msk.f32.gmra.mrb[70].mxu1 %vm933_vm1, %v5091_v29  ;;  %9216 = vrsqrt.f32 %v4209_v51  ;;  %v4391_v44 = vmul.f32 %v12275_v55, %v4323_v60  ;;  %v3890_v11 = vmul.f32 0.0625, %v3756_v31 }
 0x47a   : > { %v9207_v23 = vpop.eup %9206  ;;  %v4902_v26 = vadd.f32 1.0, %v4774_v53  ;;  %v4775_v56 = vmul.f32 %v4711_v62, %v4711_v62  ;;  %v4083_v6 = vmax.f32 %v4019_v30, 0.0  ;;  %v13468_v41 = vmul.f32 0.0625, %v3509_v58 }
 0x47b   : > { %v4522_v59 = vmin.f32 %v13454_v49, 20.0  ;;  %v13461_v20 = vpop.eup %9208  ;;  %v5003_v57 = vmul.f32 %v9207_v23, %v7862_v4  ;;  %v13466_v51 = vadd.f32 %v12288_v32, %v4391_v44  ;;  %v4018_v34 = vsub.f32 %v3890_v11, %v3954_v40  ;;  %v3765_v4 = vpop.xlane.xlu1 %3764 }
 0x47c   : > { %v9211_v50 = vpop.eup %9210  ;;  %9218 = vrcp.f32 %v4902_v26  ;;  %v4903_v31 = vadd.f32 1.0, %v4775_v56  ;;  %v7864_v23 = vadd.f32 -1.0, %v4774_v53  ;;  %v4211_v29 = vadd.f32 1e-05, %v4083_v6  ;;  %v16308_v6 = vld [vmem:[#allocation51_spill] sm:$0xff] }
 0x47d   : > { %v4630_v60 = vmul.f32 1.442695, %v4522_v59  ;;  %v5092_v62 = vmul.f32 %v5003_v57, %v13334_v0  ;;  %v5005_v30 = vmul.f32 %v9211_v50, %v7863_v37  ;;  %9220 = vrsqrt.f32 %v4208_v2  ;;  %v16304_v37 = vld [vmem:[#allocation28_spill] sm:$0xff]  ;;  %v16305_v2 = vld [vmem:[#allocation15_spill] sm:$0xff] }
 0x47e   : > { %v4523_v63 = vmin.f32 %v13466_v51, 20.0  ;;  %9222 = vrcp.f32 %v4903_v31  ;;  %v4082_v5 = vmax.f32 %v4018_v34, 0.0  ;;  %v7865_v44 = vadd.f32 -1.0, %v4775_v56  ;;  %v16307_v57 = vld [vmem:[#allocation52_spill] sm:$0xff]  ;;  %v3762_v31 = vpop.xlane.xlu0 %3761 }
 0x47f   : > { %8483 = vmatprep.mubr.msk.f32.mxu1 %vm933_vm1, %v5092_v62  ;;  %v5093_v40 = vmul.f32 %v5005_v30, %v13340_v7  ;;  %9224 = vpow2.f32 %v4630_v60  ;;  %v3957_v0 = vmul.f32 %v13468_v41, %v13468_v41  ;;  %v16306_v26 = vsub.f32 %v16304_v37, %v16305_v2  ;;  %v16310_v2 = vld [vmem:[#allocation12_spill] sm:$0xff] }
 0x480   : > { %v4632_v11 = vmul.f32 1.442695, %v4523_v63  ;;  %v3893_v53 = vmul.f32 0.0625, %v3765_v4  ;;  %v16309_v34 = vsub.f32 %v16307_v57, %v16308_v6  ;;  %v4210_v56 = vadd.f32 1e-05, %v4082_v5 }
 0x481   : > { %v9213_v58 = vpop.eup %9212  ;;  %v4324_v59 = vmul.f32 %v13272_v38, %v16306_v26  ;;  %8484 = vmatmul.mubr.msk.f32.gmra.mrb[72].mxu1 %vm933_vm1, %v5093_v40  ;;  %v13485_v60 = vmul.f32 0.0625, %v3506_v61  ;;  %v3892_v57 = vmul.f32 0.0625, %v3762_v31  ;;  %v16311_v5 = vsub.f32 %v16260_v36, %v13211_v15 }
 0x482   : > { %v4325_v50 = vmul.f32 %v13254_v12, %v16309_v34  ;;  %v9215_v7 = vpop.eup %9214  ;;  %v4712_v63 = vadd.f32 1.0, %v9213_v58  ;;  %9226 = vpow2.f32 %v4632_v11  ;;  %v4021_v38 = vsub.f32 %v3893_v53, %v3957_v0  ;;  %v16313_v58 = vld [vmem:[#allocation65_spill] sm:$0xff] }
 0x483   : > { %v4713_v62 = vadd.f32 1.0, %v9215_v7  ;;  %9228 = vrsqrt.f32 %v4211_v29  ;;  %v4392_v30 = vmul.f32 %v12275_v55, %v4324_v59  ;;  %v13488_v4 = vpop.eup %9216  ;;  %v4326_v61 = vmul.f32 %v13308_v14, %v16311_v5  ;;  %v16312_v29 = vld [vmem:[#allocation7_spill] sm:$0xff] }
 0x484   : > { %v4776_v37 = vmul.f32 %v4712_v63, %v4712_v63  ;;  %v4393_v26 = vmul.f32 %v12275_v55, %v4325_v50  ;;  %v16314_v0 = vsub.f32 %v16312_v29, %v16313_v58  ;;  %9230 = vrsqrt.f32 %v4210_v56 }
 0x485   : > { %v4777_v40 = vmul.f32 %v4713_v62, %v4713_v62  ;;  %v13494_v11 = vadd.f32 %v12288_v32, %v4392_v30  ;;  %v3956_v6 = vmul.f32 %v13485_v60, %v13485_v60  ;;  %v4085_v36 = vmax.f32 %v4021_v38, 0.0 }
 0x486   : > { %v4327_v59 = vmul.f32 %v13289_v48, %v16314_v0  ;;  %v4904_v53 = vadd.f32 1.0, %v4776_v37  ;;  %v13507_v34 = vadd.f32 %v12288_v32, %v4393_v26  ;;  %v9219_v50 = vpop.eup %9218  ;;  %v7866_v31 = vadd.f32 -1.0, %v4776_v37 }
 0x487   : > { %v4905_v7 = vadd.f32 1.0, %v4777_v40  ;;  %v4524_v15 = vmin.f32 %v13494_v11, 20.0  ;;  %v13510_v14 = vpop.eup %9220  ;;  %v5007_v63 = vmul.f32 %v9219_v50, %v7864_v23  ;;  %v4020_v62 = vsub.f32 %v3892_v57, %v3956_v6 }
 0x488   : > { %9232 = vrcp.f32 %v4904_v53  ;;  %v4525_v48 = vmin.f32 %v13507_v34, 20.0  ;;  %v9223_v56 = vpop.eup %9222  ;;  %v4394_v5 = vmul.f32 %v12275_v55, %v4326_v61  ;;  %v4395_v26 = vmul.f32 %v12275_v55, %v4327_v59 }
 0x489   : > { %9234 = vrcp.f32 %v4905_v7  ;;  %v4634_v30 = vmul.f32 1.442695, %v4524_v15  ;;  %v9225_v29 = vpop.eup %9224  ;;  %v5094_v37 = vmul.f32 %v5007_v63, %v13371_v43  ;;  %v5009_v58 = vmul.f32 %v9223_v56, %v7865_v44  ;;  %v16316_v63 = vld [vmem:[#allocation16_spill] sm:$0xff] }
 0x48a   : > { %v7867_v0 = vadd.f32 -1.0, %v4777_v40  ;;  %v4636_v38 = vmul.f32 1.442695, %v4525_v48  ;;  %v4714_v12 = vadd.f32 1.0, %v9225_v29  ;;  %v4213_v23 = vadd.f32 1e-05, %v4085_v36 }
 0x48b   : > { %9236 = vpow2.f32 %v4634_v30  ;;  %v13517_v53 = vadd.f32 %v12288_v32, %v4394_v5  ;;  %8486 = vmatprep.mubr.msk.f32.mxu1 %vm933_vm1, %v5094_v37  ;;  %v5095_v6 = vmul.f32 %v5009_v58, %v13382_v22  ;;  %v13522_v61 = vadd.f32 %v12288_v32, %v4395_v26  ;;  %v13544_v56 = vpop.f32.mrb[38].mxu1 }
 0x48c   : > { %v9227_v57 = vpop.eup %9226  ;;  %9238 = vpow2.f32 %v4636_v38  ;;  %v16315_v43 = vsub.f32 %v16269_v33, %v13234_v47  ;;  %v13530_v59 = vmul.f32 %v4714_v12, %v4714_v12  ;;  %v4084_v7 = vmax.f32 %v4020_v62, 0.0  ;;  %v16318_v33 = vld [vmem:[#allocation64_spill] sm:$0xff]  ;;  %v13547_v26 = vpop.f32.mrb[39].mxu1 }
 0x48d   : > { %v13528_v40 = vpop.eup %9228  ;;  %v4715_v50 = vadd.f32 1.0, %v9227_v57  ;;  %v4526_v15 = vmin.f32 %v13517_v53, 20.0  ;;  %8487 = vmatmul.mubr.msk.f32.gmra.mrb[74].mxu1 %vm933_vm1, %v5095_v6  ;;  %v4527_v22 = vmin.f32 %v13522_v61, 20.0  ;;  %v16317_v48 = vsub.f32 %v16268_v28, %v16316_v63  ;;  %v5120_v28 = vld [vmem:[%s15562_s6] sm:$0x7]  ;;  %v16321_v57 = vld [vmem:[#allocation67_spill] sm:$0xff] }
 0x48e   : > { %v4328_v44 = vmul.f32 %v13342_v46, %v16315_v43  ;;  %v16319_v46 = vsub.f32 %v16280_v9, %v16318_v33  ;;  %v4906_v62 = vadd.f32 1.0, %v13530_v59  ;;  %9240 = vrsqrt.f32 %v4213_v23  ;;  %v13549_v29 = vpop.eup %9230  ;;  %v16320_v23 = vld [vmem:[#allocation53_spill] sm:$0xff] }
 0x48f   : > { %v4329_v47 = vmul.f32 %v13329_v10, %v16317_v48  ;;  %v4779_v30 = vmul.f32 %v4715_v50, %v4715_v50  ;;  %v4638_v5 = vmul.f32 1.442695, %v4526_v15  ;;  %v4640_v10 = vmul.f32 1.442695, %v4527_v22  ;;  %v16323_v48 = vld [vmem:[#allocation2_spill] sm:$0xff] }
 0x490   : > { %v4396_v36 = vmul.f32 %v12275_v55, %v4328_v44  ;;  %v4330_v12 = vmul.f32 %v13389_v18, %v16319_v46  ;;  %9242 = vrcp.f32 %v4906_v62  ;;  %v13559_v38 = vadd.f32 1e-05, %v4084_v7 }
 0x491   : > { %v4397_v18 = vmul.f32 %v12275_v55, %v4329_v47  ;;  %v4907_v58 = vadd.f32 1.0, %v4779_v30  ;;  %v16322_v6 = vsub.f32 %v16320_v23, %v16321_v57  ;;  %9244 = vpow2.f32 %v4638_v5 }
 0x492   : > { %v13555_v9 = vadd.f32 %v12288_v32, %v4396_v36  ;;  %v4398_v37 = vmul.f32 %v12275_v55, %v4330_v12  ;;  %v9233_v44 = vpop.eup %9232  ;;  %v13574_v47 = vrot.slane %v5120_v28, %v16323_v48 }
 0x493   : > { %v4331_v43 = vmul.f32 %v13376_v45, %v16322_v6  ;;  %v13567_v15 = vadd.f32 %v12288_v32, %v4397_v18  ;;  %v9235_v36 = vpop.eup %9234  ;;  %v5011_v63 = vmul.f32 %v9233_v44, %v7866_v31  ;;  %9246 = vrcp.f32 %v4907_v58 }
 0x494   : > { %v4528_v50 = vmin.f32 %v13555_v9, 20.0  ;;  %v13570_v22 = vadd.f32 %v12288_v32, %v4398_v37  ;;  %v5013_v33 = vmul.f32 %v9235_v36, %v7867_v0  ;;  %9248 = vpow2.f32 %v4640_v10 }
 0x495   : > { %v4399_v7 = vmul.f32 %v12275_v55, %v4331_v43  ;;  %v4529_v46 = vmin.f32 %v13567_v15, 20.0  ;;  %v9237_v12 = vpop.eup %9236  ;;  %v5096_v62 = vmul.f32 %v5011_v63, %v13420_v42  ;;  %v13584_v31 = vadd.f32 %v13409_v25, %v13574_v47 }
 0x496   : > { %v4642_v45 = vmul.f32 1.442695, %v4528_v50  ;;  %v4530_v5 = vmin.f32 %v13570_v22, 20.0  ;;  %v9239_v37 = vpop.eup %9238  ;;  %v5097_v28 = vmul.f32 %v5013_v33, %v13425_v52  ;;  %v4716_v0 = vadd.f32 1.0, %v9237_v12  ;;  %v16325_v33 = vld [vmem:[#allocation17_spill] sm:$0xff] }
 0x497   : > { %v13580_v18 = vadd.f32 %v12288_v32, %v4399_v7  ;;  %v4644_v10 = vmul.f32 1.442695, %v4529_v46  ;;  %8489 = vmatprep.mubr.msk.f32.mxu1 %vm933_vm1, %v5096_v62  ;;  %v4717_v58 = vadd.f32 1.0, %v9239_v37  ;;  %v13591_v57 = vadd.f32 %v13412_v19, %v13574_v47 }
 0x498   : > { %9250 = vpow2.f32 %v4642_v45  ;;  %v4646_v23 = vmul.f32 1.442695, %v4530_v5  ;;  %8490 = vmatmul.mubr.msk.f32.gmra.mrb[76].mxu1 %vm933_vm1, %v5097_v28  ;;  %v4780_v25 = vmul.f32 %v4716_v0, %v4716_v0  ;;  %v16324_v52 = vsub.f32 %v16283_v27, %v13316_v1  ;;  %v13598_v43 = vpop.eup %9240 }
 0x499   : > { %v4531_v42 = vmin.f32 %v13580_v18, 20.0  ;;  %9252 = vpow2.f32 %v4644_v10  ;;  %v13600_v44 = vmul.f32 %v4717_v58, %v4717_v58  ;;  %v5706_v19 = vsel %vm5702_vm2, %v13584_v31, 0.0 }
 0x49a   : > { %v4332_v6 = vmul.f32 %v13417_v17, %v16324_v52  ;;  %9254 = vpow2.f32 %v4646_v23  ;;  %v7868_v36 = vadd.f32 -1.0, %v13530_v59  ;;  %v4908_v63 = vadd.f32 1.0, %v4780_v25  ;;  %5707 = vadd.xlane.f32.xlu1 %v5706_v19  ;;  %v9243_v27 = vpop.eup %9242 }
 0x49b   : > { %v4648_v50 = vmul.f32 1.442695, %v4531_v42  ;;  %v5703_v1 = vsel %vm5702_vm2, %v13591_v57, 0.0  ;;  %v7869_v17 = vadd.f32 -1.0, %v4779_v30  ;;  %v4909_v48 = vadd.f32 1.0, %v13600_v44  ;;  %v9245_v12 = vpop.eup %9244 }
 0x49c   : > { %v4400_v7 = vmul.f32 %v12275_v55, %v4332_v6  ;;  %5704 = vadd.xlane.f32.xlu0 %v5703_v1  ;;  %v16326_v45 = vsub.f32 %v16281_v24, %v16325_v33  ;;  %v5015_v59 = vmul.f32 %v9243_v27, %v7868_v36  ;;  %v5896_v5 = vmul.f32 %v13584_v31, %v13584_v31 }
 0x49d   : > { %9256 = vpow2.f32 %v4648_v50  ;;  %v9247_v37 = vpop.eup %9246  ;;  %v4718_v30 = vadd.f32 1.0, %v9245_v12  ;;  %v13621_v0 = vadd.f32 %v13438_v16, %v13574_v47  ;;  %v13638_v1 = vadd.f32 %v13444_v39, %v13574_v47  ;;  %v13640_v27 = vpop.f32.mrb[40].mxu1 }
 0x49e   : > { %v4333_v46 = vmul.f32 %v13395_v13, %v16326_v45  ;;  %9258 = vrcp.f32 %v4908_v63  ;;  %v13614_v62 = vadd.f32 %v12288_v32, %v4400_v7  ;;  %v9249_v24 = vpop.eup %9248  ;;  %v5098_v13 = vmul.f32 %v5015_v59, %v13454_v49 }
 0x49f   : > { %9260 = vrcp.f32 %v4909_v48  ;;  %v5017_v10 = vmul.f32 %v9247_v37, %v7869_v17  ;;  %v5962_v23 = vsel %vm5702_vm2, %v5896_v5, 0.0  ;;  %v4782_v42 = vmul.f32 %v4718_v30, %v4718_v30 }
 0x4a0   : > { %v4401_v28 = vmul.f32 %v12275_v55, %v4333_v46  ;;  %v4532_v58 = vmin.f32 %v13614_v62, 20.0  ;;  %9262 = vrsqrt.f32 %v13559_v38  ;;  %v4719_v52 = vadd.f32 1.0, %v9249_v24  ;;  %5963 = vadd.xlane.f32.xlu1 %v5962_v23  ;;  %8492 = vmatprep.mubr.msk.f32.mxu1 %vm933_vm1, %v5098_v13  ;;  %v13649_v46 = vpop.f32.mrb[41].mxu1 }
 0x4a1   : > { %v5099_v16 = vmul.f32 %v5017_v10, %v13466_v51  ;;  %v5895_v49 = vmul.f32 %v13591_v57, %v13591_v57  ;;  %v5712_v36 = vsel %vm5702_vm2, %v13621_v0, 0.0  ;;  %v4910_v63 = vadd.f32 1.0, %v4782_v42 }
 0x4a2   : > { %v13628_v6 = vadd.f32 %v12288_v32, %v4401_v28  ;;  %v9251_v50 = vpop.eup %9250  ;;  %v4650_v19 = vmul.f32 1.442695, %v4532_v58  ;;  %v4783_v38 = vmul.f32 %v4719_v52, %v4719_v52  ;;  %v16327_v33 = vsub.f32 %v16289_v21, %v13355_v8 }
 0x4a3   : > { %v4720_v7 = vadd.f32 1.0, %v9251_v50  ;;  %v9253_v17 = vpop.eup %9252  ;;  %8493 = vmatmul.mubr.msk.f32.gmra.mrb[78].mxu1 %vm933_vm1, %v5099_v16  ;;  %v5959_v48 = vsel %vm5702_vm2, %v5895_v49, 0.0  ;;  %v7870_v39 = vadd.f32 -1.0, %v4780_v25  ;;  %v7871_v10 = vadd.f32 -1.0, %v13600_v44  ;;  %v16329_v44 = vld [vmem:[#allocation66_spill] sm:$0xff] }
 0x4a4   : > { %9264 = vpow2.f32 %v4650_v19  ;;  %v4533_v51 = vmin.f32 %v13628_v6, 20.0  ;;  %v4334_v45 = vmul.f32 %v13461_v20, %v16327_v33  ;;  %v9255_v12 = vpop.eup %9254  ;;  %v4911_v59 = vadd.f32 1.0, %v4783_v38  ;;  %5960 = vadd.xlane.f32.xlu0 %v5959_v48  ;;  %5713 = vadd.xlane.f32.xlu1 %v5712_v36  ;;  %v16328_v19 = vld [vmem:[#allocation60_spill] sm:$0xff] }
 0x4a5   : > { %9266 = vrcp.f32 %v4910_v63  ;;  %v4784_v5 = vmul.f32 %v4720_v7, %v4720_v7  ;;  %v4721_v37 = vadd.f32 1.0, %v9253_v17  ;;  %v4722_v30 = vadd.f32 1.0, %v9255_v12 }
 0x4a6   : > { %v4652_v28 = vmul.f32 1.442695, %v4533_v51  ;;  %v4402_v24 = vmul.f32 %v12275_v55, %v4334_v45  ;;  %9268 = vrcp.f32 %v4911_v59  ;;  %v5709_v21 = vsel %vm5702_vm2, %v13638_v1, 0.0 }
 0x4a7   : > { %v9257_v13 = vpop.eup %9256  ;;  %v4912_v8 = vadd.f32 1.0, %v4784_v5  ;;  %v4785_v25 = vmul.f32 %v4721_v37, %v4721_v37  ;;  %v13655_v58 = vmul.f32 %v4722_v30, %v4722_v30  ;;  %v16330_v49 = vsub.f32 %v16328_v19, %v16329_v44 }
 0x4a8   : > { %v9259_v20 = vpop.eup %9258  ;;  %v4723_v23 = vadd.f32 1.0, %v9257_v13  ;;  %9270 = vpow2.f32 %v4652_v28  ;;  %v13658_v16 = vadd.f32 %v12288_v32, %v4402_v24  ;;  %5710 = vadd.xlane.f32.xlu0 %v5709_v21  ;;  %v7872_v7 = vadd.f32 -1.0, %v4782_v42  ;;  %v16331_v21 = vld [vmem:[#allocation11_spill] sm:$0xff] }
 0x4a9   : > { %v9261_v52 = vpop.eup %9260  ;;  %v5019_v50 = vmul.f32 %v9259_v20, %v7870_v39  ;;  %9272 = vrcp.f32 %v4912_v8  ;;  %v4335_v36 = vmul.f32 %v13451_v35, %v16330_v49  ;;  %v7873_v17 = vadd.f32 -1.0, %v4783_v38  ;;  %v16332_v20 = vld [vmem:[#allocation8_spill] sm:$0xff] }
 0x4aa   : > { %v5021_v63 = vmul.f32 %v9261_v52, %v7871_v10  ;;  %v4913_v51 = vadd.f32 1.0, %v4785_v25  ;;  %v13664_v48 = vpop.eup %9262  ;;  %v4914_v45 = vadd.f32 1.0, %v13655_v58  ;;  %v13668_v12 = vmul.f32 %v4723_v23, %v4723_v23  ;;  %v13699_v19 = vpop.f32.mrb[42].mxu1 }
 0x4ab   : > { %v5100_v33 = vmul.f32 %v5019_v50, %v13494_v11  ;;  %v4534_v39 = vmin.f32 %v13658_v16, 20.0  ;;  %v4403_v37 = vmul.f32 %v12275_v55, %v4335_v36  ;;  %v5898_v35 = vmul.f32 %v13621_v0, %v13621_v0 }
 0x4ac   : > { %v5101_v59 = vmul.f32 %v5021_v63, %v13507_v34  ;;  %9274 = vrcp.f32 %v4913_v51  ;;  %v7874_v42 = vadd.f32 -1.0, %v4784_v5  ;;  %v4915_v11 = vadd.f32 1.0, %v13668_v12 }
 0x4ad   : > { %8495 = vmatprep.mubr.msk.f32.mxu1 %vm933_vm1, %v5100_v33  ;;  %9276 = vrcp.f32 %v4914_v45  ;;  %v4654_v38 = vmul.f32 1.442695, %v4534_v39  ;;  %v13679_v28 = vadd.f32 %v12288_v32, %v4403_v37  ;;  %v5968_v34 = vsel %vm5702_vm2, %v5898_v35, 0.0  ;;  %v13703_v33 = vpop.f32.mrb[43].mxu1  ;;  %v16335_v37 = vld [vmem:[#allocation18_spill] sm:$0xff] }
 0x4ae   : > { %v9265_v30 = vpop.eup %9264  ;;  %8496 = vmatmul.mubr.msk.f32.gmra.mrb[80].mxu1 %vm933_vm1, %v5101_v59  ;;  %v13684_v24 = vadd.f32 %v13544_v56, %v13574_v47  ;;  %v13688_v13 = vadd.f32 %v13547_v26, %v13574_v47  ;;  %9278 = vrcp.f32 %v4915_v11  ;;  %5969 = vadd.xlane.f32.xlu1 %v5968_v34  ;;  %v5897_v8 = vmul.f32 %v13638_v1, %v13638_v1  ;;  %v16334_v59 = vld [vmem:[#allocation59_spill] sm:$0xff] }
 0x4af   : > { %v9267_v5 = vpop.eup %9266  ;;  %v4724_v10 = vadd.f32 1.0, %v9265_v30  ;;  %v16333_v23 = vsub.f32 %v16331_v21, %v16332_v20  ;;  %9280 = vpow2.f32 %v4654_v38  ;;  %v4535_v56 = vmin.f32 %v13679_v28, 20.0 }
 0x4b0   : > { %v5023_v50 = vmul.f32 %v9267_v5, %v7872_v7  ;;  %v5718_v26 = vsel %vm5702_vm2, %v13684_v24, 0.0  ;;  %v9269_v44 = vpop.eup %9268  ;;  %v7875_v49 = vadd.f32 -1.0, %v4785_v25  ;;  %v5965_v63 = vsel %vm5702_vm2, %v5897_v8, 0.0 }
 0x4b1   : > { %v4336_v52 = vmul.f32 %v13510_v14, %v16333_v23  ;;  %v4788_v36 = vmul.f32 %v4724_v10, %v4724_v10  ;;  %v5025_v7 = vmul.f32 %v9269_v44, %v7873_v17  ;;  %v4656_v39 = vmul.f32 1.442695, %v4535_v56  ;;  %5966 = vadd.xlane.f32.xlu0 %v5965_v63 }
 0x4b2   : > { %v9271_v45 = vpop.eup %9270  ;;  %v5102_v14 = vmul.f32 %v5023_v50, %v13517_v53  ;;  %v16336_v35 = vsub.f32 %v16334_v59, %v16335_v37  ;;  %5719 = vadd.xlane.f32.xlu1 %v5718_v26  ;;  %v5715_v5 = vsel %vm5702_vm2, %v13688_v13, 0.0  ;;  %v5900_v21 = vmul.f32 %v13684_v24, %v13684_v24 }
 0x4b3   : > { %v4404_v51 = vmul.f32 %v12275_v55, %v4336_v52  ;;  %v9273_v38 = vpop.eup %9272  ;;  %v4916_v25 = vadd.f32 1.0, %v4788_v36  ;;  %v4725_v30 = vadd.f32 1.0, %v9271_v45  ;;  %v5103_v53 = vmul.f32 %v5025_v7, %v13522_v61 }
 0x4b4   : > { %v4337_v11 = vmul.f32 %v13488_v4, %v16336_v35  ;;  %8498 = vmatprep.mubr.msk.f32.mxu1 %vm933_vm1, %v5102_v14  ;;  %v5027_v17 = vmul.f32 %v9273_v38, %v7874_v42  ;;  %9282 = vpow2.f32 %v4656_v39  ;;  %v7876_v52 = vadd.f32 -1.0, %v13655_v58 }
 0x4b5   : > { %v13711_v34 = vadd.f32 %v12288_v32, %v4404_v51  ;;  %9284 = vrcp.f32 %v4916_v25  ;;  %v4789_v4 = vmul.f32 %v4725_v30, %v4725_v30  ;;  %8499 = vmatmul.mubr.msk.f32.gmra.mrb[82].mxu1 %vm933_vm1, %v5103_v53  ;;  %5716 = vadd.xlane.f32.xlu0 %v5715_v5  ;;  %v13729_v42 = vadd.f32 %v13640_v27, %v13574_v47  ;;  %v16340_v5 = vld [vmem:[#allocation68_spill] sm:$0xff] }
 0x4b6   : > { %v4405_v10 = vmul.f32 %v12275_v55, %v4337_v11  ;;  %v9275_v20 = vpop.eup %9274  ;;  %v5104_v23 = vmul.f32 %v5027_v17, %v13555_v9  ;;  %v7877_v26 = vadd.f32 -1.0, %v13668_v12  ;;  %v5974_v58 = vsel %vm5702_vm2, %v5900_v21, 0.0 }
 0x4b7   : > { %v4536_v8 = vmin.f32 %v13711_v34, 20.0  ;;  %v9277_v50 = vpop.eup %9276  ;;  %v5029_v56 = vmul.f32 %v9275_v20, %v7875_v49  ;;  %v4917_v44 = vadd.f32 1.0, %v4789_v4  ;;  %v13737_v45 = vadd.f32 %v13649_v46, %v13574_v47  ;;  %5975 = vadd.xlane.f32.xlu1 %v5974_v58  ;;  %v16337_v46 = vld [vmem:[#allocation42_spill] sm:$0xff] }
 0x4b8   : > { %v13725_v61 = vadd.f32 %v12288_v32, %v4405_v10  ;;  %8501 = vmatprep.mubr.msk.f32.mxu1 %vm933_vm1, %v5104_v23  ;;  %v5031_v51 = vmul.f32 %v9277_v50, %v7876_v52  ;;  %v9279_v14 = vpop.eup %9278  ;;  %v5899_v12 = vmul.f32 %v13688_v13, %v13688_v13  ;;  %v5724_v49 = vsel %vm5702_vm2, %v13729_v42, 0.0  ;;  %v8443_v23 = vpop.f32.mrb[44].mxu1 }
 0x4b9   : > { %v4658_v63 = vmul.f32 1.442695, %v4536_v8  ;;  %v5105_v27 = vmul.f32 %v5029_v56, %v13567_v15  ;;  %9286 = vrcp.f32 %v4917_v44  ;;  %v9281_v7 = vpop.eup %9280  ;;  %v5033_v59 = vmul.f32 %v9279_v14, %v7877_v26  ;;  %v5433_v26 = vpop.f32.mrb[45].mxu1 }
 0x4ba   : > { %v4537_v9 = vmin.f32 %v13725_v61, 20.0  ;;  %v5106_v39 = vmul.f32 %v5031_v51, %v13570_v22  ;;  %v4148_v35 = vsub.f32 %v16337_v46, %v13485_v60  ;;  %v4726_v15 = vadd.f32 1.0, %v9281_v7  ;;  %v16339_v22 = vld [vmem:[#allocation62_spill] sm:$0xff] }
 0x4bb   : > { %9288 = vpow2.f32 %v4658_v63  ;;  %8502 = vmatmul.mubr.msk.f32.gmra.mrb[84].mxu1 %vm933_vm1, %v5105_v27  ;;  %v5971_v11 = vsel %vm5702_vm2, %v5899_v12, 0.0  ;;  %v16338_v38 = vsub.f32 %v16303_v3, %v13436_v54  ;;  %v7878_v30 = vadd.f32 -1.0, %v4788_v36  ;;  %5725 = vadd.xlane.f32.xlu1 %v5724_v49 }
 0x4bc   : > { %v4660_v37 = vmul.f32 1.442695, %v4537_v9  ;;  %8504 = vmatprep.mubr.msk.f32.mxu1 %vm933_vm1, %v5106_v39  ;;  %5972 = vadd.xlane.f32.xlu0 %v5971_v11  ;;  %v16341_v53 = vsub.f32 %v16339_v22, %v16340_v5  ;;  %v5902_v17 = vmul.f32 %v13729_v42, %v13729_v42  ;;  %v5107_v10 = vmul.f32 %v5033_v59, %v13580_v18 }
 0x4bd   : > { %v4338_v25 = vmul.f32 %v13549_v29, %v16338_v38  ;;  %v13761_v8 = vmul.f32 %v4726_v15, %v4726_v15  ;;  %v5721_v3 = vsel %vm5702_vm2, %v13737_v45, 0.0  ;;  %v7879_v36 = vadd.f32 -1.0, %v4789_v4 }
 0x4be   : > { %9290 = vpow2.f32 %v4660_v37  ;;  %v4339_v60 = vmul.f32 %v13528_v40, %v16341_v53  ;;  %v9283_v29 = vpop.eup %9282  ;;  %v13769_v40 = vadd.f32 %v13699_v19, %v13574_v47  ;;  %v4340_v20 = vmul.f32 %v13664_v48, %v4148_v35 }
 0x4bf   : > { %v4406_v54 = vmul.f32 %v12275_v55, %v4338_v25  ;;  %v9285_v18 = vpop.eup %9284  ;;  %8505 = vmatmul.mubr.msk.f32.gmra.mrb[86].mxu1 %vm933_vm1, %v5107_v10  ;;  %v4918_v52 = vadd.f32 1.0, %v13761_v8  ;;  %v4727_v50 = vadd.f32 1.0, %v9283_v29  ;;  %v5901_v4 = vmul.f32 %v13737_v45, %v13737_v45 }
 0x4c0   : > { %v4407_v21 = vmul.f32 %v12275_v55, %v4339_v60  ;;  %v5035_v44 = vmul.f32 %v9285_v18, %v7878_v30  ;;  %5722 = vadd.xlane.f32.xlu0 %v5721_v3  ;;  %v5980_v48 = vsel %vm5702_vm2, %v5902_v17, 0.0  ;;  %v13785_v63 = vadd.f32 %v13703_v33, %v13574_v47 }
 0x4c1   : > { %v13775_v56 = vadd.f32 %v12288_v32, %v4406_v54  ;;  %9292 = vrcp.f32 %v4918_v52  ;;  %v4791_v51 = vmul.f32 %v4727_v50, %v4727_v50  ;;  %5981 = vadd.xlane.f32.xlu1 %v5980_v48  ;;  %v4408_v58 = vmul.f32 %v12275_v55, %v4340_v20 }
 0x4c2   : > { %v13780_v19 = vadd.f32 %v12288_v32, %v4407_v21  ;;  %v5108_v14 = vmul.f32 %v5035_v44, %v13614_v62  ;;  %v5730_v12 = vsel %vm5702_vm2, %v13769_v40, 0.0  ;;  %v16342_v49 = vsub.f32 %v16310_v2, %v13468_v41 }
 0x4c3   : > { %v4538_v9 = vmin.f32 %v13775_v56, 20.0  ;;  %v9287_v7 = vpop.eup %9286  ;;  %v4919_v39 = vadd.f32 1.0, %v4791_v51  ;;  %v5977_v37 = vsel %vm5702_vm2, %v5901_v4, 0.0  ;;  %v13799_v46 = vadd.f32 %v12288_v32, %v4408_v58 }
 0x4c4   : > { %v4539_v27 = vmin.f32 %v13780_v19, 20.0  ;;  %v4341_v33 = vmul.f32 %v13598_v43, %v16342_v49  ;;  %8507 = vmatprep.mubr.msk.f32.mxu1 %vm933_vm1, %v5108_v14  ;;  %v5037_v62 = vmul.f32 %v9287_v7, %v7879_v36  ;;  %5978 = vadd.xlane.f32.xlu0 %v5977_v37  ;;  %v5904_v41 = vmul.f32 %v13769_v40, %v13769_v40 }
 0x4c5   : > { %v4662_v59 = vmul.f32 1.442695, %v4538_v9  ;;  %v9289_v35 = vpop.eup %9288  ;;  %9294 = vrcp.f32 %v4919_v39  ;;  %5731 = vadd.xlane.f32.xlu1 %v5730_v12  ;;  %v4540_v43 = vmin.f32 %v13799_v46, 20.0  ;;  %v5727_v38 = vsel %vm5702_vm2, %v13785_v63, 0.0 }
 0x4c6   : > { %v4664_v15 = vmul.f32 1.442695, %v4539_v27  ;;  %v4409_v11 = vmul.f32 %v12275_v55, %v4341_v33  ;;  %v4728_v2 = vadd.f32 1.0, %v9289_v35  ;;  %v5109_v30 = vmul.f32 %v5037_v62, %v13628_v6  ;;  %v8446_v52 = vpop.f32.mrb[46].mxu1 }
 0x4c7   : > { %9296 = vpow2.f32 %v4662_v59  ;;  %v13813_v55 = vadd.f32 %v8443_v23, %v13574_v47  ;;  %v4666_v60 = vmul.f32 1.442695, %v4540_v43  ;;  %v5986_v10 = vsel %vm5702_vm2, %v5904_v41, 0.0 }
 0x4c8   : > { %v9291_v25 = vpop.eup %9290  ;;  %v13810_v22 = vadd.f32 %v12288_v32, %v4409_v11  ;;  %v4792_v5 = vmul.f32 %v4728_v2, %v4728_v2  ;;  %9298 = vpow2.f32 %v4664_v15  ;;  %8508 = vmatmul.mubr.msk.f32.gmra.mrb[88].mxu1 %vm933_vm1, %v5109_v30  ;;  %5728 = vadd.xlane.f32.xlu0 %v5727_v38  ;;  %v5903_v6 = vmul.f32 %v13785_v63, %v13785_v63 }
 0x4c9   : > { %v4729_v53 = vadd.f32 1.0, %v9291_v25  ;;  %9300 = vpow2.f32 %v4666_v60  ;;  %5987 = vadd.xlane.f32.xlu1 %v5986_v10  ;;  %v13821_v3 = vadd.f32 %v5433_v26, %v13574_v47  ;;  %v7880_v29 = vadd.f32 -1.0, %v13761_v8  ;;  %v5443_v26 = vpop.f32.mrb[47].mxu1 }
 0x4ca   : > { %v4541_v17 = vmin.f32 %v13810_v22, 20.0  ;;  %v4920_v54 = vadd.f32 1.0, %v4792_v5  ;;  %v5736_v21 = vsel %vm5702_vm2, %v13813_v55, 0.0  ;;  %v5983_v18 = vsel %vm5702_vm2, %v5903_v6, 0.0 }
 0x4cb   : > { %v4793_v32 = vmul.f32 %v4729_v53, %v4729_v53  ;;  %v9293_v20 = vpop.eup %9292  ;;  %v5906_v4 = vmul.f32 %v13813_v55, %v13813_v55  ;;  %v5733_v8 = vsel %vm5702_vm2, %v13821_v3, 0.0  ;;  %v7881_v48 = vadd.f32 -1.0, %v4791_v51 }
 0x4cc   : > { %v4668_v36 = vmul.f32 1.442695, %v4541_v17  ;;  %9302 = vrcp.f32 %v4920_v54  ;;  %v5039_v50 = vmul.f32 %v9293_v20, %v7880_v29  ;;  %5984 = vadd.xlane.f32.xlu0 %v5983_v18  ;;  %v13833_v9 = vadd.f32 %v8446_v52, %v13574_v47 }
 0x4cd   : > { %v4921_v23 = vadd.f32 1.0, %v4793_v32  ;;  %5737 = vadd.xlane.f32.xlu1 %v5736_v21  ;;  %v5905_v14 = vmul.f32 %v13821_v3, %v13821_v3  ;;  %v5992_v49 = vsel %vm5702_vm2, %v5906_v4, 0.0  ;;  %v7882_v15 = vadd.f32 -1.0, %v4792_v5 }
 0x4ce   : > { %9304 = vpow2.f32 %v4668_v36  ;;  %v5110_v44 = vmul.f32 %v5039_v50, %v13658_v16  ;;  %v13840_v16 = vadd.f32 %v5443_v26, %v13574_v47  ;;  %v5742_v59 = vsel %vm5702_vm2, %v13833_v9, 0.0 }
 0x4cf   : > { %9306 = vrcp.f32 %v4921_v23  ;;  %v9295_v58 = vpop.eup %9294  ;;  %v5989_v62 = vsel %vm5702_vm2, %v5905_v14, 0.0  ;;  %v5908_v2 = vmul.f32 %v13833_v9, %v13833_v9  ;;  %v7883_v53 = vadd.f32 -1.0, %v4793_v32 }
 0x4d0   : > { %8510 = vmatprep.mubr.msk.f32.mxu1 %vm933_vm1, %v5110_v44  ;;  %v5041_v12 = vmul.f32 %v9295_v58, %v7881_v48  ;;  %5734 = vadd.xlane.f32.xlu0 %v5733_v8  ;;  %v5907_v6 = vmul.f32 %v13840_v16, %v13840_v16 }
 0x4d1   : > { %v9297_v27 = vpop.eup %9296  ;;  %5993 = vadd.xlane.f32.xlu1 %v5992_v49  ;;  %v5998_v36 = vsel %vm5702_vm2, %v5908_v2, 0.0 }
 0x4d2   : > { %v9299_v33 = vpop.eup %9298  ;;  %v4730_v7 = vadd.f32 1.0, %v9297_v27  ;;  %v5111_v51 = vmul.f32 %v5041_v12, %v13679_v28  ;;  %v5739_v28 = vsel %vm5702_vm2, %v13840_v16, 0.0  ;;  %v5995_v18 = vsel %vm5702_vm2, %v5907_v6, 0.0 }
 0x4d3   : > { %v4731_v39 = vadd.f32 1.0, %v9299_v33  ;;  %v9301_v37 = vpop.eup %9300 }
 0x4d4   : > { %v4794_v35 = vmul.f32 %v4730_v7, %v4730_v7  ;;  %8511 = vmatmul.mubr.msk.f32.gmra.mrb[90].mxu1 %vm933_vm1, %v5111_v51  ;;  %v4732_v41 = vadd.f32 1.0, %v9301_v37  ;;  %5990 = vadd.xlane.f32.xlu0 %v5989_v62 }
 0x4d5   : > { %v4795_v11 = vmul.f32 %v4731_v39, %v4731_v39  ;;  %5743 = vadd.xlane.f32.xlu1 %v5742_v59 }
 0x4d6   : > { %v9303_v43 = vpop.eup %9302  ;;  %v4922_v38 = vadd.f32 1.0, %v4794_v35  ;;  %v4796_v17 = vmul.f32 %v4732_v41, %v4732_v41  ;;  %v7884_v52 = vadd.f32 -1.0, %v4794_v35 }
 0x4d7   : > { %v5043_v30 = vmul.f32 %v9303_v43, %v7882_v15  ;;  %v4923_v60 = vadd.f32 1.0, %v4795_v11  ;;  %v7885_v8 = vadd.f32 -1.0, %v4795_v11 }
 0x4d8   : > { %v9305_v25 = vpop.eup %9304  ;;  %9308 = vrcp.f32 %v4922_v38  ;;  %5740 = vadd.xlane.f32.xlu0 %v5739_v28  ;;  %v4924_v21 = vadd.f32 1.0, %v4796_v17  ;;  %v7886_v7 = vadd.f32 -1.0, %v4796_v17 }
 0x4d9   : > { %v9307_v10 = vpop.eup %9306  ;;  %v4733_v5 = vadd.f32 1.0, %v9305_v25  ;;  %v5112_v54 = vmul.f32 %v5043_v30, %v13711_v34  ;;  %9310 = vrcp.f32 %v4923_v60  ;;  %5999 = vadd.xlane.f32.xlu1 %v5998_v36 }
 0x4da   : > { %v5045_v29 = vmul.f32 %v9307_v10, %v7883_v53  ;;  %9312 = vrcp.f32 %v4924_v21  ;;  %v8449_v34 = vpop.f32.mrb[48].mxu1 }
 0x4db   : > { %v4797_v20 = vmul.f32 %v4733_v5, %v4733_v5  ;;  %8513 = vmatprep.mubr.msk.f32.mxu1 %vm933_vm1, %v5112_v54  ;;  %v13860_v50 = vadd.f32 %v8449_v34, %v13574_v47  ;;  %v5453_v4 = vpop.f32.mrb[49].mxu1 }
 0x4dc   : > { %v5113_v32 = vmul.f32 %v5045_v29, %v13725_v61  ;;  %5996 = vadd.xlane.f32.xlu0 %v5995_v18  ;;  %v13863_v44 = vadd.f32 %v5453_v4, %v13574_v47 }
 0x4dd   : > { %v4925_v23 = vadd.f32 1.0, %v4797_v20  ;;  %v5748_v58 = vsel %vm5702_vm2, %v13860_v50, 0.0  ;;  %v5910_v14 = vmul.f32 %v13860_v50, %v13860_v50  ;;  %v7887_v37 = vadd.f32 -1.0, %v4797_v20 }
 0x4de   : > { %8514 = vmatmul.mubr.msk.f32.gmra.mrb[92].mxu1 %vm933_vm1, %v5113_v32  ;;  %5749 = vadd.xlane.f32.xlu1 %v5748_v58  ;;  %v5745_v12 = vsel %vm5702_vm2, %v13863_v44, 0.0  ;;  %v5909_v49 = vmul.f32 %v13863_v44, %v13863_v44 }
 0x4df   : > { %9314 = vrcp.f32 %v4925_v23  ;;  %v6004_v35 = vsel %vm5702_vm2, %v5910_v14, 0.0 }
 0x4e0   : > { %5746 = vadd.xlane.f32.xlu0 %v5745_v12  ;;  %v6001_v41 = vsel %vm5702_vm2, %v5909_v49, 0.0 }
 0x4e1   : > { %v8452_v62 = vpop.f32.mrb[50].mxu1 }
 0x4e2   : > { %v9309_v26 = vpop.eup %9308  ;;  %6005 = vadd.xlane.f32.xlu1 %v6004_v35  ;;  %v13879_v11 = vadd.f32 %v8452_v62, %v13574_v47 }
 0x4e3   : > { %v9311_v61 = vpop.eup %9310  ;;  %v5047_v48 = vmul.f32 %v9309_v26, %v7884_v52 }
 0x4e4   : > { %v5049_v27 = vmul.f32 %v9311_v61, %v7885_v8  ;;  %v9313_v51 = vpop.eup %9312  ;;  %6002 = vadd.xlane.f32.xlu0 %v6001_v41  ;;  %v5754_v38 = vsel %vm5702_vm2, %v13879_v11, 0.0  ;;  %v5912_v30 = vmul.f32 %v13879_v11, %v13879_v11 }
 0x4e5   : > { %v5114_v33 = vmul.f32 %v5047_v48, %v13775_v56  ;;  %v5051_v59 = vmul.f32 %v9313_v51, %v7886_v7  ;;  %v5463_v56 = vpop.f32.mrb[51].mxu1 }
 0x4e6   : > { %v5115_v39 = vmul.f32 %v5049_v27, %v13780_v19  ;;  %v13884_v43 = vadd.f32 %v5463_v56, %v13574_v47  ;;  %5755 = vadd.xlane.f32.xlu1 %v5754_v38  ;;  %v6010_v53 = vsel %vm5702_vm2, %v5912_v30, 0.0 }
 0x4e7   : > { %8516 = vmatprep.mubr.msk.f32.mxu1 %vm933_vm1, %v5114_v33  ;;  %v5116_v2 = vmul.f32 %v5051_v59, %v13799_v46 }
 0x4e8   : > { %8517 = vmatmul.mubr.msk.f32.gmra.mrb[94].mxu1 %vm933_vm1, %v5115_v39  ;;  %v5751_v25 = vsel %vm5702_vm2, %v13884_v43, 0.0  ;;  %v5911_v46 = vmul.f32 %v13884_v43, %v13884_v43 }
 0x4e9   : > { %v9315_v15 = vpop.eup %9314  ;;  %8519 = vmatprep.mubr.msk.f32.mxu1 %vm933_vm1, %v5116_v2  ;;  %5752 = vadd.xlane.f32.xlu0 %v5751_v25 }
 0x4ea   : > { %v5053_v19 = vmul.f32 %v9315_v15, %v7887_v37  ;;  %6011 = vadd.xlane.f32.xlu1 %v6010_v53  ;;  %v8455_v60 = vpop.f32.mrb[52].mxu1  ;;  %v6007_v17 = vsel %vm5702_vm2, %v5911_v46, 0.0 }
 0x4eb   : > { %v5473_v10 = vpop.f32.mrb[53].mxu1 }
 0x4ec   : > { %v5117_v28 = vmul.f32 %v5053_v19, %v13810_v22  ;;  %v13900_v22 = vadd.f32 %v8455_v60, %v13574_v47  ;;  %v13903_v5 = vadd.f32 %v5473_v10, %v13574_v47 }
 0x4ed   : > { %6008 = vadd.xlane.f32.xlu0 %v6007_v17 }
 0x4ee   : > { %8520 = vmatmul.mubr.msk.f32.gmra.mrb[96].mxu1 %vm933_vm1, %v5117_v28  ;;  %v5760_v6 = vsel %vm5702_vm2, %v13900_v22, 0.0  ;;  %v5914_v54 = vmul.f32 %v13900_v22, %v13900_v22  ;;  %v5757_v29 = vsel %vm5702_vm2, %v13903_v5, 0.0  ;;  %v5913_v36 = vmul.f32 %v13903_v5, %v13903_v5 }
 0x4ef   : > { %5761 = vadd.xlane.f32.xlu1 %v5760_v6 }
 0x4f0   : > { %v6016_v21 = vsel %vm5702_vm2, %v5914_v54, 0.0  ;;  %v6013_v18 = vsel %vm5702_vm2, %v5913_v36, 0.0 }
 0x4f1   : > { %5758 = vadd.xlane.f32.xlu0 %v5757_v29  ;;  %v8458_v20 = vpop.f32.mrb[54].mxu1 }
 0x4f2   : > { %v13915_v32 = vadd.f32 %v8458_v20, %v13574_v47  ;;  %v5483_v23 = vpop.f32.mrb[55].mxu1 }
 0x4f3   : > { %6017 = vadd.xlane.f32.xlu1 %v6016_v21  ;;  %v13919_v34 = vadd.f32 %v5483_v23, %v13574_v47 }
 0x4f4   : > { %v5766_v52 = vsel %vm5702_vm2, %v13915_v32, 0.0  ;;  %v5916_v26 = vmul.f32 %v13915_v32, %v13915_v32 }
 0x4f5   : > { %6014 = vadd.xlane.f32.xlu0 %v6013_v18  ;;  %v5763_v4 = vsel %vm5702_vm2, %v13919_v34, 0.0  ;;  %v5915_v8 = vmul.f32 %v13919_v34, %v13919_v34 }
 0x4f6   : > { %v6022_v61 = vsel %vm5702_vm2, %v5916_v26, 0.0 }
 0x4f7   : > { %5767 = vadd.xlane.f32.xlu1 %v5766_v52  ;;  %v6019_v48 = vsel %vm5702_vm2, %v5915_v8, 0.0 }
 0x4f9   : > { %5764 = vadd.xlane.f32.xlu0 %v5763_v4 }
 0x4fb   : > { %6023 = vadd.xlane.f32.xlu1 %v6022_v61 }
 0x4fd   : > { %6020 = vadd.xlane.f32.xlu0 %v6019_v48  ;;  %v8461_v58 = vpop.f32.mrb[56].mxu1 }
 0x4fe   : > { %v13932_v14 = vadd.f32 %v8461_v58, %v13574_v47  ;;  %v5493_v27 = vpop.f32.mrb[57].mxu1 }
 0x4ff   : > { %v13935_v12 = vadd.f32 %v5493_v27, %v13574_v47 }
 0x500   : > { %v5772_v49 = vsel %vm5702_vm2, %v13932_v14, 0.0  ;;  %v5918_v33 = vmul.f32 %v13932_v14, %v13932_v14 }
 0x501   : > { %5773 = vadd.xlane.f32.xlu1 %v5772_v49  ;;  %v5769_v7 = vsel %vm5702_vm2, %v13935_v12, 0.0  ;;  %v5917_v51 = vmul.f32 %v13935_v12, %v13935_v12 }
 0x502   : > { %5770 = vadd.xlane.f32.xlu0 %v5769_v7  ;;  %v6028_v39 = vsel %vm5702_vm2, %v5918_v33, 0.0 }
 0x503   : > { %v6025_v59 = vsel %vm5702_vm2, %v5917_v51, 0.0 }
 0x505   : > { %6029 = vadd.xlane.f32.xlu1 %v6028_v39 }
 0x506   : > { %6026 = vadd.xlane.f32.xlu0 %v6025_v59 }
 0x50c   : > { %v8464_v37 = vpop.f32.mrb[58].mxu1 }
 0x50d   : > { %v13948_v35 = vadd.f32 %v8464_v37, %v13574_v47  ;;  %v5503_v62 = vpop.f32.mrb[59].mxu1 }
 0x50e   : > { %v13951_v15 = vadd.f32 %v5503_v62, %v13574_v47 }
 0x50f   : > { %v5778_v56 = vsel %vm5702_vm2, %v13948_v35, 0.0  ;;  %v5920_v41 = vmul.f32 %v13948_v35, %v13948_v35 }
 0x510   : > { %5779 = vadd.xlane.f32.xlu1 %v5778_v56  ;;  %v5775_v2 = vsel %vm5702_vm2, %v13951_v15, 0.0  ;;  %v5919_v19 = vmul.f32 %v13951_v15, %v13951_v15 }
 0x511   : > { %5776 = vadd.xlane.f32.xlu0 %v5775_v2  ;;  %v6034_v38 = vsel %vm5702_vm2, %v5920_v41, 0.0 }
 0x512   : > { %v6031_v25 = vsel %vm5702_vm2, %v5919_v19, 0.0 }
 0x514   : > { %6035 = vadd.xlane.f32.xlu1 %v6034_v38  ;;  %v8467_v28 = vpop.f32.mrb[60].mxu1 }
 0x515   : > { %v13964_v30 = vadd.f32 %v8467_v28, %v13574_v47  ;;  %v5513_v46 = vpop.f32.mrb[61].mxu1  ;;  %6032 = vadd.xlane.f32.xlu0 %v6031_v25 }
 0x516   : > { %v13967_v53 = vadd.f32 %v5513_v46, %v13574_v47 }
 0x517   : > { %v5784_v60 = vsel %vm5702_vm2, %v13964_v30, 0.0  ;;  %v5922_v17 = vmul.f32 %v13964_v30, %v13964_v30 }
 0x518   : > { %5785 = vadd.xlane.f32.xlu1 %v5784_v60  ;;  %v5781_v10 = vsel %vm5702_vm2, %v13967_v53, 0.0  ;;  %v5921_v6 = vmul.f32 %v13967_v53, %v13967_v53 }
 0x519   : > { %5782 = vadd.xlane.f32.xlu0 %v5781_v10  ;;  %v6040_v54 = vsel %vm5702_vm2, %v5922_v17, 0.0 }
 0x51a   : > { %v6037_v36 = vsel %vm5702_vm2, %v5921_v6, 0.0 }
 0x51c   : > { %6041 = vadd.xlane.f32.xlu1 %v6040_v54  ;;  %v8470_v29 = vpop.f32.mrb[62].mxu1 }
 0x51d   : > { %v13980_v21 = vadd.f32 %v8470_v29, %v13574_v47  ;;  %v5523_v20 = vpop.f32.mrb[63].mxu1  ;;  %6038 = vadd.xlane.f32.xlu0 %v6037_v36 }
 0x51e   : > { %v13983_v23 = vadd.f32 %v5523_v20, %v13574_v47 }
 0x51f   : > { %v5790_v18 = vsel %vm5702_vm2, %v13980_v21, 0.0  ;;  %v5924_v52 = vmul.f32 %v13980_v21, %v13980_v21 }
 0x520   : > { %16343 = vst [vmem:[#allocation69_spill] sm:$0xff] %v13983_v23  ;;  %5791 = vadd.xlane.f32.xlu1 %v5790_v18  ;;  %v5787_v4 = vsel %vm5702_vm2, %v13983_v23, 0.0  ;;  %v5923_v26 = vmul.f32 %v13983_v23, %v13983_v23 }
 0x521   : > { %5788 = vadd.xlane.f32.xlu0 %v5787_v4  ;;  %v6046_v8 = vsel %vm5702_vm2, %v5924_v52, 0.0 }
 0x522   : > { %v6043_v61 = vsel %vm5702_vm2, %v5923_v26, 0.0 }
 0x524   : > { %6047 = vadd.xlane.f32.xlu1 %v6046_v8 }
 0x525   : > { %6044 = vadd.xlane.f32.xlu0 %v6043_v61 }
 0x527   : > { %v5708_v48 = vpop.xlane.xlu1 %5707 }
 0x528   : > { %v13995_v58 = vmul.f32 0.125, %v5708_v48 }
 0x529   : > { %v5705_v27 = vpop.xlane.xlu0 %5704  ;;  %v8473_v7 = vpop.f32.mrb[64].mxu1 }
 0x52a   : > { %v13997_v49 = vmul.f32 0.125, %v5705_v27  ;;  %v6280_v51 = vmul.f32 %v13995_v58, %v13995_v58  ;;  %v14002_v59 = vadd.f32 %v8473_v7, %v13574_v47  ;;  %v5533_v37 = vpop.f32.mrb[65].mxu1 }
 0x52b   : > { %v14005_v62 = vadd.f32 %v5533_v37, %v13574_v47 }
 0x52c   : > { %16344 = vst [vmem:[#allocation71_spill] sm:$0xff] %v14002_v59  ;;  %v5796_v41 = vsel %vm5702_vm2, %v14002_v59, 0.0  ;;  %v5926_v2 = vmul.f32 %v14002_v59, %v14002_v59  ;;  %v6279_v19 = vmul.f32 %v13997_v49, %v13997_v49 }
 0x52d   : > { %v5964_v33 = vpop.xlane.xlu1 %5963  ;;  %16345 = vst [vmem:[#allocation40_spill] sm:$0xff] %v14005_v62  ;;  %5797 = vadd.xlane.f32.xlu1 %v5796_v41  ;;  %v5793_v28 = vsel %vm5702_vm2, %v14005_v62, 0.0  ;;  %v5925_v25 = vmul.f32 %v14005_v62, %v14005_v62 }
 0x52e   : > { %v6216_v39 = vmul.f32 0.125, %v5964_v33  ;;  %5794 = vadd.xlane.f32.xlu0 %v5793_v28  ;;  %v6052_v6 = vsel %vm5702_vm2, %v5926_v2, 0.0  ;;  %v16348_v28 = vld [vmem:[#allocation30_spill] sm:$0xff] }
 0x52f   : > { %v6049_v29 = vsel %vm5702_vm2, %v5925_v25, 0.0 }
 0x530   : > { %v6344_v56 = vsub.f32 %v6216_v39, %v6280_v51 }
 0x531   : > { %v5961_v38 = vpop.xlane.xlu0 %5960  ;;  %v5714_v54 = vpop.xlane.xlu1 %5713  ;;  %6053 = vadd.xlane.f32.xlu1 %v6052_v6 }
 0x532   : > { %v6408_v46 = vmax.f32 %v6344_v56, 0.0  ;;  %v6215_v60 = vmul.f32 0.125, %v5961_v38  ;;  %6050 = vadd.xlane.f32.xlu0 %v6049_v29  ;;  %v14019_v18 = vmul.f32 0.125, %v5714_v54  ;;  %v9701_v38 = vld [vmem:[%s15562_s6] sm:$0x7]  ;;  %v16349_v29 = vld [vmem:[#allocation31_spill] sm:$0xff] }
 0x533   : > { %v14045_v25 = vrot.slane %v9701_v38, %v16348_v28 }
 0x534   : > { %v6536_v17 = vadd.f32 1e-05, %v6408_v46  ;;  %v6343_v10 = vsub.f32 %v6215_v60, %v6279_v19  ;;  %v8476_v4 = vpop.f32.mrb[66].mxu1  ;;  %v6282_v51 = vmul.f32 %v14019_v18, %v14019_v18  ;;  %v6472_v19 = vsub.f32 %v13584_v31, %v13995_v58 }
 0x535   : > { %v5711_v52 = vpop.xlane.xlu0 %5710  ;;  %v14022_v26 = vadd.f32 %v8476_v4, %v13574_v47  ;;  %v5543_v8 = vpop.f32.mrb[67].mxu1 }
 0x536   : > { %9316 = vrsqrt.f32 %v6536_v17  ;;  %v6407_v36 = vmax.f32 %v6343_v10, 0.0  ;;  %v14025_v61 = vadd.f32 %v5543_v8, %v13574_v47  ;;  %v14027_v48 = vmul.f32 0.125, %v5711_v52 }
 0x537   : > { %16346 = vst [vmem:[#allocation3_spill] sm:$0xff] %v14022_v26  ;;  %v5802_v33 = vsel %vm5702_vm2, %v14022_v26, 0.0  ;;  %v5928_v7 = vmul.f32 %v14022_v26, %v14022_v26 }
 0x538   : > { %v6535_v20 = vadd.f32 1e-05, %v6407_v36  ;;  %16347 = vst [vmem:[#allocation38_spill] sm:$0xff] %v14025_v61  ;;  %5803 = vadd.xlane.f32.xlu1 %v5802_v33  ;;  %v5799_v37 = vsel %vm5702_vm2, %v14025_v61, 0.0  ;;  %v5927_v56 = vmul.f32 %v14025_v61, %v14025_v61  ;;  %v6281_v46 = vmul.f32 %v14027_v48, %v14027_v48 }
 0x539   : > { %5800 = vadd.xlane.f32.xlu0 %v5799_v37  ;;  %v6058_v6 = vsel %vm5702_vm2, %v5928_v7, 0.0  ;;  %v14051_v36 = vrot.slane %v9701_v38, %v16349_v29  ;;  %v6471_v7 = vsub.f32 %v13591_v57, %v13997_v49 }
 0x53a   : > { %9318 = vrsqrt.f32 %v6535_v20  ;;  %v6055_v31 = vsel %vm5702_vm2, %v5927_v56, 0.0 }
 0x53b   : > { %v5970_v27 = vpop.xlane.xlu1 %5969 }
 0x53c   : > { %v6218_v39 = vmul.f32 0.125, %v5970_v27  ;;  %6059 = vadd.xlane.f32.xlu1 %v6058_v6 }
 0x53d   : > { %6056 = vadd.xlane.f32.xlu0 %v6055_v31 }
 0x53e   : > { %v6346_v41 = vsub.f32 %v6218_v39, %v6282_v51  ;;  %v5967_v2 = vpop.xlane.xlu0 %5966 }
 0x53f   : > { %v6217_v60 = vmul.f32 0.125, %v5967_v2  ;;  %v5720_v17 = vpop.xlane.xlu1 %5719 }
 0x540   : > { %v9317_v10 = vpop.eup %9316  ;;  %v6410_v54 = vmax.f32 %v6346_v41, 0.0  ;;  %v8479_v52 = vpop.f32.mrb[68].mxu1  ;;  %v14063_v56 = vmul.f32 0.125, %v5720_v17 }
 0x541   : > { %v6664_v58 = vmul.f32 %v9317_v10, %v6472_v19  ;;  %v6345_v20 = vsub.f32 %v6217_v60, %v6281_v46  ;;  %v14055_v27 = vadd.f32 %v8479_v52, %v13574_v47  ;;  %v5553_v33 = vpop.f32.mrb[69].mxu1 }
 0x542   : > { %v6538_v4 = vadd.f32 1e-05, %v6410_v54  ;;  %v5717_v8 = vpop.xlane.xlu0 %5716  ;;  %v14061_v41 = vadd.f32 %v5553_v33, %v13574_v47  ;;  %v6284_v54 = vmul.f32 %v14063_v56, %v14063_v56 }
 0x543   : > { %16350 = vst [vmem:[#allocation20_spill] sm:$0xff] %v14055_v27  ;;  %v6732_v51 = vmul.f32 %v14045_v25, %v6664_v58  ;;  %v6409_v39 = vmax.f32 %v6345_v20, 0.0  ;;  %v14065_v2 = vmul.f32 0.125, %v5717_v8  ;;  %v5808_v19 = vsel %vm5702_vm2, %v14055_v27, 0.0 }
 0x544   : > { %v9319_v37 = vpop.eup %9318  ;;  %16351 = vst [vmem:[#allocation48_spill] sm:$0xff] %v14061_v41  ;;  %9320 = vrsqrt.f32 %v6538_v4  ;;  %v5930_v38 = vmul.f32 %v14055_v27, %v14055_v27  ;;  %v5976_v28 = vpop.xlane.xlu1 %5975  ;;  %5809 = vadd.xlane.f32.xlu1 %v5808_v19  ;;  %v5805_v46 = vsel %vm5702_vm2, %v14061_v41, 0.0  ;;  %v5929_v60 = vmul.f32 %v14061_v41, %v14061_v41 }
 0x545   : > { %v14072_v57 = vadd.f32 %v14051_v36, %v6732_v51  ;;  %v6663_v49 = vmul.f32 %v9319_v37, %v6471_v7  ;;  %v6537_v17 = vadd.f32 1e-05, %v6409_v39  ;;  %5806 = vadd.xlane.f32.xlu0 %v5805_v46  ;;  %v6283_v29 = vmul.f32 %v14065_v2, %v14065_v2 }
 0x546   : > { %v6220_v31 = vmul.f32 0.125, %v5976_v28  ;;  %v6064_v20 = vsel %vm5702_vm2, %v5930_v38, 0.0  ;;  %v6061_v7 = vsel %vm5702_vm2, %v5929_v60, 0.0  ;;  %v6474_v46 = vsub.f32 %v13621_v0, %v14019_v18 }
 0x547   : > { %v6864_v10 = vmin.f32 %v14072_v57, 20.0  ;;  %v6731_v6 = vmul.f32 %v14045_v25, %v6663_v49  ;;  %9322 = vrsqrt.f32 %v6537_v17 }
 0x548   : > { %v5726_v33 = vpop.xlane.xlu1 %5725  ;;  %6065 = vadd.xlane.f32.xlu1 %v6064_v20  ;;  %v6348_v51 = vsub.f32 %v6220_v31, %v6284_v54  ;;  %v6473_v54 = vsub.f32 %v13638_v1, %v14027_v48 }
 0x549   : > { %v5973_v58 = vpop.xlane.xlu0 %5972  ;;  %v6929_v52 = vmul.f32 1.442695, %v6864_v10  ;;  %v14086_v4 = vadd.f32 %v14051_v36, %v6731_v6  ;;  %6062 = vadd.xlane.f32.xlu0 %v6061_v7  ;;  %v14090_v49 = vmul.f32 0.125, %v5726_v33 }
 0x54a   : > { %v6219_v8 = vmul.f32 0.125, %v5973_v58  ;;  %v6412_v19 = vmax.f32 %v6348_v51, 0.0 }
 0x54b   : > { %9324 = vpow2.f32 %v6929_v52  ;;  %v6863_v39 = vmin.f32 %v14086_v4, 20.0  ;;  %v6286_v18 = vmul.f32 %v14090_v49, %v14090_v49 }
 0x54c   : > { %v6347_v37 = vsub.f32 %v6219_v8, %v6283_v29  ;;  %v8482_v60 = vpop.f32.mrb[70].mxu1  ;;  %v6540_v31 = vadd.f32 1e-05, %v6412_v19 }
 0x54d   : > { %v5723_v28 = vpop.xlane.xlu0 %5722  ;;  %v6927_v38 = vmul.f32 1.442695, %v6863_v39  ;;  %v14099_v29 = vadd.f32 %v8482_v60, %v13574_v47  ;;  %v5563_v52 = vpop.f32.mrb[71].mxu1  ;;  %v6476_v60 = vsub.f32 %v13684_v24, %v14063_v56 }
 0x54e   : > { %v6411_v17 = vmax.f32 %v6347_v37, 0.0  ;;  %v14094_v10 = vmul.f32 0.125, %v5723_v28  ;;  %v5982_v6 = vpop.xlane.xlu1 %5981  ;;  %v9321_v58 = vpop.eup %9320  ;;  %v14102_v0 = vadd.f32 %v5563_v52, %v13574_v47  ;;  %v6475_v52 = vsub.f32 %v13688_v13, %v14065_v2 }
 0x54f   : > { %v6222_v20 = vmul.f32 0.125, %v5982_v6  ;;  %16352 = vst [vmem:[#allocation22_spill] sm:$0xff] %v14099_v29  ;;  %9326 = vpow2.f32 %v6927_v38  ;;  %v6666_v8 = vmul.f32 %v9321_v58, %v6474_v46  ;;  %v5814_v48 = vsel %vm5702_vm2, %v14099_v29, 0.0 }
 0x550   : > { %v6539_v33 = vadd.f32 1e-05, %v6411_v17  ;;  %16353 = vst [vmem:[#allocation23_spill] sm:$0xff] %v14102_v0  ;;  %9328 = vrsqrt.f32 %v6540_v31  ;;  %v6285_v7 = vmul.f32 %v14094_v10, %v14094_v10  ;;  %v5932_v51 = vmul.f32 %v14099_v29, %v14099_v29  ;;  %5815 = vadd.xlane.f32.xlu1 %v5814_v48 }
 0x551   : > { %v5979_v1 = vpop.xlane.xlu0 %5978  ;;  %v6734_v39 = vmul.f32 %v14045_v25, %v6666_v8  ;;  %v9323_v19 = vpop.eup %9322  ;;  %v5811_v28 = vsel %vm5702_vm2, %v14102_v0, 0.0  ;;  %v5931_v38 = vmul.f32 %v14102_v0, %v14102_v0  ;;  %v6350_v46 = vsub.f32 %v6222_v20, %v6286_v18 }
 0x552   : > { %9330 = vrsqrt.f32 %v6539_v33  ;;  %v5732_v37 = vpop.xlane.xlu1 %5731  ;;  %v6221_v17 = vmul.f32 0.125, %v5979_v1  ;;  %5812 = vadd.xlane.f32.xlu0 %v5811_v28  ;;  %v6665_v58 = vmul.f32 %v9323_v19, %v6473_v54  ;;  %v6070_v1 = vsel %vm5702_vm2, %v5932_v51, 0.0 }
 0x553   : > { %v14118_v6 = vadd.f32 %v14051_v36, %v6734_v39  ;;  %v14122_v31 = vmul.f32 0.125, %v5732_v37  ;;  %v6414_v33 = vmax.f32 %v6350_v46, 0.0  ;;  %v6067_v2 = vsel %vm5702_vm2, %v5931_v38, 0.0 }
 0x554   : > { %v6349_v48 = vsub.f32 %v6221_v17, %v6285_v7  ;;  %v6733_v54 = vmul.f32 %v14045_v25, %v6665_v58  ;;  %6071 = vadd.xlane.f32.xlu1 %v6070_v1  ;;  %v8485_v13 = vpop.f32.mrb[72].mxu1 }
 0x555   : > { %v5729_v20 = vpop.xlane.xlu0 %5728  ;;  %v9325_v18 = vpop.eup %9324  ;;  %v6866_v39 = vmin.f32 %v14118_v6, 20.0  ;;  %v6542_v19 = vadd.f32 1e-05, %v6414_v33  ;;  %v14135_v7 = vadd.f32 %v8485_v13, %v13574_v47  ;;  %v6288_v58 = vmul.f32 %v14122_v31, %v14122_v31 }
 0x556   : > { %v5988_v56 = vpop.xlane.xlu1 %5987  ;;  %v7056_v37 = vadd.f32 1.0, %v9325_v18  ;;  %v6413_v28 = vmax.f32 %v6349_v48, 0.0  ;;  %v5573_v46 = vpop.f32.mrb[73].mxu1  ;;  %6068 = vadd.xlane.f32.xlu0 %v6067_v2  ;;  %v14138_v17 = vadd.f32 %v14051_v36, %v6733_v54  ;;  %v14145_v38 = vmul.f32 0.125, %v5729_v20 }
 0x557   : > { %16354 = vst [vmem:[#allocation24_spill] sm:$0xff] %v14135_v7  ;;  %v6933_v51 = vmul.f32 1.442695, %v6866_v39  ;;  %v14143_v18 = vadd.f32 %v5573_v46, %v13574_v47  ;;  %9332 = vrsqrt.f32 %v6542_v19  ;;  %v5820_v1 = vsel %vm5702_vm2, %v14135_v7, 0.0 }
 0x558   : > { %v7120_v24 = vmul.f32 %v7056_v37, %v7056_v37  ;;  %v6865_v39 = vmin.f32 %v14138_v17, 20.0  ;;  %v5934_v54 = vmul.f32 %v14135_v7, %v14135_v7  ;;  %5821 = vadd.xlane.f32.xlu1 %v5820_v1  ;;  %v6541_v19 = vadd.f32 1e-05, %v6413_v28 }
 0x559   : > { %16355 = vst [vmem:[#allocation25_spill] sm:$0xff] %v14143_v18  ;;  %v5985_v33 = vpop.xlane.xlu0 %5984  ;;  %v9327_v48 = vpop.eup %9326  ;;  %9334 = vpow2.f32 %v6933_v51  ;;  %v5817_v20 = vsel %vm5702_vm2, %v14143_v18, 0.0  ;;  %v5933_v51 = vmul.f32 %v14143_v18, %v14143_v18  ;;  %v6224_v41 = vmul.f32 0.125, %v5988_v56 }
 0x55a   : > { %v5738_v13 = vpop.xlane.xlu1 %5737  ;;  %v9329_v2 = vpop.eup %9328  ;;  %v7248_v37 = vadd.f32 1.0, %v7120_v24  ;;  %v7055_v8 = vadd.f32 1.0, %v9327_v48  ;;  %5818 = vadd.xlane.f32.xlu0 %v5817_v20  ;;  %v6931_v0 = vmul.f32 1.442695, %v6865_v39  ;;  %v6076_v1 = vsel %vm5702_vm2, %v5934_v54, 0.0 }
 0x55b   : > { %v6668_v29 = vmul.f32 %v9329_v2, %v6476_v60  ;;  %v6287_v39 = vmul.f32 %v14145_v38, %v14145_v38  ;;  %v6073_v60 = vsel %vm5702_vm2, %v5933_v51, 0.0  ;;  %v6223_v56 = vmul.f32 0.125, %v5985_v33 }
 0x55c   : > { %v9331_v46 = vpop.eup %9330  ;;  %9336 = vrcp.f32 %v7248_v37  ;;  %v7119_v27 = vmul.f32 %v7055_v8, %v7055_v8  ;;  %6077 = vadd.xlane.f32.xlu1 %v6076_v1  ;;  %v14167_v54 = vmul.f32 0.125, %v5738_v13 }
 0x55d   : > { %v6667_v7 = vmul.f32 %v9331_v46, %v6475_v52  ;;  %v5735_v48 = vpop.xlane.xlu0 %5734  ;;  %9338 = vpow2.f32 %v6931_v0  ;;  %v6736_v28 = vmul.f32 %v14045_v25, %v6668_v29  ;;  %v6352_v0 = vsub.f32 %v6224_v41, %v6288_v58 }
 0x55e   : > { %v5994_v20 = vpop.xlane.xlu1 %5993  ;;  %v7247_v26 = vadd.f32 1.0, %v7119_v27  ;;  %9340 = vrsqrt.f32 %v6541_v19  ;;  %6074 = vadd.xlane.f32.xlu0 %v6073_v60  ;;  %v7953_v29 = vadd.f32 -1.0, %v7120_v24  ;;  %v7952_v51 = vadd.f32 -1.0, %v7119_v27 }
 0x55f   : > { %v6735_v8 = vmul.f32 %v14045_v25, %v6667_v7  ;;  %v14165_v52 = vadd.f32 %v14051_v36, %v6736_v28  ;;  %v6416_v19 = vmax.f32 %v6352_v0, 0.0  ;;  %v6351_v1 = vsub.f32 %v6223_v56, %v6287_v39 }
 0x560   : > { %9342 = vrcp.f32 %v7247_v26  ;;  %v8488_v60 = vpop.f32.mrb[74].mxu1  ;;  %v6290_v24 = vmul.f32 %v14167_v54, %v14167_v54  ;;  %v14178_v26 = vmul.f32 0.125, %v5735_v48  ;;  %v6226_v58 = vmul.f32 0.125, %v5994_v20 }
 0x561   : > { %v14170_v2 = vadd.f32 %v14051_v36, %v6735_v8  ;;  %v5991_v46 = vpop.xlane.xlu0 %5990  ;;  %v6868_v7 = vmin.f32 %v14165_v52, 20.0  ;;  %v9333_v28 = vpop.eup %9332  ;;  %v14181_v13 = vadd.f32 %v8488_v60, %v13574_v47  ;;  %v16357_v0 = vsub.f32 %v13729_v42, %v14090_v49 }
 0x562   : > { %v5583_v8 = vpop.f32.mrb[75].mxu1  ;;  %v6544_v56 = vadd.f32 1e-05, %v6416_v19  ;;  %v14186_v37 = vpop.xlane.xlu1 %5743  ;;  %v6415_v62 = vmax.f32 %v6351_v1, 0.0  ;;  %v6225_v23 = vmul.f32 0.125, %v5991_v46 }
 0x563   : > { %v6867_v41 = vmin.f32 %v14170_v2, 20.0  ;;  %v9335_v33 = vpop.eup %9334  ;;  %16356 = vst [vmem:[#allocation27_spill] sm:$0xff] %v14181_v13  ;;  %v6937_v27 = vmul.f32 1.442695, %v6868_v7  ;;  %v6670_v39 = vmul.f32 %v9333_v28, %v16357_v0  ;;  %v14189_v18 = vadd.f32 %v5583_v8, %v13574_v47 }
 0x564   : > { %v7058_v61 = vadd.f32 1.0, %v9335_v33  ;;  %v5826_v60 = vsel %vm5702_vm2, %v14181_v13, 0.0  ;;  %v5936_v42 = vmul.f32 %v14181_v13, %v14181_v13 }
 0x565   : > { %16358 = vst [vmem:[#allocation32_spill] sm:$0xff] %v14189_v18  ;;  %v6935_v48 = vmul.f32 1.442695, %v6867_v41  ;;  %v14191_v20 = vpop.xlane.xlu0 %5740  ;;  %9344 = vpow2.f32 %v6937_v27  ;;  %v6738_v49 = vmul.f32 %v14045_v25, %v6670_v39  ;;  %5827 = vadd.xlane.f32.xlu1 %v5826_v60  ;;  %v5823_v28 = vsel %vm5702_vm2, %v14189_v18, 0.0 }
 0x566   : > { %v9337_v7 = vpop.eup %9336  ;;  %v14198_v19 = vmul.f32 %v7058_v61, %v7058_v61  ;;  %v5935_v1 = vmul.f32 %v14189_v18, %v14189_v18  ;;  %5824 = vadd.xlane.f32.xlu0 %v5823_v28  ;;  %v6289_v27 = vmul.f32 %v14178_v26, %v14178_v26  ;;  %v6543_v28 = vadd.f32 1e-05, %v6415_v62  ;;  %v14224_v18 = vpop.xlane.xlu1 %5999 }
 0x567   : > { %9346 = vpow2.f32 %v6935_v48  ;;  %v9339_v41 = vpop.eup %9338  ;;  %v7314_v33 = vmul.f32 %v9337_v7, %v7953_v29  ;;  %v14205_v8 = vadd.f32 %v14051_v36, %v6738_v49  ;;  %v6082_v29 = vsel %vm5702_vm2, %v5936_v42, 0.0 }
 0x568   : > { %9348 = vrsqrt.f32 %v6544_v56  ;;  %v9341_v61 = vpop.eup %9340  ;;  %v7250_v0 = vadd.f32 1.0, %v14198_v19  ;;  %v7057_v39 = vadd.f32 1.0, %v9339_v41  ;;  %v6079_v48 = vsel %vm5702_vm2, %v5935_v1, 0.0 }
 0x569   : > { %v7440_v56 = vmul.f32 %v7314_v33, %v14072_v57  ;;  %v6870_v60 = vmin.f32 %v14205_v8, 20.0  ;;  %v16359_v49 = vsub.f32 %v13737_v45, %v14094_v10  ;;  %6083 = vadd.xlane.f32.xlu1 %v6082_v29  ;;  %v6354_v41 = vsub.f32 %v6226_v58, %v6290_v24  ;;  %v14226_v42 = vpop.xlane.xlu0 %5996 }
 0x56a   : > { %v9343_v13 = vpop.eup %9342  ;;  %9350 = vrcp.f32 %v7250_v0  ;;  %v7121_v59 = vmul.f32 %v7057_v39, %v7057_v39  ;;  %6080 = vadd.xlane.f32.xlu0 %v6079_v48  ;;  %v6353_v0 = vsub.f32 %v6225_v23, %v6289_v27 }
 0x56b   : > { %v6669_v7 = vmul.f32 %v9341_v61, %v16359_v49  ;;  %7504 = vst.msk [vmem:[%s14214_s16 + $0x8] sm:$0xff] %vm5702_vm2, %v7440_v56  ;;  %v7312_v57 = vmul.f32 %v9343_v13, %v7952_v51  ;;  %v6941_v1 = vmul.f32 1.442695, %v6870_v60  ;;  %9352 = vrsqrt.f32 %v6543_v28  ;;  %v8491_v62 = vpop.f32.mrb[76].mxu1  ;;  %v14253_v60 = vpop.xlane.xlu1 %5749 }
 0x56c   : > { %v7249_v45 = vadd.f32 1.0, %v7121_v59  ;;  %v6418_v61 = vmax.f32 %v6354_v41, 0.0  ;;  %v14235_v24 = vadd.f32 %v8491_v62, %v13574_v47  ;;  %v5593_v58 = vpop.f32.mrb[77].mxu1  ;;  %v6417_v29 = vmax.f32 %v6353_v0, 0.0 }
 0x56d   : > { %v6737_v33 = vmul.f32 %v14045_v25, %v6669_v7  ;;  %v7439_v46 = vmul.f32 %v7312_v57, %v14086_v4  ;;  %9354 = vpow2.f32 %v6941_v1  ;;  %v14241_v13 = vadd.f32 %v5593_v58, %v13574_v47  ;;  %v14259_v57 = vpop.xlane.xlu0 %5746 }
 0x56e   : > { %9356 = vrcp.f32 %v7249_v45  ;;  %v6546_v39 = vadd.f32 1e-05, %v6418_v61  ;;  %v5832_v23 = vsel %vm5702_vm2, %v14235_v24, 0.0  ;;  %v5938_v27 = vmul.f32 %v14235_v24, %v14235_v24 }
 0x56f   : > { %v14238_v51 = vadd.f32 %v14051_v36, %v6737_v33  ;;  %16360 = vst [vmem:[#allocation72_spill] sm:$0xff] %v14241_v13  ;;  %v9345_v48 = vpop.eup %9344  ;;  %7503 = vst.msk [vmem:[%s14214_s16] sm:$0xff] %vm5702_vm2, %v7439_v46  ;;  %v14251_v56 = vmul.f32 0.125, %v14186_v37  ;;  %5833 = vadd.xlane.f32.xlu1 %v5832_v23  ;;  %v5829_v28 = vsel %vm5702_vm2, %v14241_v13, 0.0  ;;  %v5937_v41 = vmul.f32 %v14241_v13, %v14241_v13 }
 0x570   : > { %v7060_v7 = vadd.f32 1.0, %v9345_v48  ;;  %9358 = vrsqrt.f32 %v6546_v39  ;;  %5830 = vadd.xlane.f32.xlu0 %v5829_v28  ;;  %v6545_v62 = vadd.f32 1e-05, %v6417_v29  ;;  %v7955_v61 = vadd.f32 -1.0, %v14198_v19  ;;  %v14269_v28 = vpop.xlane.xlu1 %6005 }
 0x571   : > { %v6869_v4 = vmin.f32 %v14238_v51, 20.0  ;;  %v9347_v49 = vpop.eup %9346  ;;  %v7954_v0 = vadd.f32 -1.0, %v7121_v59  ;;  %v16361_v58 = vsub.f32 %v13769_v40, %v14122_v31  ;;  %v6088_v39 = vsel %vm5702_vm2, %v5938_v27, 0.0  ;;  %v14274_v19 = vpop.xlane.xlu0 %6002 }
 0x572   : > { %v9349_v1 = vpop.eup %9348  ;;  %v7059_v33 = vadd.f32 1.0, %v9347_v49  ;;  %v7124_v46 = vmul.f32 %v7060_v7, %v7060_v7  ;;  %v6085_v49 = vsel %vm5702_vm2, %v5937_v41, 0.0  ;;  %v6292_v59 = vmul.f32 %v14251_v56, %v14251_v56 }
 0x573   : > { %v6939_v45 = vmul.f32 1.442695, %v6869_v4  ;;  %v6672_v48 = vmul.f32 %v9349_v1, %v16361_v58  ;;  %6089 = vadd.xlane.f32.xlu1 %v6088_v39  ;;  %v14279_v41 = vmul.f32 0.125, %v14191_v20 }
 0x574   : > { %v7123_v23 = vmul.f32 %v7059_v33, %v7059_v33  ;;  %v9351_v4 = vpop.eup %9350  ;;  %v7252_v10 = vadd.f32 1.0, %v7124_v46  ;;  %6086 = vadd.xlane.f32.xlu0 %v6085_v49  ;;  %v14281_v1 = vadd.f32 -1.0, %v7124_v46  ;;  %v6228_v46 = vmul.f32 0.125, %v14224_v18 }
 0x575   : > { %9360 = vpow2.f32 %v6939_v45  ;;  %v6740_v29 = vmul.f32 %v14045_v25, %v6672_v48  ;;  %v9353_v40 = vpop.eup %9352  ;;  %v7318_v31 = vmul.f32 %v9351_v4, %v7955_v61 }
 0x576   : > { %9362 = vrsqrt.f32 %v6545_v62  ;;  %v7251_v7 = vadd.f32 1.0, %v7123_v23  ;;  %v8494_v33 = vpop.f32.mrb[78].mxu1  ;;  %v16362_v62 = vsub.f32 %v13785_v63, %v14145_v38 }
 0x577   : > { %9364 = vrcp.f32 %v7252_v10  ;;  %v14284_v45 = vadd.f32 %v14051_v36, %v6740_v29  ;;  %v9355_v58 = vpop.eup %9354  ;;  %v7442_v48 = vmul.f32 %v7318_v31, %v14118_v6  ;;  %v14291_v39 = vadd.f32 %v8494_v33, %v13574_v47  ;;  %v5603_v20 = vpop.f32.mrb[79].mxu1 }
 0x578   : > { %v6671_v61 = vmul.f32 %v9353_v40, %v16362_v62  ;;  %9366 = vrcp.f32 %v7251_v7  ;;  %v14294_v10 = vpop.xlane.xlu1 %5755  ;;  %v9357_v49 = vpop.eup %9356  ;;  %v7062_v4 = vadd.f32 1.0, %v9355_v58  ;;  %v14297_v29 = vadd.f32 %v5603_v20, %v13574_v47 }
 0x579   : > { %16363 = vst [vmem:[#allocation34_spill] sm:$0xff] %v14291_v39  ;;  %v6872_v63 = vmin.f32 %v14284_v45, 20.0  ;;  %v14301_v40 = vpop.xlane.xlu0 %5752  ;;  %7506 = vst.msk [vmem:[%s14214_s16 + $0x18] sm:$0xff] %vm5702_vm2, %v7442_v48  ;;  %v7316_v6 = vmul.f32 %v9357_v49, %v7954_v0  ;;  %v5838_v31 = vsel %vm5702_vm2, %v14291_v39, 0.0  ;;  %v5940_v18 = vmul.f32 %v14291_v39, %v14291_v39 }
 0x57a   : > { %16364 = vst [vmem:[#allocation19_spill] sm:$0xff] %v14297_v29  ;;  %v6739_v38 = vmul.f32 %v14045_v25, %v6671_v61  ;;  %v6356_v7 = vsub.f32 %v6228_v46, %v6292_v59  ;;  %v9359_v33 = vpop.eup %9358  ;;  %v7126_v62 = vmul.f32 %v7062_v4, %v7062_v4  ;;  %5839 = vadd.xlane.f32.xlu1 %v5838_v31  ;;  %v5835_v61 = vsel %vm5702_vm2, %v14297_v29, 0.0 }
 0x57b   : > { %v6945_v58 = vmul.f32 1.442695, %v6872_v63  ;;  %v7441_v0 = vmul.f32 %v7316_v6, %v14138_v17  ;;  %v7956_v48 = vadd.f32 -1.0, %v7123_v23  ;;  %5836 = vadd.xlane.f32.xlu0 %v5835_v61  ;;  %v5939_v49 = vmul.f32 %v14297_v29, %v14297_v29 }
 0x57c   : > { %v14312_v20 = vadd.f32 %v14051_v36, %v6739_v38  ;;  %v16365_v59 = vsub.f32 %v13813_v55, %v14167_v54  ;;  %v14320_v4 = vpop.xlane.xlu1 %6011  ;;  %v7254_v63 = vadd.f32 1.0, %v7126_v62  ;;  %v6291_v38 = vmul.f32 %v14279_v41, %v14279_v41 }
 0x57d   : > { %9368 = vpow2.f32 %v6945_v58  ;;  %v14325_v27 = vpop.xlane.xlu0 %6008  ;;  %7505 = vst.msk [vmem:[%s14214_s16 + $0x10] sm:$0xff] %vm5702_vm2, %v7441_v0  ;;  %v6094_v23 = vsel %vm5702_vm2, %v5940_v18, 0.0  ;;  %v6091_v6 = vsel %vm5702_vm2, %v5939_v49, 0.0  ;;  %v6227_v54 = vmul.f32 0.125, %v14226_v42 }
 0x57e   : > { %v6674_v46 = vmul.f32 %v9359_v33, %v16365_v59  ;;  %v6871_v31 = vmin.f32 %v14312_v20, 20.0  ;;  %9370 = vrcp.f32 %v7254_v63  ;;  %6095 = vadd.xlane.f32.xlu1 %v6094_v23  ;;  %v6420_v59 = vmax.f32 %v6356_v7, 0.0 }
 0x57f   : > { %v9361_v17 = vpop.eup %9360  ;;  %v7959_v37 = vadd.f32 -1.0, %v7126_v62  ;;  %6092 = vadd.xlane.f32.xlu0 %v6091_v6  ;;  %v16366_v18 = vsub.f32 %v13821_v3, %v14178_v26  ;;  %v6355_v7 = vsub.f32 %v6227_v54, %v6291_v38  ;;  %v14346_v62 = vmul.f32 0.125, %v14253_v60 }
 0x580   : > { %v6742_v55 = vmul.f32 %v14045_v25, %v6674_v46  ;;  %v9363_v33 = vpop.eup %9362  ;;  %v7061_v58 = vadd.f32 1.0, %v9361_v17  ;;  %v6943_v61 = vmul.f32 1.442695, %v6871_v31  ;;  %v14341_v46 = vpop.xlane.xlu1 %5761  ;;  %v6548_v54 = vadd.f32 1e-05, %v6420_v59 }
 0x581   : > { %v6673_v0 = vmul.f32 %v9363_v33, %v16366_v18  ;;  %v9365_v42 = vpop.eup %9364  ;;  %v8497_v31 = vpop.f32.mrb[80].mxu1 }
 0x582   : > { %v14334_v29 = vadd.f32 %v14051_v36, %v6742_v55  ;;  %v14343_v63 = vmul.f32 %v7061_v58, %v7061_v58  ;;  %9372 = vpow2.f32 %v6943_v61  ;;  %v14348_v17 = vpop.xlane.xlu0 %5758  ;;  %v9367_v23 = vpop.eup %9366  ;;  %v7322_v3 = vmul.f32 %v9365_v42, %v14281_v1 }
 0x583   : > { %v14352_v26 = vadd.f32 %v8497_v31, %v13574_v47  ;;  %v5613_v6 = vpop.f32.mrb[81].mxu1  ;;  %v6741_v33 = vmul.f32 %v14045_v25, %v6673_v0  ;;  %v7320_v58 = vmul.f32 %v9367_v23, %v7956_v48 }
 0x584   : > { %v6874_v55 = vmin.f32 %v14334_v29, 20.0  ;;  %v7253_v38 = vadd.f32 1.0, %v14343_v63  ;;  %v14358_v60 = vadd.f32 %v5613_v6, %v13574_v47  ;;  %v7444_v61 = vmul.f32 %v7322_v3, %v14165_v52  ;;  %v14366_v31 = vpop.xlane.xlu1 %6017 }
 0x585   : > { %16367 = vst [vmem:[#allocation9_spill] sm:$0xff] %v14352_v26  ;;  %v5844_v1 = vsel %vm5702_vm2, %v14352_v26, 0.0  ;;  %v14364_v42 = vadd.f32 %v14051_v36, %v6741_v33  ;;  %v7443_v48 = vmul.f32 %v7320_v58, %v14170_v2  ;;  %v5942_v52 = vmul.f32 %v14352_v26, %v14352_v26 }
 0x586   : > { %16368 = vst [vmem:[#allocation10_spill] sm:$0xff] %v14358_v60  ;;  %v6949_v18 = vmul.f32 1.442695, %v6874_v55  ;;  %9374 = vrcp.f32 %v7253_v38  ;;  %5845 = vadd.xlane.f32.xlu1 %v5844_v1  ;;  %v5841_v0 = vsel %vm5702_vm2, %v14358_v60, 0.0  ;;  %v14373_v59 = vpop.xlane.xlu0 %6014  ;;  %7508 = vst.msk [vmem:[%s14214_s16 + $0x28] sm:$0xff] %vm5702_vm2, %v7444_v61  ;;  %v5941_v3 = vmul.f32 %v14358_v60, %v14358_v60 }
 0x587   : > { %5842 = vadd.xlane.f32.xlu0 %v5841_v0  ;;  %v6873_v23 = vmin.f32 %v14364_v42, 20.0  ;;  %v6419_v2 = vmax.f32 %v6355_v7, 0.0  ;;  %v9369_v6 = vpop.eup %9368  ;;  %7507 = vst.msk [vmem:[%s14214_s16 + $0x20] sm:$0xff] %vm5702_vm2, %v7443_v48  ;;  %v6294_v55 = vmul.f32 %v14346_v62, %v14346_v62  ;;  %v14385_v33 = vmul.f32 0.125, %v14259_v57 }
 0x588   : > { %9376 = vpow2.f32 %v6949_v18  ;;  %v6230_v58 = vmul.f32 0.125, %v14269_v28  ;;  %v7064_v38 = vadd.f32 1.0, %v9369_v6  ;;  %v6100_v1 = vsel %vm5702_vm2, %v5942_v52, 0.0  ;;  %v9371_v0 = vpop.eup %9370  ;;  %v8500_v7 = vpop.f32.mrb[82].mxu1 }
 0x589   : > { %9378 = vrsqrt.f32 %v6548_v54  ;;  %v6947_v61 = vmul.f32 1.442695, %v6873_v23  ;;  %v6547_v18 = vadd.f32 1e-05, %v6419_v2  ;;  %v6097_v49 = vsel %vm5702_vm2, %v5941_v3, 0.0  ;;  %v5623_v23 = vpop.f32.mrb[83].mxu1  ;;  %v14396_v52 = vpop.xlane.xlu1 %5767 }
 0x58a   : > { %6101 = vadd.xlane.f32.xlu1 %v6100_v1  ;;  %v6293_v54 = vmul.f32 %v14385_v33, %v14385_v33  ;;  %v6358_v48 = vsub.f32 %v6230_v58, %v6294_v55  ;;  %v6229_v60 = vmul.f32 0.125, %v14274_v19  ;;  %v7326_v57 = vmul.f32 %v9371_v0, %v7959_v37  ;;  %v14401_v58 = vpop.xlane.xlu0 %5764 }
 0x58b   : > { %v7128_v26 = vmul.f32 %v7064_v38, %v7064_v38  ;;  %9380 = vpow2.f32 %v6947_v61  ;;  %v14394_v28 = vadd.f32 %v8500_v7, %v13574_v47  ;;  %6098 = vadd.xlane.f32.xlu0 %v6097_v49  ;;  %v14399_v3 = vadd.f32 %v5623_v23, %v13574_v47 }
 0x58c   : > { %v9373_v2 = vpop.eup %9372  ;;  %9382 = vrsqrt.f32 %v6547_v18  ;;  %v6422_v6 = vmax.f32 %v6358_v48, 0.0  ;;  %v6357_v55 = vsub.f32 %v6229_v60, %v6293_v54  ;;  %v7446_v37 = vmul.f32 %v7326_v57, %v14205_v8 }
 0x58d   : > { %16369 = vst [vmem:[#allocation39_spill] sm:$0xff] %v14394_v28  ;;  %16370 = vst [vmem:[#allocation73_spill] sm:$0xff] %v14399_v3  ;;  %v7958_v19 = vadd.f32 -1.0, %v14343_v63  ;;  %v7256_v38 = vadd.f32 1.0, %v7128_v26  ;;  %v7063_v61 = vadd.f32 1.0, %v9373_v2  ;;  %v5850_v49 = vsel %vm5702_vm2, %v14394_v28, 0.0 }
 0x58e   : > { %v5847_v1 = vsel %vm5702_vm2, %v14399_v3, 0.0  ;;  %v5944_v0 = vmul.f32 %v14394_v28, %v14394_v28  ;;  %v5943_v60 = vmul.f32 %v14399_v3, %v14399_v3  ;;  %7510 = vst.msk [vmem:[%s14214_s16 + $0x38] sm:$0xff] %vm5702_vm2, %v7446_v37  ;;  %5851 = vadd.xlane.f32.xlu1 %v5850_v49  ;;  %v8503_v63 = vpop.f32.mrb[84].mxu1  ;;  %v6550_v18 = vadd.f32 1e-05, %v6422_v6  ;;  %v14432_v28 = vpop.xlane.xlu0 %6020 }
 0x58f   : > { %9384 = vrcp.f32 %v7256_v38  ;;  %v7127_v8 = vmul.f32 %v7063_v61, %v7063_v61  ;;  %5848 = vadd.xlane.f32.xlu0 %v5847_v1  ;;  %v6421_v7 = vmax.f32 %v6357_v55, 0.0  ;;  %v14417_v57 = vadd.f32 %v8503_v63, %v13574_v47  ;;  %v5633_v2 = vpop.f32.mrb[85].mxu1  ;;  %v14427_v55 = vpop.xlane.xlu1 %6023 }
 0x590   : > { %v9375_v54 = vpop.eup %9374  ;;  %v6106_v48 = vsel %vm5702_vm2, %v5944_v0, 0.0  ;;  %v14424_v1 = vadd.f32 %v5633_v2, %v13574_v47  ;;  %v6103_v6 = vsel %vm5702_vm2, %v5943_v60, 0.0  ;;  %9386 = vrsqrt.f32 %v6550_v18 }
 0x591   : > { %16371 = vst [vmem:[#allocation37_spill] sm:$0xff] %v14417_v57  ;;  %v7324_v61 = vmul.f32 %v9375_v54, %v7958_v19  ;;  %v7255_v49 = vadd.f32 1.0, %v7127_v8  ;;  %v6549_v3 = vadd.f32 1e-05, %v6421_v7  ;;  %v14430_v23 = vmul.f32 0.125, %v14294_v10 }
 0x592   : > { %v9377_v38 = vpop.eup %9376  ;;  %16372 = vst [vmem:[#allocation21_spill] sm:$0xff] %v14424_v1  ;;  %v7961_v54 = vadd.f32 -1.0, %v7128_v26  ;;  %v16373_v2 = vsub.f32 %v13833_v9, %v14251_v56  ;;  %6107 = vadd.xlane.f32.xlu1 %v6106_v48  ;;  %v8506_v37 = vpop.f32.mrb[86].mxu1  ;;  %v5856_v18 = vsel %vm5702_vm2, %v14417_v57, 0.0  ;;  %v5853_v10 = vsel %vm5702_vm2, %v14424_v1, 0.0 }
 0x593   : > { %v9379_v0 = vpop.eup %9378  ;;  %v7066_v63 = vadd.f32 1.0, %v9377_v38  ;;  %v7445_v19 = vmul.f32 %v7324_v61, %v14238_v51  ;;  %9388 = vrcp.f32 %v7255_v49  ;;  %6104 = vadd.xlane.f32.xlu0 %v6103_v6  ;;  %v5643_v7 = vpop.f32.mrb[87].mxu1  ;;  %v7960_v51 = vadd.f32 -1.0, %v7127_v8 }
 0x594   : > { %v6676_v60 = vmul.f32 %v9379_v0, %v16373_v2  ;;  %9390 = vrsqrt.f32 %v6549_v3  ;;  %v5946_v9 = vmul.f32 %v14417_v57, %v14417_v57  ;;  %v14448_v56 = vadd.f32 %v8506_v37, %v13574_v47 }
 0x595   : > { %v7130_v38 = vmul.f32 %v7066_v63, %v7066_v63  ;;  %v9381_v39 = vpop.eup %9380  ;;  %7509 = vst.msk [vmem:[%s14214_s16 + $0x30] sm:$0xff] %vm5702_vm2, %v7445_v19  ;;  %v6296_v6 = vmul.f32 %v14430_v23, %v14430_v23  ;;  %v14453_v3 = vadd.f32 %v5643_v7, %v13574_v47  ;;  %v16374_v8 = vsub.f32 %v13840_v16, %v14279_v41  ;;  %v14466_v19 = vpop.xlane.xlu1 %5773 }
 0x596   : > { %v6744_v26 = vmul.f32 %v14045_v25, %v6676_v60  ;;  %v9383_v48 = vpop.eup %9382  ;;  %v7065_v49 = vadd.f32 1.0, %v9381_v39  ;;  %5857 = vadd.xlane.f32.xlu1 %v5856_v18  ;;  %v5945_v37 = vmul.f32 %v14424_v1, %v14424_v1  ;;  %v14464_v39 = vmul.f32 0.125, %v14301_v40 }
 0x597   : > { %v7258_v61 = vadd.f32 1.0, %v7130_v38  ;;  %v6675_v63 = vmul.f32 %v9383_v48, %v16374_v8  ;;  %5854 = vadd.xlane.f32.xlu0 %v5853_v10  ;;  %v7963_v2 = vadd.f32 -1.0, %v7130_v38  ;;  %v6232_v7 = vmul.f32 0.125, %v14320_v4 }
 0x598   : > { %v14456_v0 = vadd.f32 %v14051_v36, %v6744_v26  ;;  %v7129_v60 = vmul.f32 %v7065_v49, %v7065_v49  ;;  %v14469_v26 = vpop.xlane.xlu0 %5770  ;;  %v6112_v18 = vsel %vm5702_vm2, %v5946_v9, 0.0  ;;  %v5862_v40 = vsel %vm5702_vm2, %v14448_v56, 0.0 }
 0x599   : > { %9392 = vrcp.f32 %v7258_v61  ;;  %v9385_v57 = vpop.eup %9384  ;;  %v6743_v41 = vmul.f32 %v14045_v25, %v6675_v63  ;;  %v6109_v38 = vsel %vm5702_vm2, %v5945_v37, 0.0  ;;  %v6295_v61 = vmul.f32 %v14464_v39, %v14464_v39 }
 0x59a   : > { %v6876_v16 = vmin.f32 %v14456_v0, 20.0  ;;  %v7330_v10 = vmul.f32 %v9385_v57, %v7961_v54  ;;  %v7257_v48 = vadd.f32 1.0, %v7129_v60  ;;  %v14479_v4 = vadd.f32 -1.0, %v7129_v60  ;;  %6113 = vadd.xlane.f32.xlu1 %v6112_v18  ;;  %v9387_v63 = vpop.eup %9386 }
 0x59b   : > { %v14482_v8 = vadd.f32 %v14051_v36, %v6743_v41  ;;  %6110 = vadd.xlane.f32.xlu0 %v6109_v38  ;;  %v6360_v9 = vsub.f32 %v6232_v7, %v6296_v6  ;;  %v5859_v57 = vsel %vm5702_vm2, %v14453_v3, 0.0  ;;  %v6231_v54 = vmul.f32 0.125, %v14325_v27  ;;  %v8509_v37 = vpop.f32.mrb[88].mxu1  ;;  %v14492_v7 = vpop.xlane.xlu1 %6029 }
 0x59c   : > { %v6953_v49 = vmul.f32 1.442695, %v6876_v16  ;;  %v7448_v1 = vmul.f32 %v7330_v10, %v14284_v45  ;;  %9394 = vrcp.f32 %v7257_v48  ;;  %v16375_v41 = vsub.f32 %v13860_v50, %v14346_v62  ;;  %v5653_v6 = vpop.f32.mrb[89].mxu1  ;;  %v14501_v13 = vpop.xlane.xlu0 %6026 }
 0x59d   : > { %v9389_v60 = vpop.eup %9388  ;;  %v6875_v16 = vmin.f32 %v14482_v8, 20.0  ;;  %v6424_v38 = vmax.f32 %v6360_v9, 0.0  ;;  %v6359_v48 = vsub.f32 %v6231_v54, %v6295_v61  ;;  %v5948_v27 = vmul.f32 %v14448_v56, %v14448_v56 }
 0x59e   : > { %9396 = vpow2.f32 %v6953_v49  ;;  %v6678_v18 = vmul.f32 %v9387_v63, %v16375_v41  ;;  %v9391_v45 = vpop.eup %9390  ;;  %7512 = vst.msk [vmem:[%s14214_s16 + $0x48] sm:$0xff] %vm5702_vm2, %v7448_v1  ;;  %v7328_v10 = vmul.f32 %v9389_v60, %v7960_v51  ;;  %v14499_v49 = vadd.f32 %v8509_v37, %v13574_v47  ;;  %5863 = vadd.xlane.f32.xlu1 %v5862_v40 }
 0x59f   : > { %v6951_v50 = vmul.f32 1.442695, %v6875_v16  ;;  %v16376_v9 = vsub.f32 %v13863_v44, %v14385_v33  ;;  %v6552_v1 = vadd.f32 1e-05, %v6424_v38  ;;  %5860 = vadd.xlane.f32.xlu0 %v5859_v57  ;;  %v6423_v61 = vmax.f32 %v6359_v48, 0.0 }
 0x5a0   : > { %v6746_v62 = vmul.f32 %v14045_v25, %v6678_v18  ;;  %v7447_v51 = vmul.f32 %v7328_v10, %v14312_v20  ;;  %v14509_v54 = vmul.f32 0.125, %v14341_v46  ;;  %v14512_v37 = vadd.f32 %v5653_v6, %v13574_v47  ;;  %v14530_v6 = vpop.xlane.xlu1 %5779  ;;  %v14538_v48 = vpop.xlane.xlu0 %5776 }
 0x5a1   : > { %v6677_v63 = vmul.f32 %v9391_v45, %v16376_v9  ;;  %9398 = vpow2.f32 %v6951_v50  ;;  %v5947_v44 = vmul.f32 %v14453_v3, %v14453_v3  ;;  %v6551_v20 = vadd.f32 1e-05, %v6423_v61 }
 0x5a2   : > { %16377 = vst [vmem:[#allocation4_spill] sm:$0xff] %v14512_v37  ;;  %v14515_v60 = vadd.f32 %v14051_v36, %v6746_v62  ;;  %7511 = vst.msk [vmem:[%s14214_s16 + $0x40] sm:$0xff] %vm5702_vm2, %v7447_v51  ;;  %9400 = vrsqrt.f32 %v6552_v1  ;;  %v6118_v46 = vsel %vm5702_vm2, %v5948_v27, 0.0  ;;  %v6298_v40 = vmul.f32 %v14509_v54, %v14509_v54 }
 0x5a3   : > { %v6745_v16 = vmul.f32 %v14045_v25, %v6677_v63  ;;  %v9393_v33 = vpop.eup %9392  ;;  %6119 = vadd.xlane.f32.xlu1 %v6118_v46  ;;  %v6115_v38 = vsel %vm5702_vm2, %v5947_v44, 0.0  ;;  %9402 = vrsqrt.f32 %v6551_v20  ;;  %v14533_v45 = vmul.f32 0.125, %v14348_v17 }
 0x5a4   : > { %v7334_v57 = vmul.f32 %v9393_v33, %v7963_v2  ;;  %v6878_v41 = vmin.f32 %v14515_v60, 20.0  ;;  %6116 = vadd.xlane.f32.xlu0 %v6115_v38  ;;  %v5868_v10 = vsel %vm5702_vm2, %v14499_v49, 0.0  ;;  %v6234_v2 = vmul.f32 0.125, %v14366_v31  ;;  %v14559_v38 = vpop.xlane.xlu1 %6035 }
 0x5a5   : > { %v14527_v18 = vadd.f32 %v14051_v36, %v6745_v16  ;;  %v5865_v9 = vsel %vm5702_vm2, %v14512_v37, 0.0  ;;  %v6297_v17 = vmul.f32 %v14533_v45, %v14533_v45  ;;  %v6233_v51 = vmul.f32 0.125, %v14373_v59 }
 0x5a6   : > { %v7450_v27 = vmul.f32 %v7334_v57, %v14334_v29  ;;  %v6957_v50 = vmul.f32 1.442695, %v6878_v41  ;;  %v9395_v63 = vpop.eup %9394  ;;  %v6362_v1 = vsub.f32 %v6234_v2, %v6298_v40  ;;  %v5950_v16 = vmul.f32 %v14499_v49, %v14499_v49 }
 0x5a7   : > { %v6877_v62 = vmin.f32 %v14527_v18, 20.0  ;;  %v7332_v31 = vmul.f32 %v9395_v63, %v14479_v4  ;;  %5869 = vadd.xlane.f32.xlu1 %v5868_v10  ;;  %v6488_v33 = vsub.f32 %v13879_v11, %v14430_v23  ;;  %v6361_v46 = vsub.f32 %v6233_v51, %v6297_v17  ;;  %v8512_v59 = vpop.f32.mrb[90].mxu1  ;;  %v14564_v23 = vpop.xlane.xlu0 %6032 }
 0x5a8   : > { %v9397_v61 = vpop.eup %9396  ;;  %7514 = vst.msk [vmem:[%s14214_s16 + $0x58] sm:$0xff] %vm5702_vm2, %v7450_v27  ;;  %9404 = vpow2.f32 %v6957_v50  ;;  %v6426_v20 = vmax.f32 %v6362_v1, 0.0  ;;  %5866 = vadd.xlane.f32.xlu0 %v5865_v9  ;;  %v6124_v4 = vsel %vm5702_vm2, %v5950_v16, 0.0  ;;  %v14557_v57 = vmul.f32 0.125, %v14396_v52  ;;  %v5663_v41 = vpop.f32.mrb[91].mxu1 }
 0x5a9   : > { %v6955_v29 = vmul.f32 1.442695, %v6877_v62  ;;  %v7068_v44 = vadd.f32 1.0, %v9397_v61  ;;  %v7449_v40 = vmul.f32 %v7332_v31, %v14364_v42  ;;  %v6425_v27 = vmax.f32 %v6361_v46, 0.0 }
 0x5aa   : > { %v6554_v2 = vadd.f32 1e-05, %v6426_v20  ;;  %v14562_v11 = vadd.f32 %v8512_v59, %v13574_v47  ;;  %v6487_v42 = vsub.f32 %v13884_v43, %v14464_v39  ;;  %v14573_v62 = vadd.f32 %v5663_v41, %v13574_v47  ;;  %v14589_v59 = vpop.xlane.xlu1 %5785 }
 0x5ab   : > { %9406 = vpow2.f32 %v6955_v29  ;;  %v7132_v10 = vmul.f32 %v7068_v44, %v7068_v44  ;;  %v9399_v50 = vpop.eup %9398  ;;  %7513 = vst.msk [vmem:[%s14214_s16 + $0x50] sm:$0xff] %vm5702_vm2, %v7449_v40  ;;  %6125 = vadd.xlane.f32.xlu1 %v6124_v4  ;;  %v5949_v9 = vmul.f32 %v14512_v37, %v14512_v37  ;;  %v14578_v51 = vmul.f32 0.125, %v14401_v58 }
 0x5ac   : > { %16378 = vst [vmem:[#allocation41_spill] sm:$0xff] %v14562_v11  ;;  %v9401_v63 = vpop.eup %9400  ;;  %v7067_v1 = vadd.f32 1.0, %v9399_v50  ;;  %9408 = vrsqrt.f32 %v6554_v2  ;;  %v6553_v39 = vadd.f32 1e-05, %v6425_v27  ;;  %v6300_v44 = vmul.f32 %v14557_v57, %v14557_v57  ;;  %v14596_v50 = vpop.xlane.xlu0 %5782 }
 0x5ad   : > { %v7260_v17 = vadd.f32 1.0, %v7132_v10  ;;  %v6680_v61 = vmul.f32 %v9401_v63, %v6488_v33  ;;  %v6121_v31 = vsel %vm5702_vm2, %v5949_v9, 0.0  ;;  %v9403_v29 = vpop.eup %9402  ;;  %v5874_v20 = vsel %vm5702_vm2, %v14562_v11, 0.0 }
 0x5ae   : > { %v7131_v16 = vmul.f32 %v7067_v1, %v7067_v1  ;;  %6122 = vadd.xlane.f32.xlu0 %v6121_v31  ;;  %v6679_v46 = vmul.f32 %v9403_v29, %v6487_v42  ;;  %v6236_v33 = vmul.f32 0.125, %v14427_v55  ;;  %v6299_v4 = vmul.f32 %v14578_v51, %v14578_v51 }
 0x5af   : > { %9410 = vrcp.f32 %v7260_v17  ;;  %v6748_v58 = vmul.f32 %v14045_v25, %v6680_v61  ;;  %5875 = vadd.xlane.f32.xlu1 %v5874_v20  ;;  %v5871_v41 = vsel %vm5702_vm2, %v14573_v62, 0.0  ;;  %v6235_v2 = vmul.f32 0.125, %v14432_v28 }
 0x5b0   : > { %9412 = vrsqrt.f32 %v6553_v39  ;;  %v7259_v40 = vadd.f32 1.0, %v7131_v16  ;;  %v6747_v55 = vmul.f32 %v14045_v25, %v6679_v46  ;;  %v6364_v63 = vsub.f32 %v6236_v33, %v6300_v44 }
 0x5b1   : > { %v8515_v27 = vpop.f32.mrb[92].mxu1  ;;  %v14599_v42 = vadd.f32 %v14051_v36, %v6748_v58  ;;  %v5952_v17 = vmul.f32 %v14562_v11, %v14562_v11  ;;  %v6363_v28 = vsub.f32 %v6235_v2, %v6299_v4  ;;  %v7965_v46 = vadd.f32 -1.0, %v7132_v10 }
 0x5b2   : > { %v9405_v9 = vpop.eup %9404  ;;  %v5673_v1 = vpop.f32.mrb[93].mxu1  ;;  %9414 = vrcp.f32 %v7259_v40  ;;  %5872 = vadd.xlane.f32.xlu0 %v5871_v41  ;;  %v14608_v20 = vadd.f32 %v14051_v36, %v6747_v55  ;;  %v6428_v58 = vmax.f32 %v6364_v63, 0.0  ;;  %v7964_v40 = vadd.f32 -1.0, %v7131_v16 }
 0x5b3   : > { %v7070_v61 = vadd.f32 1.0, %v9405_v9  ;;  %v6880_v29 = vmin.f32 %v14599_v42, 20.0  ;;  %v6130_v44 = vsel %vm5702_vm2, %v5952_v17, 0.0  ;;  %v6427_v52 = vmax.f32 %v6363_v28, 0.0  ;;  %v14614_v41 = vpop.xlane.xlu1 %6041  ;;  %v14622_v17 = vpop.xlane.xlu0 %6038 }
 0x5b4   : > { %6131 = vadd.xlane.f32.xlu1 %v6130_v44  ;;  %v6879_v39 = vmin.f32 %v14608_v20, 20.0  ;;  %v14617_v63 = vadd.f32 %v8515_v27, %v13574_v47  ;;  %v14620_v10 = vmul.f32 0.125, %v14466_v19 }
 0x5b5   : > { %v9407_v31 = vpop.eup %9406  ;;  %v7134_v33 = vmul.f32 %v7070_v61, %v7070_v61  ;;  %v6961_v9 = vmul.f32 1.442695, %v6880_v29  ;;  %v16380_v61 = vsub.f32 %v13900_v22, %v14509_v54  ;;  %v6555_v4 = vadd.f32 1e-05, %v6427_v52 }
 0x5b6   : > { %v7069_v43 = vadd.f32 1.0, %v9407_v31  ;;  %v9409_v2 = vpop.eup %9408  ;;  %16379 = vst [vmem:[#allocation74_spill] sm:$0xff] %v14617_v63  ;;  %v6959_v16 = vmul.f32 1.442695, %v6879_v39  ;;  %v6556_v31 = vadd.f32 1e-05, %v6428_v58  ;;  %v5951_v39 = vmul.f32 %v14573_v62, %v14573_v62 }
 0x5b7   : > { %v7262_v55 = vadd.f32 1.0, %v7134_v33  ;;  %9416 = vpow2.f32 %v6961_v9  ;;  %v6682_v28 = vmul.f32 %v9409_v2, %v16380_v61  ;;  %v16382_v22 = vsub.f32 %v13903_v5, %v14533_v45 }
 0x5b8   : > { %v7133_v11 = vmul.f32 %v7069_v43, %v7069_v43  ;;  %v14628_v43 = vadd.f32 %v5673_v1, %v13574_v47  ;;  %v14637_v58 = vmul.f32 0.125, %v14469_v26  ;;  %v5880_v52 = vsel %vm5702_vm2, %v14617_v63, 0.0 }
 0x5b9   : > { %v9411_v29 = vpop.eup %9410  ;;  %9418 = vrcp.f32 %v7262_v55  ;;  %v6750_v19 = vmul.f32 %v14045_v25, %v6682_v28  ;;  %v6127_v9 = vsel %vm5702_vm2, %v5951_v39, 0.0  ;;  %5881 = vadd.xlane.f32.xlu1 %v5880_v52  ;;  %v14646_v55 = vpop.xlane.xlu1 %5791  ;;  %v7967_v45 = vadd.f32 -1.0, %v7134_v33 }
 0x5ba   : > { %v7261_v44 = vadd.f32 1.0, %v7133_v11  ;;  %16381 = vst [vmem:[#allocation56_spill] sm:$0xff] %v14628_v43  ;;  %v9413_v27 = vpop.eup %9412  ;;  %v7338_v37 = vmul.f32 %v9411_v29, %v7965_v46  ;;  %9420 = vpow2.f32 %v6959_v16  ;;  %v6302_v16 = vmul.f32 %v14620_v10, %v14620_v10  ;;  %6128 = vadd.xlane.f32.xlu0 %v6127_v9 }
 0x5bb   : > { %v6681_v54 = vmul.f32 %v9413_v27, %v16382_v22  ;;  %v14643_v46 = vadd.f32 %v14051_v36, %v6750_v19  ;;  %v8518_v2 = vpop.f32.mrb[94].mxu1  ;;  %v5877_v33 = vsel %vm5702_vm2, %v14628_v43, 0.0  ;;  %v6301_v29 = vmul.f32 %v14637_v58, %v14637_v58 }
 0x5bc   : > { %9422 = vrcp.f32 %v7261_v44  ;;  %v7452_v1 = vmul.f32 %v7338_v37, %v14456_v0  ;;  %v9415_v5 = vpop.eup %9414  ;;  %v5683_v0 = vpop.f32.mrb[95].mxu1  ;;  %v6237_v44 = vmul.f32 0.125, %v14501_v13  ;;  %v5954_v27 = vmul.f32 %v14617_v63, %v14617_v63 }
 0x5bd   : > { %9424 = vrsqrt.f32 %v6556_v31  ;;  %v6749_v26 = vmul.f32 %v14045_v25, %v6681_v54  ;;  %v14651_v37 = vpop.xlane.xlu0 %5788  ;;  %v7336_v61 = vmul.f32 %v9415_v5, %v7964_v40  ;;  %v6882_v28 = vmin.f32 %v14643_v46, 20.0 }
 0x5be   : > { %9426 = vrsqrt.f32 %v6555_v4  ;;  %7516 = vst.msk [vmem:[%s14214_s16 + $0x68] sm:$0xff] %vm5702_vm2, %v7452_v1  ;;  %v6238_v31 = vmul.f32 0.125, %v14492_v7  ;;  %v14669_v7 = vadd.f32 %v8518_v2, %v13574_v47  ;;  %v7966_v22 = vadd.f32 -1.0, %v7133_v11  ;;  %5878 = vadd.xlane.f32.xlu0 %v5877_v33 }
 0x5bf   : > { %v14660_v4 = vadd.f32 %v14051_v36, %v6749_v26  ;;  %v7451_v40 = vmul.f32 %v7336_v61, %v14482_v8  ;;  %v6965_v19 = vmul.f32 1.442695, %v6882_v28  ;;  %v6365_v52 = vsub.f32 %v6237_v44, %v6301_v29  ;;  %v14685_v26 = vpop.xlane.xlu1 %6047 }
 0x5c0   : > { %v6366_v39 = vsub.f32 %v6238_v31, %v6302_v16  ;;  %v6136_v1 = vsel %vm5702_vm2, %v5954_v27, 0.0  ;;  %v14678_v8 = vmul.f32 0.125, %v14530_v6  ;;  %v14681_v2 = vadd.f32 %v5683_v0, %v13574_v47 }
 0x5c1   : > { %v6881_v54 = vmin.f32 %v14660_v4, 20.0  ;;  %v14673_v9 = vpop.f32.mrb[96].mxu1  ;;  %v9417_v13 = vpop.eup %9416  ;;  %7515 = vst.msk [vmem:[%s14214_s16 + $0x60] sm:$0xff] %vm5702_vm2, %v7451_v40  ;;  %9428 = vpow2.f32 %v6965_v19  ;;  %6137 = vadd.xlane.f32.xlu1 %v6136_v1  ;;  %v6429_v31 = vmax.f32 %v6365_v52, 0.0  ;;  %v5953_v33 = vmul.f32 %v14628_v43, %v14628_v43 }
 0x5c2   : > { %v6430_v5 = vmax.f32 %v6366_v39, 0.0  ;;  %v14683_v11 = vpop.f32.mrb[97].mxu1  ;;  %v7072_v61 = vadd.f32 1.0, %v9417_v13  ;;  %v14689_v29 = vpop.xlane.xlu0 %6044  ;;  %v14692_v40 = vmul.f32 0.125, %v14538_v48  ;;  %v5886_v0 = vsel %vm5702_vm2, %v14669_v7, 0.0 }
 0x5c3   : > { %v9419_v16 = vpop.eup %9418  ;;  %v6963_v28 = vmul.f32 1.442695, %v6881_v54  ;;  %v6557_v54 = vadd.f32 1e-05, %v6429_v31  ;;  %v16383_v63 = vsub.f32 %v13915_v32, %v14557_v57 }
 0x5c4   : > { %v9421_v44 = vpop.eup %9420  ;;  %v7342_v27 = vmul.f32 %v9419_v16, %v7967_v45  ;;  %v6558_v6 = vadd.f32 1e-05, %v6430_v5  ;;  %v7136_v39 = vmul.f32 %v7072_v61, %v7072_v61  ;;  %v6133_v45 = vsel %vm5702_vm2, %v5953_v33, 0.0 }
 0x5c5   : > { %v7071_v1 = vadd.f32 1.0, %v9421_v44  ;;  %9430 = vpow2.f32 %v6963_v28  ;;  %5887 = vadd.xlane.f32.xlu1 %v5886_v0  ;;  %v6494_v28 = vsub.f32 %v13932_v14, %v14620_v10  ;;  %6134 = vadd.xlane.f32.xlu0 %v6133_v45  ;;  %v6493_v33 = vsub.f32 %v13935_v12, %v14637_v58  ;;  %v14711_v44 = vpop.xlane.xlu1 %5797 }
 0x5c6   : > { %v9423_v19 = vpop.eup %9422  ;;  %v7454_v13 = vmul.f32 %v7342_v27, %v14515_v60  ;;  %9432 = vrsqrt.f32 %v6558_v6  ;;  %v7264_v48 = vadd.f32 1.0, %v7136_v39  ;;  %v6304_v14 = vmul.f32 %v14678_v8, %v14678_v8 }
 0x5c7   : > { %v9425_v52 = vpop.eup %9424  ;;  %v7340_v43 = vmul.f32 %v9423_v19, %v7966_v22  ;;  %v7135_v16 = vmul.f32 %v7071_v1, %v7071_v1  ;;  %v16384_v22 = vsub.f32 %v13919_v34, %v14578_v51  ;;  %9434 = vrsqrt.f32 %v6557_v54 }
 0x5c8   : > { %v9427_v5 = vpop.eup %9426  ;;  %v6684_v61 = vmul.f32 %v9425_v52, %v16383_v63  ;;  %7518 = vst.msk [vmem:[%s14214_s16 + $0x78] sm:$0xff] %vm5702_vm2, %v7454_v13  ;;  %9436 = vrcp.f32 %v7264_v48  ;;  %v14716_v63 = vpop.xlane.xlu0 %5794  ;;  %v6240_v12 = vmul.f32 0.125, %v14559_v38  ;;  %v5883_v51 = vsel %vm5702_vm2, %v14681_v2, 0.0 }
 0x5c9   : > { %v7453_v60 = vmul.f32 %v7340_v43, %v14527_v18  ;;  %v6683_v31 = vmul.f32 %v9427_v5, %v16384_v22  ;;  %v7263_v32 = vadd.f32 1.0, %v7135_v16  ;;  %v6303_v18 = vmul.f32 %v14692_v40, %v14692_v40  ;;  %5884 = vadd.xlane.f32.xlu0 %v5883_v51  ;;  %v14742_v48 = vpop.xlane.xlu1 %6053 }
 0x5ca   : > { %v6752_v57 = vmul.f32 %v14045_v25, %v6684_v61  ;;  %v6239_v43 = vmul.f32 0.125, %v14564_v23  ;;  %v5956_v58 = vmul.f32 %v14669_v7, %v14669_v7  ;;  %v7969_v6 = vadd.f32 -1.0, %v7136_v39 }
 0x5cb   : > { %7517 = vst.msk [vmem:[%s14214_s16 + $0x70] sm:$0xff] %vm5702_vm2, %v7453_v60  ;;  %v6751_v34 = vmul.f32 %v14045_v25, %v6683_v31  ;;  %9438 = vrcp.f32 %v7263_v32  ;;  %v9429_v27 = vpop.eup %9428  ;;  %v6496_v38 = vsub.f32 %v13948_v35, %v14678_v8  ;;  %v6368_v19 = vsub.f32 %v6240_v12, %v6304_v14 }
 0x5cc   : > { %v14727_v10 = vadd.f32 %v14051_v36, %v6752_v57  ;;  %v7074_v1 = vadd.f32 1.0, %v9429_v27  ;;  %v6367_v52 = vsub.f32 %v6239_v43, %v6303_v18  ;;  %v6142_v13 = vsel %vm5702_vm2, %v5956_v58, 0.0  ;;  %v14748_v57 = vpop.xlane.xlu0 %6050 }
 0x5cd   : > { %v14733_v0 = vadd.f32 %v14051_v36, %v6751_v34  ;;  %v7968_v45 = vadd.f32 -1.0, %v7135_v16  ;;  %v6495_v5 = vsub.f32 %v13951_v15, %v14692_v40  ;;  %v6432_v39 = vmax.f32 %v6368_v19, 0.0  ;;  %6143 = vadd.xlane.f32.xlu1 %v6142_v13 }
 0x5ce   : > { %v6884_v54 = vmin.f32 %v14727_v10, 20.0  ;;  %v7138_v60 = vmul.f32 %v7074_v1, %v7074_v1  ;;  %v6431_v31 = vmax.f32 %v6367_v52, 0.0  ;;  %v14746_v32 = vadd.f32 %v14673_v9, %v13574_v47 }
 0x5cf   : > { %v6883_v23 = vmin.f32 %v14733_v0, 20.0  ;;  %v9431_v61 = vpop.eup %9430  ;;  %v6560_v18 = vadd.f32 1e-05, %v6432_v39  ;;  %v5955_v12 = vmul.f32 %v14681_v2, %v14681_v2  ;;  %v14753_v58 = vmul.f32 0.125, %v14589_v59 }
 0x5d0   : > { %v6969_v22 = vmul.f32 1.442695, %v6884_v54  ;;  %v9433_v16 = vpop.eup %9432  ;;  %v7073_v14 = vadd.f32 1.0, %v9431_v61  ;;  %v7266_v51 = vadd.f32 1.0, %v7138_v60  ;;  %v6559_v9 = vadd.f32 1e-05, %v6431_v31  ;;  %v14764_v61 = vpop.xlane.xlu1 %5803 }
 0x5d1   : > { %v6967_v34 = vmul.f32 1.442695, %v6883_v23  ;;  %v6686_v43 = vmul.f32 %v9433_v16, %v6494_v28  ;;  %v9435_v27 = vpop.eup %9434  ;;  %v6139_v1 = vsel %vm5702_vm2, %v5955_v12, 0.0  ;;  %v14758_v23 = vmul.f32 0.125, %v14596_v50 }
 0x5d2   : > { %9440 = vpow2.f32 %v6969_v22  ;;  %v7137_v19 = vmul.f32 %v7073_v14, %v7073_v14  ;;  %v9437_v54 = vpop.eup %9436  ;;  %v6685_v13 = vmul.f32 %v9435_v27, %v6493_v33  ;;  %6140 = vadd.xlane.f32.xlu0 %v6139_v1  ;;  %v14762_v59 = vadd.f32 %v14683_v11, %v13574_v47 }
 0x5d3   : > { %9442 = vpow2.f32 %v6967_v34  ;;  %v6754_v52 = vmul.f32 %v14045_v25, %v6686_v43  ;;  %v7346_v39 = vmul.f32 %v9437_v54, %v7969_v6  ;;  %v6306_v50 = vmul.f32 %v14753_v58, %v14753_v58  ;;  %v14772_v6 = vpop.xlane.xlu0 %5800 }
 0x5d4   : > { %9444 = vrcp.f32 %v7266_v51  ;;  %v7265_v28 = vadd.f32 1.0, %v7137_v19  ;;  %v6753_v33 = vmul.f32 %v14045_v25, %v6685_v13  ;;  %v6305_v47 = vmul.f32 %v14758_v23, %v14758_v23  ;;  %v14802_v13 = vpop.xlane.xlu1 %6059 }
 0x5d5   : > { %9446 = vrsqrt.f32 %v6560_v18  ;;  %v9439_v22 = vpop.eup %9438  ;;  %v14767_v31 = vadd.f32 %v14051_v36, %v6754_v52  ;;  %v7456_v16 = vmul.f32 %v7346_v39, %v14599_v42  ;;  %v5892_v18 = vsel %vm5702_vm2, %v14746_v32, 0.0 }
 0x5d6   : > { %9448 = vrsqrt.f32 %v6559_v9  ;;  %v7344_v14 = vmul.f32 %v9439_v22, %v7968_v45  ;;  %v14779_v34 = vadd.f32 %v14051_v36, %v6753_v33  ;;  %v6242_v12 = vmul.f32 0.125, %v14614_v41  ;;  %5893 = vadd.xlane.f32.xlu1 %v5892_v18 }
 0x5d7   : > { %9450 = vrcp.f32 %v7265_v28  ;;  %v6886_v11 = vmin.f32 %v14767_v31, 20.0  ;;  %7520 = vst.msk [vmem:[%s14214_s16 + $0x88] sm:$0xff] %vm5702_vm2, %v7456_v16  ;;  %v5889_v45 = vsel %vm5702_vm2, %v14762_v59, 0.0  ;;  %v6241_v51 = vmul.f32 0.125, %v14622_v17 }
 0x5d8   : > { %v7455_v42 = vmul.f32 %v7344_v14, %v14608_v20  ;;  %v5958_v43 = vmul.f32 %v14746_v32, %v14746_v32  ;;  %v6885_v9 = vmin.f32 %v14779_v34, 20.0  ;;  %v6498_v1 = vsub.f32 %v13964_v30, %v14753_v58  ;;  %5890 = vadd.xlane.f32.xlu0 %v5889_v45 }
 0x5d9   : > { %v6973_v27 = vmul.f32 1.442695, %v6886_v11  ;;  %v6370_v41 = vsub.f32 %v6242_v12, %v6306_v50  ;;  %v7971_v20 = vadd.f32 -1.0, %v7138_v60  ;;  %v6369_v54 = vsub.f32 %v6241_v51, %v6305_v47  ;;  %v14805_v50 = vpop.xlane.xlu0 %6056 }
 0x5da   : > { %7519 = vst.msk [vmem:[%s14214_s16 + $0x80] sm:$0xff] %vm5702_vm2, %v7455_v42  ;;  %v14798_v52 = vmul.f32 0.125, %v14646_v55  ;;  %v5957_v17 = vmul.f32 %v14762_v59, %v14762_v59  ;;  %v6971_v28 = vmul.f32 1.442695, %v6885_v9  ;;  %v6148_v33 = vsel %vm5702_vm2, %v5958_v43, 0.0 }
 0x5db   : > { %9452 = vpow2.f32 %v6973_v27  ;;  %v6434_v22 = vmax.f32 %v6370_v41, 0.0  ;;  %v7970_v14 = vadd.f32 -1.0, %v7137_v19  ;;  %v6433_v47 = vmax.f32 %v6369_v54, 0.0  ;;  %6149 = vadd.xlane.f32.xlu1 %v6148_v33  ;;  %v14823_v33 = vpop.xlane.xlu1 %5809 }
 0x5dc   : > { %v9441_v39 = vpop.eup %9440  ;;  %v6145_v55 = vsel %vm5702_vm2, %v5957_v17, 0.0  ;;  %9454 = vpow2.f32 %v6971_v28  ;;  %v14809_v42 = vmul.f32 0.125, %v14651_v37  ;;  %v6497_v27 = vsub.f32 %v13967_v53, %v14758_v23 }
 0x5dd   : > { %v9443_v16 = vpop.eup %9442  ;;  %v7076_v60 = vadd.f32 1.0, %v9441_v39  ;;  %v6562_v12 = vadd.f32 1e-05, %v6434_v22  ;;  %6146 = vadd.xlane.f32.xlu0 %v6145_v55  ;;  %v6308_v19 = vmul.f32 %v14798_v52, %v14798_v52  ;;  %v6244_v37 = vmul.f32 0.125, %v14685_v26  ;;  %v14828_v8 = vpop.xlane.xlu0 %5806 }
 0x5de   : > { %v9445_v11 = vpop.eup %9444  ;;  %v7075_v18 = vadd.f32 1.0, %v9443_v16  ;;  %v6561_v22 = vadd.f32 1e-05, %v6433_v47  ;;  %v6307_v35 = vmul.f32 %v14809_v42, %v14809_v42  ;;  %v6243_v26 = vmul.f32 0.125, %v14689_v29 }
 0x5df   : > { %v9447_v45 = vpop.eup %9446  ;;  %v7350_v51 = vmul.f32 %v9445_v11, %v7971_v20  ;;  %v7140_v43 = vmul.f32 %v7076_v60, %v7076_v60  ;;  %9456 = vrsqrt.f32 %v6562_v12  ;;  %v6372_v15 = vsub.f32 %v6244_v37, %v6308_v19  ;;  %v16385_v12 = vld [vmem:[#allocation69_spill] sm:$0xff]  ;;  %v14855_v37 = vpop.xlane.xlu1 %6065 }
 0x5e0   : > { %v9449_v9 = vpop.eup %9448  ;;  %v7139_v41 = vmul.f32 %v7075_v18, %v7075_v18  ;;  %v6688_v54 = vmul.f32 %v9447_v45, %v6496_v38  ;;  %v6371_v11 = vsub.f32 %v6243_v26, %v6307_v35  ;;  %v6499_v45 = vsub.f32 %v16385_v12, %v14809_v42 }
 0x5e1   : > { %v9451_v17 = vpop.eup %9450  ;;  %v7458_v20 = vmul.f32 %v7350_v51, %v14643_v46  ;;  %v7268_v39 = vadd.f32 1.0, %v7140_v43  ;;  %v6687_v28 = vmul.f32 %v9449_v9, %v6495_v5  ;;  %v14839_v5 = vmul.f32 0.125, %v14711_v44 }
 0x5e2   : > { %v7348_v16 = vmul.f32 %v9451_v17, %v7970_v14  ;;  %v7267_v60 = vadd.f32 1.0, %v7139_v41  ;;  %v6756_v55 = vmul.f32 %v14045_v25, %v6688_v54  ;;  %v6436_v47 = vmax.f32 %v6372_v15, 0.0 }
 0x5e3   : > { %7522 = vst.msk [vmem:[%s14214_s16 + $0x98] sm:$0xff] %vm5702_vm2, %v7458_v20  ;;  %9458 = vrcp.f32 %v7268_v39  ;;  %v6755_v46 = vmul.f32 %v14045_v25, %v6687_v28  ;;  %v14852_v44 = vmul.f32 0.125, %v14716_v63  ;;  %v6435_v54 = vmax.f32 %v6371_v11, 0.0 }
 0x5e4   : > { %v7457_v40 = vmul.f32 %v7348_v16, %v14660_v4  ;;  %9460 = vrcp.f32 %v7267_v60  ;;  %v14836_v38 = vadd.f32 %v14051_v36, %v6756_v55  ;;  %v6500_v4 = vsub.f32 %v13980_v21, %v14798_v52  ;;  %v14862_v16 = vpop.xlane.xlu0 %6062 }
 0x5e5   : > { %v14842_v14 = vadd.f32 %v14051_v36, %v6755_v46  ;;  %9462 = vrsqrt.f32 %v6561_v22  ;;  %v9453_v18 = vpop.eup %9452  ;;  %v6564_v9 = vadd.f32 1e-05, %v6436_v47  ;;  %v6310_v39 = vmul.f32 %v14839_v5, %v14839_v5 }
 0x5e6   : > { %7521 = vst.msk [vmem:[%s14214_s16 + $0x90] sm:$0xff] %vm5702_vm2, %v7457_v40  ;;  %v6888_v29 = vmin.f32 %v14836_v38, 20.0  ;;  %v7078_v51 = vadd.f32 1.0, %v9453_v18  ;;  %v9455_v17 = vpop.eup %9454  ;;  %v6309_v28 = vmul.f32 %v14852_v44, %v14852_v44  ;;  %v6246_v22 = vmul.f32 0.125, %v14742_v48 }
 0x5e7   : > { %v6887_v19 = vmin.f32 %v14842_v14, 20.0  ;;  %v7077_v60 = vadd.f32 1.0, %v9455_v17  ;;  %9464 = vrsqrt.f32 %v6564_v9  ;;  %v6563_v46 = vadd.f32 1e-05, %v6435_v54  ;;  %v14871_v17 = vpop.xlane.xlu1 %5815 }
 0x5e8   : > { %v6977_v20 = vmul.f32 1.442695, %v6888_v29  ;;  %v7142_v63 = vmul.f32 %v7078_v51, %v7078_v51  ;;  %v6374_v15 = vsub.f32 %v6246_v22, %v6310_v39  ;;  %v6245_v26 = vmul.f32 0.125, %v14748_v57  ;;  %v14874_v58 = vpop.xlane.xlu0 %5812 }
 0x5e9   : > { %v6975_v55 = vmul.f32 1.442695, %v6887_v19  ;;  %v9457_v35 = vpop.eup %9456  ;;  %v7973_v40 = vadd.f32 -1.0, %v7140_v43  ;;  %v7141_v11 = vmul.f32 %v7077_v60, %v7077_v60  ;;  %v7972_v19 = vadd.f32 -1.0, %v7139_v41  ;;  %v16386_v41 = vld [vmem:[#allocation71_spill] sm:$0xff] }
 0x5ea   : > { %9466 = vpow2.f32 %v6977_v20  ;;  %v7270_v47 = vadd.f32 1.0, %v7142_v63  ;;  %v6690_v48 = vmul.f32 %v9457_v35, %v6498_v1  ;;  %v6438_v18 = vmax.f32 %v6374_v15, 0.0 }
 0x5eb   : > { %9468 = vpow2.f32 %v6975_v55  ;;  %v6373_v29 = vsub.f32 %v6245_v26, %v6309_v28  ;;  %v7269_v9 = vadd.f32 1.0, %v7141_v11  ;;  %v14869_v54 = vmul.f32 0.125, %v14764_v61 }
 0x5ec   : > { %9470 = vrsqrt.f32 %v6563_v46  ;;  %v6758_v20 = vmul.f32 %v14045_v25, %v6690_v48  ;;  %v6566_v39 = vadd.f32 1e-05, %v6438_v18  ;;  %v6502_v22 = vsub.f32 %v16386_v41, %v14839_v5 }
 0x5ed   : > { %v9459_v51 = vpop.eup %9458  ;;  %9472 = vrcp.f32 %v7270_v47  ;;  %v6437_v30 = vmax.f32 %v6373_v29, 0.0  ;;  %v6312_v61 = vmul.f32 %v14869_v54, %v14869_v54  ;;  %v14889_v26 = vmul.f32 0.125, %v14772_v6  ;;  %v16387_v47 = vld [vmem:[#allocation40_spill] sm:$0xff] }
 0x5ee   : > { %v9461_v57 = vpop.eup %9460  ;;  %v7354_v43 = vmul.f32 %v9459_v51, %v7973_v40  ;;  %9474 = vrcp.f32 %v7269_v9  ;;  %v14882_v55 = vadd.f32 %v14051_v36, %v6758_v20  ;;  %v6248_v5 = vmul.f32 0.125, %v14802_v13 }
 0x5ef   : > { %v9463_v1 = vpop.eup %9462  ;;  %v7352_v28 = vmul.f32 %v9461_v57, %v7972_v19  ;;  %9476 = vrsqrt.f32 %v6566_v39  ;;  %v6565_v15 = vadd.f32 1e-05, %v6437_v30  ;;  %v6501_v48 = vsub.f32 %v16387_v47, %v14852_v44  ;;  %v14911_v44 = vpop.xlane.xlu0 %6068  ;;  %v16388_v57 = vld [vmem:[#allocation3_spill] sm:$0xff] }
 0x5f0   : > { %v7460_v60 = vmul.f32 %v7354_v43, %v14727_v10  ;;  %v6689_v35 = vmul.f32 %v9463_v1, %v6497_v27  ;;  %v6890_v10 = vmin.f32 %v14882_v55, 20.0  ;;  %v6247_v53 = vmul.f32 0.125, %v14805_v50  ;;  %v14903_v27 = vpop.xlane.xlu1 %6071 }
 0x5f1   : > { %v7459_v46 = vmul.f32 %v7352_v28, %v14733_v0  ;;  %v9465_v23 = vpop.eup %9464  ;;  %v7975_v0 = vadd.f32 -1.0, %v7142_v63  ;;  %9478 = vrsqrt.f32 %v6565_v15  ;;  %v6311_v6 = vmul.f32 %v14889_v26, %v14889_v26 }
 0x5f2   : > { %7524 = vst.msk [vmem:[%s14214_s16 + $0xa8] sm:$0xff] %vm5702_vm2, %v7460_v60  ;;  %v6757_v40 = vmul.f32 %v14045_v25, %v6689_v35  ;;  %v6376_v13 = vsub.f32 %v6248_v5, %v6312_v61  ;;  %v7974_v29 = vadd.f32 -1.0, %v7141_v11  ;;  %v6981_v51 = vmul.f32 1.442695, %v6890_v10 }
 0x5f3   : > { %7523 = vst.msk [vmem:[%s14214_s16 + $0xa0] sm:$0xff] %vm5702_vm2, %v7459_v46  ;;  %v6692_v50 = vmul.f32 %v9465_v23, %v6500_v4  ;;  %v6504_v43 = vsub.f32 %v16388_v57, %v14869_v54  ;;  %v6375_v39 = vsub.f32 %v6247_v53, %v6311_v6  ;;  %v14921_v4 = vmul.f32 0.125, %v14823_v33  ;;  %v16389_v23 = vld [vmem:[#allocation38_spill] sm:$0xff]  ;;  %v14932_v6 = vpop.xlane.xlu0 %5818 }
 0x5f4   : > { %v9467_v18 = vpop.eup %9466  ;;  %v14906_v19 = vadd.f32 %v14051_v36, %v6757_v40  ;;  %v6440_v20 = vmax.f32 %v6376_v13, 0.0  ;;  %9480 = vpow2.f32 %v6981_v51  ;;  %v14927_v53 = vpop.xlane.xlu1 %5821 }
 0x5f5   : > { %v9469_v63 = vpop.eup %9468  ;;  %v7080_v9 = vadd.f32 1.0, %v9467_v18  ;;  %v6760_v28 = vmul.f32 %v14045_v25, %v6692_v50  ;;  %v6439_v15 = vmax.f32 %v6375_v39, 0.0 }
 0x5f6   : > { %v9471_v30 = vpop.eup %9470  ;;  %v7079_v1 = vadd.f32 1.0, %v9469_v63  ;;  %v6889_v11 = vmin.f32 %v14906_v19, 20.0  ;;  %v6568_v52 = vadd.f32 1e-05, %v6440_v20 }
 0x5f7   : > { %v9473_v41 = vpop.eup %9472  ;;  %v7144_v61 = vmul.f32 %v7080_v9, %v7080_v9  ;;  %v6691_v21 = vmul.f32 %v9471_v30, %v6499_v45  ;;  %v14924_v46 = vadd.f32 %v14051_v36, %v6760_v28 }
 0x5f8   : > { %v7358_v60 = vmul.f32 %v9473_v41, %v7975_v0  ;;  %v7143_v35 = vmul.f32 %v7079_v1, %v7079_v1  ;;  %v9475_v5 = vpop.eup %9474  ;;  %v6979_v40 = vmul.f32 1.442695, %v6889_v11  ;;  %9482 = vrsqrt.f32 %v6568_v52  ;;  %v14956_v28 = vpop.xlane.xlu1 %6077 }
 0x5f9   : > { %v7272_v10 = vadd.f32 1.0, %v7144_v61  ;;  %v6759_v47 = vmul.f32 %v14045_v25, %v6691_v21  ;;  %v9477_v42 = vpop.eup %9476  ;;  %v7356_v33 = vmul.f32 %v9475_v5, %v7974_v29  ;;  %v6503_v0 = vsub.f32 %v16389_v23, %v14889_v26 }
 0x5fa   : > { %v7462_v12 = vmul.f32 %v7358_v60, %v14767_v31  ;;  %v7271_v45 = vadd.f32 1.0, %v7143_v35  ;;  %v6892_v13 = vmin.f32 %v14924_v46, 20.0  ;;  %v6694_v51 = vmul.f32 %v9477_v42, %v6502_v22  ;;  %v16390_v42 = vld [vmem:[#allocation20_spill] sm:$0xff] }
 0x5fb   : > { %9484 = vrcp.f32 %v7272_v10  ;;  %v14936_v18 = vadd.f32 %v14051_v36, %v6759_v47  ;;  %v7461_v50 = vmul.f32 %v7356_v33, %v14779_v34  ;;  %v6567_v31 = vadd.f32 1e-05, %v6439_v15  ;;  %v9479_v63 = vpop.eup %9478  ;;  %v14966_v15 = vpop.xlane.xlu0 %6074 }
 0x5fc   : > { %7526 = vst.msk [vmem:[%s14214_s16 + $0xb8] sm:$0xff] %vm5702_vm2, %v7462_v12  ;;  %9486 = vrcp.f32 %v7271_v45  ;;  %v14942_v29 = vmul.f32 0.125, %v14828_v8  ;;  %v6985_v9 = vmul.f32 1.442695, %v6892_v13  ;;  %v6762_v39 = vmul.f32 %v14045_v25, %v6694_v51 }
 0x5fd   : > { %9488 = vpow2.f32 %v6979_v40  ;;  %v6891_v20 = vmin.f32 %v14936_v18, 20.0  ;;  %7525 = vst.msk [vmem:[%s14214_s16 + $0xb0] sm:$0xff] %vm5702_vm2, %v7461_v50  ;;  %v6693_v30 = vmul.f32 %v9479_v63, %v6501_v48  ;;  %v6314_v22 = vmul.f32 %v14921_v4, %v14921_v4 }
 0x5fe   : > { %9490 = vrsqrt.f32 %v6567_v31  ;;  %v6313_v34 = vmul.f32 %v14942_v29, %v14942_v29  ;;  %v14953_v1 = vadd.f32 %v14051_v36, %v6762_v39  ;;  %v6250_v11 = vmul.f32 0.125, %v14855_v37  ;;  %v9481_v41 = vpop.eup %9480  ;;  %v14982_v39 = vpop.xlane.xlu1 %5827 }
 0x5ff   : > { %9492 = vpow2.f32 %v6985_v9  ;;  %v6983_v8 = vmul.f32 1.442695, %v6891_v20  ;;  %v6761_v21 = vmul.f32 %v14045_v25, %v6693_v30  ;;  %v6249_v48 = vmul.f32 0.125, %v14862_v16  ;;  %v14985_v57 = vpop.xlane.xlu0 %5824 }
 0x600   : > { %v14961_v52 = vmul.f32 0.125, %v14871_v17  ;;  %v14964_v60 = vmul.f32 0.125, %v14874_v58  ;;  %v7082_v5 = vadd.f32 1.0, %v9481_v41  ;;  %v6894_v10 = vmin.f32 %v14953_v1, 20.0 }
 0x601   : > { %9494 = vpow2.f32 %v6983_v8  ;;  %v6378_v37 = vsub.f32 %v6250_v11, %v6314_v22  ;;  %v7977_v40 = vadd.f32 -1.0, %v7144_v61  ;;  %v14970_v47 = vadd.f32 %v14051_v36, %v6761_v21 }
 0x602   : > { %v6506_v16 = vsub.f32 %v16390_v42, %v14921_v4  ;;  %v6377_v12 = vsub.f32 %v6249_v48, %v6313_v34  ;;  %v9483_v17 = vpop.eup %9482  ;;  %v7976_v33 = vadd.f32 -1.0, %v7143_v35  ;;  %v7146_v45 = vmul.f32 %v7082_v5, %v7082_v5  ;;  %v15005_v23 = vpop.xlane.xlu1 %6083  ;;  %v16394_v42 = vld [vmem:[#allocation24_spill] sm:$0xff] }
 0x603   : > { %v6989_v58 = vmul.f32 1.442695, %v6894_v10  ;;  %v6442_v13 = vmax.f32 %v6378_v37, 0.0  ;;  %v6893_v51 = vmin.f32 %v14970_v47, 20.0  ;;  %v6696_v50 = vmul.f32 %v9483_v17, %v6504_v43 }
 0x604   : > { %v6441_v31 = vmax.f32 %v6377_v12, 0.0  ;;  %v6316_v61 = vmul.f32 %v14961_v52, %v14961_v52  ;;  %v7274_v9 = vadd.f32 1.0, %v7146_v45  ;;  %v6315_v35 = vmul.f32 %v14964_v60, %v14964_v60 }
 0x605   : > { %v9485_v63 = vpop.eup %9484  ;;  %9496 = vpow2.f32 %v6989_v58  ;;  %v6570_v20 = vadd.f32 1e-05, %v6442_v13  ;;  %v6987_v34 = vmul.f32 1.442695, %v6893_v51  ;;  %v6764_v8 = vmul.f32 %v14045_v25, %v6696_v50 }
 0x606   : > { %v9487_v30 = vpop.eup %9486  ;;  %v7362_v22 = vmul.f32 %v9485_v63, %v7977_v40  ;;  %v6569_v54 = vadd.f32 1e-05, %v6441_v31  ;;  %9498 = vrcp.f32 %v7274_v9  ;;  %v6252_v41 = vmul.f32 0.125, %v14903_v27  ;;  %v16392_v63 = vld [vmem:[#allocation22_spill] sm:$0xff] }
 0x607   : > { %v9489_v43 = vpop.eup %9488  ;;  %v7360_v11 = vmul.f32 %v9487_v30, %v7976_v33  ;;  %v6251_v21 = vmul.f32 0.125, %v14911_v44  ;;  %9500 = vpow2.f32 %v6987_v34  ;;  %v14991_v37 = vadd.f32 %v14051_v36, %v6764_v8 }
 0x608   : > { %v9491_v48 = vpop.eup %9490  ;;  %v7464_v5 = vmul.f32 %v7362_v22, %v14836_v38  ;;  %v7081_v10 = vadd.f32 1.0, %v9489_v43  ;;  %9502 = vrsqrt.f32 %v6570_v20  ;;  %v6380_v27 = vsub.f32 %v6252_v41, %v6316_v61  ;;  %v15009_v20 = vpop.xlane.xlu0 %6080 }
 0x609   : > { %v9493_v40 = vpop.eup %9492  ;;  %v7463_v12 = vmul.f32 %v7360_v11, %v14842_v14  ;;  %v6695_v17 = vmul.f32 %v9491_v48, %v6503_v0  ;;  %v6896_v38 = vmin.f32 %v14991_v37, 20.0  ;;  %9504 = vrsqrt.f32 %v6569_v54  ;;  %v16391_v14 = vld [vmem:[#allocation48_spill] sm:$0xff] }
 0x60a   : > { %7528 = vst.msk [vmem:[%s14214_s16 + $0xc8] sm:$0xff] %vm5702_vm2, %v7464_v5  ;;  %v7145_v44 = vmul.f32 %v7081_v10, %v7081_v10  ;;  %v7084_v33 = vadd.f32 1.0, %v9493_v40  ;;  %v6505_v51 = vsub.f32 %v16391_v14, %v14942_v29  ;;  %v6444_v50 = vmax.f32 %v6380_v27, 0.0 }
 0x60b   : > { %v9495_v58 = vpop.eup %9494  ;;  %7527 = vst.msk [vmem:[%s14214_s16 + $0xc0] sm:$0xff] %vm5702_vm2, %v7463_v12  ;;  %v6763_v13 = vmul.f32 %v14045_v25, %v6695_v17  ;;  %v6379_v26 = vsub.f32 %v6251_v21, %v6315_v35  ;;  %v6508_v9 = vsub.f32 %v16392_v63, %v14961_v52  ;;  %v6993_v30 = vmul.f32 1.442695, %v6896_v38  ;;  %v16393_v35 = vld [vmem:[#allocation23_spill] sm:$0xff]  ;;  %v15023_v38 = vpop.xlane.xlu1 %5833 }
 0x60c   : > { %v7273_v0 = vadd.f32 1.0, %v7145_v44  ;;  %v7148_v31 = vmul.f32 %v7084_v33, %v7084_v33  ;;  %v7083_v61 = vadd.f32 1.0, %v9495_v58  ;;  %v6572_v34 = vadd.f32 1e-05, %v6444_v50 }
 0x60d   : > { %v15012_v22 = vadd.f32 %v14051_v36, %v6763_v13  ;;  %v6443_v8 = vmax.f32 %v6379_v26, 0.0  ;;  %v6507_v43 = vsub.f32 %v16393_v35, %v14964_v60  ;;  %v7979_v41 = vadd.f32 -1.0, %v7146_v45 }
 0x60e   : > { %9506 = vrcp.f32 %v7273_v0  ;;  %v7276_v29 = vadd.f32 1.0, %v7148_v31  ;;  %v7147_v54 = vmul.f32 %v7083_v61, %v7083_v61  ;;  %v15018_v48 = vmul.f32 0.125, %v14927_v53 }
 0x60f   : > { %v9497_v11 = vpop.eup %9496  ;;  %9508 = vpow2.f32 %v6993_v30  ;;  %v6895_v21 = vmin.f32 %v15012_v22, 20.0  ;;  %v7978_v5 = vadd.f32 -1.0, %v7145_v44  ;;  %v6571_v27 = vadd.f32 1e-05, %v6443_v8  ;;  %v15026_v44 = vpop.xlane.xlu0 %5830 }
 0x610   : > { %9510 = vrcp.f32 %v7276_v29  ;;  %v7275_v10 = vadd.f32 1.0, %v7147_v54  ;;  %v7086_v40 = vadd.f32 1.0, %v9497_v11  ;;  %v9499_v12 = vpop.eup %9498  ;;  %v15021_v33 = vmul.f32 0.125, %v14932_v6 }
 0x611   : > { %v6991_v17 = vmul.f32 1.442695, %v6895_v21  ;;  %9512 = vrsqrt.f32 %v6572_v34  ;;  %v9501_v45 = vpop.eup %9500  ;;  %v7366_v58 = vmul.f32 %v9499_v12, %v7979_v41  ;;  %v6254_v53 = vmul.f32 0.125, %v14956_v28  ;;  %v15046_v21 = vpop.xlane.xlu1 %6089  ;;  %v16395_v12 = vld [vmem:[#allocation25_spill] sm:$0xff] }
 0x612   : > { %9514 = vrcp.f32 %v7275_v10  ;;  %v7150_v13 = vmul.f32 %v7086_v40, %v7086_v40  ;;  %v9503_v14 = vpop.eup %9502  ;;  %v7981_v50 = vadd.f32 -1.0, %v7148_v31  ;;  %v7085_v26 = vadd.f32 1.0, %v9501_v45 }
 0x613   : > { %9516 = vpow2.f32 %v6991_v17  ;;  %v6318_v0 = vmul.f32 %v15018_v48, %v15018_v48  ;;  %v9505_v6 = vpop.eup %9504  ;;  %v7466_v61 = vmul.f32 %v7366_v58, %v14882_v55  ;;  %v7980_v30 = vadd.f32 -1.0, %v7147_v54  ;;  %v15056_v45 = vpop.xlane.xlu0 %6086 }
 0x614   : > { %v7278_v34 = vadd.f32 1.0, %v7150_v13  ;;  %v6698_v8 = vmul.f32 %v9503_v14, %v6506_v16  ;;  %v15034_v28 = vmul.f32 %v7085_v26, %v7085_v26  ;;  %v6697_v29 = vmul.f32 %v9505_v6, %v6505_v51 }
 0x615   : > { %9518 = vrsqrt.f32 %v6571_v27  ;;  %v6382_v11 = vsub.f32 %v6254_v53, %v6318_v0  ;;  %7530 = vst.msk [vmem:[%s14214_s16 + $0xd8] sm:$0xff] %vm5702_vm2, %v7466_v61  ;;  %v6317_v41 = vmul.f32 %v15021_v33, %v15021_v33  ;;  %v6253_v55 = vmul.f32 0.125, %v14966_v15 }
 0x616   : > { %9520 = vrcp.f32 %v7278_v34  ;;  %v6766_v31 = vmul.f32 %v14045_v25, %v6698_v8  ;;  %v7277_v54 = vadd.f32 1.0, %v15034_v28  ;;  %v6765_v4 = vmul.f32 %v14045_v25, %v6697_v29 }
 0x617   : > { %v6510_v16 = vsub.f32 %v16394_v42, %v15018_v48  ;;  %v6446_v51 = vmax.f32 %v6382_v11, 0.0  ;;  %v6509_v17 = vsub.f32 %v16395_v12, %v15021_v33  ;;  %v6381_v27 = vsub.f32 %v6253_v55, %v6317_v41  ;;  %v15080_v52 = vpop.xlane.xlu0 %5836 }
 0x618   : > { %v9507_v10 = vpop.eup %9506  ;;  %v15049_v40 = vadd.f32 %v14051_v36, %v6766_v31  ;;  %v15054_v15 = vmul.f32 0.125, %v14982_v39  ;;  %9522 = vrcp.f32 %v7277_v54  ;;  %v15059_v14 = vadd.f32 %v14051_v36, %v6765_v4 }
 0x619   : > { %v9509_v58 = vpop.eup %9508  ;;  %v7364_v53 = vmul.f32 %v9507_v10, %v7978_v5  ;;  %v6574_v26 = vadd.f32 1e-05, %v6446_v51  ;;  %v6445_v34 = vmax.f32 %v6381_v27, 0.0  ;;  %v15063_v8 = vmul.f32 0.125, %v14985_v57  ;;  %v15075_v27 = vpop.xlane.xlu1 %5839 }
 0x61a   : > { %v9511_v0 = vpop.eup %9510  ;;  %v7088_v6 = vadd.f32 1.0, %v9509_v58  ;;  %v6898_v61 = vmin.f32 %v15049_v40, 20.0  ;;  %v6897_v5 = vmin.f32 %v15059_v14, 20.0  ;;  %v7983_v41 = vadd.f32 -1.0, %v7150_v13 }
 0x61b   : > { %v9513_v39 = vpop.eup %9512  ;;  %v7465_v29 = vmul.f32 %v7364_v53, %v14906_v19  ;;  %v7370_v11 = vmul.f32 %v9511_v0, %v7981_v50  ;;  %9524 = vrsqrt.f32 %v6574_v26  ;;  %v6573_v10 = vadd.f32 1e-05, %v6445_v34 }
 0x61c   : > { %v9515_v31 = vpop.eup %9514  ;;  %v15067_v55 = vmul.f32 %v7088_v6, %v7088_v6  ;;  %v6997_v54 = vmul.f32 1.442695, %v6898_v61  ;;  %v6700_v4 = vmul.f32 %v9513_v39, %v6508_v9  ;;  %v6995_v50 = vmul.f32 1.442695, %v6897_v5 }
 0x61d   : > { %v9517_v51 = vpop.eup %9516  ;;  %7529 = vst.msk [vmem:[%s14214_s16 + $0xd0] sm:$0xff] %vm5702_vm2, %v7465_v29  ;;  %v7468_v57 = vmul.f32 %v7370_v11, %v14924_v46  ;;  %v7368_v19 = vmul.f32 %v9515_v31, %v7980_v30  ;;  %v6320_v53 = vmul.f32 %v15054_v15, %v15054_v15  ;;  %v6319_v30 = vmul.f32 %v15063_v8, %v15063_v8 }
 0x61e   : > { %v7280_v13 = vadd.f32 1.0, %v15067_v55  ;;  %v7087_v58 = vadd.f32 1.0, %v9517_v51  ;;  %9526 = vpow2.f32 %v6997_v54  ;;  %v6768_v9 = vmul.f32 %v14045_v25, %v6700_v4  ;;  %v15108_v54 = vpop.xlane.xlu1 %6095  ;;  %v15113_v51 = vpop.xlane.xlu0 %6092 }
 0x61f   : > { %v9519_v63 = vpop.eup %9518  ;;  %7532 = vst.msk [vmem:[%s14214_s16 + $0xe8] sm:$0xff] %vm5702_vm2, %v7468_v57  ;;  %v7467_v46 = vmul.f32 %v7368_v19, %v14936_v18  ;;  %9528 = vpow2.f32 %v6995_v50  ;;  %v6256_v61 = vmul.f32 0.125, %v15005_v23  ;;  %v6255_v39 = vmul.f32 0.125, %v15009_v20  ;;  %v16396_v19 = vld [vmem:[#allocation27_spill] sm:$0xff] }
 0x620   : > { %v9521_v26 = vpop.eup %9520  ;;  %9530 = vrcp.f32 %v7280_v13  ;;  %v15088_v0 = vmul.f32 %v7087_v58, %v7087_v58  ;;  %v6699_v6 = vmul.f32 %v9519_v63, %v6507_v43  ;;  %v15097_v18 = vadd.f32 %v14051_v36, %v6768_v9 }
 0x621   : > { %7531 = vst.msk [vmem:[%s14214_s16 + $0xe0] sm:$0xff] %vm5702_vm2, %v7467_v46  ;;  %v7374_v34 = vmul.f32 %v9521_v26, %v7983_v41  ;;  %9532 = vrsqrt.f32 %v6573_v10  ;;  %v7982_v29 = vadd.f32 -1.0, %v15034_v28  ;;  %v6384_v60 = vsub.f32 %v6256_v61, %v6320_v53 }
 0x622   : > { %v7279_v11 = vadd.f32 1.0, %v15088_v0  ;;  %v6767_v5 = vmul.f32 %v14045_v25, %v6699_v6  ;;  %v9523_v35 = vpop.eup %9522  ;;  %v6900_v43 = vmin.f32 %v15097_v18, 20.0  ;;  %v6383_v31 = vsub.f32 %v6255_v39, %v6319_v30 }
 0x623   : > { %v7470_v23 = vmul.f32 %v7374_v34, %v14953_v1  ;;  %v15106_v41 = vmul.f32 0.125, %v15023_v38  ;;  %v7372_v20 = vmul.f32 %v9523_v35, %v7982_v29  ;;  %v6448_v4 = vmax.f32 %v6384_v60, 0.0 }
 0x624   : > { %9534 = vrcp.f32 %v7279_v11  ;;  %v15111_v28 = vadd.f32 %v14051_v36, %v6767_v5  ;;  %v7001_v1 = vmul.f32 1.442695, %v6900_v43  ;;  %v6512_v50 = vsub.f32 %v16396_v19, %v15054_v15  ;;  %v15142_v5 = vpop.xlane.xlu0 %5842 }
 0x625   : > { %v9525_v57 = vpop.eup %9524  ;;  %7534 = vst.msk [vmem:[%s14214_s16 + $0xf8] sm:$0xff] %vm5702_vm2, %v7470_v23  ;;  %v6447_v38 = vmax.f32 %v6383_v31, 0.0  ;;  %v6322_v10 = vmul.f32 %v15106_v41, %v15106_v41  ;;  %v7469_v13 = vmul.f32 %v7372_v20, %v14970_v47  ;;  %v6576_v63 = vadd.f32 1e-05, %v6448_v4 }
 0x626   : > { %v6899_v58 = vmin.f32 %v15111_v28, 20.0  ;;  %v6702_v53 = vmul.f32 %v9525_v57, %v6510_v16  ;;  %9536 = vpow2.f32 %v7001_v1  ;;  %v15127_v9 = vmul.f32 0.125, %v15026_v44  ;;  %v15137_v16 = vpop.xlane.xlu1 %5845 }
 0x627   : > { %v6575_v46 = vadd.f32 1e-05, %v6447_v38  ;;  %v6258_v30 = vmul.f32 0.125, %v15046_v21  ;;  %7533 = vst.msk [vmem:[%s14214_s16 + $0xf0] sm:$0xff] %vm5702_vm2, %v7469_v13  ;;  %9538 = vrsqrt.f32 %v6576_v63  ;;  %v6257_v61 = vmul.f32 0.125, %v15056_v45  ;;  %v16397_v63 = vld [vmem:[#allocation32_spill] sm:$0xff] }
 0x628   : > { %v9527_v26 = vpop.eup %9526  ;;  %v6999_v6 = vmul.f32 1.442695, %v6899_v58  ;;  %v6770_v47 = vmul.f32 %v14045_v25, %v6702_v53  ;;  %v7985_v48 = vadd.f32 -1.0, %v15067_v55  ;;  %v6321_v44 = vmul.f32 %v15127_v9, %v15127_v9 }
 0x629   : > { %v9529_v34 = vpop.eup %9528  ;;  %v7090_v42 = vadd.f32 1.0, %v9527_v26  ;;  %9540 = vrsqrt.f32 %v6575_v46  ;;  %v6386_v11 = vsub.f32 %v6258_v30, %v6322_v10  ;;  %v15145_v23 = vmul.f32 0.125, %v15075_v27 }
 0x62a   : > { %v9531_v21 = vpop.eup %9530  ;;  %v7089_v39 = vadd.f32 1.0, %v9529_v34  ;;  %9542 = vpow2.f32 %v6999_v6  ;;  %v15140_v29 = vadd.f32 %v14051_v36, %v6770_v47  ;;  %v6385_v55 = vsub.f32 %v6257_v61, %v6321_v44  ;;  %v15165_v6 = vpop.xlane.xlu0 %6098 }
 0x62b   : > { %v9533_v45 = vpop.eup %9532  ;;  %v7378_v60 = vmul.f32 %v9531_v21, %v7985_v48  ;;  %v7154_v35 = vmul.f32 %v7090_v42, %v7090_v42  ;;  %v6450_v4 = vmax.f32 %v6386_v11, 0.0  ;;  %v7984_v1 = vadd.f32 -1.0, %v15088_v0  ;;  %v16398_v11 = vld [vmem:[#allocation72_spill] sm:$0xff] }
 0x62c   : > { %v7153_v43 = vmul.f32 %v7089_v39, %v7089_v39  ;;  %v6902_v31 = vmin.f32 %v15140_v29, 20.0  ;;  %v6701_v20 = vmul.f32 %v9533_v45, %v6509_v17  ;;  %v6449_v10 = vmax.f32 %v6385_v55, 0.0  ;;  %v6102_v17 = vpop.xlane.xlu1 %6101 }
 0x62d   : > { %v7472_v57 = vmul.f32 %v7378_v60, %v14991_v37  ;;  %v7282_v38 = vadd.f32 1.0, %v7154_v35  ;;  %v6511_v46 = vsub.f32 %v16397_v63, %v15063_v8  ;;  %v6578_v33 = vadd.f32 1e-05, %v6450_v4 }
 0x62e   : > { %v9535_v13 = vpop.eup %9534  ;;  %v7281_v58 = vadd.f32 1.0, %v7153_v43  ;;  %v7005_v53 = vmul.f32 1.442695, %v6902_v31  ;;  %v6769_v27 = vmul.f32 %v14045_v25, %v6701_v20  ;;  %v6577_v12 = vadd.f32 1e-05, %v6449_v10 }
 0x62f   : > { %7536 = vst.msk [vmem:[%s14214_s16 + $0x108] sm:$0xff] %vm5702_vm2, %v7472_v57  ;;  %v7376_v30 = vmul.f32 %v9535_v13, %v7984_v1  ;;  %9544 = vrcp.f32 %v7282_v38  ;;  %v6514_v0 = vsub.f32 %v14235_v24, %v15106_v41  ;;  %v6324_v26 = vmul.f32 %v15145_v23, %v15145_v23 }
 0x630   : > { %9546 = vrcp.f32 %v7281_v58  ;;  %v15159_v37 = vadd.f32 %v14051_v36, %v6769_v27  ;;  %v9537_v8 = vpop.eup %9536  ;;  %v15169_v61 = vmul.f32 0.125, %v15080_v52  ;;  %v6260_v34 = vmul.f32 0.125, %v15108_v54  ;;  %v5852_v38 = vpop.xlane.xlu1 %5851  ;;  %v16399_v27 = vld [vmem:[#allocation34_spill] sm:$0xff] }
 0x631   : > { %v7471_v47 = vmul.f32 %v7376_v30, %v15012_v22  ;;  %9548 = vpow2.f32 %v7005_v53  ;;  %v9539_v48 = vpop.eup %9538  ;;  %v7092_v42 = vadd.f32 1.0, %v9537_v8  ;;  %v6259_v21 = vmul.f32 0.125, %v15113_v51 }
 0x632   : > { %v6901_v44 = vmin.f32 %v15159_v37, 20.0  ;;  %9550 = vrsqrt.f32 %v6578_v33  ;;  %v6704_v22 = vmul.f32 %v9539_v48, %v6512_v50  ;;  %v6513_v52 = vsub.f32 %v16398_v11, %v15127_v9  ;;  %v15185_v9 = vpop.xlane.xlu0 %5848 }
 0x633   : > { %v9541_v39 = vpop.eup %9540  ;;  %7535 = vst.msk [vmem:[%s14214_s16 + $0x100] sm:$0xff] %vm5702_vm2, %v7471_v47  ;;  %9552 = vrsqrt.f32 %v6577_v12  ;;  %v6323_v54 = vmul.f32 %v15169_v61, %v15169_v61  ;;  %v7156_v60 = vmul.f32 %v7092_v42, %v7092_v42  ;;  %v6388_v20 = vsub.f32 %v6260_v34, %v6324_v26 }
 0x634   : > { %v9543_v45 = vpop.eup %9542  ;;  %v7003_v55 = vmul.f32 1.442695, %v6901_v44  ;;  %v6703_v31 = vmul.f32 %v9541_v39, %v6511_v46  ;;  %v7987_v51 = vadd.f32 -1.0, %v7154_v35  ;;  %v6772_v57 = vmul.f32 %v14045_v25, %v6704_v22 }
 0x635   : > { %v7091_v4 = vadd.f32 1.0, %v9543_v45  ;;  %v6387_v1 = vsub.f32 %v6259_v21, %v6323_v54  ;;  %v7986_v15 = vadd.f32 -1.0, %v7153_v43  ;;  %v7284_v19 = vadd.f32 1.0, %v7156_v60  ;;  %v16400_v43 = vld [vmem:[#allocation19_spill] sm:$0xff]  ;;  %v6108_v54 = vpop.xlane.xlu1 %6107 }
 0x636   : > { %9554 = vpow2.f32 %v7003_v55  ;;  %v6771_v50 = vmul.f32 %v14045_v25, %v6703_v31  ;;  %v15188_v13 = vadd.f32 %v14051_v36, %v6772_v57  ;;  %v6452_v58 = vmax.f32 %v6388_v20, 0.0  ;;  %v15206_v20 = vpop.xlane.xlu0 %6104 }
 0x637   : > { %v7155_v10 = vmul.f32 %v7091_v4, %v7091_v4  ;;  %v6451_v53 = vmax.f32 %v6387_v1, 0.0  ;;  %9556 = vrcp.f32 %v7284_v19  ;;  %v6516_v63 = vsub.f32 %v16399_v27, %v15145_v23 }
 0x638   : > { %v15191_v35 = vadd.f32 %v14051_v36, %v6771_v50  ;;  %v6515_v46 = vsub.f32 %v16400_v43, %v15169_v61  ;;  %v6904_v12 = vmin.f32 %v15188_v13, 20.0  ;;  %v6580_v26 = vadd.f32 1e-05, %v6452_v58 }
 0x639   : > { %v9545_v30 = vpop.eup %9544  ;;  %v7283_v33 = vadd.f32 1.0, %v7155_v10  ;;  %v15199_v8 = vmul.f32 0.125, %v15137_v16  ;;  %v6579_v42 = vadd.f32 1e-05, %v6451_v53  ;;  %v15203_v44 = vmul.f32 0.125, %v15142_v5 }
 0x63a   : > { %v9547_v47 = vpop.eup %9546  ;;  %v7382_v34 = vmul.f32 %v9545_v30, %v7987_v51  ;;  %v6903_v48 = vmin.f32 %v15191_v35, 20.0  ;;  %v7009_v22 = vmul.f32 1.442695, %v6904_v12  ;;  %v6262_v11 = vmul.f32 0.125, %v6102_v17  ;;  %v5858_v12 = vpop.xlane.xlu1 %5857 }
 0x63b   : > { %v9549_v21 = vpop.eup %9548  ;;  %v7380_v39 = vmul.f32 %v9547_v47, %v7986_v15  ;;  %9558 = vrcp.f32 %v7283_v33  ;;  %v6326_v17 = vmul.f32 %v15199_v8, %v15199_v8  ;;  %v6325_v1 = vmul.f32 %v15203_v44, %v15203_v44 }
 0x63c   : > { %v9551_v45 = vpop.eup %9550  ;;  %v7474_v16 = vmul.f32 %v7382_v34, %v15049_v40  ;;  %v7094_v55 = vadd.f32 1.0, %v9549_v21  ;;  %v7007_v31 = vmul.f32 1.442695, %v6903_v48  ;;  %9560 = vrsqrt.f32 %v6580_v26  ;;  %v15233_v48 = vpop.xlane.xlu0 %5854 }
 0x63d   : > { %v9553_v51 = vpop.eup %9552  ;;  %v7473_v5 = vmul.f32 %v7380_v39, %v15059_v14  ;;  %9562 = vpow2.f32 %v7009_v22  ;;  %v6706_v4 = vmul.f32 %v9551_v45, %v6514_v0  ;;  %v6390_v15 = vsub.f32 %v6262_v11, %v6326_v17 }
 0x63e   : > { %7538 = vst.msk [vmem:[%s14214_s16 + $0x118] sm:$0xff] %vm5702_vm2, %v7474_v16  ;;  %v7158_v57 = vmul.f32 %v7094_v55, %v7094_v55  ;;  %9564 = vpow2.f32 %v7007_v31  ;;  %v6705_v40 = vmul.f32 %v9553_v51, %v6513_v52  ;;  %v6261_v24 = vmul.f32 0.125, %v15165_v6  ;;  %v16401_v6 = vld [vmem:[#allocation9_spill] sm:$0xff] }
 0x63f   : > { %7537 = vst.msk [vmem:[%s14214_s16 + $0x110] sm:$0xff] %vm5702_vm2, %v7473_v5  ;;  %v6774_v14 = vmul.f32 %v14045_v25, %v6706_v4  ;;  %9566 = vrsqrt.f32 %v6579_v42  ;;  %v7989_v0 = vadd.f32 -1.0, %v7156_v60  ;;  %v15223_v58 = vmul.f32 0.125, %v5852_v38 }
 0x640   : > { %v9555_v41 = vpop.eup %9554  ;;  %v7286_v19 = vadd.f32 1.0, %v7158_v57  ;;  %v6773_v50 = vmul.f32 %v14045_v25, %v6705_v40  ;;  %v6454_v30 = vmax.f32 %v6390_v15, 0.0  ;;  %v6389_v33 = vsub.f32 %v6261_v24, %v6325_v1 }
 0x641   : > { %v7093_v53 = vadd.f32 1.0, %v9555_v41  ;;  %v15226_v52 = vadd.f32 %v14051_v36, %v6774_v14  ;;  %v9557_v26 = vpop.eup %9556  ;;  %v7988_v47 = vadd.f32 -1.0, %v7155_v10  ;;  %v6518_v60 = vsub.f32 %v16401_v6, %v15199_v8 }
 0x642   : > { %9568 = vrcp.f32 %v7286_v19  ;;  %v15229_v34 = vadd.f32 %v14051_v36, %v6773_v50  ;;  %v7386_v38 = vmul.f32 %v9557_v26, %v7989_v0  ;;  %v6582_v39 = vadd.f32 1e-05, %v6454_v30  ;;  %v6111_v50 = vpop.xlane.xlu0 %6110 }
 0x643   : > { %v7157_v42 = vmul.f32 %v7093_v53, %v7093_v53  ;;  %v6906_v21 = vmin.f32 %v15226_v52, 20.0  ;;  %v6453_v11 = vmax.f32 %v6389_v33, 0.0  ;;  %v15238_v10 = vmul.f32 0.125, %v15185_v9 }
 0x644   : > { %v6905_v22 = vmin.f32 %v15229_v34, 20.0  ;;  %v6264_v45 = vmul.f32 0.125, %v6108_v54  ;;  %v7476_v55 = vmul.f32 %v7386_v38, %v15097_v18  ;;  %v6328_v5 = vmul.f32 %v15223_v58, %v15223_v58  ;;  %v6114_v54 = vpop.xlane.xlu1 %6113 }
 0x645   : > { %v9559_v16 = vpop.eup %9558  ;;  %v7285_v31 = vadd.f32 1.0, %v7157_v42  ;;  %v7013_v51 = vmul.f32 1.442695, %v6906_v21  ;;  %9570 = vrsqrt.f32 %v6582_v39  ;;  %v6581_v1 = vadd.f32 1e-05, %v6453_v11 }
 0x646   : > { %v9561_v4 = vpop.eup %9560  ;;  %v7384_v17 = vmul.f32 %v9559_v16, %v7988_v47  ;;  %v7011_v40 = vmul.f32 1.442695, %v6905_v22  ;;  %7540 = vst.msk [vmem:[%s14214_s16 + $0x128] sm:$0xff] %vm5702_vm2, %v7476_v55  ;;  %v7991_v15 = vadd.f32 -1.0, %v7158_v57  ;;  %v6327_v9 = vmul.f32 %v15238_v10, %v15238_v10  ;;  %v16402_v22 = vld [vmem:[#allocation10_spill] sm:$0xff] }
 0x647   : > { %v9563_v14 = vpop.eup %9562  ;;  %9572 = vrcp.f32 %v7285_v31  ;;  %v6708_v18 = vmul.f32 %v9561_v4, %v6516_v63  ;;  %v6392_v19 = vsub.f32 %v6264_v45, %v6328_v5  ;;  %v6263_v33 = vmul.f32 0.125, %v15206_v20  ;;  %v5861_v4 = vpop.xlane.xlu0 %5860 }
 0x648   : > { %v9565_v24 = vpop.eup %9564  ;;  %v7475_v41 = vmul.f32 %v7384_v17, %v15111_v28  ;;  %v7096_v0 = vadd.f32 1.0, %v9563_v14  ;;  %9574 = vpow2.f32 %v7013_v51  ;;  %v15261_v38 = vmul.f32 0.125, %v5858_v12  ;;  %v5864_v31 = vpop.xlane.xlu1 %5863 }
 0x649   : > { %v9567_v53 = vpop.eup %9566  ;;  %v7095_v30 = vadd.f32 1.0, %v9565_v24  ;;  %9576 = vpow2.f32 %v7011_v40  ;;  %v6776_v57 = vmul.f32 %v14045_v25, %v6708_v18  ;;  %v6456_v28 = vmax.f32 %v6392_v19, 0.0 }
 0x64a   : > { %7539 = vst.msk [vmem:[%s14214_s16 + $0x120] sm:$0xff] %vm5702_vm2, %v7475_v41  ;;  %v7160_v23 = vmul.f32 %v7096_v0, %v7096_v0  ;;  %v6707_v27 = vmul.f32 %v9567_v53, %v6515_v46  ;;  %9578 = vrsqrt.f32 %v6581_v1  ;;  %v6391_v47 = vsub.f32 %v6263_v33, %v6327_v9  ;;  %v16403_v46 = vld [vmem:[#allocation39_spill] sm:$0xff]  ;;  %v16404_v33 = vld [vmem:[#allocation73_spill] sm:$0xff] }
 0x64b   : > { %v7159_v63 = vmul.f32 %v7095_v30, %v7095_v30  ;;  %v15259_v26 = vadd.f32 %v14051_v36, %v6776_v57  ;;  %v6517_v11 = vsub.f32 %v16402_v22, %v15203_v44  ;;  %v6584_v45 = vadd.f32 1e-05, %v6456_v28 }
 0x64c   : > { %v9569_v21 = vpop.eup %9568  ;;  %v7288_v39 = vadd.f32 1.0, %v7160_v23  ;;  %v6775_v20 = vmul.f32 %v14045_v25, %v6707_v27  ;;  %v6520_v55 = vsub.f32 %v16403_v46, %v15223_v58  ;;  %v7990_v51 = vadd.f32 -1.0, %v7157_v42  ;;  %v6120_v8 = vpop.xlane.xlu1 %6119 }
 0x64d   : > { %v7390_v16 = vmul.f32 %v9569_v21, %v7991_v15  ;;  %v7287_v61 = vadd.f32 1.0, %v7159_v63  ;;  %v6908_v43 = vmin.f32 %v15259_v26, 20.0  ;;  %v6455_v5 = vmax.f32 %v6391_v47, 0.0  ;;  %v6117_v47 = vpop.xlane.xlu0 %6116 }
 0x64e   : > { %9580 = vrcp.f32 %v7288_v39  ;;  %v15270_v12 = vadd.f32 %v14051_v36, %v6775_v20  ;;  %v6330_v40 = vmul.f32 %v15261_v38, %v15261_v38  ;;  %v15277_v42 = vmul.f32 0.125, %v15233_v48 }
 0x64f   : > { %v7478_v17 = vmul.f32 %v7390_v16, %v15140_v29  ;;  %9582 = vrcp.f32 %v7287_v61  ;;  %v7017_v44 = vmul.f32 1.442695, %v6908_v43  ;;  %v9571_v1 = vpop.eup %9570  ;;  %v6583_v15 = vadd.f32 1e-05, %v6455_v5  ;;  %v16405_v5 = vld [vmem:[#allocation37_spill] sm:$0xff] }
 0x650   : > { %v6907_v14 = vmin.f32 %v15270_v12, 20.0  ;;  %9584 = vrsqrt.f32 %v6584_v45  ;;  %v6710_v29 = vmul.f32 %v9571_v1, %v6518_v60  ;;  %v6266_v9 = vmul.f32 0.125, %v6114_v54 }
 0x651   : > { %v9573_v18 = vpop.eup %9572  ;;  %7542 = vst.msk [vmem:[%s14214_s16 + $0x138] sm:$0xff] %vm5702_vm2, %v7478_v17  ;;  %9586 = vpow2.f32 %v7017_v44  ;;  %v6265_v24 = vmul.f32 0.125, %v6111_v50  ;;  %v6329_v53 = vmul.f32 %v15277_v42, %v15277_v42  ;;  %v6519_v27 = vsub.f32 %v16404_v33, %v15238_v10 }
 0x652   : > { %v9575_v41 = vpop.eup %9574  ;;  %v7388_v0 = vmul.f32 %v9573_v18, %v7990_v51  ;;  %v7015_v19 = vmul.f32 1.442695, %v6907_v14  ;;  %9588 = vrsqrt.f32 %v6583_v15  ;;  %v6778_v57 = vmul.f32 %v14045_v25, %v6710_v29  ;;  %v5870_v29 = vpop.xlane.xlu1 %5869 }
 0x653   : > { %v9577_v30 = vpop.eup %9576  ;;  %v7098_v48 = vadd.f32 1.0, %v9575_v41  ;;  %v6394_v28 = vsub.f32 %v6266_v9, %v6330_v40  ;;  %v6393_v50 = vsub.f32 %v6265_v24, %v6329_v53  ;;  %v7993_v45 = vadd.f32 -1.0, %v7160_v23  ;;  %v16406_v41 = vld [vmem:[#allocation21_spill] sm:$0xff]  ;;  %v5867_v53 = vpop.xlane.xlu0 %5866 }
 0x654   : > { %v9579_v6 = vpop.eup %9578  ;;  %v7477_v60 = vmul.f32 %v7388_v0, %v15159_v37  ;;  %v7097_v54 = vadd.f32 1.0, %v9577_v30  ;;  %9590 = vpow2.f32 %v7015_v19  ;;  %v15291_v39 = vadd.f32 %v14051_v36, %v6778_v57 }
 0x655   : > { %v7162_v21 = vmul.f32 %v7098_v48, %v7098_v48  ;;  %v6709_v20 = vmul.f32 %v9579_v6, %v6517_v11  ;;  %v6458_v22 = vmax.f32 %v6394_v28, 0.0  ;;  %v7992_v16 = vadd.f32 -1.0, %v7159_v63 }
 0x656   : > { %7541 = vst.msk [vmem:[%s14214_s16 + $0x130] sm:$0xff] %vm5702_vm2, %v7477_v60  ;;  %v7161_v10 = vmul.f32 %v7097_v54, %v7097_v54  ;;  %v6457_v61 = vmax.f32 %v6393_v50, 0.0  ;;  %v6910_v51 = vmin.f32 %v15291_v39, 20.0  ;;  %v6522_v17 = vsub.f32 %v16405_v5, %v15261_v38 }
 0x657   : > { %v7290_v43 = vadd.f32 1.0, %v7162_v21  ;;  %v6777_v37 = vmul.f32 %v14045_v25, %v6709_v20  ;;  %v6586_v1 = vadd.f32 1e-05, %v6458_v22  ;;  %v15299_v11 = vmul.f32 0.125, %v5864_v31 }
 0x658   : > { %v9581_v44 = vpop.eup %9580  ;;  %v7289_v40 = vadd.f32 1.0, %v7161_v10  ;;  %v6585_v14 = vadd.f32 1e-05, %v6457_v61  ;;  %v7021_v23 = vmul.f32 1.442695, %v6910_v51  ;;  %v6521_v0 = vsub.f32 %v16406_v41, %v15277_v42 }
 0x659   : > { %v9583_v15 = vpop.eup %9582  ;;  %v7394_v18 = vmul.f32 %v9581_v44, %v7993_v45  ;;  %9592 = vrcp.f32 %v7290_v43  ;;  %v15302_v63 = vadd.f32 %v14051_v36, %v6777_v37  ;;  %v15306_v19 = vmul.f32 0.125, %v5861_v4  ;;  %v6123_v37 = vpop.xlane.xlu0 %6122 }
 0x65a   : > { %v9585_v9 = vpop.eup %9584  ;;  %v7392_v24 = vmul.f32 %v9583_v15, %v7992_v16  ;;  %9594 = vrcp.f32 %v7289_v40  ;;  %v6332_v4 = vmul.f32 %v15299_v11, %v15299_v11  ;;  %v6126_v16 = vpop.xlane.xlu1 %6125  ;;  %v7995_v61 = vadd.f32 -1.0, %v7162_v21 }
 0x65b   : > { %v9587_v31 = vpop.eup %9586  ;;  %v7480_v30 = vmul.f32 %v7394_v18, %v15188_v13  ;;  %9596 = vpow2.f32 %v7021_v23  ;;  %v6909_v48 = vmin.f32 %v15302_v63, 20.0  ;;  %v6712_v57 = vmul.f32 %v9585_v9, %v6520_v55 }
 0x65c   : > { %v9589_v33 = vpop.eup %9588  ;;  %v7479_v28 = vmul.f32 %v7392_v24, %v15191_v35  ;;  %v7100_v6 = vadd.f32 1.0, %v9587_v31  ;;  %9598 = vrsqrt.f32 %v6586_v1  ;;  %v6331_v46 = vmul.f32 %v15306_v19, %v15306_v19 }
 0x65d   : > { %7544 = vst.msk [vmem:[%s14214_s16 + $0x148] sm:$0xff] %vm5702_vm2, %v7480_v30  ;;  %v7019_v60 = vmul.f32 1.442695, %v6909_v48  ;;  %v6780_v13 = vmul.f32 %v14045_v25, %v6712_v57  ;;  %v6711_v54 = vmul.f32 %v9589_v33, %v6519_v27  ;;  %9600 = vrsqrt.f32 %v6585_v14 }
 0x65e   : > { %v9591_v50 = vpop.eup %9590  ;;  %7543 = vst.msk [vmem:[%s14214_s16 + $0x140] sm:$0xff] %vm5702_vm2, %v7479_v28  ;;  %v7164_v58 = vmul.f32 %v7100_v6, %v7100_v6  ;;  %v6268_v35 = vmul.f32 0.125, %v6120_v8  ;;  %v6267_v55 = vmul.f32 0.125, %v6117_v47  ;;  %v7994_v44 = vadd.f32 -1.0, %v7161_v10 }
 0x65f   : > { %v7099_v20 = vadd.f32 1.0, %v9591_v50  ;;  %9602 = vpow2.f32 %v7019_v60  ;;  %v15324_v22 = vadd.f32 %v14051_v36, %v6780_v13  ;;  %v6779_v45 = vmul.f32 %v14045_v25, %v6711_v54  ;;  %v5876_v60 = vpop.xlane.xlu1 %5875 }
 0x660   : > { %v7292_v27 = vadd.f32 1.0, %v7164_v58  ;;  %v6396_v43 = vsub.f32 %v6268_v35, %v6332_v4  ;;  %v6395_v51 = vsub.f32 %v6267_v55, %v6331_v46  ;;  %v6524_v47 = vsub.f32 %v14448_v56, %v15299_v11  ;;  %v5873_v46 = vpop.xlane.xlu0 %5872 }
 0x661   : > { %v7163_v40 = vmul.f32 %v7099_v20, %v7099_v20  ;;  %v6912_v1 = vmin.f32 %v15324_v22, 20.0  ;;  %v15329_v8 = vadd.f32 %v14051_v36, %v6779_v45  ;;  %v15334_v24 = vmul.f32 0.125, %v5870_v29 }
 0x662   : > { %9604 = vrcp.f32 %v7292_v27  ;;  %v6460_v14 = vmax.f32 %v6396_v43, 0.0  ;;  %v6459_v15 = vmax.f32 %v6395_v51, 0.0  ;;  %v6523_v30 = vsub.f32 %v14453_v3, %v15306_v19 }
 0x663   : > { %v9593_v18 = vpop.eup %9592  ;;  %v7291_v23 = vadd.f32 1.0, %v7163_v40  ;;  %v7025_v21 = vmul.f32 1.442695, %v6912_v1  ;;  %v6911_v9 = vmin.f32 %v15329_v8, 20.0  ;;  %v15338_v57 = vmul.f32 0.125, %v5867_v53 }
 0x664   : > { %v9595_v10 = vpop.eup %9594  ;;  %v7398_v31 = vmul.f32 %v9593_v18, %v7995_v61  ;;  %v6588_v48 = vadd.f32 1e-05, %v6460_v14  ;;  %v6587_v4 = vadd.f32 1e-05, %v6459_v15  ;;  %v7997_v29 = vadd.f32 -1.0, %v7164_v58 }
 0x665   : > { %v9597_v33 = vpop.eup %9596  ;;  %v7396_v28 = vmul.f32 %v9595_v10, %v7994_v44  ;;  %9606 = vrcp.f32 %v7291_v23  ;;  %v7023_v6 = vmul.f32 1.442695, %v6911_v9  ;;  %v6334_v20 = vmul.f32 %v15334_v24, %v15334_v24  ;;  %v6132_v44 = vpop.xlane.xlu1 %6131 }
 0x666   : > { %v9599_v13 = vpop.eup %9598  ;;  %v7482_v54 = vmul.f32 %v7398_v31, %v15226_v52  ;;  %v7102_v50 = vadd.f32 1.0, %v9597_v33  ;;  %9608 = vpow2.f32 %v7025_v21  ;;  %v6270_v58 = vmul.f32 0.125, %v6126_v16 }
 0x667   : > { %v9601_v35 = vpop.eup %9600  ;;  %v7481_v55 = vmul.f32 %v7396_v28, %v15229_v34  ;;  %9610 = vpow2.f32 %v7023_v6  ;;  %v6714_v53 = vmul.f32 %v9599_v13, %v6522_v17  ;;  %v6333_v38 = vmul.f32 %v15338_v57, %v15338_v57 }
 0x668   : > { %7546 = vst.msk [vmem:[%s14214_s16 + $0x158] sm:$0xff] %vm5702_vm2, %v7482_v54  ;;  %v15349_v45 = vmul.f32 %v7102_v50, %v7102_v50  ;;  %v6713_v52 = vmul.f32 %v9601_v35, %v6521_v0  ;;  %9612 = vrsqrt.f32 %v6588_v48  ;;  %v6269_v5 = vmul.f32 0.125, %v6123_v37  ;;  %v16407_v48 = vld [vmem:[#allocation4_spill] sm:$0xff] }
 0x669   : > { %v9603_v61 = vpop.eup %9602  ;;  %7545 = vst.msk [vmem:[%s14214_s16 + $0x150] sm:$0xff] %vm5702_vm2, %v7481_v55  ;;  %v6782_v34 = vmul.f32 %v14045_v25, %v6714_v53  ;;  %9614 = vrsqrt.f32 %v6587_v4  ;;  %v7996_v17 = vadd.f32 -1.0, %v7163_v40  ;;  %v6398_v41 = vsub.f32 %v6270_v58, %v6334_v20  ;;  %v6129_v40 = vpop.xlane.xlu0 %6128 }
 0x66a   : > { %v7294_v27 = vadd.f32 1.0, %v15349_v45  ;;  %v7101_v43 = vadd.f32 1.0, %v9603_v61  ;;  %v6781_v51 = vmul.f32 %v14045_v25, %v6713_v52  ;;  %v6397_v0 = vsub.f32 %v6269_v5, %v6333_v38  ;;  %v5882_v52 = vpop.xlane.xlu1 %5881 }
 0x66b   : > { %v15362_v42 = vadd.f32 %v14051_v36, %v6782_v34  ;;  %v15364_v16 = vmul.f32 0.125, %v5876_v60  ;;  %v6526_v37 = vsub.f32 %v14499_v49, %v15334_v24  ;;  %v6462_v21 = vmax.f32 %v6398_v41, 0.0 }
 0x66c   : > { %v9605_v1 = vpop.eup %9604  ;;  %9616 = vrcp.f32 %v7294_v27  ;;  %v7165_v14 = vmul.f32 %v7101_v43, %v7101_v43  ;;  %v15367_v15 = vadd.f32 %v14051_v36, %v6781_v51  ;;  %v6461_v9 = vmax.f32 %v6397_v0, 0.0 }
 0x66d   : > { %v7402_v18 = vmul.f32 %v9605_v1, %v7997_v29  ;;  %v6914_v23 = vmin.f32 %v15362_v42, 20.0  ;;  %v6525_v33 = vsub.f32 %v16407_v48, %v15338_v57  ;;  %v15375_v28 = vmul.f32 0.125, %v5873_v46  ;;  %v5879_v5 = vpop.xlane.xlu0 %5878 }
 0x66e   : > { %v7293_v10 = vadd.f32 1.0, %v7165_v14  ;;  %v6913_v31 = vmin.f32 %v15367_v15, 20.0  ;;  %v6590_v13 = vadd.f32 1e-05, %v6462_v21  ;;  %v6336_v54 = vmul.f32 %v15364_v16, %v15364_v16  ;;  %v6138_v19 = vpop.xlane.xlu1 %6137 }
 0x66f   : > { %v9607_v6 = vpop.eup %9606  ;;  %v7484_v4 = vmul.f32 %v7402_v18, %v15259_v26  ;;  %v7029_v60 = vmul.f32 1.442695, %v6914_v23  ;;  %v6589_v55 = vadd.f32 1e-05, %v6461_v9  ;;  %v6335_v46 = vmul.f32 %v15375_v28, %v15375_v28 }
 0x670   : > { %v9609_v29 = vpop.eup %9608  ;;  %v7400_v50 = vmul.f32 %v9607_v6, %v7996_v17  ;;  %9618 = vrcp.f32 %v7293_v10  ;;  %v7027_v35 = vmul.f32 1.442695, %v6913_v31  ;;  %v6272_v26 = vmul.f32 0.125, %v6132_v44 }
 0x671   : > { %v9611_v53 = vpop.eup %9610  ;;  %7548 = vst.msk [vmem:[%s14214_s16 + $0x168] sm:$0xff] %vm5702_vm2, %v7484_v4  ;;  %v7104_v20 = vadd.f32 1.0, %v9609_v29  ;;  %9620 = vpow2.f32 %v7029_v60  ;;  %v6271_v38 = vmul.f32 0.125, %v6129_v40  ;;  %v7999_v44 = vadd.f32 -1.0, %v15349_v45  ;;  %v16408_v29 = vld [vmem:[#allocation41_spill] sm:$0xff] }
 0x672   : > { %v9613_v58 = vpop.eup %9612  ;;  %v7483_v61 = vmul.f32 %v7400_v50, %v15270_v12  ;;  %v7103_v34 = vadd.f32 1.0, %v9611_v53  ;;  %9622 = vpow2.f32 %v7027_v35  ;;  %v6400_v51 = vsub.f32 %v6272_v26, %v6336_v54 }
 0x673   : > { %v9615_v17 = vpop.eup %9614  ;;  %v7168_v27 = vmul.f32 %v7104_v20, %v7104_v20  ;;  %v6716_v43 = vmul.f32 %v9613_v58, %v6524_v47  ;;  %9624 = vrsqrt.f32 %v6590_v13  ;;  %v6399_v12 = vsub.f32 %v6271_v38, %v6335_v46 }
 0x674   : > { %7547 = vst.msk [vmem:[%s14214_s16 + $0x160] sm:$0xff] %vm5702_vm2, %v7483_v61  ;;  %v7167_v41 = vmul.f32 %v7103_v34, %v7103_v34  ;;  %v6715_v0 = vmul.f32 %v9615_v17, %v6523_v30  ;;  %9626 = vrsqrt.f32 %v6589_v55  ;;  %v6464_v18 = vmax.f32 %v6400_v51, 0.0 }
 0x675   : > { %v7296_v1 = vadd.f32 1.0, %v7168_v27  ;;  %v6784_v40 = vmul.f32 %v14045_v25, %v6716_v43  ;;  %v7998_v56 = vadd.f32 -1.0, %v7165_v14  ;;  %v6463_v21 = vmax.f32 %v6399_v12, 0.0  ;;  %v6135_v14 = vpop.xlane.xlu0 %6134 }
 0x676   : > { %v9617_v23 = vpop.eup %9616  ;;  %v7295_v11 = vadd.f32 1.0, %v7167_v41  ;;  %v6783_v47 = vmul.f32 %v14045_v25, %v6715_v0  ;;  %v6592_v3 = vadd.f32 1e-05, %v6464_v18  ;;  %v15402_v31 = vmul.f32 0.125, %v5882_v52 }
 0x677   : > { %v7406_v9 = vmul.f32 %v9617_v23, %v7999_v44  ;;  %9628 = vrcp.f32 %v7296_v1  ;;  %v15397_v10 = vadd.f32 %v14051_v36, %v6784_v40  ;;  %v6591_v45 = vadd.f32 1e-05, %v6463_v21  ;;  %v16409_v23 = vld [vmem:[#allocation74_spill] sm:$0xff] }
 0x678   : > { %9630 = vrcp.f32 %v7295_v11  ;;  %v15400_v30 = vadd.f32 %v14051_v36, %v6783_v47  ;;  %v15406_v60 = vmul.f32 0.125, %v5879_v5  ;;  %v6528_v50 = vsub.f32 %v16408_v29, %v15364_v16  ;;  %v5888_v5 = vpop.xlane.xlu1 %5887 }
 0x679   : > { %v7486_v6 = vmul.f32 %v7406_v9, %v15291_v39  ;;  %v6916_v4 = vmin.f32 %v15397_v10, 20.0  ;;  %9632 = vrsqrt.f32 %v6592_v3  ;;  %v6527_v35 = vsub.f32 %v14573_v62, %v15375_v28  ;;  %v5885_v0 = vpop.xlane.xlu0 %5884 }
 0x67a   : > { %v9619_v13 = vpop.eup %9618  ;;  %v6915_v54 = vmin.f32 %v15400_v30, 20.0  ;;  %9634 = vrsqrt.f32 %v6591_v45  ;;  %v8001_v39 = vadd.f32 -1.0, %v7168_v27  ;;  %v6338_v46 = vmul.f32 %v15402_v31, %v15402_v31 }
 0x67b   : > { %v9621_v55 = vpop.eup %9620  ;;  %7550 = vst.msk [vmem:[%s14214_s16 + $0x178] sm:$0xff] %vm5702_vm2, %v7486_v6  ;;  %v7404_v53 = vmul.f32 %v9619_v13, %v7998_v56  ;;  %v7033_v20 = vmul.f32 1.442695, %v6916_v4  ;;  %v6274_v61 = vmul.f32 0.125, %v6138_v19  ;;  %v6273_v34 = vmul.f32 0.125, %v6135_v14 }
 0x67c   : > { %v9623_v26 = vpop.eup %9622  ;;  %v7106_v52 = vadd.f32 1.0, %v9621_v55  ;;  %v7031_v58 = vmul.f32 1.442695, %v6915_v54  ;;  %v6337_v28 = vmul.f32 %v15406_v60, %v15406_v60  ;;  %v8000_v12 = vadd.f32 -1.0, %v7167_v41  ;;  %v6144_v14 = vpop.xlane.xlu1 %6143 }
 0x67d   : > { %v9625_v16 = vpop.eup %9624  ;;  %v7485_v38 = vmul.f32 %v7404_v53, %v15302_v63  ;;  %v7105_v62 = vadd.f32 1.0, %v9623_v26  ;;  %9636 = vpow2.f32 %v7033_v20  ;;  %v6402_v51 = vsub.f32 %v6274_v61, %v6338_v46  ;;  %v6141_v29 = vpop.xlane.xlu0 %6140 }
 0x67e   : > { %v9627_v17 = vpop.eup %9626  ;;  %v15420_v27 = vmul.f32 %v7106_v52, %v7106_v52  ;;  %9638 = vpow2.f32 %v7031_v58  ;;  %v6718_v43 = vmul.f32 %v9625_v16, %v6526_v37  ;;  %v6401_v1 = vsub.f32 %v6273_v34, %v6337_v28 }
 0x67f   : > { %7549 = vst.msk [vmem:[%s14214_s16 + $0x170] sm:$0xff] %vm5702_vm2, %v7485_v38  ;;  %v7169_v63 = vmul.f32 %v7105_v62, %v7105_v62  ;;  %v6717_v44 = vmul.f32 %v9627_v17, %v6525_v33  ;;  %v6530_v56 = vsub.f32 %v16409_v23, %v15402_v31  ;;  %v6466_v49 = vmax.f32 %v6402_v51, 0.0 }
 0x680   : > { %v7298_v40 = vadd.f32 1.0, %v15420_v27  ;;  %v6786_v18 = vmul.f32 %v14045_v25, %v6718_v43  ;;  %v6465_v47 = vmax.f32 %v6401_v1, 0.0  ;;  %v15435_v41 = vmul.f32 0.125, %v5888_v5  ;;  %v16410_v5 = vld [vmem:[#allocation56_spill] sm:$0xff]  ;;  %v5894_v43 = vpop.xlane.xlu1 %5893 }
 0x681   : > { %v9629_v24 = vpop.eup %9628  ;;  %v7297_v37 = vadd.f32 1.0, %v7169_v63  ;;  %v6785_v11 = vmul.f32 %v14045_v25, %v6717_v44  ;;  %v6594_v48 = vadd.f32 1e-05, %v6466_v49  ;;  %v6276_v58 = vmul.f32 0.125, %v6144_v14  ;;  %v5891_v1 = vpop.xlane.xlu0 %5890 }
 0x682   : > { %v9631_v21 = vpop.eup %9630  ;;  %v7410_v9 = vmul.f32 %v9629_v24, %v8001_v39  ;;  %9640 = vrcp.f32 %v7298_v40  ;;  %v15438_v57 = vadd.f32 %v14051_v36, %v6786_v18  ;;  %v6593_v45 = vadd.f32 1e-05, %v6465_v47 }
 0x683   : > { %v9633_v33 = vpop.eup %9632  ;;  %v7408_v3 = vmul.f32 %v9631_v21, %v8000_v12  ;;  %9642 = vrcp.f32 %v7297_v37  ;;  %v15441_v19 = vadd.f32 %v14051_v36, %v6785_v11  ;;  %v6340_v26 = vmul.f32 %v15435_v41, %v15435_v41 }
 0x684   : > { %v9635_v6 = vpop.eup %9634  ;;  %v7488_v4 = vmul.f32 %v7410_v9, %v15324_v22  ;;  %v6918_v13 = vmin.f32 %v15438_v57, 20.0  ;;  %v6720_v54 = vmul.f32 %v9633_v33, %v6528_v50  ;;  %9644 = vrsqrt.f32 %v6594_v48 }
 0x685   : > { %v7487_v55 = vmul.f32 %v7408_v3, %v15329_v8  ;;  %v6917_v53 = vmin.f32 %v15441_v19, 20.0  ;;  %v6719_v39 = vmul.f32 %v9635_v6, %v6527_v35  ;;  %9646 = vrsqrt.f32 %v6593_v45 }
 0x686   : > { %7552 = vst.msk [vmem:[%s14214_s16 + $0x188] sm:$0xff] %vm5702_vm2, %v7488_v4  ;;  %v7037_v20 = vmul.f32 1.442695, %v6918_v13  ;;  %v6788_v46 = vmul.f32 %v14045_v25, %v6720_v54  ;;  %v15452_v22 = vmul.f32 0.125, %v5885_v0  ;;  %v6275_v61 = vmul.f32 0.125, %v6141_v29  ;;  %v6150_v29 = vpop.xlane.xlu1 %6149 }
 0x687   : > { %v9637_v52 = vpop.eup %9636  ;;  %7551 = vst.msk [vmem:[%s14214_s16 + $0x180] sm:$0xff] %vm5702_vm2, %v7487_v55  ;;  %v7035_v50 = vmul.f32 1.442695, %v6917_v53  ;;  %v6787_v8 = vmul.f32 %v14045_v25, %v6719_v39  ;;  %v6529_v17 = vsub.f32 %v16410_v5, %v15406_v60  ;;  %v6404_v12 = vsub.f32 %v6276_v58, %v6340_v26 }
 0x688   : > { %v9639_v35 = vpop.eup %9638  ;;  %v7108_v34 = vadd.f32 1.0, %v9637_v52  ;;  %9648 = vpow2.f32 %v7037_v20  ;;  %v15458_v16 = vadd.f32 %v14051_v36, %v6788_v46  ;;  %v6339_v38 = vmul.f32 %v15452_v22, %v15452_v22  ;;  %v6147_v20 = vpop.xlane.xlu0 %6146 }
 0x689   : > { %v7107_v62 = vadd.f32 1.0, %v9639_v35  ;;  %9650 = vpow2.f32 %v7035_v50  ;;  %v15463_v28 = vadd.f32 %v14051_v36, %v6787_v8  ;;  %v8003_v40 = vadd.f32 -1.0, %v15420_v27 }
 0x68a   : > { %v7172_v51 = vmul.f32 %v7108_v34, %v7108_v34  ;;  %v6920_v0 = vmin.f32 %v15458_v16, 20.0  ;;  %v6403_v44 = vsub.f32 %v6275_v61, %v6339_v38  ;;  %v8002_v18 = vadd.f32 -1.0, %v7169_v63 }
 0x68b   : > { %v7171_v49 = vmul.f32 %v7107_v62, %v7107_v62  ;;  %v6919_v24 = vmin.f32 %v15463_v28, 20.0  ;;  %v6468_v21 = vmax.f32 %v6404_v12, 0.0  ;;  %v15470_v9 = vmul.f32 0.125, %v5894_v43 }
 0x68c   : > { %v9641_v37 = vpop.eup %9640  ;;  %v7300_v11 = vadd.f32 1.0, %v7172_v51  ;;  %v7041_v47 = vmul.f32 1.442695, %v6920_v0  ;;  %v15472_v45 = vmul.f32 0.125, %v5891_v1  ;;  %v6467_v63 = vmax.f32 %v6403_v44, 0.0 }
 0x68d   : > { %v9643_v60 = vpop.eup %9642  ;;  %v7414_v48 = vmul.f32 %v9641_v37, %v8003_v40  ;;  %v7299_v33 = vadd.f32 1.0, %v7171_v49  ;;  %v7039_v3 = vmul.f32 1.442695, %v6919_v24  ;;  %v6596_v27 = vadd.f32 1e-05, %v6468_v21 }
 0x68e   : > { %v9645_v14 = vpop.eup %9644  ;;  %v7412_v6 = vmul.f32 %v9643_v60, %v8002_v18  ;;  %9652 = vrcp.f32 %v7300_v11  ;;  %v6595_v39 = vadd.f32 1e-05, %v6467_v63  ;;  %v6278_v23 = vmul.f32 0.125, %v6150_v29 }
 0x68f   : > { %v9647_v4 = vpop.eup %9646  ;;  %v7490_v13 = vmul.f32 %v7414_v48, %v15362_v42  ;;  %9654 = vrcp.f32 %v7299_v33  ;;  %v6722_v54 = vmul.f32 %v9645_v14, %v6530_v56  ;;  %v6342_v42 = vmul.f32 %v15470_v9, %v15470_v9 }
 0x690   : > { %v7489_v55 = vmul.f32 %v7412_v6, %v15367_v15  ;;  %9656 = vpow2.f32 %v7041_v47  ;;  %v6721_v53 = vmul.f32 %v9647_v4, %v6529_v17  ;;  %v6341_v15 = vmul.f32 %v15472_v45, %v15472_v45 }
 0x691   : > { %7554 = vst.msk [vmem:[%s14214_s16 + $0x198] sm:$0xff] %vm5702_vm2, %v7490_v13  ;;  %9658 = vpow2.f32 %v7039_v3  ;;  %v6790_v46 = vmul.f32 %v14045_v25, %v6722_v54  ;;  %v6277_v8 = vmul.f32 0.125, %v6147_v20  ;;  %v6406_v35 = vsub.f32 %v6278_v23, %v6342_v42 }
 0x692   : > { %v9649_v26 = vpop.eup %9648  ;;  %7553 = vst.msk [vmem:[%s14214_s16 + $0x190] sm:$0xff] %vm5702_vm2, %v7489_v55  ;;  %v6789_v31 = vmul.f32 %v14045_v25, %v6721_v53  ;;  %9660 = vrsqrt.f32 %v6596_v27  ;;  %v8005_v0 = vadd.f32 -1.0, %v7172_v51  ;;  %v8004_v18 = vadd.f32 -1.0, %v7171_v49 }
 0x693   : > { %v9651_v56 = vpop.eup %9650  ;;  %v7110_v52 = vadd.f32 1.0, %v9649_v26  ;;  %v15490_v50 = vadd.f32 %v14051_v36, %v6790_v46  ;;  %9662 = vrsqrt.f32 %v6595_v39  ;;  %v6405_v62 = vsub.f32 %v6277_v8, %v6341_v15 }
 0x694   : > { %v7109_v58 = vadd.f32 1.0, %v9651_v56  ;;  %v15493_v61 = vadd.f32 %v14051_v36, %v6789_v31  ;;  %v6470_v43 = vmax.f32 %v6406_v35, 0.0  ;;  %v6532_v49 = vsub.f32 %v14669_v7, %v15435_v41 }
 0x695   : > { %v7174_v34 = vmul.f32 %v7110_v52, %v7110_v52  ;;  %v6922_v38 = vmin.f32 %v15490_v50, 20.0  ;;  %v6469_v1 = vmax.f32 %v6405_v62, 0.0  ;;  %v6531_v4 = vsub.f32 %v14681_v2, %v15452_v22 }
 0x696   : > { %v7173_v5 = vmul.f32 %v7109_v58, %v7109_v58  ;;  %v6921_v17 = vmin.f32 %v15493_v61, 20.0  ;;  %v6598_v21 = vadd.f32 1e-05, %v6470_v43  ;;  %v6533_v43 = vsub.f32 %v14762_v59, %v15472_v45 }
 0x697   : > { %v7302_v12 = vadd.f32 1.0, %v7174_v34  ;;  %v7045_v44 = vmul.f32 1.442695, %v6922_v38  ;;  %v6597_v33 = vadd.f32 1e-05, %v6469_v1  ;;  %v8007_v22 = vadd.f32 -1.0, %v7174_v34 }
 0x698   : > { %v9653_v40 = vpop.eup %9652  ;;  %v7301_v24 = vadd.f32 1.0, %v7173_v5  ;;  %v7043_v37 = vmul.f32 1.442695, %v6921_v17  ;;  %v8006_v46 = vadd.f32 -1.0, %v7173_v5  ;;  %v6534_v38 = vsub.f32 %v14746_v32, %v15470_v9 }
 0x699   : > { %v9655_v11 = vpop.eup %9654  ;;  %v7418_v47 = vmul.f32 %v9653_v40, %v8005_v0  ;;  %9664 = vrcp.f32 %v7302_v12 }
 0x69a   : > { %v9657_v60 = vpop.eup %9656  ;;  %v7416_v48 = vmul.f32 %v9655_v11, %v8004_v18  ;;  %9666 = vrcp.f32 %v7301_v24 }
 0x69b   : > { %v9659_v3 = vpop.eup %9658  ;;  %v7492_v51 = vmul.f32 %v7418_v47, %v15397_v10  ;;  %v7112_v14 = vadd.f32 1.0, %v9657_v60  ;;  %9668 = vpow2.f32 %v7045_v44 }
 0x69c   : > { %v9661_v6 = vpop.eup %9660  ;;  %v7491_v27 = vmul.f32 %v7416_v48, %v15400_v30  ;;  %v7111_v63 = vadd.f32 1.0, %v9659_v3  ;;  %9670 = vpow2.f32 %v7043_v37 }
 0x69d   : > { %v9663_v13 = vpop.eup %9662  ;;  %7556 = vst.msk [vmem:[%s14214_s16 + $0x1a8] sm:$0xff] %vm5702_vm2, %v7492_v51  ;;  %v7176_v54 = vmul.f32 %v7112_v14, %v7112_v14  ;;  %v6724_v29 = vmul.f32 %v9661_v6, %v6532_v49  ;;  %9672 = vrsqrt.f32 %v6598_v21 }
 0x69e   : > { %7555 = vst.msk [vmem:[%s14214_s16 + $0x1a0] sm:$0xff] %vm5702_vm2, %v7491_v27  ;;  %v7175_v10 = vmul.f32 %v7111_v63, %v7111_v63  ;;  %v6723_v55 = vmul.f32 %v9663_v13, %v6531_v4  ;;  %9674 = vrsqrt.f32 %v6597_v33 }
 0x69f   : > { %v7304_v7 = vadd.f32 1.0, %v7176_v54  ;;  %v6792_v41 = vmul.f32 %v14045_v25, %v6724_v29  ;;  %v8009_v40 = vadd.f32 -1.0, %v7176_v54 }
 0x6a0   : > { %v7303_v30 = vadd.f32 1.0, %v7175_v10  ;;  %v6791_v53 = vmul.f32 %v14045_v25, %v6723_v55  ;;  %v8008_v18 = vadd.f32 -1.0, %v7175_v10 }
 0x6a1   : > { %9676 = vrcp.f32 %v7304_v7  ;;  %v15510_v2 = vadd.f32 %v14051_v36, %v6792_v41 }
 0x6a2   : > { %9678 = vrcp.f32 %v7303_v30  ;;  %v15513_v39 = vadd.f32 %v14051_v36, %v6791_v53 }
 0x6a3   : > { %v9665_v20 = vpop.eup %9664  ;;  %v6924_v42 = vmin.f32 %v15510_v2, 20.0 }
 0x6a4   : > { %v9667_v26 = vpop.eup %9666  ;;  %v7422_v31 = vmul.f32 %v9665_v20, %v8007_v22  ;;  %v6923_v15 = vmin.f32 %v15513_v39, 20.0 }
 0x6a5   : > { %v9669_v23 = vpop.eup %9668  ;;  %v7420_v56 = vmul.f32 %v9667_v26, %v8006_v46  ;;  %v7049_v52 = vmul.f32 1.442695, %v6924_v42 }
 0x6a6   : > { %v9671_v8 = vpop.eup %9670  ;;  %v7494_v58 = vmul.f32 %v7422_v31, %v15438_v57  ;;  %v7114_v35 = vadd.f32 1.0, %v9669_v23  ;;  %v7047_v34 = vmul.f32 1.442695, %v6923_v15 }
 0x6a7   : > { %v9673_v62 = vpop.eup %9672  ;;  %v7493_v5 = vmul.f32 %v7420_v56, %v15441_v19  ;;  %v7113_v17 = vadd.f32 1.0, %v9671_v8  ;;  %9680 = vpow2.f32 %v7049_v52 }
 0x6a8   : > { %v9675_v0 = vpop.eup %9674  ;;  %7558 = vst.msk [vmem:[%s14214_s16 + $0x1b8] sm:$0xff] %vm5702_vm2, %v7494_v58  ;;  %v7178_v12 = vmul.f32 %v7114_v35, %v7114_v35  ;;  %9682 = vpow2.f32 %v7047_v34  ;;  %v6726_v44 = vmul.f32 %v9673_v62, %v6534_v38 }
 0x6a9   : > { %7557 = vst.msk [vmem:[%s14214_s16 + $0x1b0] sm:$0xff] %vm5702_vm2, %v7493_v5  ;;  %v7177_v57 = vmul.f32 %v7113_v17, %v7113_v17  ;;  %v6725_v1 = vmul.f32 %v9675_v0, %v6533_v43 }
 0x6aa   : > { %v7306_v32 = vadd.f32 1.0, %v7178_v12  ;;  %v6794_v9 = vmul.f32 %v14045_v25, %v6726_v44 }
 0x6ab   : > { %v9677_v19 = vpop.eup %9676  ;;  %v7305_v24 = vadd.f32 1.0, %v7177_v57  ;;  %v6793_v59 = vmul.f32 %v14045_v25, %v6725_v1 }
 0x6ac   : > { %v9679_v45 = vpop.eup %9678  ;;  %v7426_v37 = vmul.f32 %v9677_v19, %v8009_v40  ;;  %9684 = vrcp.f32 %v7306_v32  ;;  %v6862_v11 = vadd.f32 %v14051_v36, %v6794_v9 }
 0x6ad   : > { %v7424_v47 = vmul.f32 %v9679_v45, %v8008_v18  ;;  %9686 = vrcp.f32 %v7305_v24  ;;  %v6861_v21 = vadd.f32 %v14051_v36, %v6793_v59 }
 0x6ae   : > { %v7496_v60 = vmul.f32 %v7426_v37, %v15458_v16  ;;  %v6926_v48 = vmin.f32 %v6862_v11, 20.0  ;;  %v8011_v16 = vadd.f32 -1.0, %v7178_v12 }
 0x6af   : > { %v7495_v33 = vmul.f32 %v7424_v47, %v15463_v28  ;;  %v6925_v3 = vmin.f32 %v6861_v21, 20.0  ;;  %v8010_v28 = vadd.f32 -1.0, %v7177_v57 }
 0x6b0   : > { %7560 = vst.msk [vmem:[%s14214_s16 + $0x1c8] sm:$0xff] %vm5702_vm2, %v7496_v60  ;;  %v7053_v51 = vmul.f32 1.442695, %v6926_v48 }
 0x6b1   : > { %v9681_v14 = vpop.eup %9680  ;;  %7559 = vst.msk [vmem:[%s14214_s16 + $0x1c0] sm:$0xff] %vm5702_vm2, %v7495_v33  ;;  %v7051_v25 = vmul.f32 1.442695, %v6925_v3 }
 0x6b2   : > { %v9683_v49 = vpop.eup %9682  ;;  %v7116_v6 = vadd.f32 1.0, %v9681_v14  ;;  %9688 = vpow2.f32 %v7053_v51 }
 0x6b3   : > { %v7115_v27 = vadd.f32 1.0, %v9683_v49  ;;  %9690 = vpow2.f32 %v7051_v25 }
 0x6b4   : > { %v7180_v36 = vmul.f32 %v7116_v6, %v7116_v6 }
 0x6b5   : > { %v7179_v63 = vmul.f32 %v7115_v27, %v7115_v27 }
 0x6b6   : > { %v9685_v4 = vpop.eup %9684  ;;  %v7308_v13 = vadd.f32 1.0, %v7180_v36  ;;  %v8013_v26 = vadd.f32 -1.0, %v7180_v36 }
 0x6b7   : > { %v9687_v54 = vpop.eup %9686  ;;  %v7430_v29 = vmul.f32 %v9685_v4, %v8011_v16  ;;  %v7307_v10 = vadd.f32 1.0, %v7179_v63  ;;  %v8012_v23 = vadd.f32 -1.0, %v7179_v63 }
 0x6b8   : > { %v7428_v55 = vmul.f32 %v9687_v54, %v8010_v28  ;;  %9692 = vrcp.f32 %v7308_v13 }
 0x6b9   : > { %v7498_v7 = vmul.f32 %v7430_v29, %v15490_v50  ;;  %9694 = vrcp.f32 %v7307_v10 }
 0x6ba   : > { %v7497_v41 = vmul.f32 %v7428_v55, %v15493_v61 }
 0x6bb   : > { %7562 = vst.msk [vmem:[%s14214_s16 + $0x1d8] sm:$0xff] %vm5702_vm2, %v7498_v7 }
 0x6bc   : > { %v9689_v30 = vpop.eup %9688  ;;  %7561 = vst.msk [vmem:[%s14214_s16 + $0x1d0] sm:$0xff] %vm5702_vm2, %v7497_v41 }
 0x6bd   : > { %v9691_v53 = vpop.eup %9690  ;;  %v7118_v22 = vadd.f32 1.0, %v9689_v30 }
 0x6be   : > { %v7117_v20 = vadd.f32 1.0, %v9691_v53 }
 0x6bf   : > { %v7182_v46 = vmul.f32 %v7118_v22, %v7118_v22 }
 0x6c0   : > { %v7181_v42 = vmul.f32 %v7117_v20, %v7117_v20 }
 0x6c1   : > { %v7310_v31 = vadd.f32 1.0, %v7182_v46  ;;  %v8015_v35 = vadd.f32 -1.0, %v7182_v46 }
 0x6c2   : > { %v9693_v15 = vpop.eup %9692  ;;  %v7309_v50 = vadd.f32 1.0, %v7181_v42  ;;  %v8014_v38 = vadd.f32 -1.0, %v7181_v42 }
 0x6c3   : > { %v9695_v56 = vpop.eup %9694  ;;  %v7434_v52 = vmul.f32 %v9693_v15, %v8013_v26  ;;  %9696 = vrcp.f32 %v7310_v31 }
 0x6c4   : > { %v7432_v61 = vmul.f32 %v9695_v56, %v8012_v23  ;;  %9698 = vrcp.f32 %v7309_v50 }
 0x6c5   : > { %v7500_v8 = vmul.f32 %v7434_v52, %v15510_v2 }
 0x6c6   : > { %v7499_v58 = vmul.f32 %v7432_v61, %v15513_v39 }
 0x6c7   : > { %7564 = vst.msk [vmem:[%s14214_s16 + $0x1e8] sm:$0xff] %vm5702_vm2, %v7500_v8 }
 0x6c8   : > { %7563 = vst.msk [vmem:[%s14214_s16 + $0x1e0] sm:$0xff] %vm5702_vm2, %v7499_v58 }
 0x6cd   : > { %v9697_v34 = vpop.eup %9696 }
 0x6ce   : > { %v9699_v62 = vpop.eup %9698  ;;  %v7438_v5 = vmul.f32 %v9697_v34, %v8015_v35 }
 0x6cf   : > { %v7436_v17 = vmul.f32 %v9699_v62, %v8014_v38 }
 0x6d0   : > { %v7502_v43 = vmul.f32 %v7438_v5, %v6862_v11 }
 0x6d1   : > { %v7501_v0 = vmul.f32 %v7436_v17, %v6861_v21 }
 0x6d2   : > { %7566 = vst.msk [vmem:[%s14214_s16 + $0x1f8] sm:$0xff] %vm5702_vm2, %v7502_v43 }
 0x6d3   : > { %7565 = vst.msk [vmem:[%s14214_s16 + $0x1f0] sm:$0xff] %vm5702_vm2, %v7501_v0 }
 0x6d4 PF: > { %s17_s24 = sadd.s32 1, %s9708_s24  }
 0x6d5   : > { %p14_p4 = scmp.ge.s32.totalorder %s17_s24, 4  }
 0x6d7   :  { %16 = sbr.rel (!%p14_p4) target bundleno = 1 (0x1), region = 78 }

</bundles_post_ra>
